<compile_context>
chip_gen: v7x
topology: tpu7x:2x2x1
jax: 0.10.0
libtpu: 0.0.40
codegen_flags: <defaults>
</compile_context>

<pallas_src>
import functools
import math

import jax
import jax.numpy as jnp
from jax.experimental import pallas as pl
from jax.experimental.pallas import tpu as pltpu

# ---------------- config (small, consistent with the module) ----------------
VOCAB = 64
N_EMBD = 32
N_HEAD = 4
N_LAYER = 2
HEAD_DIM = N_EMBD // N_HEAD
REDUCED_DIM = 16          # SimpleCrossChannelFusion reduced_dim
LN_EPS = 1e-5


def _vmem():
    return pl.BlockSpec(memory_space=pltpu.MemorySpace.VMEM)


# --------------------------- in-kernel helpers (f32) -------------------------
def _ln_f32(x, g, b):
    mu = jnp.mean(x, axis=-1, keepdims=True)
    var = jnp.mean((x - mu) ** 2, axis=-1, keepdims=True)
    return (x - mu) * jax.lax.rsqrt(var + LN_EPS) * g + b


def _gelu_tanh(x):
    c = jnp.float32(math.sqrt(2.0 / math.pi))
    return 0.5 * x * (1.0 + jnp.tanh(c * (x + 0.044715 * x * x * x)))


def _mlp_f32(xln, wfc, bfc, wpr, bpr):
    h = jnp.dot(xln, wfc, preferred_element_type=jnp.float32) + bfc
    h = _gelu_tanh(h)
    return jnp.dot(h, wpr, preferred_element_type=jnp.float32) + bpr


def _attn_f32(xln, ma, mb, wqa, bqa, wqb, bqb, wka, bka, wkb, bkb,
              wv, bv, wo, bo, R, T):
    # xln: (R*T, E).  Weights are stacked per head: wq*/wk*/wv (H, E, hd),
    # biases (H, 1, hd), wo (H, hd, E).  RoPE is applied as
    # q = qA*ma + qB*mb where the A/B column permutations were folded into the
    # weights at prepare time (ma/mb are (T, hd) multiplier tables).
    hd = HEAD_DIM
    E = N_EMBD
    scale = jnp.float32(1.0 / math.sqrt(hd))
    row = jax.lax.broadcasted_iota(jnp.int32, (T, T), 0)
    col = jax.lax.broadcasted_iota(jnp.int32, (T, T), 1)
    causal = col <= row
    acc = jnp.zeros((R * T, E), jnp.float32)
    for h in range(N_HEAD):                      # static unroll, 4 heads
        qa = jnp.dot(xln, wqa[h], preferred_element_type=jnp.float32) + bqa[h]
        qb = jnp.dot(xln, wqb[h], preferred_element_type=jnp.float32) + bqb[h]
        ka = jnp.dot(xln, wka[h], preferred_element_type=jnp.float32) + bka[h]
        kb = jnp.dot(xln, wkb[h], preferred_element_type=jnp.float32) + bkb[h]
        vh = jnp.dot(xln, wv[h], preferred_element_type=jnp.float32) + bv[h]
        qh = qa.reshape(R, T, hd) * ma + qb.reshape(R, T, hd) * mb   # RoPE
        kh = ka.reshape(R, T, hd) * ma + kb.reshape(R, T, hd) * mb   # RoPE
        vh = vh.reshape(R, T, hd)
        s = jnp.einsum('rtd,rsd->rts', qh, kh,
                       preferred_element_type=jnp.float32) * scale
        s = jnp.where(causal, s, -jnp.inf)       # causal mask (diag unmasked)
        s = s - jnp.max(s, axis=-1, keepdims=True)
        p = jnp.exp(s)
        p = p / jnp.sum(p, axis=-1, keepdims=True)
        oh = jnp.einsum('rts,rsd->rtd', p, vh,
                        preferred_element_type=jnp.float32)
        # fold the head-concat into the output projection: y@Wo == sum_h oh@Wo_h
        acc = acc + jnp.dot(oh.reshape(R * T, hd), wo[h],
                            preferred_element_type=jnp.float32)
    return acc + bo


# ------------------------------- fused kernels -------------------------------
def _block_kernel(x_ref, ma_ref, mb_ref,
                  ln1g_ref, ln1b_ref,
                  wqa_ref, bqa_ref, wqb_ref, bqb_ref,
                  wka_ref, bka_ref, wkb_ref, bkb_ref,
                  wv_ref, bv_ref, wo_ref, bo_ref,
                  ln2g_ref, ln2b_ref,
                  wfc_ref, bfc_ref, wpr_ref, bpr_ref,
                  o_ref):
    # One full Block on a flat (R*T, E) slab (R sequences of length T).
    # TODO(synk): attn_dropout / resid_dropout are identity (inference mode).
    T = ma_ref.shape[0]
    x = x_ref[...].astype(jnp.float32)
    R = x.shape[0] // T
    xln = _ln_f32(x, ln1g_ref[...], ln1b_ref[...])
    x = x + _attn_f32(xln, ma_ref[...], mb_ref[...],
                      wqa_ref[...], bqa_ref[...], wqb_ref[...], bqb_ref[...],
                      wka_ref[...], bka_ref[...], wkb_ref[...], bkb_ref[...],
                      wv_ref[...], bv_ref[...], wo_ref[...], bo_ref[...], R, T)
    xln = _ln_f32(x, ln2g_ref[...], ln2b_ref[...])
    x = x + _mlp_f32(xln, wfc_ref[...], bfc_ref[...], wpr_ref[...], bpr_ref[...])
    o_ref[...] = x.astype(o_ref.dtype)


def _block_fusion_kernel(x_ref, ma_ref, mb_ref,
                         ln1g_ref, ln1b_ref,
                         wqa_ref, bqa_ref, wqb_ref, bqb_ref,
                         wka_ref, bka_ref, wkb_ref, bkb_ref,
                         wv_ref, bv_ref, wo_ref, bo_ref,
                         ln2g_ref, ln2b_ref,
                         rw_ref, rb_ref, ew_ref, eb_ref, flng_ref, flnb_ref,
                         ln3g_ref, ln3b_ref,
                         wfc_ref, bfc_ref, wpr_ref, bpr_ref,
                         o_ref, *, num_channels):
    # One full BlockWithFusion on a flat (B*T*C, E) slab (rows in (b,t,c)
    # order).  The torch .view(B*C, T, E) on a contiguous (B,T,C,E) tensor is
    # just a regrouping of the same flat rows, so both views are in-kernel
    # leading-dim reshapes of the same slab (reproduced exactly).
    T = ma_ref.shape[0]
    x = x_ref[...].astype(jnp.float32)
    n_rows, E = x.shape
    R = n_rows // T                     # == B*C
    C = num_channels
    BT = n_rows // C                    # == B*T
    # --- attention sub-block on the (B*C, T, E) view ---
    xln = _ln_f32(x, ln1g_ref[...], ln1b_ref[...])
    x = x + _attn_f32(xln, ma_ref[...], mb_ref[...],
                      wqa_ref[...], bqa_ref[...], wqb_ref[...], bqb_ref[...],
                      wka_ref[...], bka_ref[...], wkb_ref[...], bkb_ref[...],
                      wv_ref[...], bv_ref[...], wo_ref[...], bo_ref[...], R, T)
    # --- SimpleCrossChannelFusion on the (B, T, C, E) view ---
    xln2 = _ln_f32(x, ln2g_ref[...], ln2b_ref[...])
    m = jnp.mean(xln2.reshape(BT, C, E), axis=1)                       # mean over C
    f = jnp.dot(m, rw_ref[...], preferred_element_type=jnp.float32) + rb_ref[...]
    f = jnp.dot(f, ew_ref[...], preferred_element_type=jnp.float32) + eb_ref[...]
    fo = (xln2.reshape(BT, C, E) + f[:, None, :]).reshape(n_rows, E)
    x = x + _ln_f32(fo, flng_ref[...], flnb_ref[...])
    # --- MLP sub-block (row-wise, independent of the view) ---
    xln3 = _ln_f32(x, ln3g_ref[...], ln3b_ref[...])
    x = x + _mlp_f32(xln3, wfc_ref[...], bfc_ref[...], wpr_ref[...], bpr_ref[...])
    o_ref[...] = x.astype(o_ref.dtype)


def _head_kernel(x_ref, g_ref, b_ref, wte_t_ref, o_ref):
    # ln_f + tied lm_head in one kernel (wte_T is pre-transposed once).
    xln = _ln_f32(x_ref[...].astype(jnp.float32), g_ref[...], b_ref[...])
    o_ref[...] = jnp.dot(xln, wte_t_ref[...],
                         preferred_element_type=jnp.float32).astype(o_ref.dtype)


# ----------------------------- kernel wrappers -------------------------------
def _attn_args(ap):
    return [ap['wqa'], ap['bqa'], ap['wqb'], ap['bqb'],
            ap['wka'], ap['bka'], ap['wkb'], ap['bkb'],
            ap['wv'], ap['bv'], ap['wo'], ap['bo']]


def run_block(x2d, ma, mb, bp):
    args = ([x2d, ma, mb, bp['ln1g'], bp['ln1b']] + _attn_args(bp['attn'])
            + [bp['ln2g'], bp['ln2b'],
               bp['mlp']['wfc'], bp['mlp']['bfc'],
               bp['mlp']['wpr'], bp['mlp']['bpr']])
    return pl.pallas_call(
        _block_kernel,
        out_shape=jax.ShapeDtypeStruct(x2d.shape, x2d.dtype),
        in_specs=[_vmem() for _ in args],
        out_specs=_vmem(),
    )(*args)


def run_block_fusion(x2d, ma, mb, bp, num_channels):
    fu = bp['fusion']
    args = ([x2d, ma, mb, bp['ln1g'], bp['ln1b']] + _attn_args(bp['attn'])
            + [bp['ln2g'], bp['ln2b'],
               fu['rw'], fu['rb'], fu['ew'], fu['eb'], fu['lng'], fu['lnb'],
               bp['ln3g'], bp['ln3b'],
               bp['mlp']['wfc'], bp['mlp']['bfc'],
               bp['mlp']['wpr'], bp['mlp']['bpr']])
    return pl.pallas_call(
        functools.partial(_block_fusion_kernel, num_channels=num_channels),
        out_shape=jax.ShapeDtypeStruct(x2d.shape, x2d.dtype),
        in_specs=[_vmem() for _ in args],
        out_specs=_vmem(),
    )(*args)


def run_head(x2d, g, b, wte_t):
    M = x2d.shape[0]
    V = wte_t.shape[1]
    return pl.pallas_call(
        _head_kernel,
        out_shape=jax.ShapeDtypeStruct((M, V), x2d.dtype),
        in_specs=[_vmem()] * 4,
        out_specs=_vmem(),
    )(x2d, g, b, wte_t)


# ------------------------------ model forward --------------------------------
def gpt_forward(ep, idx):
    # idx: (B, C, T) int32.  Returns logits (B, C, T, VOCAB).
    # (targets path / cross-entropy loss not implemented — logits only.)
    B, C, T = idx.shape
    E = N_EMBD
    tok = jnp.take(ep['wte'], idx, axis=0)                  # (B, C, T, E)

    # intra_channel_encoder: per-channel loop folded into the batch dim
    # (weights are shared across channels -> identical math, 1 launch / block).
    x = tok.reshape(B * C * T, E)                           # rows: (b, c, t)
    for bp in ep['intra']:
        x = run_block(x, ep['ma'], ep['mb'], bp)

    # reorder rows (b, c, t) -> (b, t, c) for the fusion stage (torch stack(dim=2))
    x = x.reshape(B, C, T, E).transpose(0, 2, 1, 3).reshape(B * T * C, E)
    for bp in ep['h']:
        x = run_block_fusion(x, ep['ma'], ep['mb'], bp, C)

    # reorder rows (b, t, c) -> (b, c, t) for the tied head (torch transpose(1,2))
    x = x.reshape(B, T, C, E).transpose(0, 2, 1, 3).reshape(B * C * T, E)
    logits = run_head(x, ep['ln_f_g'], ep['ln_f_b'], ep['wte_t'])
    return logits.reshape(B, C, T, VOCAB)


# ------------------------------ parameter init --------------------------------
def init_params(key):
    std = 0.02
    std_proj = 0.02 * (2 * N_LAYER) ** (-0.5)    # NANOGPT_SCALE_INIT
    keys = iter(jax.random.split(key, 256))

    def lin(fan_in, fan_out, s):
        w = jax.random.normal(next(keys), (fan_in, fan_out), jnp.float32) * s
        return w, jnp.zeros((fan_out,), jnp.float32)

    def ln():
        return jnp.ones((N_EMBD,), jnp.float32), jnp.zeros((N_EMBD,), jnp.float32)

    def attn_params():
        caw, cab = lin(N_EMBD, 3 * N_EMBD, std)
        cpw, cpb = lin(N_EMBD, N_EMBD, std_proj)
        return {'c_attn_w': caw, 'c_attn_b': cab, 'c_proj_w': cpw, 'c_proj_b': cpb}

    def mlp_params():
        fw, fb = lin(N_EMBD, 4 * N_EMBD, std)
        pw, pb = lin(4 * N_EMBD, N_EMBD, std_proj)
        return {'c_fc_w': fw, 'c_fc_b': fb, 'c_proj_w': pw, 'c_proj_b': pb}

    def block_params():
        g1, b1 = ln(); g2, b2 = ln()
        return {'ln_1_g': g1, 'ln_1_b': b1, 'attn': attn_params(),
                'ln_2_g': g2, 'ln_2_b': b2, 'mlp': mlp_params()}

    def fusion_params():
        rw, rb = lin(N_EMBD, REDUCED_DIM, std)
        ew, eb = lin(REDUCED_DIM, N_EMBD, std)
        g, b = ln()
        return {'reduce_w': rw, 'reduce_b': rb, 'expand_w': ew, 'expand_b': eb,
                'ln_g': g, 'ln_b': b}

    def block_fusion_params():
        g1, b1 = ln(); g2, b2 = ln(); g3, b3 = ln()
        return {'ln_1_g': g1, 'ln_1_b': b1, 'attn': attn_params(),
                'ln_2_g': g2, 'ln_2_b': b2, 'fusion': fusion_params(),
                'ln_3_g': g3, 'ln_3_b': b3, 'mlp': mlp_params()}

    wte = jax.random.normal(next(keys), (VOCAB, N_EMBD), jnp.float32) * std
    gf, bf = ln()
    return {'wte': wte,
            'intra': [block_params() for _ in range(3)],
            'h': [block_fusion_params() for _ in range(N_LAYER)],
            'ln_f_g': gf, 'ln_f_b': bf}


# --------------------- one-time prep: fold layout into weights ----------------
def prepare_params(params, T):
    # Precompute (outside the forward): RoPE multiplier tables, RoPE column
    # permutations folded into per-head q/k projection weights, per-head weight
    # stacks (so the kernel never slices the lane dim), 2D bias/LN shapes, and
    # the transposed tied head weight.
    E, hd, H = N_EMBD, HEAD_DIM, N_HEAD

    # RoPE tables matching torch apply_rotary_emb (half-split output layout):
    #   out = qA * ma + qB * mb, with qA/qB gathered from even/odd columns.
    freqs = jnp.arange(0, hd, 2, dtype=jnp.float32) / hd
    theta = 1000.0 ** (-freqs)
    pos = jnp.arange(T, dtype=jnp.float32)
    ang = pos[:, None] * theta[None, :]
    sin, cos = jnp.sin(ang), jnp.cos(ang)
    ma = jnp.concatenate([cos, sin], axis=-1)      # (T, hd)
    mb = jnp.concatenate([-sin, cos], axis=-1)     # (T, hd)

    even = jnp.arange(0, hd, 2, dtype=jnp.int32)
    idx_a = jnp.concatenate([even, even])          # sources for the A part
    idx_b = idx_a + 1                              # sources for the B part
    ident = jnp.arange(hd, dtype=jnp.int32)

    def v2(a):
        return a.reshape(1, -1)

    def prep_attn(p):
        wq, wk, wv = (p['c_attn_w'][:, :E], p['c_attn_w'][:, E:2 * E],
                      p['c_attn_w'][:, 2 * E:])
        bq, bk, bv = (p['c_attn_b'][:E], p['c_attn_b'][E:2 * E],
                      p['c_attn_b'][2 * E:])

        def per_head(w, b, idx):
            ws = jnp.stack([w[:, h * hd + idx] for h in range(H)], axis=0)      # (H,E,hd)
            bs = jnp.stack([b[h * hd + idx].reshape(1, hd) for h in range(H)], 0)  # (H,1,hd)
            return ws, bs

        wqa, bqa = per_head(wq, bq, idx_a)
        wqb, bqb = per_head(wq, bq, idx_b)
        wka, bka = per_head(wk, bk, idx_a)
        wkb, bkb = per_head(wk, bk, idx_b)
        wv_s, bv_s = per_head(wv, bv, ident)
        wo = jnp.stack([p['c_proj_w'][h * hd:(h + 1) * hd, :] for h in range(H)], 0)  # (H,hd,E)
        return dict(wqa=wqa, bqa=bqa, wqb=wqb, bqb=bqb,
                    wka=wka, bka=bka, wkb=wkb, bkb=bkb,
                    wv=wv_s, bv=bv_s, wo=wo, bo=v2(p['c_proj_b']))

    def prep_mlp(p):
        return dict(wfc=p['c_fc_w'], bfc=v2(p['c_fc_b']),
                    wpr=p['c_proj_w'], bpr=v2(p['c_proj_b']))

    def prep_block(p):
        return dict(ln1g=v2(p['ln_1_g']), ln1b=v2(p['ln_1_b']),
                    attn=prep_attn(p['attn']),
                    ln2g=v2(p['ln_2_g']), ln2b=v2(p['ln_2_b']),
                    mlp=prep_mlp(p['mlp']))

    def prep_fusion(p):
        return dict(rw=p['reduce_w'], rb=v2(p['reduce_b']),
                    ew=p['expand_w'], eb=v2(p['expand_b']),
                    lng=v2(p['ln_g']), lnb=v2(p['ln_b']))

    def prep_block_fusion(p):
        return dict(ln1g=v2(p['ln_1_g']), ln1b=v2(p['ln_1_b']),
                    attn=prep_attn(p['attn']),
                    ln2g=v2(p['ln_2_g']), ln2b=v2(p['ln_2_b']),
                    fusion=prep_fusion(p['fusion']),
                    ln3g=v2(p['ln_3_g']), ln3b=v2(p['ln_3_b']),
                    mlp=prep_mlp(p['mlp']))

    # NOTE: f32 kept everywhere (safe on v5e's no-bf16 VPU/EUP); at these tiny
    # sizes bf16-at-the-MXU buys nothing, so it is intentionally skipped.
    return dict(wte=params['wte'], wte_t=params['wte'].T,
                ma=ma, mb=mb,
                intra=[prep_block(b) for b in params['intra']],
                h=[prep_block_fusion(b) for b in params['h']],
                ln_f_g=v2(params['ln_f_g']), ln_f_b=v2(params['ln_f_b']))


# ------------------------------------ main ------------------------------------
if __name__ == "__main__":
    key = jax.random.PRNGKey(0)
    pkey, ikey = jax.random.split(key)
    raw_params = init_params(pkey)

    B, C, T = 2, 4, 8
    exec_params = prepare_params(raw_params, T)        # one-time weight packing
    idx = jax.random.randint(ikey, (B, C, T), 0, VOCAB, dtype=jnp.int32)

    logits = jax.jit(gpt_forward)(exec_params, idx)
    jax.block_until_ready(logits)
    assert logits.shape == (B, C, T, VOCAB)
    assert bool(jnp.all(jnp.isfinite(logits)))
    print("KERNEL_OK")
</pallas_src>

<mosaic_0001>
module attributes {stable_mosaic.version = 11 : i64} {
  func.func @_head_kernel(%arg0: memref<64x32xf32, #tpu.memory_space<vmem>>, %arg1: memref<1x32xf32, #tpu.memory_space<vmem>>, %arg2: memref<1x32xf32, #tpu.memory_space<vmem>>, %arg3: memref<32x64xf32, #tpu.memory_space<vmem>>, %arg4: memref<64x64xf32, #tpu.memory_space<vmem>>) attributes {dimension_semantics = [], scalar_prefetch = 0 : i64, scratch_operands = 0 : i64, tpu.core_type = #tpu.core_type<tc>} {
    %c0 = arith.constant 0 : index
    %c0_0 = arith.constant 0 : index
    %0 = vector.load %arg0[%c0, %c0_0] : memref<64x32xf32, #tpu.memory_space<vmem>>, vector<64x32xf32>
    %c0_1 = arith.constant 0 : index
    %c0_2 = arith.constant 0 : index
    %1 = vector.load %arg1[%c0_1, %c0_2] : memref<1x32xf32, #tpu.memory_space<vmem>>, vector<1x32xf32>
    %c0_3 = arith.constant 0 : index
    %c0_4 = arith.constant 0 : index
    %2 = vector.load %arg2[%c0_3, %c0_4] : memref<1x32xf32, #tpu.memory_space<vmem>>, vector<1x32xf32>
    %cst = arith.constant dense<0.000000e+00> : vector<64xf32>
    %3 = vector.multi_reduction <add>, %0, %cst [1] : vector<64x32xf32> to vector<64xf32>
    %4 = vector.shape_cast %3 : vector<64xf32> to vector<64x1xf32>
    %cst_5 = arith.constant 3.200000e+01 : f32
    %5 = vector.broadcast %cst_5 : f32 to vector<64x1xf32>
    %6 = arith.divf %4, %5 : vector<64x1xf32>
    %7 = vector.broadcast %6 : vector<64x1xf32> to vector<64x32xf32>
    %8 = arith.subf %0, %7 : vector<64x32xf32>
    %9 = arith.mulf %8, %8 : vector<64x32xf32>
    %cst_6 = arith.constant dense<0.000000e+00> : vector<64xf32>
    %10 = vector.multi_reduction <add>, %9, %cst_6 [1] : vector<64x32xf32> to vector<64xf32>
    %11 = vector.shape_cast %10 : vector<64xf32> to vector<64x1xf32>
    %cst_7 = arith.constant 3.200000e+01 : f32
    %12 = vector.broadcast %cst_7 : f32 to vector<64x1xf32>
    %13 = arith.divf %11, %12 : vector<64x1xf32>
    %14 = vector.broadcast %6 : vector<64x1xf32> to vector<64x32xf32>
    %15 = arith.subf %0, %14 : vector<64x32xf32>
    %cst_8 = arith.constant 9.99999974E-6 : f32
    %16 = vector.broadcast %cst_8 : f32 to vector<64x1xf32>
    %17 = arith.addf %13, %16 : vector<64x1xf32>
    %18 = math.rsqrt %17 : vector<64x1xf32>
    %19 = vector.broadcast %18 : vector<64x1xf32> to vector<64x32xf32>
    %20 = arith.mulf %15, %19 : vector<64x32xf32>
    %21 = vector.broadcast %1 : vector<1x32xf32> to vector<64x32xf32>
    %22 = arith.mulf %20, %21 : vector<64x32xf32>
    %23 = vector.broadcast %2 : vector<1x32xf32> to vector<64x32xf32>
    %24 = arith.addf %22, %23 : vector<64x32xf32>
    %c0_9 = arith.constant 0 : index
    %c0_10 = arith.constant 0 : index
    %25 = vector.load %arg3[%c0_9, %c0_10] : memref<32x64xf32, #tpu.memory_space<vmem>>, vector<32x64xf32>
    %cst_11 = arith.constant dense<0.000000e+00> : vector<64x64xf32>
    %26 = tpu.matmul %24, %25, %cst_11 {dimension_numbers = #tpu.dot_dimension_numbers<[1], [0], [0], [1], [0, 0, 1, 1], [], []>} : vector<64x32xf32>, vector<32x64xf32>, vector<64x64xf32> -> vector<64x64xf32>
    %c0_12 = arith.constant 0 : index
    %c0_13 = arith.constant 0 : index
    %27 = vector.load %arg4[%c0_12, %c0_13] : memref<64x64xf32, #tpu.memory_space<vmem>>, vector<64x64xf32>
    tpu.vector_store %arg4[%c0_12, %c0_13], %26 {strides = array<i32>} : memref<64x64xf32, #tpu.memory_space<vmem>>, vector<64x64xf32>,
    return
  }
}

module attributes {stable_mosaic.version = 11 : i64} {
  func.func @_block_fusion_kernel(%arg0: memref<64x32xf32, #tpu.memory_space<vmem>>, %arg1: memref<8x8xf32, #tpu.memory_space<vmem>>, %arg2: memref<8x8xf32, #tpu.memory_space<vmem>>, %arg3: memref<1x32xf32, #tpu.memory_space<vmem>>, %arg4: memref<1x32xf32, #tpu.memory_space<vmem>>, %arg5: memref<4x32x8xf32, #tpu.memory_space<vmem>>, %arg6: memref<4x1x8xf32, #tpu.memory_space<vmem>>, %arg7: memref<4x32x8xf32, #tpu.memory_space<vmem>>, %arg8: memref<4x1x8xf32, #tpu.memory_space<vmem>>, %arg9: memref<4x32x8xf32, #tpu.memory_space<vmem>>, %arg10: memref<4x1x8xf32, #tpu.memory_space<vmem>>, %arg11: memref<4x32x8xf32, #tpu.memory_space<vmem>>, %arg12: memref<4x1x8xf32, #tpu.memory_space<vmem>>, %arg13: memref<4x32x8xf32, #tpu.memory_space<vmem>>, %arg14: memref<4x1x8xf32, #tpu.memory_space<vmem>>, %arg15: memref<4x8x32xf32, #tpu.memory_space<vmem>>, %arg16: memref<1x32xf32, #tpu.memory_space<vmem>>, %arg17: memref<1x32xf32, #tpu.memory_space<vmem>>, %arg18: memref<1x32xf32, #tpu.memory_space<vmem>>, %arg19: memref<32x16xf32, #tpu.memory_space<vmem>>, %arg20: memref<1x16xf32, #tpu.memory_space<vmem>>, %arg21: memref<16x32xf32, #tpu.memory_space<vmem>>, %arg22: memref<1x32xf32, #tpu.memory_space<vmem>>, %arg23: memref<1x32xf32, #tpu.memory_space<vmem>>, %arg24: memref<1x32xf32, #tpu.memory_space<vmem>>, %arg25: memref<1x32xf32, #tpu.memory_space<vmem>>, %arg26: memref<1x32xf32, #tpu.memory_space<vmem>>, %arg27: memref<32x128xf32, #tpu.memory_space<vmem>>, %arg28: memref<1x128xf32, #tpu.memory_space<vmem>>, %arg29: memref<128x32xf32, #tpu.memory_space<vmem>>, %arg30: memref<1x32xf32, #tpu.memory_space<vmem>>, %arg31: memref<64x32xf32, #tpu.memory_space<vmem>>) attributes {dimension_semantics = [], scalar_prefetch = 0 : i64, scratch_operands = 0 : i64, tpu.core_type = #tpu.core_type<tc>} {
    %c0 = arith.constant 0 : index
    %c0_0 = arith.constant 0 : index
    %0 = vector.load %arg0[%c0, %c0_0] : memref<64x32xf32, #tpu.memory_space<vmem>>, vector<64x32xf32>
    %c0_1 = arith.constant 0 : index
    %c0_2 = arith.constant 0 : index
    %1 = vector.load %arg3[%c0_1, %c0_2] : memref<1x32xf32, #tpu.memory_space<vmem>>, vector<1x32xf32>
    %c0_3 = arith.constant 0 : index
    %c0_4 = arith.constant 0 : index
    %2 = vector.load %arg4[%c0_3, %c0_4] : memref<1x32xf32, #tpu.memory_space<vmem>>, vector<1x32xf32>
    %cst = arith.constant dense<0.000000e+00> : vector<64xf32>
    %3 = vector.multi_reduction <add>, %0, %cst [1] : vector<64x32xf32> to vector<64xf32>
    %4 = vector.shape_cast %3 : vector<64xf32> to vector<64x1xf32>
    %cst_5 = arith.constant 3.200000e+01 : f32
    %5 = vector.broadcast %cst_5 : f32 to vector<64x1xf32>
    %6 = arith.divf %4, %5 : vector<64x1xf32>
    %7 = vector.broadcast %6 : vector<64x1xf32> to vector<64x32xf32>
    %8 = arith.subf %0, %7 : vector<64x32xf32>
    %9 = arith.mulf %8, %8 : vector<64x32xf32>
    %cst_6 = arith.constant dense<0.000000e+00> : vector<64xf32>
    %10 = vector.multi_reduction <add>, %9, %cst_6 [1] : vector<64x32xf32> to vector<64xf32>
    %11 = vector.shape_cast %10 : vector<64xf32> to vector<64x1xf32>
    %cst_7 = arith.constant 3.200000e+01 : f32
    %12 = vector.broadcast %cst_7 : f32 to vector<64x1xf32>
    %13 = arith.divf %11, %12 : vector<64x1xf32>
    %14 = vector.broadcast %6 : vector<64x1xf32> to vector<64x32xf32>
    %15 = arith.subf %0, %14 : vector<64x32xf32>
    %cst_8 = arith.constant 9.99999974E-6 : f32
    %16 = vector.broadcast %cst_8 : f32 to vector<64x1xf32>
    %17 = arith.addf %13, %16 : vector<64x1xf32>
    %18 = math.rsqrt %17 : vector<64x1xf32>
    %19 = vector.broadcast %18 : vector<64x1xf32> to vector<64x32xf32>
    %20 = arith.mulf %15, %19 : vector<64x32xf32>
    %21 = vector.broadcast %1 : vector<1x32xf32> to vector<64x32xf32>
    %22 = arith.mulf %20, %21 : vector<64x32xf32>
    %23 = vector.broadcast %2 : vector<1x32xf32> to vector<64x32xf32>
    %24 = arith.addf %22, %23 : vector<64x32xf32>
    %c0_9 = arith.constant 0 : index
    %c0_10 = arith.constant 0 : index
    %25 = vector.load %arg1[%c0_9, %c0_10] : memref<8x8xf32, #tpu.memory_space<vmem>>, vector<8x8xf32>
    %c0_11 = arith.constant 0 : index
    %c0_12 = arith.constant 0 : index
    %26 = vector.load %arg2[%c0_11, %c0_12] : memref<8x8xf32, #tpu.memory_space<vmem>>, vector<8x8xf32>
    %c0_13 = arith.constant 0 : index
    %c0_14 = arith.constant 0 : index
    %c0_15 = arith.constant 0 : index
    %27 = vector.load %arg5[%c0_13, %c0_14, %c0_15] : memref<4x32x8xf32, #tpu.memory_space<vmem>>, vector<4x32x8xf32>
    %c0_16 = arith.constant 0 : index
    %c0_17 = arith.constant 0 : index
    %c0_18 = arith.constant 0 : index
    %28 = vector.load %arg6[%c0_16, %c0_17, %c0_18] : memref<4x1x8xf32, #tpu.memory_space<vmem>>, vector<4x1x8xf32>
    %c0_19 = arith.constant 0 : index
    %c0_20 = arith.constant 0 : index
    %c0_21 = arith.constant 0 : index
    %29 = vector.load %arg7[%c0_19, %c0_20, %c0_21] : memref<4x32x8xf32, #tpu.memory_space<vmem>>, vector<4x32x8xf32>
    %c0_22 = arith.constant 0 : index
    %c0_23 = arith.constant 0 : index
    %c0_24 = arith.constant 0 : index
    %30 = vector.load %arg8[%c0_22, %c0_23, %c0_24] : memref<4x1x8xf32, #tpu.memory_space<vmem>>, vector<4x1x8xf32>
    %c0_25 = arith.constant 0 : index
    %c0_26 = arith.constant 0 : index
    %c0_27 = arith.constant 0 : index
    %31 = vector.load %arg9[%c0_25, %c0_26, %c0_27] : memref<4x32x8xf32, #tpu.memory_space<vmem>>, vector<4x32x8xf32>
    %c0_28 = arith.constant 0 : index
    %c0_29 = arith.constant 0 : index
    %c0_30 = arith.constant 0 : index
    %32 = vector.load %arg10[%c0_28, %c0_29, %c0_30] : memref<4x1x8xf32, #tpu.memory_space<vmem>>, vector<4x1x8xf32>
    %c0_31 = arith.constant 0 : index
    %c0_32 = arith.constant 0 : index
    %c0_33 = arith.constant 0 : index
    %33 = vector.load %arg11[%c0_31, %c0_32, %c0_33] : memref<4x32x8xf32, #tpu.memory_space<vmem>>, vector<4x32x8xf32>
    %c0_34 = arith.constant 0 : index
    %c0_35 = arith.constant 0 : index
    %c0_36 = arith.constant 0 : index
    %34 = vector.load %arg12[%c0_34, %c0_35, %c0_36] : memref<4x1x8xf32, #tpu.memory_space<vmem>>, vector<4x1x8xf32>
    %c0_37 = arith.constant 0 : index
    %c0_38 = arith.constant 0 : index
    %c0_39 = arith.constant 0 : index
    %35 = vector.load %arg13[%c0_37, %c0_38, %c0_39] : memref<4x32x8xf32, #tpu.memory_space<vmem>>, vector<4x32x8xf32>
    %c0_40 = arith.constant 0 : index
    %c0_41 = arith.constant 0 : index
    %c0_42 = arith.constant 0 : index
    %36 = vector.load %arg14[%c0_40, %c0_41, %c0_42] : memref<4x1x8xf32, #tpu.memory_space<vmem>>, vector<4x1x8xf32>
    %c0_43 = arith.constant 0 : index
    %c0_44 = arith.constant 0 : index
    %c0_45 = arith.constant 0 : index
    %37 = vector.load %arg15[%c0_43, %c0_44, %c0_45] : memref<4x8x32xf32, #tpu.memory_space<vmem>>, vector<4x8x32xf32>
    %c0_46 = arith.constant 0 : index
    %c0_47 = arith.constant 0 : index
    %38 = vector.load %arg16[%c0_46, %c0_47] : memref<1x32xf32, #tpu.memory_space<vmem>>, vector<1x32xf32>
    %39 = tpu.iota {dimensions = array<i32: 0>} : vector<8x8xi32>
    %40 = tpu.iota {dimensions = array<i32: 1>} : vector<8x8xi32>
    %41 = arith.cmpi sle, %40, %39 : vector<8x8xi32>
    %cst_48 = arith.constant 0.000000e+00 : f32
    %42 = vector.broadcast %cst_48 : f32 to vector<64x32xf32>
    %43 = vector.extract_strided_slice %27 {offsets = [0, 0, 0], sizes = [1, 32, 8], strides = [1, 1, 1]} : vector<4x32x8xf32> to vector<1x32x8xf32>
    %44 = vector.shape_cast %43 : vector<1x32x8xf32> to vector<32x8xf32>
    %cst_49 = arith.constant dense<0.000000e+00> : vector<64x8xf32>
    %45 = tpu.matmul %24, %44, %cst_49 {dimension_numbers = #tpu.dot_dimension_numbers<[1], [0], [0], [1], [0, 0, 1, 1], [], []>} : vector<64x32xf32>, vector<32x8xf32>, vector<64x8xf32> -> vector<64x8xf32>
    %46 = vector.extract_strided_slice %28 {offsets = [0, 0, 0], sizes = [1, 1, 8], strides = [1, 1, 1]} : vector<4x1x8xf32> to vector<1x1x8xf32>
    %47 = vector.shape_cast %46 : vector<1x1x8xf32> to vector<1x8xf32>
    %48 = vector.broadcast %47 : vector<1x8xf32> to vector<64x8xf32>
    %49 = arith.addf %45, %48 : vector<64x8xf32>
    %50 = vector.extract_strided_slice %29 {offsets = [0, 0, 0], sizes = [1, 32, 8], strides = [1, 1, 1]} : vector<4x32x8xf32> to vector<1x32x8xf32>
    %51 = vector.shape_cast %50 : vector<1x32x8xf32> to vector<32x8xf32>
    %cst_50 = arith.constant dense<0.000000e+00> : vector<64x8xf32>
    %52 = tpu.matmul %24, %51, %cst_50 {dimension_numbers = #tpu.dot_dimension_numbers<[1], [0], [0], [1], [0, 0, 1, 1], [], []>} : vector<64x32xf32>, vector<32x8xf32>, vector<64x8xf32> -> vector<64x8xf32>
    %53 = vector.extract_strided_slice %30 {offsets = [0, 0, 0], sizes = [1, 1, 8], strides = [1, 1, 1]} : vector<4x1x8xf32> to vector<1x1x8xf32>
    %54 = vector.shape_cast %53 : vector<1x1x8xf32> to vector<1x8xf32>
    %55 = vector.broadcast %54 : vector<1x8xf32> to vector<64x8xf32>
    %56 = arith.addf %52, %55 : vector<64x8xf32>
    %57 = vector.extract_strided_slice %31 {offsets = [0, 0, 0], sizes = [1, 32, 8], strides = [1, 1, 1]} : vector<4x32x8xf32> to vector<1x32x8xf32>
    %58 = vector.shape_cast %57 : vector<1x32x8xf32> to vector<32x8xf32>
    %cst_51 = arith.constant dense<0.000000e+00> : vector<64x8xf32>
    %59 = tpu.matmul %24, %58, %cst_51 {dimension_numbers = #tpu.dot_dimension_numbers<[1], [0], [0], [1], [0, 0, 1, 1], [], []>} : vector<64x32xf32>, vector<32x8xf32>, vector<64x8xf32> -> vector<64x8xf32>
    %60 = vector.extract_strided_slice %32 {offsets = [0, 0, 0], sizes = [1, 1, 8], strides = [1, 1, 1]} : vector<4x1x8xf32> to vector<1x1x8xf32>
    %61 = vector.shape_cast %60 : vector<1x1x8xf32> to vector<1x8xf32>
    %62 = vector.broadcast %61 : vector<1x8xf32> to vector<64x8xf32>
    %63 = arith.addf %59, %62 : vector<64x8xf32>
    %64 = vector.extract_strided_slice %33 {offsets = [0, 0, 0], sizes = [1, 32, 8], strides = [1, 1, 1]} : vector<4x32x8xf32> to vector<1x32x8xf32>
    %65 = vector.shape_cast %64 : vector<1x32x8xf32> to vector<32x8xf32>
    %cst_52 = arith.constant dense<0.000000e+00> : vector<64x8xf32>
    %66 = tpu.matmul %24, %65, %cst_52 {dimension_numbers = #tpu.dot_dimension_numbers<[1], [0], [0], [1], [0, 0, 1, 1], [], []>} : vector<64x32xf32>, vector<32x8xf32>, vector<64x8xf32> -> vector<64x8xf32>
    %67 = vector.extract_strided_slice %34 {offsets = [0, 0, 0], sizes = [1, 1, 8], strides = [1, 1, 1]} : vector<4x1x8xf32> to vector<1x1x8xf32>
    %68 = vector.shape_cast %67 : vector<1x1x8xf32> to vector<1x8xf32>
    %69 = vector.broadcast %68 : vector<1x8xf32> to vector<64x8xf32>
    %70 = arith.addf %66, %69 : vector<64x8xf32>
    %71 = vector.extract_strided_slice %35 {offsets = [0, 0, 0], sizes = [1, 32, 8], strides = [1, 1, 1]} : vector<4x32x8xf32> to vector<1x32x8xf32>
    %72 = vector.shape_cast %71 : vector<1x32x8xf32> to vector<32x8xf32>
    %cst_53 = arith.constant dense<0.000000e+00> : vector<64x8xf32>
    %73 = tpu.matmul %24, %72, %cst_53 {dimension_numbers = #tpu.dot_dimension_numbers<[1], [0], [0], [1], [0, 0, 1, 1], [], []>} : vector<64x32xf32>, vector<32x8xf32>, vector<64x8xf32> -> vector<64x8xf32>
    %74 = vector.extract_strided_slice %36 {offsets = [0, 0, 0], sizes = [1, 1, 8], strides = [1, 1, 1]} : vector<4x1x8xf32> to vector<1x1x8xf32>
    %75 = vector.shape_cast %74 : vector<1x1x8xf32> to vector<1x8xf32>
    %76 = vector.broadcast %75 : vector<1x8xf32> to vector<64x8xf32>
    %77 = arith.addf %73, %76 : vector<64x8xf32>
    %78 = vector.shape_cast %49 : vector<64x8xf32> to vector<8x8x8xf32>
    %79 = vector.shape_cast %25 : vector<8x8xf32> to vector<1x8x8xf32>
    %80 = vector.broadcast %79 : vector<1x8x8xf32> to vector<8x8x8xf32>
    %81 = arith.mulf %78, %80 : vector<8x8x8xf32>
    %82 = vector.shape_cast %56 : vector<64x8xf32> to vector<8x8x8xf32>
    %83 = vector.shape_cast %26 : vector<8x8xf32> to vector<1x8x8xf32>
    %84 = vector.broadcast %83 : vector<1x8x8xf32> to vector<8x8x8xf32>
    %85 = arith.mulf %82, %84 : vector<8x8x8xf32>
    %86 = arith.addf %81, %85 : vector<8x8x8xf32>
    %87 = vector.shape_cast %63 : vector<64x8xf32> to vector<8x8x8xf32>
    %88 = vector.shape_cast %25 : vector<8x8xf32> to vector<1x8x8xf32>
    %89 = vector.broadcast %88 : vector<1x8x8xf32> to vector<8x8x8xf32>
    %90 = arith.mulf %87, %89 : vector<8x8x8xf32>
    %91 = vector.shape_cast %70 : vector<64x8xf32> to vector<8x8x8xf32>
    %92 = vector.shape_cast %26 : vector<8x8xf32> to vector<1x8x8xf32>
    %93 = vector.broadcast %92 : vector<1x8x8xf32> to vector<8x8x8xf32>
    %94 = arith.mulf %91, %93 : vector<8x8x8xf32>
    %95 = arith.addf %90, %94 : vector<8x8x8xf32>
    %96 = vector.shape_cast %77 : vector<64x8xf32> to vector<8x8x8xf32>
    "tpu.trace_start"() <{level = 10 : i32, message = "rtd,rsd->rts"}> : () -> ()
    %cst_54 = arith.constant dense<0.000000e+00> : vector<8x8x8xf32>
    %97 = tpu.matmul %86, %95, %cst_54 {dimension_numbers = #tpu.dot_dimension_numbers<[2], [2], [1], [1], [0, 0, 0, 1, 1, 1], [0], [0]>} : vector<8x8x8xf32>, vector<8x8x8xf32>, vector<8x8x8xf32> -> vector<8x8x8xf32>
    "tpu.trace_stop"() : () -> ()
    %cst_55 = arith.constant 0.353553385 : f32
    %98 = vector.broadcast %cst_55 : f32 to vector<8x8x8xf32>
    %99 = arith.mulf %97, %98 : vector<8x8x8xf32>
    %cst_56 = arith.constant 0xFF800000 : f32
    %100 = vector.shape_cast %41 : vector<8x8xi1> to vector<1x8x8xi1>
    %101 = vector.broadcast %100 : vector<1x8x8xi1> to vector<8x8x8xi1>
    %102 = vector.broadcast %cst_56 : f32 to vector<8x8x8xf32>
    %103 = arith.select %101, %99, %102 : vector<8x8x8xi1>, vector<8x8x8xf32>
    %cst_57 = arith.constant dense<0xFF800000> : vector<8x8xf32>
    %104 = vector.multi_reduction <maximumf>, %103, %cst_57 [2] : vector<8x8x8xf32> to vector<8x8xf32>
    %105 = vector.shape_cast %104 : vector<8x8xf32> to vector<8x8x1xf32>
    %106 = vector.broadcast %105 : vector<8x8x1xf32> to vector<8x8x8xf32>
    %107 = arith.subf %103, %106 : vector<8x8x8xf32>
    %108 = math.exp %107 : vector<8x8x8xf32>
    %cst_58 = arith.constant dense<0.000000e+00> : vector<8x8xf32>
    %109 = vector.multi_reduction <add>, %108, %cst_58 [2] : vector<8x8x8xf32> to vector<8x8xf32>
    %110 = vector.shape_cast %109 : vector<8x8xf32> to vector<8x8x1xf32>
    %111 = vector.broadcast %110 : vector<8x8x1xf32> to vector<8x8x8xf32>
    %112 = arith.divf %108, %111 : vector<8x8x8xf32>
    "tpu.trace_start"() <{level = 10 : i32, message = "rts,rsd->rtd"}> : () -> ()
    %cst_59 = arith.constant dense<0.000000e+00> : vector<8x8x8xf32>
    %113 = tpu.matmul %112, %96, %cst_59 {dimension_numbers = #tpu.dot_dimension_numbers<[2], [1], [1], [2], [0, 0, 0, 1, 1, 2], [0], [0]>} : vector<8x8x8xf32>, vector<8x8x8xf32>, vector<8x8x8xf32> -> vector<8x8x8xf32>
    "tpu.trace_stop"() : () -> ()
    %114 = vector.shape_cast %113 : vector<8x8x8xf32> to vector<64x8xf32>
    %115 = vector.extract_strided_slice %37 {offsets = [0, 0, 0], sizes = [1, 8, 32], strides = [1, 1, 1]} : vector<4x8x32xf32> to vector<1x8x32xf32>
    %116 = vector.shape_cast %115 : vector<1x8x32xf32> to vector<8x32xf32>
    %cst_60 = arith.constant dense<0.000000e+00> : vector<64x32xf32>
    %117 = tpu.matmul %114, %116, %cst_60 {dimension_numbers = #tpu.dot_dimension_numbers<[1], [0], [0], [1], [0, 0, 1, 1], [], []>} : vector<64x8xf32>, vector<8x32xf32>, vector<64x32xf32> -> vector<64x32xf32>
    %118 = arith.addf %42, %117 : vector<64x32xf32>
    %119 = vector.extract_strided_slice %27 {offsets = [1, 0, 0], sizes = [1, 32, 8], strides = [1, 1, 1]} : vector<4x32x8xf32> to vector<1x32x8xf32>
    %120 = vector.shape_cast %119 : vector<1x32x8xf32> to vector<32x8xf32>
    %cst_61 = arith.constant dense<0.000000e+00> : vector<64x8xf32>
    %121 = tpu.matmul %24, %120, %cst_61 {dimension_numbers = #tpu.dot_dimension_numbers<[1], [0], [0], [1], [0, 0, 1, 1], [], []>} : vector<64x32xf32>, vector<32x8xf32>, vector<64x8xf32> -> vector<64x8xf32>
    %122 = vector.extract_strided_slice %28 {offsets = [1, 0, 0], sizes = [1, 1, 8], strides = [1, 1, 1]} : vector<4x1x8xf32> to vector<1x1x8xf32>
    %123 = vector.shape_cast %122 : vector<1x1x8xf32> to vector<1x8xf32>
    %124 = vector.broadcast %123 : vector<1x8xf32> to vector<64x8xf32>
    %125 = arith.addf %121, %124 : vector<64x8xf32>
    %126 = vector.extract_strided_slice %29 {offsets = [1, 0, 0], sizes = [1, 32, 8], strides = [1, 1, 1]} : vector<4x32x8xf32> to vector<1x32x8xf32>
    %127 = vector.shape_cast %126 : vector<1x32x8xf32> to vector<32x8xf32>
    %cst_62 = arith.constant dense<0.000000e+00> : vector<64x8xf32>
    %128 = tpu.matmul %24, %127, %cst_62 {dimension_numbers = #tpu.dot_dimension_numbers<[1], [0], [0], [1], [0, 0, 1, 1], [], []>} : vector<64x32xf32>, vector<32x8xf32>, vector<64x8xf32> -> vector<64x8xf32>
    %129 = vector.extract_strided_slice %30 {offsets = [1, 0, 0], sizes = [1, 1, 8], strides = [1, 1, 1]} : vector<4x1x8xf32> to vector<1x1x8xf32>
    %130 = vector.shape_cast %129 : vector<1x1x8xf32> to vector<1x8xf32>
    %131 = vector.broadcast %130 : vector<1x8xf32> to vector<64x8xf32>
    %132 = arith.addf %128, %131 : vector<64x8xf32>
    %133 = vector.extract_strided_slice %31 {offsets = [1, 0, 0], sizes = [1, 32, 8], strides = [1, 1, 1]} : vector<4x32x8xf32> to vector<1x32x8xf32>
    %134 = vector.shape_cast %133 : vector<1x32x8xf32> to vector<32x8xf32>
    %cst_63 = arith.constant dense<0.000000e+00> : vector<64x8xf32>
    %135 = tpu.matmul %24, %134, %cst_63 {dimension_numbers = #tpu.dot_dimension_numbers<[1], [0], [0], [1], [0, 0, 1, 1], [], []>} : vector<64x32xf32>, vector<32x8xf32>, vector<64x8xf32> -> vector<64x8xf32>
    %136 = vector.extract_strided_slice %32 {offsets = [1, 0, 0], sizes = [1, 1, 8], strides = [1, 1, 1]} : vector<4x1x8xf32> to vector<1x1x8xf32>
    %137 = vector.shape_cast %136 : vector<1x1x8xf32> to vector<1x8xf32>
    %138 = vector.broadcast %137 : vector<1x8xf32> to vector<64x8xf32>
    %139 = arith.addf %135, %138 : vector<64x8xf32>
    %140 = vector.extract_strided_slice %33 {offsets = [1, 0, 0], sizes = [1, 32, 8], strides = [1, 1, 1]} : vector<4x32x8xf32> to vector<1x32x8xf32>
    %141 = vector.shape_cast %140 : vector<1x32x8xf32> to vector<32x8xf32>
    %cst_64 = arith.constant dense<0.000000e+00> : vector<64x8xf32>
    %142 = tpu.matmul %24, %141, %cst_64 {dimension_numbers = #tpu.dot_dimension_numbers<[1], [0], [0], [1], [0, 0, 1, 1], [], []>} : vector<64x32xf32>, vector<32x8xf32>, vector<64x8xf32> -> vector<64x8xf32>
    %143 = vector.extract_strided_slice %34 {offsets = [1, 0, 0], sizes = [1, 1, 8], strides = [1, 1, 1]} : vector<4x1x8xf32> to vector<1x1x8xf32>
    %144 = vector.shape_cast %143 : vector<1x1x8xf32> to vector<1x8xf32>
    %145 = vector.broadcast %144 : vector<1x8xf32> to vector<64x8xf32>
    %146 = arith.addf %142, %145 : vector<64x8xf32>
    %147 = vector.extract_strided_slice %35 {offsets = [1, 0, 0], sizes = [1, 32, 8], strides = [1, 1, 1]} : vector<4x32x8xf32> to vector<1x32x8xf32>
    %148 = vector.shape_cast %147 : vector<1x32x8xf32> to vector<32x8xf32>
    %cst_65 = arith.constant dense<0.000000e+00> : vector<64x8xf32>
    %149 = tpu.matmul %24, %148, %cst_65 {dimension_numbers = #tpu.dot_dimension_numbers<[1], [0], [0], [1], [0, 0, 1, 1], [], []>} : vector<64x32xf32>, vector<32x8xf32>, vector<64x8xf32> -> vector<64x8xf32>
    %150 = vector.extract_strided_slice %36 {offsets = [1, 0, 0], sizes = [1, 1, 8], strides = [1, 1, 1]} : vector<4x1x8xf32> to vector<1x1x8xf32>
    %151 = vector.shape_cast %150 : vector<1x1x8xf32> to vector<1x8xf32>
    %152 = vector.broadcast %151 : vector<1x8xf32> to vector<64x8xf32>
    %153 = arith.addf %149, %152 : vector<64x8xf32>
    %154 = vector.shape_cast %125 : vector<64x8xf32> to vector<8x8x8xf32>
    %155 = vector.shape_cast %25 : vector<8x8xf32> to vector<1x8x8xf32>
    %156 = vector.broadcast %155 : vector<1x8x8xf32> to vector<8x8x8xf32>
    %157 = arith.mulf %154, %156 : vector<8x8x8xf32>
    %158 = vector.shape_cast %132 : vector<64x8xf32> to vector<8x8x8xf32>
    %159 = vector.shape_cast %26 : vector<8x8xf32> to vector<1x8x8xf32>
    %160 = vector.broadcast %159 : vector<1x8x8xf32> to vector<8x8x8xf32>
    %161 = arith.mulf %158, %160 : vector<8x8x8xf32>
    %162 = arith.addf %157, %161 : vector<8x8x8xf32>
    %163 = vector.shape_cast %139 : vector<64x8xf32> to vector<8x8x8xf32>
    %164 = vector.shape_cast %25 : vector<8x8xf32> to vector<1x8x8xf32>
    %165 = vector.broadcast %164 : vector<1x8x8xf32> to vector<8x8x8xf32>
    %166 = arith.mulf %163, %165 : vector<8x8x8xf32>
    %167 = vector.shape_cast %146 : vector<64x8xf32> to vector<8x8x8xf32>
    %168 = vector.shape_cast %26 : vector<8x8xf32> to vector<1x8x8xf32>
    %169 = vector.broadcast %168 : vector<1x8x8xf32> to vector<8x8x8xf32>
    %170 = arith.mulf %167, %169 : vector<8x8x8xf32>
    %171 = arith.addf %166, %170 : vector<8x8x8xf32>
    %172 = vector.shape_cast %153 : vector<64x8xf32> to vector<8x8x8xf32>
    "tpu.trace_start"() <{level = 10 : i32, message = "rtd,rsd->rts"}> : () -> ()
    %cst_66 = arith.constant dense<0.000000e+00> : vector<8x8x8xf32>
    %173 = tpu.matmul %162, %171, %cst_66 {dimension_numbers = #tpu.dot_dimension_numbers<[2], [2], [1], [1], [0, 0, 0, 1, 1, 1], [0], [0]>} : vector<8x8x8xf32>, vector<8x8x8xf32>, vector<8x8x8xf32> -> vector<8x8x8xf32>
    "tpu.trace_stop"() : () -> ()
    %cst_67 = arith.constant 0.353553385 : f32
    %174 = vector.broadcast %cst_67 : f32 to vector<8x8x8xf32>
    %175 = arith.mulf %173, %174 : vector<8x8x8xf32>
    %cst_68 = arith.constant 0xFF800000 : f32
    %176 = vector.shape_cast %41 : vector<8x8xi1> to vector<1x8x8xi1>
    %177 = vector.broadcast %176 : vector<1x8x8xi1> to vector<8x8x8xi1>
    %178 = vector.broadcast %cst_68 : f32 to vector<8x8x8xf32>
    %179 = arith.select %177, %175, %178 : vector<8x8x8xi1>, vector<8x8x8xf32>
    %cst_69 = arith.constant dense<0xFF800000> : vector<8x8xf32>
    %180 = vector.multi_reduction <maximumf>, %179, %cst_69 [2] : vector<8x8x8xf32> to vector<8x8xf32>
    %181 = vector.shape_cast %180 : vector<8x8xf32> to vector<8x8x1xf32>
    %182 = vector.broadcast %181 : vector<8x8x1xf32> to vector<8x8x8xf32>
    %183 = arith.subf %179, %182 : vector<8x8x8xf32>
    %184 = math.exp %183 : vector<8x8x8xf32>
    %cst_70 = arith.constant dense<0.000000e+00> : vector<8x8xf32>
    %185 = vector.multi_reduction <add>, %184, %cst_70 [2] : vector<8x8x8xf32> to vector<8x8xf32>
    %186 = vector.shape_cast %185 : vector<8x8xf32> to vector<8x8x1xf32>
    %187 = vector.broadcast %186 : vector<8x8x1xf32> to vector<8x8x8xf32>
    %188 = arith.divf %184, %187 : vector<8x8x8xf32>
    "tpu.trace_start"() <{level = 10 : i32, message = "rts,rsd->rtd"}> : () -> ()
    %cst_71 = arith.constant dense<0.000000e+00> : vector<8x8x8xf32>
    %189 = tpu.matmul %188, %172, %cst_71 {dimension_numbers = #tpu.dot_dimension_numbers<[2], [1], [1], [2], [0, 0, 0, 1, 1, 2], [0], [0]>} : vector<8x8x8xf32>, vector<8x8x8xf32>, vector<8x8x8xf32> -> vector<8x8x8xf32>
    "tpu.trace_stop"() : () -> ()
    %190 = vector.shape_cast %189 : vector<8x8x8xf32> to vector<64x8xf32>
    %191 = vector.extract_strided_slice %37 {offsets = [1, 0, 0], sizes = [1, 8, 32], strides = [1, 1, 1]} : vector<4x8x32xf32> to vector<1x8x32xf32>
    %192 = vector.shape_cast %191 : vector<1x8x32xf32> to vector<8x32xf32>
    %cst_72 = arith.constant dense<0.000000e+00> : vector<64x32xf32>
    %193 = tpu.matmul %190, %192, %cst_72 {dimension_numbers = #tpu.dot_dimension_numbers<[1], [0], [0], [1], [0, 0, 1, 1], [], []>} : vector<64x8xf32>, vector<8x32xf32>, vector<64x32xf32> -> vector<64x32xf32>
    %194 = arith.addf %118, %193 : vector<64x32xf32>
    %195 = vector.extract_strided_slice %27 {offsets = [2, 0, 0], sizes = [1, 32, 8], strides = [1, 1, 1]} : vector<4x32x8xf32> to vector<1x32x8xf32>
    %196 = vector.shape_cast %195 : vector<1x32x8xf32> to vector<32x8xf32>
    %cst_73 = arith.constant dense<0.000000e+00> : vector<64x8xf32>
    %197 = tpu.matmul %24, %196, %cst_73 {dimension_numbers = #tpu.dot_dimension_numbers<[1], [0], [0], [1], [0, 0, 1, 1], [], []>} : vector<64x32xf32>, vector<32x8xf32>, vector<64x8xf32> -> vector<64x8xf32>
    %198 = vector.extract_strided_slice %28 {offsets = [2, 0, 0], sizes = [1, 1, 8], strides = [1, 1, 1]} : vector<4x1x8xf32> to vector<1x1x8xf32>
    %199 = vector.shape_cast %198 : vector<1x1x8xf32> to vector<1x8xf32>
    %200 = vector.broadcast %199 : vector<1x8xf32> to vector<64x8xf32>
    %201 = arith.addf %197, %200 : vector<64x8xf32>
    %202 = vector.extract_strided_slice %29 {offsets = [2, 0, 0], sizes = [1, 32, 8], strides = [1, 1, 1]} : vector<4x32x8xf32> to vector<1x32x8xf32>
    %203 = vector.shape_cast %202 : vector<1x32x8xf32> to vector<32x8xf32>
    %cst_74 = arith.constant dense<0.000000e+00> : vector<64x8xf32>
    %204 = tpu.matmul %24, %203, %cst_74 {dimension_numbers = #tpu.dot_dimension_numbers<[1], [0], [0], [1], [0, 0, 1, 1], [], []>} : vector<64x32xf32>, vector<32x8xf32>, vector<64x8xf32> -> vector<64x8xf32>
    %205 = vector.extract_strided_slice %30 {offsets = [2, 0, 0], sizes = [1, 1, 8], strides = [1, 1, 1]} : vector<4x1x8xf32> to vector<1x1x8xf32>
    %206 = vector.shape_cast %205 : vector<1x1x8xf32> to vector<1x8xf32>
    %207 = vector.broadcast %206 : vector<1x8xf32> to vector<64x8xf32>
    %208 = arith.addf %204, %207 : vector<64x8xf32>
    %209 = vector.extract_strided_slice %31 {offsets = [2, 0, 0], sizes = [1, 32, 8], strides = [1, 1, 1]} : vector<4x32x8xf32> to vector<1x32x8xf32>
    %210 = vector.shape_cast %209 : vector<1x32x8xf32> to vector<32x8xf32>
    %cst_75 = arith.constant dense<0.000000e+00> : vector<64x8xf32>
    %211 = tpu.matmul %24, %210, %cst_75 {dimension_numbers = #tpu.dot_dimension_numbers<[1], [0], [0], [1], [0, 0, 1, 1], [], []>} : vector<64x32xf32>, vector<32x8xf32>, vector<64x8xf32> -> vector<64x8xf32>
    %212 = vector.extract_strided_slice %32 {offsets = [2, 0, 0], sizes = [1, 1, 8], strides = [1, 1, 1]} : vector<4x1x8xf32> to vector<1x1x8xf32>
    %213 = vector.shape_cast %212 : vector<1x1x8xf32> to vector<1x8xf32>
    %214 = vector.broadcast %213 : vector<1x8xf32> to vector<64x8xf32>
    %215 = arith.addf %211, %214 : vector<64x8xf32>
    %216 = vector.extract_strided_slice %33 {offsets = [2, 0, 0], sizes = [1, 32, 8], strides = [1, 1, 1]} : vector<4x32x8xf32> to vector<1x32x8xf32>
    %217 = vector.shape_cast %216 : vector<1x32x8xf32> to vector<32x8xf32>
    %cst_76 = arith.constant dense<0.000000e+00> : vector<64x8xf32>
    %218 = tpu.matmul %24, %217, %cst_76 {dimension_numbers = #tpu.dot_dimension_numbers<[1], [0], [0], [1], [0, 0, 1, 1], [], []>} : vector<64x32xf32>, vector<32x8xf32>, vector<64x8xf32> -> vector<64x8xf32>
    %219 = vector.extract_strided_slice %34 {offsets = [2, 0, 0], sizes = [1, 1, 8], strides = [1, 1, 1]} : vector<4x1x8xf32> to vector<1x1x8xf32>
    %220 = vector.shape_cast %219 : vector<1x1x8xf32> to vector<1x8xf32>
    %221 = vector.broadcast %220 : vector<1x8xf32> to vector<64x8xf32>
    %222 = arith.addf %218, %221 : vector<64x8xf32>
    %223 = vector.extract_strided_slice %35 {offsets = [2, 0, 0], sizes = [1, 32, 8], strides = [1, 1, 1]} : vector<4x32x8xf32> to vector<1x32x8xf32>
    %224 = vector.shape_cast %223 : vector<1x32x8xf32> to vector<32x8xf32>
    %cst_77 = arith.constant dense<0.000000e+00> : vector<64x8xf32>
    %225 = tpu.matmul %24, %224, %cst_77 {dimension_numbers = #tpu.dot_dimension_numbers<[1], [0], [0], [1], [0, 0, 1, 1], [], []>} : vector<64x32xf32>, vector<32x8xf32>, vector<64x8xf32> -> vector<64x8xf32>
    %226 = vector.extract_strided_slice %36 {offsets = [2, 0, 0], sizes = [1, 1, 8], strides = [1, 1, 1]} : vector<4x1x8xf32> to vector<1x1x8xf32>
    %227 = vector.shape_cast %226 : vector<1x1x8xf32> to vector<1x8xf32>
    %228 = vector.broadcast %227 : vector<1x8xf32> to vector<64x8xf32>
    %229 = arith.addf %225, %228 : vector<64x8xf32>
    %230 = vector.shape_cast %201 : vector<64x8xf32> to vector<8x8x8xf32>
    %231 = vector.shape_cast %25 : vector<8x8xf32> to vector<1x8x8xf32>
    %232 = vector.broadcast %231 : vector<1x8x8xf32> to vector<8x8x8xf32>
    %233 = arith.mulf %230, %232 : vector<8x8x8xf32>
    %234 = vector.shape_cast %208 : vector<64x8xf32> to vector<8x8x8xf32>
    %235 = vector.shape_cast %26 : vector<8x8xf32> to vector<1x8x8xf32>
    %236 = vector.broadcast %235 : vector<1x8x8xf32> to vector<8x8x8xf32>
    %237 = arith.mulf %234, %236 : vector<8x8x8xf32>
    %238 = arith.addf %233, %237 : vector<8x8x8xf32>
    %239 = vector.shape_cast %215 : vector<64x8xf32> to vector<8x8x8xf32>
    %240 = vector.shape_cast %25 : vector<8x8xf32> to vector<1x8x8xf32>
    %241 = vector.broadcast %240 : vector<1x8x8xf32> to vector<8x8x8xf32>
    %242 = arith.mulf %239, %241 : vector<8x8x8xf32>
    %243 = vector.shape_cast %222 : vector<64x8xf32> to vector<8x8x8xf32>
    %244 = vector.shape_cast %26 : vector<8x8xf32> to vector<1x8x8xf32>
    %245 = vector.broadcast %244 : vector<1x8x8xf32> to vector<8x8x8xf32>
    %246 = arith.mulf %243, %245 : vector<8x8x8xf32>
    %247 = arith.addf %242, %246 : vector<8x8x8xf32>
    %248 = vector.shape_cast %229 : vector<64x8xf32> to vector<8x8x8xf32>
    "tpu.trace_start"() <{level = 10 : i32, message = "rtd,rsd->rts"}> : () -> ()
    %cst_78 = arith.constant dense<0.000000e+00> : vector<8x8x8xf32>
    %249 = tpu.matmul %238, %247, %cst_78 {dimension_numbers = #tpu.dot_dimension_numbers<[2], [2], [1], [1], [0, 0, 0, 1, 1, 1], [0], [0]>} : vector<8x8x8xf32>, vector<8x8x8xf32>, vector<8x8x8xf32> -> vector<8x8x8xf32>
    "tpu.trace_stop"() : () -> ()
    %cst_79 = arith.constant 0.353553385 : f32
    %250 = vector.broadcast %cst_79 : f32 to vector<8x8x8xf32>
    %251 = arith.mulf %249, %250 : vector<8x8x8xf32>
    %cst_80 = arith.constant 0xFF800000 : f32
    %252 = vector.shape_cast %41 : vector<8x8xi1> to vector<1x8x8xi1>
    %253 = vector.broadcast %252 : vector<1x8x8xi1> to vector<8x8x8xi1>
    %254 = vector.broadcast %cst_80 : f32 to vector<8x8x8xf32>
    %255 = arith.select %253, %251, %254 : vector<8x8x8xi1>, vector<8x8x8xf32>
    %cst_81 = arith.constant dense<0xFF800000> : vector<8x8xf32>
    %256 = vector.multi_reduction <maximumf>, %255, %cst_81 [2] : vector<8x8x8xf32> to vector<8x8xf32>
    %257 = vector.shape_cast %256 : vector<8x8xf32> to vector<8x8x1xf32>
    %258 = vector.broadcast %257 : vector<8x8x1xf32> to vector<8x8x8xf32>
    %259 = arith.subf %255, %258 : vector<8x8x8xf32>
    %260 = math.exp %259 : vector<8x8x8xf32>
    %cst_82 = arith.constant dense<0.000000e+00> : vector<8x8xf32>
    %261 = vector.multi_reduction <add>, %260, %cst_82 [2] : vector<8x8x8xf32> to vector<8x8xf32>
    %262 = vector.shape_cast %261 : vector<8x8xf32> to vector<8x8x1xf32>
    %263 = vector.broadcast %262 : vector<8x8x1xf32> to vector<8x8x8xf32>
    %264 = arith.divf %260, %263 : vector<8x8x8xf32>
    "tpu.trace_start"() <{level = 10 : i32, message = "rts,rsd->rtd"}> : () -> ()
    %cst_83 = arith.constant dense<0.000000e+00> : vector<8x8x8xf32>
    %265 = tpu.matmul %264, %248, %cst_83 {dimension_numbers = #tpu.dot_dimension_numbers<[2], [1], [1], [2], [0, 0, 0, 1, 1, 2], [0], [0]>} : vector<8x8x8xf32>, vector<8x8x8xf32>, vector<8x8x8xf32> -> vector<8x8x8xf32>
    "tpu.trace_stop"() : () -> ()
    %266 = vector.shape_cast %265 : vector<8x8x8xf32> to vector<64x8xf32>
    %267 = vector.extract_strided_slice %37 {offsets = [2, 0, 0], sizes = [1, 8, 32], strides = [1, 1, 1]} : vector<4x8x32xf32> to vector<1x8x32xf32>
    %268 = vector.shape_cast %267 : vector<1x8x32xf32> to vector<8x32xf32>
    %cst_84 = arith.constant dense<0.000000e+00> : vector<64x32xf32>
    %269 = tpu.matmul %266, %268, %cst_84 {dimension_numbers = #tpu.dot_dimension_numbers<[1], [0], [0], [1], [0, 0, 1, 1], [], []>} : vector<64x8xf32>, vector<8x32xf32>, vector<64x32xf32> -> vector<64x32xf32>
    %270 = arith.addf %194, %269 : vector<64x32xf32>
    %271 = vector.extract_strided_slice %27 {offsets = [3, 0, 0], sizes = [1, 32, 8], strides = [1, 1, 1]} : vector<4x32x8xf32> to vector<1x32x8xf32>
    %272 = vector.shape_cast %271 : vector<1x32x8xf32> to vector<32x8xf32>
    %cst_85 = arith.constant dense<0.000000e+00> : vector<64x8xf32>
    %273 = tpu.matmul %24, %272, %cst_85 {dimension_numbers = #tpu.dot_dimension_numbers<[1], [0], [0], [1], [0, 0, 1, 1], [], []>} : vector<64x32xf32>, vector<32x8xf32>, vector<64x8xf32> -> vector<64x8xf32>
    %274 = vector.extract_strided_slice %28 {offsets = [3, 0, 0], sizes = [1, 1, 8], strides = [1, 1, 1]} : vector<4x1x8xf32> to vector<1x1x8xf32>
    %275 = vector.shape_cast %274 : vector<1x1x8xf32> to vector<1x8xf32>
    %276 = vector.broadcast %275 : vector<1x8xf32> to vector<64x8xf32>
    %277 = arith.addf %273, %276 : vector<64x8xf32>
    %278 = vector.extract_strided_slice %29 {offsets = [3, 0, 0], sizes = [1, 32, 8], strides = [1, 1, 1]} : vector<4x32x8xf32> to vector<1x32x8xf32>
    %279 = vector.shape_cast %278 : vector<1x32x8xf32> to vector<32x8xf32>
    %cst_86 = arith.constant dense<0.000000e+00> : vector<64x8xf32>
    %280 = tpu.matmul %24, %279, %cst_86 {dimension_numbers = #tpu.dot_dimension_numbers<[1], [0], [0], [1], [0, 0, 1, 1], [], []>} : vector<64x32xf32>, vector<32x8xf32>, vector<64x8xf32> -> vector<64x8xf32>
    %281 = vector.extract_strided_slice %30 {offsets = [3, 0, 0], sizes = [1, 1, 8], strides = [1, 1, 1]} : vector<4x1x8xf32> to vector<1x1x8xf32>
    %282 = vector.shape_cast %281 : vector<1x1x8xf32> to vector<1x8xf32>
    %283 = vector.broadcast %282 : vector<1x8xf32> to vector<64x8xf32>
    %284 = arith.addf %280, %283 : vector<64x8xf32>
    %285 = vector.extract_strided_slice %31 {offsets = [3, 0, 0], sizes = [1, 32, 8], strides = [1, 1, 1]} : vector<4x32x8xf32> to vector<1x32x8xf32>
    %286 = vector.shape_cast %285 : vector<1x32x8xf32> to vector<32x8xf32>
    %cst_87 = arith.constant dense<0.000000e+00> : vector<64x8xf32>
    %287 = tpu.matmul %24, %286, %cst_87 {dimension_numbers = #tpu.dot_dimension_numbers<[1], [0], [0], [1], [0, 0, 1, 1], [], []>} : vector<64x32xf32>, vector<32x8xf32>, vector<64x8xf32> -> vector<64x8xf32>
    %288 = vector.extract_strided_slice %32 {offsets = [3, 0, 0], sizes = [1, 1, 8], strides = [1, 1, 1]} : vector<4x1x8xf32> to vector<1x1x8xf32>
    %289 = vector.shape_cast %288 : vector<1x1x8xf32> to vector<1x8xf32>
    %290 = vector.broadcast %289 : vector<1x8xf32> to vector<64x8xf32>
    %291 = arith.addf %287, %290 : vector<64x8xf32>
    %292 = vector.extract_strided_slice %33 {offsets = [3, 0, 0], sizes = [1, 32, 8], strides = [1, 1, 1]} : vector<4x32x8xf32> to vector<1x32x8xf32>
    %293 = vector.shape_cast %292 : vector<1x32x8xf32> to vector<32x8xf32>
    %cst_88 = arith.constant dense<0.000000e+00> : vector<64x8xf32>
    %294 = tpu.matmul %24, %293, %cst_88 {dimension_numbers = #tpu.dot_dimension_numbers<[1], [0], [0], [1], [0, 0, 1, 1], [], []>} : vector<64x32xf32>, vector<32x8xf32>, vector<64x8xf32> -> vector<64x8xf32>
    %295 = vector.extract_strided_slice %34 {offsets = [3, 0, 0], sizes = [1, 1, 8], strides = [1, 1, 1]} : vector<4x1x8xf32> to vector<1x1x8xf32>
    %296 = vector.shape_cast %295 : vector<1x1x8xf32> to vector<1x8xf32>
    %297 = vector.broadcast %296 : vector<1x8xf32> to vector<64x8xf32>
    %298 = arith.addf %294, %297 : vector<64x8xf32>
    %299 = vector.extract_strided_slice %35 {offsets = [3, 0, 0], sizes = [1, 32, 8], strides = [1, 1, 1]} : vector<4x32x8xf32> to vector<1x32x8xf32>
    %300 = vector.shape_cast %299 : vector<1x32x8xf32> to vector<32x8xf32>
    %cst_89 = arith.constant dense<0.000000e+00> : vector<64x8xf32>
    %301 = tpu.matmul %24, %300, %cst_89 {dimension_numbers = #tpu.dot_dimension_numbers<[1], [0], [0], [1], [0, 0, 1, 1], [], []>} : vector<64x32xf32>, vector<32x8xf32>, vector<64x8xf32> -> vector<64x8xf32>
    %302 = vector.extract_strided_slice %36 {offsets = [3, 0, 0], sizes = [1, 1, 8], strides = [1, 1, 1]} : vector<4x1x8xf32> to vector<1x1x8xf32>
    %303 = vector.shape_cast %302 : vector<1x1x8xf32> to vector<1x8xf32>
    %304 = vector.broadcast %303 : vector<1x8xf32> to vector<64x8xf32>
    %305 = arith.addf %301, %304 : vector<64x8xf32>
    %306 = vector.shape_cast %277 : vector<64x8xf32> to vector<8x8x8xf32>
    %307 = vector.shape_cast %25 : vector<8x8xf32> to vector<1x8x8xf32>
    %308 = vector.broadcast %307 : vector<1x8x8xf32> to vector<8x8x8xf32>
    %309 = arith.mulf %306, %308 : vector<8x8x8xf32>
    %310 = vector.shape_cast %284 : vector<64x8xf32> to vector<8x8x8xf32>
    %311 = vector.shape_cast %26 : vector<8x8xf32> to vector<1x8x8xf32>
    %312 = vector.broadcast %311 : vector<1x8x8xf32> to vector<8x8x8xf32>
    %313 = arith.mulf %310, %312 : vector<8x8x8xf32>
    %314 = arith.addf %309, %313 : vector<8x8x8xf32>
    %315 = vector.shape_cast %291 : vector<64x8xf32> to vector<8x8x8xf32>
    %316 = vector.shape_cast %25 : vector<8x8xf32> to vector<1x8x8xf32>
    %317 = vector.broadcast %316 : vector<1x8x8xf32> to vector<8x8x8xf32>
    %318 = arith.mulf %315, %317 : vector<8x8x8xf32>
    %319 = vector.shape_cast %298 : vector<64x8xf32> to vector<8x8x8xf32>
    %320 = vector.shape_cast %26 : vector<8x8xf32> to vector<1x8x8xf32>
    %321 = vector.broadcast %320 : vector<1x8x8xf32> to vector<8x8x8xf32>
    %322 = arith.mulf %319, %321 : vector<8x8x8xf32>
    %323 = arith.addf %318, %322 : vector<8x8x8xf32>
    %324 = vector.shape_cast %305 : vector<64x8xf32> to vector<8x8x8xf32>
    "tpu.trace_start"() <{level = 10 : i32, message = "rtd,rsd->rts"}> : () -> ()
    %cst_90 = arith.constant dense<0.000000e+00> : vector<8x8x8xf32>
    %325 = tpu.matmul %314, %323, %cst_90 {dimension_numbers = #tpu.dot_dimension_numbers<[2], [2], [1], [1], [0, 0, 0, 1, 1, 1], [0], [0]>} : vector<8x8x8xf32>, vector<8x8x8xf32>, vector<8x8x8xf32> -> vector<8x8x8xf32>
    "tpu.trace_stop"() : () -> ()
    %cst_91 = arith.constant 0.353553385 : f32
    %326 = vector.broadcast %cst_91 : f32 to vector<8x8x8xf32>
    %327 = arith.mulf %325, %326 : vector<8x8x8xf32>
    %cst_92 = arith.constant 0xFF800000 : f32
    %328 = vector.shape_cast %41 : vector<8x8xi1> to vector<1x8x8xi1>
    %329 = vector.broadcast %328 : vector<1x8x8xi1> to vector<8x8x8xi1>
    %330 = vector.broadcast %cst_92 : f32 to vector<8x8x8xf32>
    %331 = arith.select %329, %327, %330 : vector<8x8x8xi1>, vector<8x8x8xf32>
    %cst_93 = arith.constant dense<0xFF800000> : vector<8x8xf32>
    %332 = vector.multi_reduction <maximumf>, %331, %cst_93 [2] : vector<8x8x8xf32> to vector<8x8xf32>
    %333 = vector.shape_cast %332 : vector<8x8xf32> to vector<8x8x1xf32>
    %334 = vector.broadcast %333 : vector<8x8x1xf32> to vector<8x8x8xf32>
    %335 = arith.subf %331, %334 : vector<8x8x8xf32>
    %336 = math.exp %335 : vector<8x8x8xf32>
    %cst_94 = arith.constant dense<0.000000e+00> : vector<8x8xf32>
    %337 = vector.multi_reduction <add>, %336, %cst_94 [2] : vector<8x8x8xf32> to vector<8x8xf32>
    %338 = vector.shape_cast %337 : vector<8x8xf32> to vector<8x8x1xf32>
    %339 = vector.broadcast %338 : vector<8x8x1xf32> to vector<8x8x8xf32>
    %340 = arith.divf %336, %339 : vector<8x8x8xf32>
    "tpu.trace_start"() <{level = 10 : i32, message = "rts,rsd->rtd"}> : () -> ()
    %cst_95 = arith.constant dense<0.000000e+00> : vector<8x8x8xf32>
    %341 = tpu.matmul %340, %324, %cst_95 {dimension_numbers = #tpu.dot_dimension_numbers<[2], [1], [1], [2], [0, 0, 0, 1, 1, 2], [0], [0]>} : vector<8x8x8xf32>, vector<8x8x8xf32>, vector<8x8x8xf32> -> vector<8x8x8xf32>
    "tpu.trace_stop"() : () -> ()
    %342 = vector.shape_cast %341 : vector<8x8x8xf32> to vector<64x8xf32>
    %343 = vector.extract_strided_slice %37 {offsets = [3, 0, 0], sizes = [1, 8, 32], strides = [1, 1, 1]} : vector<4x8x32xf32> to vector<1x8x32xf32>
    %344 = vector.shape_cast %343 : vector<1x8x32xf32> to vector<8x32xf32>
    %cst_96 = arith.constant dense<0.000000e+00> : vector<64x32xf32>
    %345 = tpu.matmul %342, %344, %cst_96 {dimension_numbers = #tpu.dot_dimension_numbers<[1], [0], [0], [1], [0, 0, 1, 1], [], []>} : vector<64x8xf32>, vector<8x32xf32>, vector<64x32xf32> -> vector<64x32xf32>
    %346 = arith.addf %270, %345 : vector<64x32xf32>
    %347 = vector.broadcast %38 : vector<1x32xf32> to vector<64x32xf32>
    %348 = arith.addf %346, %347 : vector<64x32xf32>
    %349 = arith.addf %0, %348 : vector<64x32xf32>
    %c0_97 = arith.constant 0 : index
    %c0_98 = arith.constant 0 : index
    %350 = vector.load %arg17[%c0_97, %c0_98] : memref<1x32xf32, #tpu.memory_space<vmem>>, vector<1x32xf32>
    %c0_99 = arith.constant 0 : index
    %c0_100 = arith.constant 0 : index
    %351 = vector.load %arg18[%c0_99, %c0_100] : memref<1x32xf32, #tpu.memory_space<vmem>>, vector<1x32xf32>
    %cst_101 = arith.constant dense<0.000000e+00> : vector<64xf32>
    %352 = vector.multi_reduction <add>, %349, %cst_101 [1] : vector<64x32xf32> to vector<64xf32>
    %353 = vector.shape_cast %352 : vector<64xf32> to vector<64x1xf32>
    %cst_102 = arith.constant 3.200000e+01 : f32
    %354 = vector.broadcast %cst_102 : f32 to vector<64x1xf32>
    %355 = arith.divf %353, %354 : vector<64x1xf32>
    %356 = vector.broadcast %355 : vector<64x1xf32> to vector<64x32xf32>
    %357 = arith.subf %349, %356 : vector<64x32xf32>
    %358 = arith.mulf %357, %357 : vector<64x32xf32>
    %cst_103 = arith.constant dense<0.000000e+00> : vector<64xf32>
    %359 = vector.multi_reduction <add>, %358, %cst_103 [1] : vector<64x32xf32> to vector<64xf32>
    %360 = vector.shape_cast %359 : vector<64xf32> to vector<64x1xf32>
    %cst_104 = arith.constant 3.200000e+01 : f32
    %361 = vector.broadcast %cst_104 : f32 to vector<64x1xf32>
    %362 = arith.divf %360, %361 : vector<64x1xf32>
    %363 = vector.broadcast %355 : vector<64x1xf32> to vector<64x32xf32>
    %364 = arith.subf %349, %363 : vector<64x32xf32>
    %cst_105 = arith.constant 9.99999974E-6 : f32
    %365 = vector.broadcast %cst_105 : f32 to vector<64x1xf32>
    %366 = arith.addf %362, %365 : vector<64x1xf32>
    %367 = math.rsqrt %366 : vector<64x1xf32>
    %368 = vector.broadcast %367 : vector<64x1xf32> to vector<64x32xf32>
    %369 = arith.mulf %364, %368 : vector<64x32xf32>
    %370 = vector.broadcast %350 : vector<1x32xf32> to vector<64x32xf32>
    %371 = arith.mulf %369, %370 : vector<64x32xf32>
    %372 = vector.broadcast %351 : vector<1x32xf32> to vector<64x32xf32>
    %373 = arith.addf %371, %372 : vector<64x32xf32>
    %374 = vector.shape_cast %373 : vector<64x32xf32> to vector<16x4x32xf32>
    %cst_106 = arith.constant dense<0.000000e+00> : vector<16x32xf32>
    %375 = vector.multi_reduction <add>, %374, %cst_106 [1] : vector<16x4x32xf32> to vector<16x32xf32>
    %cst_107 = arith.constant 4.000000e+00 : f32
    %376 = vector.broadcast %cst_107 : f32 to vector<16x32xf32>
    %377 = arith.divf %375, %376 : vector<16x32xf32>
    %c0_108 = arith.constant 0 : index
    %c0_109 = arith.constant 0 : index
    %378 = vector.load %arg19[%c0_108, %c0_109] : memref<32x16xf32, #tpu.memory_space<vmem>>, vector<32x16xf32>
    %cst_110 = arith.constant dense<0.000000e+00> : vector<16x16xf32>
    %379 = tpu.matmul %377, %378, %cst_110 {dimension_numbers = #tpu.dot_dimension_numbers<[1], [0], [0], [1], [0, 0, 1, 1], [], []>} : vector<16x32xf32>, vector<32x16xf32>, vector<16x16xf32> -> vector<16x16xf32>
    %c0_111 = arith.constant 0 : index
    %c0_112 = arith.constant 0 : index
    %380 = vector.load %arg20[%c0_111, %c0_112] : memref<1x16xf32, #tpu.memory_space<vmem>>, vector<1x16xf32>
    %381 = vector.broadcast %380 : vector<1x16xf32> to vector<16x16xf32>
    %382 = arith.addf %379, %381 : vector<16x16xf32>
    %c0_113 = arith.constant 0 : index
    %c0_114 = arith.constant 0 : index
    %383 = vector.load %arg21[%c0_113, %c0_114] : memref<16x32xf32, #tpu.memory_space<vmem>>, vector<16x32xf32>
    %cst_115 = arith.constant dense<0.000000e+00> : vector<16x32xf32>
    %384 = tpu.matmul %382, %383, %cst_115 {dimension_numbers = #tpu.dot_dimension_numbers<[1], [0], [0], [1], [0, 0, 1, 1], [], []>} : vector<16x16xf32>, vector<16x32xf32>, vector<16x32xf32> -> vector<16x32xf32>
    %c0_116 = arith.constant 0 : index
    %c0_117 = arith.constant 0 : index
    %385 = vector.load %arg22[%c0_116, %c0_117] : memref<1x32xf32, #tpu.memory_space<vmem>>, vector<1x32xf32>
    %386 = vector.broadcast %385 : vector<1x32xf32> to vector<16x32xf32>
    %387 = arith.addf %384, %386 : vector<16x32xf32>
    %388 = vector.shape_cast %373 : vector<64x32xf32> to vector<16x4x32xf32>
    %389 = vector.shape_cast %387 : vector<16x32xf32> to vector<16x1x32xf32>
    %390 = vector.broadcast %389 : vector<16x1x32xf32> to vector<16x4x32xf32>
    %391 = arith.addf %388, %390 : vector<16x4x32xf32>
    %392 = vector.shape_cast %391 : vector<16x4x32xf32> to vector<64x32xf32>
    %c0_118 = arith.constant 0 : index
    %c0_119 = arith.constant 0 : index
    %393 = vector.load %arg23[%c0_118, %c0_119] : memref<1x32xf32, #tpu.memory_space<vmem>>, vector<1x32xf32>
    %c0_120 = arith.constant 0 : index
    %c0_121 = arith.constant 0 : index
    %394 = vector.load %arg24[%c0_120, %c0_121] : memref<1x32xf32, #tpu.memory_space<vmem>>, vector<1x32xf32>
    %cst_122 = arith.constant dense<0.000000e+00> : vector<64xf32>
    %395 = vector.multi_reduction <add>, %392, %cst_122 [1] : vector<64x32xf32> to vector<64xf32>
    %396 = vector.shape_cast %395 : vector<64xf32> to vector<64x1xf32>
    %cst_123 = arith.constant 3.200000e+01 : f32
    %397 = vector.broadcast %cst_123 : f32 to vector<64x1xf32>
    %398 = arith.divf %396, %397 : vector<64x1xf32>
    %399 = vector.broadcast %398 : vector<64x1xf32> to vector<64x32xf32>
    %400 = arith.subf %392, %399 : vector<64x32xf32>
    %401 = arith.mulf %400, %400 : vector<64x32xf32>
    %cst_124 = arith.constant dense<0.000000e+00> : vector<64xf32>
    %402 = vector.multi_reduction <add>, %401, %cst_124 [1] : vector<64x32xf32> to vector<64xf32>
    %403 = vector.shape_cast %402 : vector<64xf32> to vector<64x1xf32>
    %cst_125 = arith.constant 3.200000e+01 : f32
    %404 = vector.broadcast %cst_125 : f32 to vector<64x1xf32>
    %405 = arith.divf %403, %404 : vector<64x1xf32>
    %406 = vector.broadcast %398 : vector<64x1xf32> to vector<64x32xf32>
    %407 = arith.subf %392, %406 : vector<64x32xf32>
    %cst_126 = arith.constant 9.99999974E-6 : f32
    %408 = vector.broadcast %cst_126 : f32 to vector<64x1xf32>
    %409 = arith.addf %405, %408 : vector<64x1xf32>
    %410 = math.rsqrt %409 : vector<64x1xf32>
    %411 = vector.broadcast %410 : vector<64x1xf32> to vector<64x32xf32>
    %412 = arith.mulf %407, %411 : vector<64x32xf32>
    %413 = vector.broadcast %393 : vector<1x32xf32> to vector<64x32xf32>
    %414 = arith.mulf %412, %413 : vector<64x32xf32>
    %415 = vector.broadcast %394 : vector<1x32xf32> to vector<64x32xf32>
    %416 = arith.addf %414, %415 : vector<64x32xf32>
    %417 = arith.addf %349, %416 : vector<64x32xf32>
    %c0_127 = arith.constant 0 : index
    %c0_128 = arith.constant 0 : index
    %418 = vector.load %arg25[%c0_127, %c0_128] : memref<1x32xf32, #tpu.memory_space<vmem>>, vector<1x32xf32>
    %c0_129 = arith.constant 0 : index
    %c0_130 = arith.constant 0 : index
    %419 = vector.load %arg26[%c0_129, %c0_130] : memref<1x32xf32, #tpu.memory_space<vmem>>, vector<1x32xf32>
    %cst_131 = arith.constant dense<0.000000e+00> : vector<64xf32>
    %420 = vector.multi_reduction <add>, %417, %cst_131 [1] : vector<64x32xf32> to vector<64xf32>
    %421 = vector.shape_cast %420 : vector<64xf32> to vector<64x1xf32>
    %cst_132 = arith.constant 3.200000e+01 : f32
    %422 = vector.broadcast %cst_132 : f32 to vector<64x1xf32>
    %423 = arith.divf %421, %422 : vector<64x1xf32>
    %424 = vector.broadcast %423 : vector<64x1xf32> to vector<64x32xf32>
    %425 = arith.subf %417, %424 : vector<64x32xf32>
    %426 = arith.mulf %425, %425 : vector<64x32xf32>
    %cst_133 = arith.constant dense<0.000000e+00> : vector<64xf32>
    %427 = vector.multi_reduction <add>, %426, %cst_133 [1] : vector<64x32xf32> to vector<64xf32>
    %428 = vector.shape_cast %427 : vector<64xf32> to vector<64x1xf32>
    %cst_134 = arith.constant 3.200000e+01 : f32
    %429 = vector.broadcast %cst_134 : f32 to vector<64x1xf32>
    %430 = arith.divf %428, %429 : vector<64x1xf32>
    %431 = vector.broadcast %423 : vector<64x1xf32> to vector<64x32xf32>
    %432 = arith.subf %417, %431 : vector<64x32xf32>
    %cst_135 = arith.constant 9.99999974E-6 : f32
    %433 = vector.broadcast %cst_135 : f32 to vector<64x1xf32>
    %434 = arith.addf %430, %433 : vector<64x1xf32>
    %435 = math.rsqrt %434 : vector<64x1xf32>
    %436 = vector.broadcast %435 : vector<64x1xf32> to vector<64x32xf32>
    %437 = arith.mulf %432, %436 : vector<64x32xf32>
    %438 = vector.broadcast %418 : vector<1x32xf32> to vector<64x32xf32>
    %439 = arith.mulf %437, %438 : vector<64x32xf32>
    %440 = vector.broadcast %419 : vector<1x32xf32> to vector<64x32xf32>
    %441 = arith.addf %439, %440 : vector<64x32xf32>
    %c0_136 = arith.constant 0 : index
    %c0_137 = arith.constant 0 : index
    %442 = vector.load %arg27[%c0_136, %c0_137] : memref<32x128xf32, #tpu.memory_space<vmem>>, vector<32x128xf32>
    %c0_138 = arith.constant 0 : index
    %c0_139 = arith.constant 0 : index
    %443 = vector.load %arg28[%c0_138, %c0_139] : memref<1x128xf32, #tpu.memory_space<vmem>>, vector<1x128xf32>
    %c0_140 = arith.constant 0 : index
    %c0_141 = arith.constant 0 : index
    %444 = vector.load %arg29[%c0_140, %c0_141] : memref<128x32xf32, #tpu.memory_space<vmem>>, vector<128x32xf32>
    %c0_142 = arith.constant 0 : index
    %c0_143 = arith.constant 0 : index
    %445 = vector.load %arg30[%c0_142, %c0_143] : memref<1x32xf32, #tpu.memory_space<vmem>>, vector<1x32xf32>
    %cst_144 = arith.constant dense<0.000000e+00> : vector<64x128xf32>
    %446 = tpu.matmul %441, %442, %cst_144 {dimension_numbers = #tpu.dot_dimension_numbers<[1], [0], [0], [1], [0, 0, 1, 1], [], []>} : vector<64x32xf32>, vector<32x128xf32>, vector<64x128xf32> -> vector<64x128xf32>
    %447 = vector.broadcast %443 : vector<1x128xf32> to vector<64x128xf32>
    %448 = arith.addf %446, %447 : vector<64x128xf32>
    %cst_145 = arith.constant 5.000000e-01 : f32
    %449 = vector.broadcast %cst_145 : f32 to vector<64x128xf32>
    %450 = arith.mulf %449, %448 : vector<64x128xf32>
    %cst_146 = arith.constant 4.471500e-02 : f32
    %451 = vector.broadcast %cst_146 : f32 to vector<64x128xf32>
    %452 = arith.mulf %451, %448 : vector<64x128xf32>
    %453 = arith.mulf %452, %448 : vector<64x128xf32>
    %454 = arith.mulf %453, %448 : vector<64x128xf32>
    %455 = arith.addf %448, %454 : vector<64x128xf32>
    %cst_147 = arith.constant 0.797884583 : f32
    %456 = vector.broadcast %cst_147 : f32 to vector<64x128xf32>
    %457 = arith.mulf %456, %455 : vector<64x128xf32>
    %458 = math.tanh %457 : vector<64x128xf32>
    %cst_148 = arith.constant 1.000000e+00 : f32
    %459 = vector.broadcast %cst_148 : f32 to vector<64x128xf32>
    %460 = arith.addf %459, %458 : vector<64x128xf32>
    %461 = arith.mulf %450, %460 : vector<64x128xf32>
    %cst_149 = arith.constant dense<0.000000e+00> : vector<64x32xf32>
    %462 = tpu.matmul %461, %444, %cst_149 {dimension_numbers = #tpu.dot_dimension_numbers<[1], [0], [0], [1], [0, 0, 1, 1], [], []>} : vector<64x128xf32>, vector<128x32xf32>, vector<64x32xf32> -> vector<64x32xf32>
    %463 = vector.broadcast %445 : vector<1x32xf32> to vector<64x32xf32>
    %464 = arith.addf %462, %463 : vector<64x32xf32>
    %465 = arith.addf %417, %464 : vector<64x32xf32>
    %c0_150 = arith.constant 0 : index
    %c0_151 = arith.constant 0 : index
    %466 = vector.load %arg31[%c0_150, %c0_151] : memref<64x32xf32, #tpu.memory_space<vmem>>, vector<64x32xf32>
    tpu.vector_store %arg31[%c0_150, %c0_151], %465 {strides = array<i32>} : memref<64x32xf32, #tpu.memory_space<vmem>>, vector<64x32xf32>,
    return
  }
}

module attributes {stable_mosaic.version = 11 : i64} {
  func.func @_block_kernel(%arg0: memref<64x32xf32, #tpu.memory_space<vmem>>, %arg1: memref<8x8xf32, #tpu.memory_space<vmem>>, %arg2: memref<8x8xf32, #tpu.memory_space<vmem>>, %arg3: memref<1x32xf32, #tpu.memory_space<vmem>>, %arg4: memref<1x32xf32, #tpu.memory_space<vmem>>, %arg5: memref<4x32x8xf32, #tpu.memory_space<vmem>>, %arg6: memref<4x1x8xf32, #tpu.memory_space<vmem>>, %arg7: memref<4x32x8xf32, #tpu.memory_space<vmem>>, %arg8: memref<4x1x8xf32, #tpu.memory_space<vmem>>, %arg9: memref<4x32x8xf32, #tpu.memory_space<vmem>>, %arg10: memref<4x1x8xf32, #tpu.memory_space<vmem>>, %arg11: memref<4x32x8xf32, #tpu.memory_space<vmem>>, %arg12: memref<4x1x8xf32, #tpu.memory_space<vmem>>, %arg13: memref<4x32x8xf32, #tpu.memory_space<vmem>>, %arg14: memref<4x1x8xf32, #tpu.memory_space<vmem>>, %arg15: memref<4x8x32xf32, #tpu.memory_space<vmem>>, %arg16: memref<1x32xf32, #tpu.memory_space<vmem>>, %arg17: memref<1x32xf32, #tpu.memory_space<vmem>>, %arg18: memref<1x32xf32, #tpu.memory_space<vmem>>, %arg19: memref<32x128xf32, #tpu.memory_space<vmem>>, %arg20: memref<1x128xf32, #tpu.memory_space<vmem>>, %arg21: memref<128x32xf32, #tpu.memory_space<vmem>>, %arg22: memref<1x32xf32, #tpu.memory_space<vmem>>, %arg23: memref<64x32xf32, #tpu.memory_space<vmem>>) attributes {dimension_semantics = [], scalar_prefetch = 0 : i64, scratch_operands = 0 : i64, tpu.core_type = #tpu.core_type<tc>} {
    %c0 = arith.constant 0 : index
    %c0_0 = arith.constant 0 : index
    %0 = vector.load %arg0[%c0, %c0_0] : memref<64x32xf32, #tpu.memory_space<vmem>>, vector<64x32xf32>
    %c0_1 = arith.constant 0 : index
    %c0_2 = arith.constant 0 : index
    %1 = vector.load %arg3[%c0_1, %c0_2] : memref<1x32xf32, #tpu.memory_space<vmem>>, vector<1x32xf32>
    %c0_3 = arith.constant 0 : index
    %c0_4 = arith.constant 0 : index
    %2 = vector.load %arg4[%c0_3, %c0_4] : memref<1x32xf32, #tpu.memory_space<vmem>>, vector<1x32xf32>
    %cst = arith.constant dense<0.000000e+00> : vector<64xf32>
    %3 = vector.multi_reduction <add>, %0, %cst [1] : vector<64x32xf32> to vector<64xf32>
    %4 = vector.shape_cast %3 : vector<64xf32> to vector<64x1xf32>
    %cst_5 = arith.constant 3.200000e+01 : f32
    %5 = vector.broadcast %cst_5 : f32 to vector<64x1xf32>
    %6 = arith.divf %4, %5 : vector<64x1xf32>
    %7 = vector.broadcast %6 : vector<64x1xf32> to vector<64x32xf32>
    %8 = arith.subf %0, %7 : vector<64x32xf32>
    %9 = arith.mulf %8, %8 : vector<64x32xf32>
    %cst_6 = arith.constant dense<0.000000e+00> : vector<64xf32>
    %10 = vector.multi_reduction <add>, %9, %cst_6 [1] : vector<64x32xf32> to vector<64xf32>
    %11 = vector.shape_cast %10 : vector<64xf32> to vector<64x1xf32>
    %cst_7 = arith.constant 3.200000e+01 : f32
    %12 = vector.broadcast %cst_7 : f32 to vector<64x1xf32>
    %13 = arith.divf %11, %12 : vector<64x1xf32>
    %14 = vector.broadcast %6 : vector<64x1xf32> to vector<64x32xf32>
    %15 = arith.subf %0, %14 : vector<64x32xf32>
    %cst_8 = arith.constant 9.99999974E-6 : f32
    %16 = vector.broadcast %cst_8 : f32 to vector<64x1xf32>
    %17 = arith.addf %13, %16 : vector<64x1xf32>
    %18 = math.rsqrt %17 : vector<64x1xf32>
    %19 = vector.broadcast %18 : vector<64x1xf32> to vector<64x32xf32>
    %20 = arith.mulf %15, %19 : vector<64x32xf32>
    %21 = vector.broadcast %1 : vector<1x32xf32> to vector<64x32xf32>
    %22 = arith.mulf %20, %21 : vector<64x32xf32>
    %23 = vector.broadcast %2 : vector<1x32xf32> to vector<64x32xf32>
    %24 = arith.addf %22, %23 : vector<64x32xf32>
    %c0_9 = arith.constant 0 : index
    %c0_10 = arith.constant 0 : index
    %25 = vector.load %arg1[%c0_9, %c0_10] : memref<8x8xf32, #tpu.memory_space<vmem>>, vector<8x8xf32>
    %c0_11 = arith.constant 0 : index
    %c0_12 = arith.constant 0 : index
    %26 = vector.load %arg2[%c0_11, %c0_12] : memref<8x8xf32, #tpu.memory_space<vmem>>, vector<8x8xf32>
    %c0_13 = arith.constant 0 : index
    %c0_14 = arith.constant 0 : index
    %c0_15 = arith.constant 0 : index
    %27 = vector.load %arg5[%c0_13, %c0_14, %c0_15] : memref<4x32x8xf32, #tpu.memory_space<vmem>>, vector<4x32x8xf32>
    %c0_16 = arith.constant 0 : index
    %c0_17 = arith.constant 0 : index
    %c0_18 = arith.constant 0 : index
    %28 = vector.load %arg6[%c0_16, %c0_17, %c0_18] : memref<4x1x8xf32, #tpu.memory_space<vmem>>, vector<4x1x8xf32>
    %c0_19 = arith.constant 0 : index
    %c0_20 = arith.constant 0 : index
    %c0_21 = arith.constant 0 : index
    %29 = vector.load %arg7[%c0_19, %c0_20, %c0_21] : memref<4x32x8xf32, #tpu.memory_space<vmem>>, vector<4x32x8xf32>
    %c0_22 = arith.constant 0 : index
    %c0_23 = arith.constant 0 : index
    %c0_24 = arith.constant 0 : index
    %30 = vector.load %arg8[%c0_22, %c0_23, %c0_24] : memref<4x1x8xf32, #tpu.memory_space<vmem>>, vector<4x1x8xf32>
    %c0_25 = arith.constant 0 : index
    %c0_26 = arith.constant 0 : index
    %c0_27 = arith.constant 0 : index
    %31 = vector.load %arg9[%c0_25, %c0_26, %c0_27] : memref<4x32x8xf32, #tpu.memory_space<vmem>>, vector<4x32x8xf32>
    %c0_28 = arith.constant 0 : index
    %c0_29 = arith.constant 0 : index
    %c0_30 = arith.constant 0 : index
    %32 = vector.load %arg10[%c0_28, %c0_29, %c0_30] : memref<4x1x8xf32, #tpu.memory_space<vmem>>, vector<4x1x8xf32>
    %c0_31 = arith.constant 0 : index
    %c0_32 = arith.constant 0 : index
    %c0_33 = arith.constant 0 : index
    %33 = vector.load %arg11[%c0_31, %c0_32, %c0_33] : memref<4x32x8xf32, #tpu.memory_space<vmem>>, vector<4x32x8xf32>
    %c0_34 = arith.constant 0 : index
    %c0_35 = arith.constant 0 : index
    %c0_36 = arith.constant 0 : index
    %34 = vector.load %arg12[%c0_34, %c0_35, %c0_36] : memref<4x1x8xf32, #tpu.memory_space<vmem>>, vector<4x1x8xf32>
    %c0_37 = arith.constant 0 : index
    %c0_38 = arith.constant 0 : index
    %c0_39 = arith.constant 0 : index
    %35 = vector.load %arg13[%c0_37, %c0_38, %c0_39] : memref<4x32x8xf32, #tpu.memory_space<vmem>>, vector<4x32x8xf32>
    %c0_40 = arith.constant 0 : index
    %c0_41 = arith.constant 0 : index
    %c0_42 = arith.constant 0 : index
    %36 = vector.load %arg14[%c0_40, %c0_41, %c0_42] : memref<4x1x8xf32, #tpu.memory_space<vmem>>, vector<4x1x8xf32>
    %c0_43 = arith.constant 0 : index
    %c0_44 = arith.constant 0 : index
    %c0_45 = arith.constant 0 : index
    %37 = vector.load %arg15[%c0_43, %c0_44, %c0_45] : memref<4x8x32xf32, #tpu.memory_space<vmem>>, vector<4x8x32xf32>
    %c0_46 = arith.constant 0 : index
    %c0_47 = arith.constant 0 : index
    %38 = vector.load %arg16[%c0_46, %c0_47] : memref<1x32xf32, #tpu.memory_space<vmem>>, vector<1x32xf32>
    %39 = tpu.iota {dimensions = array<i32: 0>} : vector<8x8xi32>
    %40 = tpu.iota {dimensions = array<i32: 1>} : vector<8x8xi32>
    %41 = arith.cmpi sle, %40, %39 : vector<8x8xi32>
    %cst_48 = arith.constant 0.000000e+00 : f32
    %42 = vector.broadcast %cst_48 : f32 to vector<64x32xf32>
    %43 = vector.extract_strided_slice %27 {offsets = [0, 0, 0], sizes = [1, 32, 8], strides = [1, 1, 1]} : vector<4x32x8xf32> to vector<1x32x8xf32>
    %44 = vector.shape_cast %43 : vector<1x32x8xf32> to vector<32x8xf32>
    %cst_49 = arith.constant dense<0.000000e+00> : vector<64x8xf32>
    %45 = tpu.matmul %24, %44, %cst_49 {dimension_numbers = #tpu.dot_dimension_numbers<[1], [0], [0], [1], [0, 0, 1, 1], [], []>} : vector<64x32xf32>, vector<32x8xf32>, vector<64x8xf32> -> vector<64x8xf32>
    %46 = vector.extract_strided_slice %28 {offsets = [0, 0, 0], sizes = [1, 1, 8], strides = [1, 1, 1]} : vector<4x1x8xf32> to vector<1x1x8xf32>
    %47 = vector.shape_cast %46 : vector<1x1x8xf32> to vector<1x8xf32>
    %48 = vector.broadcast %47 : vector<1x8xf32> to vector<64x8xf32>
    %49 = arith.addf %45, %48 : vector<64x8xf32>
    %50 = vector.extract_strided_slice %29 {offsets = [0, 0, 0], sizes = [1, 32, 8], strides = [1, 1, 1]} : vector<4x32x8xf32> to vector<1x32x8xf32>
    %51 = vector.shape_cast %50 : vector<1x32x8xf32> to vector<32x8xf32>
    %cst_50 = arith.constant dense<0.000000e+00> : vector<64x8xf32>
    %52 = tpu.matmul %24, %51, %cst_50 {dimension_numbers = #tpu.dot_dimension_numbers<[1], [0], [0], [1], [0, 0, 1, 1], [], []>} : vector<64x32xf32>, vector<32x8xf32>, vector<64x8xf32> -> vector<64x8xf32>
    %53 = vector.extract_strided_slice %30 {offsets = [0, 0, 0], sizes = [1, 1, 8], strides = [1, 1, 1]} : vector<4x1x8xf32> to vector<1x1x8xf32>
    %54 = vector.shape_cast %53 : vector<1x1x8xf32> to vector<1x8xf32>
    %55 = vector.broadcast %54 : vector<1x8xf32> to vector<64x8xf32>
    %56 = arith.addf %52, %55 : vector<64x8xf32>
    %57 = vector.extract_strided_slice %31 {offsets = [0, 0, 0], sizes = [1, 32, 8], strides = [1, 1, 1]} : vector<4x32x8xf32> to vector<1x32x8xf32>
    %58 = vector.shape_cast %57 : vector<1x32x8xf32> to vector<32x8xf32>
    %cst_51 = arith.constant dense<0.000000e+00> : vector<64x8xf32>
    %59 = tpu.matmul %24, %58, %cst_51 {dimension_numbers = #tpu.dot_dimension_numbers<[1], [0], [0], [1], [0, 0, 1, 1], [], []>} : vector<64x32xf32>, vector<32x8xf32>, vector<64x8xf32> -> vector<64x8xf32>
    %60 = vector.extract_strided_slice %32 {offsets = [0, 0, 0], sizes = [1, 1, 8], strides = [1, 1, 1]} : vector<4x1x8xf32> to vector<1x1x8xf32>
    %61 = vector.shape_cast %60 : vector<1x1x8xf32> to vector<1x8xf32>
    %62 = vector.broadcast %61 : vector<1x8xf32> to vector<64x8xf32>
    %63 = arith.addf %59, %62 : vector<64x8xf32>
    %64 = vector.extract_strided_slice %33 {offsets = [0, 0, 0], sizes = [1, 32, 8], strides = [1, 1, 1]} : vector<4x32x8xf32> to vector<1x32x8xf32>
    %65 = vector.shape_cast %64 : vector<1x32x8xf32> to vector<32x8xf32>
    %cst_52 = arith.constant dense<0.000000e+00> : vector<64x8xf32>
    %66 = tpu.matmul %24, %65, %cst_52 {dimension_numbers = #tpu.dot_dimension_numbers<[1], [0], [0], [1], [0, 0, 1, 1], [], []>} : vector<64x32xf32>, vector<32x8xf32>, vector<64x8xf32> -> vector<64x8xf32>
    %67 = vector.extract_strided_slice %34 {offsets = [0, 0, 0], sizes = [1, 1, 8], strides = [1, 1, 1]} : vector<4x1x8xf32> to vector<1x1x8xf32>
    %68 = vector.shape_cast %67 : vector<1x1x8xf32> to vector<1x8xf32>
    %69 = vector.broadcast %68 : vector<1x8xf32> to vector<64x8xf32>
    %70 = arith.addf %66, %69 : vector<64x8xf32>
    %71 = vector.extract_strided_slice %35 {offsets = [0, 0, 0], sizes = [1, 32, 8], strides = [1, 1, 1]} : vector<4x32x8xf32> to vector<1x32x8xf32>
    %72 = vector.shape_cast %71 : vector<1x32x8xf32> to vector<32x8xf32>
    %cst_53 = arith.constant dense<0.000000e+00> : vector<64x8xf32>
    %73 = tpu.matmul %24, %72, %cst_53 {dimension_numbers = #tpu.dot_dimension_numbers<[1], [0], [0], [1], [0, 0, 1, 1], [], []>} : vector<64x32xf32>, vector<32x8xf32>, vector<64x8xf32> -> vector<64x8xf32>
    %74 = vector.extract_strided_slice %36 {offsets = [0, 0, 0], sizes = [1, 1, 8], strides = [1, 1, 1]} : vector<4x1x8xf32> to vector<1x1x8xf32>
    %75 = vector.shape_cast %74 : vector<1x1x8xf32> to vector<1x8xf32>
    %76 = vector.broadcast %75 : vector<1x8xf32> to vector<64x8xf32>
    %77 = arith.addf %73, %76 : vector<64x8xf32>
    %78 = vector.shape_cast %49 : vector<64x8xf32> to vector<8x8x8xf32>
    %79 = vector.shape_cast %25 : vector<8x8xf32> to vector<1x8x8xf32>
    %80 = vector.broadcast %79 : vector<1x8x8xf32> to vector<8x8x8xf32>
    %81 = arith.mulf %78, %80 : vector<8x8x8xf32>
    %82 = vector.shape_cast %56 : vector<64x8xf32> to vector<8x8x8xf32>
    %83 = vector.shape_cast %26 : vector<8x8xf32> to vector<1x8x8xf32>
    %84 = vector.broadcast %83 : vector<1x8x8xf32> to vector<8x8x8xf32>
    %85 = arith.mulf %82, %84 : vector<8x8x8xf32>
    %86 = arith.addf %81, %85 : vector<8x8x8xf32>
    %87 = vector.shape_cast %63 : vector<64x8xf32> to vector<8x8x8xf32>
    %88 = vector.shape_cast %25 : vector<8x8xf32> to vector<1x8x8xf32>
    %89 = vector.broadcast %88 : vector<1x8x8xf32> to vector<8x8x8xf32>
    %90 = arith.mulf %87, %89 : vector<8x8x8xf32>
    %91 = vector.shape_cast %70 : vector<64x8xf32> to vector<8x8x8xf32>
    %92 = vector.shape_cast %26 : vector<8x8xf32> to vector<1x8x8xf32>
    %93 = vector.broadcast %92 : vector<1x8x8xf32> to vector<8x8x8xf32>
    %94 = arith.mulf %91, %93 : vector<8x8x8xf32>
    %95 = arith.addf %90, %94 : vector<8x8x8xf32>
    %96 = vector.shape_cast %77 : vector<64x8xf32> to vector<8x8x8xf32>
    "tpu.trace_start"() <{level = 10 : i32, message = "rtd,rsd->rts"}> : () -> ()
    %cst_54 = arith.constant dense<0.000000e+00> : vector<8x8x8xf32>
    %97 = tpu.matmul %86, %95, %cst_54 {dimension_numbers = #tpu.dot_dimension_numbers<[2], [2], [1], [1], [0, 0, 0, 1, 1, 1], [0], [0]>} : vector<8x8x8xf32>, vector<8x8x8xf32>, vector<8x8x8xf32> -> vector<8x8x8xf32>
    "tpu.trace_stop"() : () -> ()
    %cst_55 = arith.constant 0.353553385 : f32
    %98 = vector.broadcast %cst_55 : f32 to vector<8x8x8xf32>
    %99 = arith.mulf %97, %98 : vector<8x8x8xf32>
    %cst_56 = arith.constant 0xFF800000 : f32
    %100 = vector.shape_cast %41 : vector<8x8xi1> to vector<1x8x8xi1>
    %101 = vector.broadcast %100 : vector<1x8x8xi1> to vector<8x8x8xi1>
    %102 = vector.broadcast %cst_56 : f32 to vector<8x8x8xf32>
    %103 = arith.select %101, %99, %102 : vector<8x8x8xi1>, vector<8x8x8xf32>
    %cst_57 = arith.constant dense<0xFF800000> : vector<8x8xf32>
    %104 = vector.multi_reduction <maximumf>, %103, %cst_57 [2] : vector<8x8x8xf32> to vector<8x8xf32>
    %105 = vector.shape_cast %104 : vector<8x8xf32> to vector<8x8x1xf32>
    %106 = vector.broadcast %105 : vector<8x8x1xf32> to vector<8x8x8xf32>
    %107 = arith.subf %103, %106 : vector<8x8x8xf32>
    %108 = math.exp %107 : vector<8x8x8xf32>
    %cst_58 = arith.constant dense<0.000000e+00> : vector<8x8xf32>
    %109 = vector.multi_reduction <add>, %108, %cst_58 [2] : vector<8x8x8xf32> to vector<8x8xf32>
    %110 = vector.shape_cast %109 : vector<8x8xf32> to vector<8x8x1xf32>
    %111 = vector.broadcast %110 : vector<8x8x1xf32> to vector<8x8x8xf32>
    %112 = arith.divf %108, %111 : vector<8x8x8xf32>
    "tpu.trace_start"() <{level = 10 : i32, message = "rts,rsd->rtd"}> : () -> ()
    %cst_59 = arith.constant dense<0.000000e+00> : vector<8x8x8xf32>
    %113 = tpu.matmul %112, %96, %cst_59 {dimension_numbers = #tpu.dot_dimension_numbers<[2], [1], [1], [2], [0, 0, 0, 1, 1, 2], [0], [0]>} : vector<8x8x8xf32>, vector<8x8x8xf32>, vector<8x8x8xf32> -> vector<8x8x8xf32>
    "tpu.trace_stop"() : () -> ()
    %114 = vector.shape_cast %113 : vector<8x8x8xf32> to vector<64x8xf32>
    %115 = vector.extract_strided_slice %37 {offsets = [0, 0, 0], sizes = [1, 8, 32], strides = [1, 1, 1]} : vector<4x8x32xf32> to vector<1x8x32xf32>
    %116 = vector.shape_cast %115 : vector<1x8x32xf32> to vector<8x32xf32>
    %cst_60 = arith.constant dense<0.000000e+00> : vector<64x32xf32>
    %117 = tpu.matmul %114, %116, %cst_60 {dimension_numbers = #tpu.dot_dimension_numbers<[1], [0], [0], [1], [0, 0, 1, 1], [], []>} : vector<64x8xf32>, vector<8x32xf32>, vector<64x32xf32> -> vector<64x32xf32>
    %118 = arith.addf %42, %117 : vector<64x32xf32>
    %119 = vector.extract_strided_slice %27 {offsets = [1, 0, 0], sizes = [1, 32, 8], strides = [1, 1, 1]} : vector<4x32x8xf32> to vector<1x32x8xf32>
    %120 = vector.shape_cast %119 : vector<1x32x8xf32> to vector<32x8xf32>
    %cst_61 = arith.constant dense<0.000000e+00> : vector<64x8xf32>
    %121 = tpu.matmul %24, %120, %cst_61 {dimension_numbers = #tpu.dot_dimension_numbers<[1], [0], [0], [1], [0, 0, 1, 1], [], []>} : vector<64x32xf32>, vector<32x8xf32>, vector<64x8xf32> -> vector<64x8xf32>
    %122 = vector.extract_strided_slice %28 {offsets = [1, 0, 0], sizes = [1, 1, 8], strides = [1, 1, 1]} : vector<4x1x8xf32> to vector<1x1x8xf32>
    %123 = vector.shape_cast %122 : vector<1x1x8xf32> to vector<1x8xf32>
    %124 = vector.broadcast %123 : vector<1x8xf32> to vector<64x8xf32>
    %125 = arith.addf %121, %124 : vector<64x8xf32>
    %126 = vector.extract_strided_slice %29 {offsets = [1, 0, 0], sizes = [1, 32, 8], strides = [1, 1, 1]} : vector<4x32x8xf32> to vector<1x32x8xf32>
    %127 = vector.shape_cast %126 : vector<1x32x8xf32> to vector<32x8xf32>
    %cst_62 = arith.constant dense<0.000000e+00> : vector<64x8xf32>
    %128 = tpu.matmul %24, %127, %cst_62 {dimension_numbers = #tpu.dot_dimension_numbers<[1], [0], [0], [1], [0, 0, 1, 1], [], []>} : vector<64x32xf32>, vector<32x8xf32>, vector<64x8xf32> -> vector<64x8xf32>
    %129 = vector.extract_strided_slice %30 {offsets = [1, 0, 0], sizes = [1, 1, 8], strides = [1, 1, 1]} : vector<4x1x8xf32> to vector<1x1x8xf32>
    %130 = vector.shape_cast %129 : vector<1x1x8xf32> to vector<1x8xf32>
    %131 = vector.broadcast %130 : vector<1x8xf32> to vector<64x8xf32>
    %132 = arith.addf %128, %131 : vector<64x8xf32>
    %133 = vector.extract_strided_slice %31 {offsets = [1, 0, 0], sizes = [1, 32, 8], strides = [1, 1, 1]} : vector<4x32x8xf32> to vector<1x32x8xf32>
    %134 = vector.shape_cast %133 : vector<1x32x8xf32> to vector<32x8xf32>
    %cst_63 = arith.constant dense<0.000000e+00> : vector<64x8xf32>
    %135 = tpu.matmul %24, %134, %cst_63 {dimension_numbers = #tpu.dot_dimension_numbers<[1], [0], [0], [1], [0, 0, 1, 1], [], []>} : vector<64x32xf32>, vector<32x8xf32>, vector<64x8xf32> -> vector<64x8xf32>
    %136 = vector.extract_strided_slice %32 {offsets = [1, 0, 0], sizes = [1, 1, 8], strides = [1, 1, 1]} : vector<4x1x8xf32> to vector<1x1x8xf32>
    %137 = vector.shape_cast %136 : vector<1x1x8xf32> to vector<1x8xf32>
    %138 = vector.broadcast %137 : vector<1x8xf32> to vector<64x8xf32>
    %139 = arith.addf %135, %138 : vector<64x8xf32>
    %140 = vector.extract_strided_slice %33 {offsets = [1, 0, 0], sizes = [1, 32, 8], strides = [1, 1, 1]} : vector<4x32x8xf32> to vector<1x32x8xf32>
    %141 = vector.shape_cast %140 : vector<1x32x8xf32> to vector<32x8xf32>
    %cst_64 = arith.constant dense<0.000000e+00> : vector<64x8xf32>
    %142 = tpu.matmul %24, %141, %cst_64 {dimension_numbers = #tpu.dot_dimension_numbers<[1], [0], [0], [1], [0, 0, 1, 1], [], []>} : vector<64x32xf32>, vector<32x8xf32>, vector<64x8xf32> -> vector<64x8xf32>
    %143 = vector.extract_strided_slice %34 {offsets = [1, 0, 0], sizes = [1, 1, 8], strides = [1, 1, 1]} : vector<4x1x8xf32> to vector<1x1x8xf32>
    %144 = vector.shape_cast %143 : vector<1x1x8xf32> to vector<1x8xf32>
    %145 = vector.broadcast %144 : vector<1x8xf32> to vector<64x8xf32>
    %146 = arith.addf %142, %145 : vector<64x8xf32>
    %147 = vector.extract_strided_slice %35 {offsets = [1, 0, 0], sizes = [1, 32, 8], strides = [1, 1, 1]} : vector<4x32x8xf32> to vector<1x32x8xf32>
    %148 = vector.shape_cast %147 : vector<1x32x8xf32> to vector<32x8xf32>
    %cst_65 = arith.constant dense<0.000000e+00> : vector<64x8xf32>
    %149 = tpu.matmul %24, %148, %cst_65 {dimension_numbers = #tpu.dot_dimension_numbers<[1], [0], [0], [1], [0, 0, 1, 1], [], []>} : vector<64x32xf32>, vector<32x8xf32>, vector<64x8xf32> -> vector<64x8xf32>
    %150 = vector.extract_strided_slice %36 {offsets = [1, 0, 0], sizes = [1, 1, 8], strides = [1, 1, 1]} : vector<4x1x8xf32> to vector<1x1x8xf32>
    %151 = vector.shape_cast %150 : vector<1x1x8xf32> to vector<1x8xf32>
    %152 = vector.broadcast %151 : vector<1x8xf32> to vector<64x8xf32>
    %153 = arith.addf %149, %152 : vector<64x8xf32>
    %154 = vector.shape_cast %125 : vector<64x8xf32> to vector<8x8x8xf32>
    %155 = vector.shape_cast %25 : vector<8x8xf32> to vector<1x8x8xf32>
    %156 = vector.broadcast %155 : vector<1x8x8xf32> to vector<8x8x8xf32>
    %157 = arith.mulf %154, %156 : vector<8x8x8xf32>
    %158 = vector.shape_cast %132 : vector<64x8xf32> to vector<8x8x8xf32>
    %159 = vector.shape_cast %26 : vector<8x8xf32> to vector<1x8x8xf32>
    %160 = vector.broadcast %159 : vector<1x8x8xf32> to vector<8x8x8xf32>
    %161 = arith.mulf %158, %160 : vector<8x8x8xf32>
    %162 = arith.addf %157, %161 : vector<8x8x8xf32>
    %163 = vector.shape_cast %139 : vector<64x8xf32> to vector<8x8x8xf32>
    %164 = vector.shape_cast %25 : vector<8x8xf32> to vector<1x8x8xf32>
    %165 = vector.broadcast %164 : vector<1x8x8xf32> to vector<8x8x8xf32>
    %166 = arith.mulf %163, %165 : vector<8x8x8xf32>
    %167 = vector.shape_cast %146 : vector<64x8xf32> to vector<8x8x8xf32>
    %168 = vector.shape_cast %26 : vector<8x8xf32> to vector<1x8x8xf32>
    %169 = vector.broadcast %168 : vector<1x8x8xf32> to vector<8x8x8xf32>
    %170 = arith.mulf %167, %169 : vector<8x8x8xf32>
    %171 = arith.addf %166, %170 : vector<8x8x8xf32>
    %172 = vector.shape_cast %153 : vector<64x8xf32> to vector<8x8x8xf32>
    "tpu.trace_start"() <{level = 10 : i32, message = "rtd,rsd->rts"}> : () -> ()
    %cst_66 = arith.constant dense<0.000000e+00> : vector<8x8x8xf32>
    %173 = tpu.matmul %162, %171, %cst_66 {dimension_numbers = #tpu.dot_dimension_numbers<[2], [2], [1], [1], [0, 0, 0, 1, 1, 1], [0], [0]>} : vector<8x8x8xf32>, vector<8x8x8xf32>, vector<8x8x8xf32> -> vector<8x8x8xf32>
    "tpu.trace_stop"() : () -> ()
    %cst_67 = arith.constant 0.353553385 : f32
    %174 = vector.broadcast %cst_67 : f32 to vector<8x8x8xf32>
    %175 = arith.mulf %173, %174 : vector<8x8x8xf32>
    %cst_68 = arith.constant 0xFF800000 : f32
    %176 = vector.shape_cast %41 : vector<8x8xi1> to vector<1x8x8xi1>
    %177 = vector.broadcast %176 : vector<1x8x8xi1> to vector<8x8x8xi1>
    %178 = vector.broadcast %cst_68 : f32 to vector<8x8x8xf32>
    %179 = arith.select %177, %175, %178 : vector<8x8x8xi1>, vector<8x8x8xf32>
    %cst_69 = arith.constant dense<0xFF800000> : vector<8x8xf32>
    %180 = vector.multi_reduction <maximumf>, %179, %cst_69 [2] : vector<8x8x8xf32> to vector<8x8xf32>
    %181 = vector.shape_cast %180 : vector<8x8xf32> to vector<8x8x1xf32>
    %182 = vector.broadcast %181 : vector<8x8x1xf32> to vector<8x8x8xf32>
    %183 = arith.subf %179, %182 : vector<8x8x8xf32>
    %184 = math.exp %183 : vector<8x8x8xf32>
    %cst_70 = arith.constant dense<0.000000e+00> : vector<8x8xf32>
    %185 = vector.multi_reduction <add>, %184, %cst_70 [2] : vector<8x8x8xf32> to vector<8x8xf32>
    %186 = vector.shape_cast %185 : vector<8x8xf32> to vector<8x8x1xf32>
    %187 = vector.broadcast %186 : vector<8x8x1xf32> to vector<8x8x8xf32>
    %188 = arith.divf %184, %187 : vector<8x8x8xf32>
    "tpu.trace_start"() <{level = 10 : i32, message = "rts,rsd->rtd"}> : () -> ()
    %cst_71 = arith.constant dense<0.000000e+00> : vector<8x8x8xf32>
    %189 = tpu.matmul %188, %172, %cst_71 {dimension_numbers = #tpu.dot_dimension_numbers<[2], [1], [1], [2], [0, 0, 0, 1, 1, 2], [0], [0]>} : vector<8x8x8xf32>, vector<8x8x8xf32>, vector<8x8x8xf32> -> vector<8x8x8xf32>
    "tpu.trace_stop"() : () -> ()
    %190 = vector.shape_cast %189 : vector<8x8x8xf32> to vector<64x8xf32>
    %191 = vector.extract_strided_slice %37 {offsets = [1, 0, 0], sizes = [1, 8, 32], strides = [1, 1, 1]} : vector<4x8x32xf32> to vector<1x8x32xf32>
    %192 = vector.shape_cast %191 : vector<1x8x32xf32> to vector<8x32xf32>
    %cst_72 = arith.constant dense<0.000000e+00> : vector<64x32xf32>
    %193 = tpu.matmul %190, %192, %cst_72 {dimension_numbers = #tpu.dot_dimension_numbers<[1], [0], [0], [1], [0, 0, 1, 1], [], []>} : vector<64x8xf32>, vector<8x32xf32>, vector<64x32xf32> -> vector<64x32xf32>
    %194 = arith.addf %118, %193 : vector<64x32xf32>
    %195 = vector.extract_strided_slice %27 {offsets = [2, 0, 0], sizes = [1, 32, 8], strides = [1, 1, 1]} : vector<4x32x8xf32> to vector<1x32x8xf32>
    %196 = vector.shape_cast %195 : vector<1x32x8xf32> to vector<32x8xf32>
    %cst_73 = arith.constant dense<0.000000e+00> : vector<64x8xf32>
    %197 = tpu.matmul %24, %196, %cst_73 {dimension_numbers = #tpu.dot_dimension_numbers<[1], [0], [0], [1], [0, 0, 1, 1], [], []>} : vector<64x32xf32>, vector<32x8xf32>, vector<64x8xf32> -> vector<64x8xf32>
    %198 = vector.extract_strided_slice %28 {offsets = [2, 0, 0], sizes = [1, 1, 8], strides = [1, 1, 1]} : vector<4x1x8xf32> to vector<1x1x8xf32>
    %199 = vector.shape_cast %198 : vector<1x1x8xf32> to vector<1x8xf32>
    %200 = vector.broadcast %199 : vector<1x8xf32> to vector<64x8xf32>
    %201 = arith.addf %197, %200 : vector<64x8xf32>
    %202 = vector.extract_strided_slice %29 {offsets = [2, 0, 0], sizes = [1, 32, 8], strides = [1, 1, 1]} : vector<4x32x8xf32> to vector<1x32x8xf32>
    %203 = vector.shape_cast %202 : vector<1x32x8xf32> to vector<32x8xf32>
    %cst_74 = arith.constant dense<0.000000e+00> : vector<64x8xf32>
    %204 = tpu.matmul %24, %203, %cst_74 {dimension_numbers = #tpu.dot_dimension_numbers<[1], [0], [0], [1], [0, 0, 1, 1], [], []>} : vector<64x32xf32>, vector<32x8xf32>, vector<64x8xf32> -> vector<64x8xf32>
    %205 = vector.extract_strided_slice %30 {offsets = [2, 0, 0], sizes = [1, 1, 8], strides = [1, 1, 1]} : vector<4x1x8xf32> to vector<1x1x8xf32>
    %206 = vector.shape_cast %205 : vector<1x1x8xf32> to vector<1x8xf32>
    %207 = vector.broadcast %206 : vector<1x8xf32> to vector<64x8xf32>
    %208 = arith.addf %204, %207 : vector<64x8xf32>
    %209 = vector.extract_strided_slice %31 {offsets = [2, 0, 0], sizes = [1, 32, 8], strides = [1, 1, 1]} : vector<4x32x8xf32> to vector<1x32x8xf32>
    %210 = vector.shape_cast %209 : vector<1x32x8xf32> to vector<32x8xf32>
    %cst_75 = arith.constant dense<0.000000e+00> : vector<64x8xf32>
    %211 = tpu.matmul %24, %210, %cst_75 {dimension_numbers = #tpu.dot_dimension_numbers<[1], [0], [0], [1], [0, 0, 1, 1], [], []>} : vector<64x32xf32>, vector<32x8xf32>, vector<64x8xf32> -> vector<64x8xf32>
    %212 = vector.extract_strided_slice %32 {offsets = [2, 0, 0], sizes = [1, 1, 8], strides = [1, 1, 1]} : vector<4x1x8xf32> to vector<1x1x8xf32>
    %213 = vector.shape_cast %212 : vector<1x1x8xf32> to vector<1x8xf32>
    %214 = vector.broadcast %213 : vector<1x8xf32> to vector<64x8xf32>
    %215 = arith.addf %211, %214 : vector<64x8xf32>
    %216 = vector.extract_strided_slice %33 {offsets = [2, 0, 0], sizes = [1, 32, 8], strides = [1, 1, 1]} : vector<4x32x8xf32> to vector<1x32x8xf32>
    %217 = vector.shape_cast %216 : vector<1x32x8xf32> to vector<32x8xf32>
    %cst_76 = arith.constant dense<0.000000e+00> : vector<64x8xf32>
    %218 = tpu.matmul %24, %217, %cst_76 {dimension_numbers = #tpu.dot_dimension_numbers<[1], [0], [0], [1], [0, 0, 1, 1], [], []>} : vector<64x32xf32>, vector<32x8xf32>, vector<64x8xf32> -> vector<64x8xf32>
    %219 = vector.extract_strided_slice %34 {offsets = [2, 0, 0], sizes = [1, 1, 8], strides = [1, 1, 1]} : vector<4x1x8xf32> to vector<1x1x8xf32>
    %220 = vector.shape_cast %219 : vector<1x1x8xf32> to vector<1x8xf32>
    %221 = vector.broadcast %220 : vector<1x8xf32> to vector<64x8xf32>
    %222 = arith.addf %218, %221 : vector<64x8xf32>
    %223 = vector.extract_strided_slice %35 {offsets = [2, 0, 0], sizes = [1, 32, 8], strides = [1, 1, 1]} : vector<4x32x8xf32> to vector<1x32x8xf32>
    %224 = vector.shape_cast %223 : vector<1x32x8xf32> to vector<32x8xf32>
    %cst_77 = arith.constant dense<0.000000e+00> : vector<64x8xf32>
    %225 = tpu.matmul %24, %224, %cst_77 {dimension_numbers = #tpu.dot_dimension_numbers<[1], [0], [0], [1], [0, 0, 1, 1], [], []>} : vector<64x32xf32>, vector<32x8xf32>, vector<64x8xf32> -> vector<64x8xf32>
    %226 = vector.extract_strided_slice %36 {offsets = [2, 0, 0], sizes = [1, 1, 8], strides = [1, 1, 1]} : vector<4x1x8xf32> to vector<1x1x8xf32>
    %227 = vector.shape_cast %226 : vector<1x1x8xf32> to vector<1x8xf32>
    %228 = vector.broadcast %227 : vector<1x8xf32> to vector<64x8xf32>
    %229 = arith.addf %225, %228 : vector<64x8xf32>
    %230 = vector.shape_cast %201 : vector<64x8xf32> to vector<8x8x8xf32>
    %231 = vector.shape_cast %25 : vector<8x8xf32> to vector<1x8x8xf32>
    %232 = vector.broadcast %231 : vector<1x8x8xf32> to vector<8x8x8xf32>
    %233 = arith.mulf %230, %232 : vector<8x8x8xf32>
    %234 = vector.shape_cast %208 : vector<64x8xf32> to vector<8x8x8xf32>
    %235 = vector.shape_cast %26 : vector<8x8xf32> to vector<1x8x8xf32>
    %236 = vector.broadcast %235 : vector<1x8x8xf32> to vector<8x8x8xf32>
    %237 = arith.mulf %234, %236 : vector<8x8x8xf32>
    %238 = arith.addf %233, %237 : vector<8x8x8xf32>
    %239 = vector.shape_cast %215 : vector<64x8xf32> to vector<8x8x8xf32>
    %240 = vector.shape_cast %25 : vector<8x8xf32> to vector<1x8x8xf32>
    %241 = vector.broadcast %240 : vector<1x8x8xf32> to vector<8x8x8xf32>
    %242 = arith.mulf %239, %241 : vector<8x8x8xf32>
    %243 = vector.shape_cast %222 : vector<64x8xf32> to vector<8x8x8xf32>
    %244 = vector.shape_cast %26 : vector<8x8xf32> to vector<1x8x8xf32>
    %245 = vector.broadcast %244 : vector<1x8x8xf32> to vector<8x8x8xf32>
    %246 = arith.mulf %243, %245 : vector<8x8x8xf32>
    %247 = arith.addf %242, %246 : vector<8x8x8xf32>
    %248 = vector.shape_cast %229 : vector<64x8xf32> to vector<8x8x8xf32>
    "tpu.trace_start"() <{level = 10 : i32, message = "rtd,rsd->rts"}> : () -> ()
    %cst_78 = arith.constant dense<0.000000e+00> : vector<8x8x8xf32>
    %249 = tpu.matmul %238, %247, %cst_78 {dimension_numbers = #tpu.dot_dimension_numbers<[2], [2], [1], [1], [0, 0, 0, 1, 1, 1], [0], [0]>} : vector<8x8x8xf32>, vector<8x8x8xf32>, vector<8x8x8xf32> -> vector<8x8x8xf32>
    "tpu.trace_stop"() : () -> ()
    %cst_79 = arith.constant 0.353553385 : f32
    %250 = vector.broadcast %cst_79 : f32 to vector<8x8x8xf32>
    %251 = arith.mulf %249, %250 : vector<8x8x8xf32>
    %cst_80 = arith.constant 0xFF800000 : f32
    %252 = vector.shape_cast %41 : vector<8x8xi1> to vector<1x8x8xi1>
    %253 = vector.broadcast %252 : vector<1x8x8xi1> to vector<8x8x8xi1>
    %254 = vector.broadcast %cst_80 : f32 to vector<8x8x8xf32>
    %255 = arith.select %253, %251, %254 : vector<8x8x8xi1>, vector<8x8x8xf32>
    %cst_81 = arith.constant dense<0xFF800000> : vector<8x8xf32>
    %256 = vector.multi_reduction <maximumf>, %255, %cst_81 [2] : vector<8x8x8xf32> to vector<8x8xf32>
    %257 = vector.shape_cast %256 : vector<8x8xf32> to vector<8x8x1xf32>
    %258 = vector.broadcast %257 : vector<8x8x1xf32> to vector<8x8x8xf32>
    %259 = arith.subf %255, %258 : vector<8x8x8xf32>
    %260 = math.exp %259 : vector<8x8x8xf32>
    %cst_82 = arith.constant dense<0.000000e+00> : vector<8x8xf32>
    %261 = vector.multi_reduction <add>, %260, %cst_82 [2] : vector<8x8x8xf32> to vector<8x8xf32>
    %262 = vector.shape_cast %261 : vector<8x8xf32> to vector<8x8x1xf32>
    %263 = vector.broadcast %262 : vector<8x8x1xf32> to vector<8x8x8xf32>
    %264 = arith.divf %260, %263 : vector<8x8x8xf32>
    "tpu.trace_start"() <{level = 10 : i32, message = "rts,rsd->rtd"}> : () -> ()
    %cst_83 = arith.constant dense<0.000000e+00> : vector<8x8x8xf32>
    %265 = tpu.matmul %264, %248, %cst_83 {dimension_numbers = #tpu.dot_dimension_numbers<[2], [1], [1], [2], [0, 0, 0, 1, 1, 2], [0], [0]>} : vector<8x8x8xf32>, vector<8x8x8xf32>, vector<8x8x8xf32> -> vector<8x8x8xf32>
    "tpu.trace_stop"() : () -> ()
    %266 = vector.shape_cast %265 : vector<8x8x8xf32> to vector<64x8xf32>
    %267 = vector.extract_strided_slice %37 {offsets = [2, 0, 0], sizes = [1, 8, 32], strides = [1, 1, 1]} : vector<4x8x32xf32> to vector<1x8x32xf32>
    %268 = vector.shape_cast %267 : vector<1x8x32xf32> to vector<8x32xf32>
    %cst_84 = arith.constant dense<0.000000e+00> : vector<64x32xf32>
    %269 = tpu.matmul %266, %268, %cst_84 {dimension_numbers = #tpu.dot_dimension_numbers<[1], [0], [0], [1], [0, 0, 1, 1], [], []>} : vector<64x8xf32>, vector<8x32xf32>, vector<64x32xf32> -> vector<64x32xf32>
    %270 = arith.addf %194, %269 : vector<64x32xf32>
    %271 = vector.extract_strided_slice %27 {offsets = [3, 0, 0], sizes = [1, 32, 8], strides = [1, 1, 1]} : vector<4x32x8xf32> to vector<1x32x8xf32>
    %272 = vector.shape_cast %271 : vector<1x32x8xf32> to vector<32x8xf32>
    %cst_85 = arith.constant dense<0.000000e+00> : vector<64x8xf32>
    %273 = tpu.matmul %24, %272, %cst_85 {dimension_numbers = #tpu.dot_dimension_numbers<[1], [0], [0], [1], [0, 0, 1, 1], [], []>} : vector<64x32xf32>, vector<32x8xf32>, vector<64x8xf32> -> vector<64x8xf32>
    %274 = vector.extract_strided_slice %28 {offsets = [3, 0, 0], sizes = [1, 1, 8], strides = [1, 1, 1]} : vector<4x1x8xf32> to vector<1x1x8xf32>
    %275 = vector.shape_cast %274 : vector<1x1x8xf32> to vector<1x8xf32>
    %276 = vector.broadcast %275 : vector<1x8xf32> to vector<64x8xf32>
    %277 = arith.addf %273, %276 : vector<64x8xf32>
    %278 = vector.extract_strided_slice %29 {offsets = [3, 0, 0], sizes = [1, 32, 8], strides = [1, 1, 1]} : vector<4x32x8xf32> to vector<1x32x8xf32>
    %279 = vector.shape_cast %278 : vector<1x32x8xf32> to vector<32x8xf32>
    %cst_86 = arith.constant dense<0.000000e+00> : vector<64x8xf32>
    %280 = tpu.matmul %24, %279, %cst_86 {dimension_numbers = #tpu.dot_dimension_numbers<[1], [0], [0], [1], [0, 0, 1, 1], [], []>} : vector<64x32xf32>, vector<32x8xf32>, vector<64x8xf32> -> vector<64x8xf32>
    %281 = vector.extract_strided_slice %30 {offsets = [3, 0, 0], sizes = [1, 1, 8], strides = [1, 1, 1]} : vector<4x1x8xf32> to vector<1x1x8xf32>
    %282 = vector.shape_cast %281 : vector<1x1x8xf32> to vector<1x8xf32>
    %283 = vector.broadcast %282 : vector<1x8xf32> to vector<64x8xf32>
    %284 = arith.addf %280, %283 : vector<64x8xf32>
    %285 = vector.extract_strided_slice %31 {offsets = [3, 0, 0], sizes = [1, 32, 8], strides = [1, 1, 1]} : vector<4x32x8xf32> to vector<1x32x8xf32>
    %286 = vector.shape_cast %285 : vector<1x32x8xf32> to vector<32x8xf32>
    %cst_87 = arith.constant dense<0.000000e+00> : vector<64x8xf32>
    %287 = tpu.matmul %24, %286, %cst_87 {dimension_numbers = #tpu.dot_dimension_numbers<[1], [0], [0], [1], [0, 0, 1, 1], [], []>} : vector<64x32xf32>, vector<32x8xf32>, vector<64x8xf32> -> vector<64x8xf32>
    %288 = vector.extract_strided_slice %32 {offsets = [3, 0, 0], sizes = [1, 1, 8], strides = [1, 1, 1]} : vector<4x1x8xf32> to vector<1x1x8xf32>
    %289 = vector.shape_cast %288 : vector<1x1x8xf32> to vector<1x8xf32>
    %290 = vector.broadcast %289 : vector<1x8xf32> to vector<64x8xf32>
    %291 = arith.addf %287, %290 : vector<64x8xf32>
    %292 = vector.extract_strided_slice %33 {offsets = [3, 0, 0], sizes = [1, 32, 8], strides = [1, 1, 1]} : vector<4x32x8xf32> to vector<1x32x8xf32>
    %293 = vector.shape_cast %292 : vector<1x32x8xf32> to vector<32x8xf32>
    %cst_88 = arith.constant dense<0.000000e+00> : vector<64x8xf32>
    %294 = tpu.matmul %24, %293, %cst_88 {dimension_numbers = #tpu.dot_dimension_numbers<[1], [0], [0], [1], [0, 0, 1, 1], [], []>} : vector<64x32xf32>, vector<32x8xf32>, vector<64x8xf32> -> vector<64x8xf32>
    %295 = vector.extract_strided_slice %34 {offsets = [3, 0, 0], sizes = [1, 1, 8], strides = [1, 1, 1]} : vector<4x1x8xf32> to vector<1x1x8xf32>
    %296 = vector.shape_cast %295 : vector<1x1x8xf32> to vector<1x8xf32>
    %297 = vector.broadcast %296 : vector<1x8xf32> to vector<64x8xf32>
    %298 = arith.addf %294, %297 : vector<64x8xf32>
    %299 = vector.extract_strided_slice %35 {offsets = [3, 0, 0], sizes = [1, 32, 8], strides = [1, 1, 1]} : vector<4x32x8xf32> to vector<1x32x8xf32>
    %300 = vector.shape_cast %299 : vector<1x32x8xf32> to vector<32x8xf32>
    %cst_89 = arith.constant dense<0.000000e+00> : vector<64x8xf32>
    %301 = tpu.matmul %24, %300, %cst_89 {dimension_numbers = #tpu.dot_dimension_numbers<[1], [0], [0], [1], [0, 0, 1, 1], [], []>} : vector<64x32xf32>, vector<32x8xf32>, vector<64x8xf32> -> vector<64x8xf32>
    %302 = vector.extract_strided_slice %36 {offsets = [3, 0, 0], sizes = [1, 1, 8], strides = [1, 1, 1]} : vector<4x1x8xf32> to vector<1x1x8xf32>
    %303 = vector.shape_cast %302 : vector<1x1x8xf32> to vector<1x8xf32>
    %304 = vector.broadcast %303 : vector<1x8xf32> to vector<64x8xf32>
    %305 = arith.addf %301, %304 : vector<64x8xf32>
    %306 = vector.shape_cast %277 : vector<64x8xf32> to vector<8x8x8xf32>
    %307 = vector.shape_cast %25 : vector<8x8xf32> to vector<1x8x8xf32>
    %308 = vector.broadcast %307 : vector<1x8x8xf32> to vector<8x8x8xf32>
    %309 = arith.mulf %306, %308 : vector<8x8x8xf32>
    %310 = vector.shape_cast %284 : vector<64x8xf32> to vector<8x8x8xf32>
    %311 = vector.shape_cast %26 : vector<8x8xf32> to vector<1x8x8xf32>
    %312 = vector.broadcast %311 : vector<1x8x8xf32> to vector<8x8x8xf32>
    %313 = arith.mulf %310, %312 : vector<8x8x8xf32>
    %314 = arith.addf %309, %313 : vector<8x8x8xf32>
    %315 = vector.shape_cast %291 : vector<64x8xf32> to vector<8x8x8xf32>
    %316 = vector.shape_cast %25 : vector<8x8xf32> to vector<1x8x8xf32>
    %317 = vector.broadcast %316 : vector<1x8x8xf32> to vector<8x8x8xf32>
    %318 = arith.mulf %315, %317 : vector<8x8x8xf32>
    %319 = vector.shape_cast %298 : vector<64x8xf32> to vector<8x8x8xf32>
    %320 = vector.shape_cast %26 : vector<8x8xf32> to vector<1x8x8xf32>
    %321 = vector.broadcast %320 : vector<1x8x8xf32> to vector<8x8x8xf32>
    %322 = arith.mulf %319, %321 : vector<8x8x8xf32>
    %323 = arith.addf %318, %322 : vector<8x8x8xf32>
    %324 = vector.shape_cast %305 : vector<64x8xf32> to vector<8x8x8xf32>
    "tpu.trace_start"() <{level = 10 : i32, message = "rtd,rsd->rts"}> : () -> ()
    %cst_90 = arith.constant dense<0.000000e+00> : vector<8x8x8xf32>
    %325 = tpu.matmul %314, %323, %cst_90 {dimension_numbers = #tpu.dot_dimension_numbers<[2], [2], [1], [1], [0, 0, 0, 1, 1, 1], [0], [0]>} : vector<8x8x8xf32>, vector<8x8x8xf32>, vector<8x8x8xf32> -> vector<8x8x8xf32>
    "tpu.trace_stop"() : () -> ()
    %cst_91 = arith.constant 0.353553385 : f32
    %326 = vector.broadcast %cst_91 : f32 to vector<8x8x8xf32>
    %327 = arith.mulf %325, %326 : vector<8x8x8xf32>
    %cst_92 = arith.constant 0xFF800000 : f32
    %328 = vector.shape_cast %41 : vector<8x8xi1> to vector<1x8x8xi1>
    %329 = vector.broadcast %328 : vector<1x8x8xi1> to vector<8x8x8xi1>
    %330 = vector.broadcast %cst_92 : f32 to vector<8x8x8xf32>
    %331 = arith.select %329, %327, %330 : vector<8x8x8xi1>, vector<8x8x8xf32>
    %cst_93 = arith.constant dense<0xFF800000> : vector<8x8xf32>
    %332 = vector.multi_reduction <maximumf>, %331, %cst_93 [2] : vector<8x8x8xf32> to vector<8x8xf32>
    %333 = vector.shape_cast %332 : vector<8x8xf32> to vector<8x8x1xf32>
    %334 = vector.broadcast %333 : vector<8x8x1xf32> to vector<8x8x8xf32>
    %335 = arith.subf %331, %334 : vector<8x8x8xf32>
    %336 = math.exp %335 : vector<8x8x8xf32>
    %cst_94 = arith.constant dense<0.000000e+00> : vector<8x8xf32>
    %337 = vector.multi_reduction <add>, %336, %cst_94 [2] : vector<8x8x8xf32> to vector<8x8xf32>
    %338 = vector.shape_cast %337 : vector<8x8xf32> to vector<8x8x1xf32>
    %339 = vector.broadcast %338 : vector<8x8x1xf32> to vector<8x8x8xf32>
    %340 = arith.divf %336, %339 : vector<8x8x8xf32>
    "tpu.trace_start"() <{level = 10 : i32, message = "rts,rsd->rtd"}> : () -> ()
    %cst_95 = arith.constant dense<0.000000e+00> : vector<8x8x8xf32>
    %341 = tpu.matmul %340, %324, %cst_95 {dimension_numbers = #tpu.dot_dimension_numbers<[2], [1], [1], [2], [0, 0, 0, 1, 1, 2], [0], [0]>} : vector<8x8x8xf32>, vector<8x8x8xf32>, vector<8x8x8xf32> -> vector<8x8x8xf32>
    "tpu.trace_stop"() : () -> ()
    %342 = vector.shape_cast %341 : vector<8x8x8xf32> to vector<64x8xf32>
    %343 = vector.extract_strided_slice %37 {offsets = [3, 0, 0], sizes = [1, 8, 32], strides = [1, 1, 1]} : vector<4x8x32xf32> to vector<1x8x32xf32>
    %344 = vector.shape_cast %343 : vector<1x8x32xf32> to vector<8x32xf32>
    %cst_96 = arith.constant dense<0.000000e+00> : vector<64x32xf32>
    %345 = tpu.matmul %342, %344, %cst_96 {dimension_numbers = #tpu.dot_dimension_numbers<[1], [0], [0], [1], [0, 0, 1, 1], [], []>} : vector<64x8xf32>, vector<8x32xf32>, vector<64x32xf32> -> vector<64x32xf32>
    %346 = arith.addf %270, %345 : vector<64x32xf32>
    %347 = vector.broadcast %38 : vector<1x32xf32> to vector<64x32xf32>
    %348 = arith.addf %346, %347 : vector<64x32xf32>
    %349 = arith.addf %0, %348 : vector<64x32xf32>
    %c0_97 = arith.constant 0 : index
    %c0_98 = arith.constant 0 : index
    %350 = vector.load %arg17[%c0_97, %c0_98] : memref<1x32xf32, #tpu.memory_space<vmem>>, vector<1x32xf32>
    %c0_99 = arith.constant 0 : index
    %c0_100 = arith.constant 0 : index
    %351 = vector.load %arg18[%c0_99, %c0_100] : memref<1x32xf32, #tpu.memory_space<vmem>>, vector<1x32xf32>
    %cst_101 = arith.constant dense<0.000000e+00> : vector<64xf32>
    %352 = vector.multi_reduction <add>, %349, %cst_101 [1] : vector<64x32xf32> to vector<64xf32>
    %353 = vector.shape_cast %352 : vector<64xf32> to vector<64x1xf32>
    %cst_102 = arith.constant 3.200000e+01 : f32
    %354 = vector.broadcast %cst_102 : f32 to vector<64x1xf32>
    %355 = arith.divf %353, %354 : vector<64x1xf32>
    %356 = vector.broadcast %355 : vector<64x1xf32> to vector<64x32xf32>
    %357 = arith.subf %349, %356 : vector<64x32xf32>
    %358 = arith.mulf %357, %357 : vector<64x32xf32>
    %cst_103 = arith.constant dense<0.000000e+00> : vector<64xf32>
    %359 = vector.multi_reduction <add>, %358, %cst_103 [1] : vector<64x32xf32> to vector<64xf32>
    %360 = vector.shape_cast %359 : vector<64xf32> to vector<64x1xf32>
    %cst_104 = arith.constant 3.200000e+01 : f32
    %361 = vector.broadcast %cst_104 : f32 to vector<64x1xf32>
    %362 = arith.divf %360, %361 : vector<64x1xf32>
    %363 = vector.broadcast %355 : vector<64x1xf32> to vector<64x32xf32>
    %364 = arith.subf %349, %363 : vector<64x32xf32>
    %cst_105 = arith.constant 9.99999974E-6 : f32
    %365 = vector.broadcast %cst_105 : f32 to vector<64x1xf32>
    %366 = arith.addf %362, %365 : vector<64x1xf32>
    %367 = math.rsqrt %366 : vector<64x1xf32>
    %368 = vector.broadcast %367 : vector<64x1xf32> to vector<64x32xf32>
    %369 = arith.mulf %364, %368 : vector<64x32xf32>
    %370 = vector.broadcast %350 : vector<1x32xf32> to vector<64x32xf32>
    %371 = arith.mulf %369, %370 : vector<64x32xf32>
    %372 = vector.broadcast %351 : vector<1x32xf32> to vector<64x32xf32>
    %373 = arith.addf %371, %372 : vector<64x32xf32>
    %c0_106 = arith.constant 0 : index
    %c0_107 = arith.constant 0 : index
    %374 = vector.load %arg19[%c0_106, %c0_107] : memref<32x128xf32, #tpu.memory_space<vmem>>, vector<32x128xf32>
    %c0_108 = arith.constant 0 : index
    %c0_109 = arith.constant 0 : index
    %375 = vector.load %arg20[%c0_108, %c0_109] : memref<1x128xf32, #tpu.memory_space<vmem>>, vector<1x128xf32>
    %c0_110 = arith.constant 0 : index
    %c0_111 = arith.constant 0 : index
    %376 = vector.load %arg21[%c0_110, %c0_111] : memref<128x32xf32, #tpu.memory_space<vmem>>, vector<128x32xf32>
    %c0_112 = arith.constant 0 : index
    %c0_113 = arith.constant 0 : index
    %377 = vector.load %arg22[%c0_112, %c0_113] : memref<1x32xf32, #tpu.memory_space<vmem>>, vector<1x32xf32>
    %cst_114 = arith.constant dense<0.000000e+00> : vector<64x128xf32>
    %378 = tpu.matmul %373, %374, %cst_114 {dimension_numbers = #tpu.dot_dimension_numbers<[1], [0], [0], [1], [0, 0, 1, 1], [], []>} : vector<64x32xf32>, vector<32x128xf32>, vector<64x128xf32> -> vector<64x128xf32>
    %379 = vector.broadcast %375 : vector<1x128xf32> to vector<64x128xf32>
    %380 = arith.addf %378, %379 : vector<64x128xf32>
    %cst_115 = arith.constant 5.000000e-01 : f32
    %381 = vector.broadcast %cst_115 : f32 to vector<64x128xf32>
    %382 = arith.mulf %381, %380 : vector<64x128xf32>
    %cst_116 = arith.constant 4.471500e-02 : f32
    %383 = vector.broadcast %cst_116 : f32 to vector<64x128xf32>
    %384 = arith.mulf %383, %380 : vector<64x128xf32>
    %385 = arith.mulf %384, %380 : vector<64x128xf32>
    %386 = arith.mulf %385, %380 : vector<64x128xf32>
    %387 = arith.addf %380, %386 : vector<64x128xf32>
    %cst_117 = arith.constant 0.797884583 : f32
    %388 = vector.broadcast %cst_117 : f32 to vector<64x128xf32>
    %389 = arith.mulf %388, %387 : vector<64x128xf32>
    %390 = math.tanh %389 : vector<64x128xf32>
    %cst_118 = arith.constant 1.000000e+00 : f32
    %391 = vector.broadcast %cst_118 : f32 to vector<64x128xf32>
    %392 = arith.addf %391, %390 : vector<64x128xf32>
    %393 = arith.mulf %382, %392 : vector<64x128xf32>
    %cst_119 = arith.constant dense<0.000000e+00> : vector<64x32xf32>
    %394 = tpu.matmul %393, %376, %cst_119 {dimension_numbers = #tpu.dot_dimension_numbers<[1], [0], [0], [1], [0, 0, 1, 1], [], []>} : vector<64x128xf32>, vector<128x32xf32>, vector<64x32xf32> -> vector<64x32xf32>
    %395 = vector.broadcast %377 : vector<1x32xf32> to vector<64x32xf32>
    %396 = arith.addf %394, %395 : vector<64x32xf32>
    %397 = arith.addf %349, %396 : vector<64x32xf32>
    %c0_120 = arith.constant 0 : index
    %c0_121 = arith.constant 0 : index
    %398 = vector.load %arg23[%c0_120, %c0_121] : memref<64x32xf32, #tpu.memory_space<vmem>>, vector<64x32xf32>
    tpu.vector_store %arg23[%c0_120, %c0_121], %397 {strides = array<i32>} : memref<64x32xf32, #tpu.memory_space<vmem>>, vector<64x32xf32>,
    return
  }
}

</mosaic_0001>

<bundles_post_ra>
// kernel: gpt_forward.11
= control target key start
LH: loop header
LB: loop body
LE: loop exit
PB: predicated region body
PF: predicated region fallthrough
CT: control target
= control target key end

     0   :  { %vm28_vm0 = vcmask 261120   ;;  %s571_s0 = inlined_call_operand.vmem [shape: f32[64,32], index: 0, kind: input, shape index: {}]   ;;  %s572_s1 = inlined_call_operand.vmem [shape: f32[1,32], index: 1, kind: input, shape index: {}]   ;;  %s573_s2 = inlined_call_operand.vmem [shape: f32[1,32], index: 2, kind: input, shape index: {}]   ;;  %s574_s3 = inlined_call_operand.vmem [shape: f32[32,64], index: 3, kind: input, shape index: {}]   ;;  %s575_s4 = inlined_call_operand.hbm [shape: f32[64,64], index: 4, kind: output, shape index: {}]  }
   0x1   :  { %v18_v0 = vld [vmem:[%s571_s0] sm:$0xff]  ;;  %v19_v1 = vld [vmem:[%s571_s0 + $0x8] sm:$0xff] }
   0x2   :  { %v22_v2 = vld [vmem:[%s571_s0 + $0x20] sm:$0xff]  ;;  %v29_v3 = vsel %vm28_vm0, %v18_v0, 0.0  ;;  %v32_v4 = vsel %vm28_vm0, %v19_v1, 0.0  ;;  %v23_v5 = vld [vmem:[%s571_s0 + $0x28] sm:$0xff] }
   0x3   :  { %30 = vadd.xlane.f32.xlu0 %v29_v3  ;;  %33 = vadd.xlane.f32.xlu1 %v32_v4  ;;  %v41_v6 = vsel %vm28_vm0, %v22_v2, 0.0  ;;  %v44_v7 = vsel %vm28_vm0, %v23_v5, 0.0 }
   0x4   :  { %9 = vsyncpa [#allocation3], 0  ;;  %v20_v8 = vld [vmem:[%s571_s0 + $0x10] sm:$0xff]  ;;  %v21_v12 = vld [vmem:[%s571_s0 + $0x18] sm:$0xff]  ;;  %vm295_vm1 = vcmask 523264  }
   0x5   :  { %v24_v9 = vld [vmem:[%s571_s0 + $0x30] sm:$0xff]  ;;  %v35_v10 = vsel %vm28_vm0, %v20_v8, 0.0  ;;  %v25_v13 = vld [vmem:[%s571_s0 + $0x38] sm:$0xff]  ;;  %v38_v14 = vsel %vm28_vm0, %v21_v12, 0.0  ;;  %v162_v56 = vld [vmem:[%s574_s3] sm:$0xff] }
   0x6   :  { %v47_v11 = vsel %vm28_vm0, %v24_v9, 0.0  ;;  %v50_v15 = vsel %vm28_vm0, %v25_v13, 0.0  ;;  %v163_v57 = vld [vmem:[%s574_s3 + $0x8] sm:$0xff]  ;;  %v164_v59 = vld [vmem:[%s574_s3 + $0x10] sm:$0xff]  ;;  %v165_v60 = vld [vmem:[%s574_s3 + $0x18] sm:$0xff] }
   0x7   :  { %42 = vadd.xlane.f32.xlu0 %v41_v6  ;;  %45 = vadd.xlane.f32.xlu1 %v44_v7  ;;  %v362_v58 = vpack.c.bf16 %v163_v57, %v162_v56  ;;  %v366_v61 = vpack.c.bf16 %v165_v60, %v164_v59 }
   0x9   :  { %363 = vmatprep.subr.bf16.mxu0 %v362_v58  ;;  %370 = vmatprep.subr.bf16.mxu1 %v362_v58 }
   0xa   :  { %365 = vmatpush3.bf16.msra.mxu0 %v362_v58  ;;  %372 = vmatpush3.bf16.msra.mxu1 %v362_v58 }
   0xb   :  { %36 = vadd.xlane.f32.xlu0 %v35_v10  ;;  %48 = vadd.xlane.f32.xlu1 %v47_v11 }
   0xc   :  { %367 = vmatprep.subr.bf16.mxu0 %v366_v61  ;;  %371 = vmatprep.subr.bf16.mxu1 %v366_v61 }
   0xe   :  { %369 = vmatpush3.bf16.msra.mxu0 %v366_v61  ;;  %373 = vmatpush3.bf16.msra.mxu1 %v366_v61 }
   0xf   :  { %39 = vadd.xlane.f32.xlu0 %v38_v14  ;;  %51 = vadd.xlane.f32.xlu1 %v50_v15 }
  0x90   :  { %v31_v16 = vpop.xlane.xlu0 %30  ;;  %v34_v17 = vpop.xlane.xlu1 %33 }
  0x91   :  { %v54_v18 = vmul.f32 0.03125, %v31_v16  ;;  %v55_v19 = vmul.f32 0.03125, %v34_v17 }
  0x93   :  { %v477_v20 = vsub.f32 %v18_v0, %v54_v18  ;;  %v479_v21 = vsub.f32 %v19_v1, %v55_v19 }
  0x94   :  { %v43_v22 = vpop.xlane.xlu0 %42  ;;  %v46_v23 = vpop.xlane.xlu1 %45 }
  0x95   :  { %v58_v24 = vmul.f32 0.03125, %v43_v22  ;;  %v59_v25 = vmul.f32 0.03125, %v46_v23  ;;  %v70_v26 = vmul.f32 %v477_v20, %v477_v20  ;;  %v71_v27 = vmul.f32 %v479_v21, %v479_v21  ;;  %v320_v22 = vld [vmem:[%s572_s1] ss:$0 sm:$0xff]  ;;  %s417_s1 = smov [#allocation2]  }
  0x97   :  { %v485_v28 = vsub.f32 %v22_v2, %v58_v24  ;;  %v487_v29 = vsub.f32 %v23_v5, %v59_v25  ;;  %v78_v30 = vsel %vm28_vm0, %v70_v26, 0.0  ;;  %v81_v33 = vsel %vm28_vm0, %v71_v27, 0.0  ;;  %v321_v26 = vld [vmem:[%s573_s2] ss:$0 sm:$0xff]  ;;  %s309_s2 = sshll.u32 %s417_s1, 4  ;;  %s310_s2 = int_to_ptr.vmem [resolvable:$true] %s309_s2 }
  0x98   :  { %79 = vadd.xlane.f32.xlu0 %v78_v30  ;;  %v37_v31 = vpop.xlane.xlu0 %36  ;;  %v49_v32 = vpop.xlane.xlu1 %48  ;;  %s393_s15 = scalar_lea.vmem %s310_s2, 1024  ;;  %p398_p1 = scmp.lt.s32.totalorder %s310_s2, %s310_s2 }
  0x99   :  { %v56_v34 = vmul.f32 0.03125, %v37_v31  ;;  %v60_v35 = vmul.f32 0.03125, %v49_v32  ;;  %v74_v36 = vmul.f32 %v485_v28, %v485_v28  ;;  %v75_v37 = vmul.f32 %v487_v29, %v487_v29  ;;  %p394_p0 = scmp.ne.s32.totalorder %s310_s2, %s393_s15  ;;  %p399_p2 = scmp.lt.s32.totalorder %s393_s15, %s393_s15 }
  0x9b   :  { %v495_v38 = vsub.f32 %v20_v8, %v56_v34  ;;  %v497_v39 = vsub.f32 %v24_v9, %v60_v35  ;;  %v90_v40 = vsel %vm28_vm0, %v74_v36, 0.0  ;;  %v93_v43 = vsel %vm28_vm0, %v75_v37, 0.0  ;;  %p400_p3 = por %p399_p2, %p398_p1 }
  0x9c   :  { %82 = vadd.xlane.f32.xlu0 %v81_v33  ;;  %91 = vadd.xlane.f32.xlu1 %v90_v40  ;;  %v40_v41 = vpop.xlane.xlu0 %39  ;;  %v52_v42 = vpop.xlane.xlu1 %51 }
  0x9d   :  { %v57_v44 = vmul.f32 0.03125, %v40_v41  ;;  %v61_v45 = vmul.f32 0.03125, %v52_v42  ;;  %v72_v46 = vmul.f32 %v495_v38, %v495_v38  ;;  %v76_v47 = vmul.f32 %v497_v39, %v497_v39  ;;  %p401_p4 = pnand %p400_p3, %p394_p0 }
  0x9f   :  { %v505_v48 = vsub.f32 %v21_v12, %v57_v44  ;;  %v507_v49 = vsub.f32 %v25_v13, %v61_v45  ;;  %v84_v50 = vsel %vm28_vm0, %v72_v46, 0.0  ;;  %v96_v51 = vsel %vm28_vm0, %v76_v47, 0.0 }
  0xa0   :  { %94 = vadd.xlane.f32.xlu1 %v93_v43  ;;  %85 = vadd.xlane.f32.xlu0 %v84_v50 }
  0xa1   :  { %v73_v52 = vmul.f32 %v505_v48, %v505_v48  ;;  %v77_v53 = vmul.f32 %v507_v49, %v507_v49 }
  0xa3   :  { %v87_v54 = vsel %vm28_vm0, %v73_v52, 0.0  ;;  %v99_v55 = vsel %vm28_vm0, %v77_v53, 0.0 }
  0xa4   :  { %97 = vadd.xlane.f32.xlu1 %v96_v51  ;;  %88 = vadd.xlane.f32.xlu0 %v87_v54 }
  0xa8   :  { %100 = vadd.xlane.f32.xlu1 %v99_v55 }
 0x125   :  { %v80_v62 = vpop.xlane.xlu0 %79 }
 0x126   :  { %v102_v63 = vmul.f32 0.03125, %v80_v62 }
 0x128   :  { %v110_v0 = vadd.f32 1e-05, %v102_v63 }
 0x129   :  { %v92_v1 = vpop.xlane.xlu1 %91  ;;  %v83_v2 = vpop.xlane.xlu0 %82 }
 0x12a   :  { %377 = vrsqrt.f32 %v110_v0  ;;  %v106_v3 = vmul.f32 0.03125, %v92_v1  ;;  %v103_v4 = vmul.f32 0.03125, %v83_v2 }
 0x12c   :  { %v114_v5 = vadd.f32 1e-05, %v106_v3  ;;  %v111_v6 = vadd.f32 1e-05, %v103_v4 }
 0x12d   :  { %v95_v7 = vpop.xlane.xlu1 %94  ;;  %v86_v8 = vpop.xlane.xlu0 %85 }
 0x12e   :  { %379 = vrsqrt.f32 %v114_v5  ;;  %v107_v9 = vmul.f32 0.03125, %v95_v7  ;;  %v104_v10 = vmul.f32 0.03125, %v86_v8 }
 0x12f   :  { %381 = vrsqrt.f32 %v111_v6 }
 0x130   :  { %v115_v11 = vadd.f32 1e-05, %v107_v9  ;;  %v112_v12 = vadd.f32 1e-05, %v104_v10 }
 0x131   :  { %v98_v13 = vpop.xlane.xlu1 %97  ;;  %v89_v14 = vpop.xlane.xlu0 %88 }
 0x132   :  { %383 = vrsqrt.f32 %v115_v11  ;;  %v108_v15 = vmul.f32 0.03125, %v98_v13  ;;  %v105_v16 = vmul.f32 0.03125, %v89_v14 }
 0x133   :  { %385 = vrsqrt.f32 %v112_v12 }
 0x134   :  { %v378_v17 = vpop.eup %377  ;;  %v116_v18 = vadd.f32 1e-05, %v108_v15  ;;  %v113_v19 = vadd.f32 1e-05, %v105_v16 }
 0x135   :  { %v101_v23 = vpop.xlane.xlu1 %100  ;;  %v126_v24 = vmul.f32 %v378_v17, %v477_v20 }
 0x136   :  { %387 = vrsqrt.f32 %v116_v18  ;;  %v109_v25 = vmul.f32 0.03125, %v101_v23 }
 0x137   :  { %389 = vrsqrt.f32 %v113_v19  ;;  %v140_v27 = vmul.f32 %v320_v22, %v126_v24 }
 0x138   :  { %v380_v30 = vpop.eup %379  ;;  %v117_v31 = vadd.f32 1e-05, %v109_v25 }
 0x139   :  { %v382_v32 = vpop.eup %381  ;;  %v154_v33 = vadd.f32 %v321_v26, %v140_v27  ;;  %v130_v34 = vmul.f32 %v380_v30, %v485_v28 }
 0x13a   :  { %391 = vrsqrt.f32 %v117_v31  ;;  %v127_v35 = vmul.f32 %v382_v32, %v479_v21 }
 0x13b   :  { %350 = vmatprep.mubr.msk.f32.mxu0 %vm28_vm0, %v154_v33  ;;  %v144_v20 = vmul.f32 %v320_v22, %v130_v34 }
 0x13c   :  { %v384_v36 = vpop.eup %383  ;;  %v141_v37 = vmul.f32 %v320_v22, %v127_v35 }
 0x13d   :  { %v386_v40 = vpop.eup %385  ;;  %v158_v41 = vadd.f32 %v321_v26, %v144_v20  ;;  %v131_v42 = vmul.f32 %v384_v36, %v487_v29 }
 0x13e   :  { %v155_v43 = vadd.f32 %v321_v26, %v141_v37  ;;  %v128_v44 = vmul.f32 %v386_v40, %v495_v38 }
 0x13f   :  { %356 = vmatprep.mubr.msk.f32.mxu1 %vm28_vm0, %v158_v41  ;;  %v145_v45 = vmul.f32 %v320_v22, %v131_v42 }
 0x140   :  { %v388_v46 = vpop.eup %387  ;;  %351 = vmatmul.mubr.msk.f32.vlgmr.msra.gmra.mrb[0].mxu0 %vm28_vm0, %v155_v43  ;;  %v142_v28 = vmul.f32 %v320_v22, %v128_v44 }
 0x141   :  { %v390_v21 = vpop.eup %389  ;;  %v159_v47 = vadd.f32 %v321_v26, %v145_v45  ;;  %v132_v50 = vmul.f32 %v388_v46, %v497_v39 }
 0x142   :  { %v156_v51 = vadd.f32 %v321_v26, %v142_v28  ;;  %v129_v52 = vmul.f32 %v390_v21, %v505_v48 }
 0x143   :  { %357 = vmatmul.mubr.msk.f32.vlgmr.msra.gmra.mrb[0].mxu1 %vm28_vm0, %v159_v47  ;;  %v146_v29 = vmul.f32 %v320_v22, %v132_v50 }
 0x144   :  { %v392_v53 = vpop.eup %391  ;;  %353 = vmatprep.mubr.msk.f32.mxu0 %vm28_vm0, %v156_v51  ;;  %v143_v38 = vmul.f32 %v320_v22, %v129_v52 }
 0x145   :  { %v160_v54 = vadd.f32 %v321_v26, %v146_v29  ;;  %v133_v55 = vmul.f32 %v392_v53, %v507_v49 }
 0x146   :  { %v157_v56 = vadd.f32 %v321_v26, %v143_v38 }
 0x147   :  { %359 = vmatprep.mubr.msk.f32.mxu1 %vm28_vm0, %v160_v54  ;;  %v147_v57 = vmul.f32 %v320_v22, %v133_v55 }
 0x148   :  { %354 = vmatmul.mubr.msk.f32.gmra.mrb[2].mxu0 %vm28_vm0, %v157_v56 }
 0x149   :  { %v161_v39 = vadd.f32 %v321_v26, %v147_v57 }
 0x14b   :  { %360 = vmatmul.mubr.msk.f32.gmra.mrb[2].mxu1 %vm28_vm0, %v161_v39 }
 0x213   :  { %v352_v48 = vpop.f32.mrb[0].mxu0 }
 0x214   :  { %297 = vst.msk [vmem:[#allocation2 + $0x8] sm:$0xff] %vm295_vm1, %v352_v48  ;;  %v256_v58 = vpop.f32.mrb[1].mxu0 }
 0x215   :  { %296 = vst.msk [vmem:[#allocation2] sm:$0xff] %vm295_vm1, %v256_v58 }
 0x216   :  { %v358_v59 = vpop.f32.mrb[0].mxu1 }
 0x217   :  { %301 = vst.msk [vmem:[#allocation2 + $0x28] sm:$0xff] %vm295_vm1, %v358_v59  ;;  %v276_v49 = vpop.f32.mrb[1].mxu1 }
 0x218   :  { %300 = vst.msk [vmem:[#allocation2 + $0x20] sm:$0xff] %vm295_vm1, %v276_v49 }
 0x21b   :  { %v355_v60 = vpop.f32.mrb[2].mxu0 }
 0x21c   :  { %299 = vst.msk [vmem:[#allocation2 + $0x18] sm:$0xff] %vm295_vm1, %v355_v60  ;;  %v266_v61 = vpop.f32.mrb[3].mxu0 }
 0x21d   :  { %298 = vst.msk [vmem:[#allocation2 + $0x10] sm:$0xff] %vm295_vm1, %v266_v61 }
 0x21e   :  { %v361_v62 = vpop.f32.mrb[2].mxu1 }
 0x21f   :  { %303 = vst.msk [vmem:[#allocation2 + $0x38] sm:$0xff] %vm295_vm1, %v361_v62  ;;  %v286_v63 = vpop.f32.mrb[3].mxu1 }
 0x220   :  { %302 = vst.msk [vmem:[#allocation2 + $0x30] sm:$0xff] %vm295_vm1, %v286_v63 }
 0x221   :  { %404 = shalt.err (!%p401_p4)
}
 0x222   :  { %s405_s18 = scalar_lea.hbm %s575_s4, 1024 }
 0x223   :  { %p406_p5 = scmp.ne.s32.totalorder %s575_s4, %s405_s18  ;;  %p409_p6 = scmp.lt.u32.totalorder %s405_s18, %s575_s4 }
 0x225   :  { %p411_p7 = pnand %p409_p6, %p406_p5 }
 0x227   :  { %414 = shalt.err (!%p411_p7)
}
 0x228   :  { %s418_s23 = smov 128   ;;  %s419_s24 = smov 8  }
 0x229   :  { %315 = dma.vmem_to_hbm [thread:$0]  %s310_s2, 1024, %s575_s4, [#allocation3], %s418_s23, %s418_s23, %s419_s24  }
 0x22a   :  { %415 = dma.done.wait [#allocation3], 1024  }
 0x22b   :  { %416 = vsyncadd [#allocation3], 4294966272 }
 0x22c   :  { %319 = vsyncpa [#allocation3], 1 }

// kernel: gpt_forward.6
= control target key start
LH: loop header
LB: loop body
LE: loop exit
PB: predicated region body
PF: predicated region fallthrough
CT: control target
= control target key end

     0   :  { %vm84_vm0 = vcmask 261120   ;;  %vm11019_vm1 = vmmov 0   ;;  %vm957_vm2 = vcmask 64512   ;;  %s13133_s0 = inlined_call_operand.vmem [shape: f32[64,32], index: 0, kind: input, shape index: {}]   ;;  %s13134_s5 = inlined_call_operand.vmem [shape: f32[4,32,8], index: 5, kind: input, shape index: {}]   ;;  %s13135_s7 = inlined_call_operand.vmem [shape: f32[4,32,8], index: 7, kind: input, shape index: {}]   ;;  %s13136_s9 = inlined_call_operand.vmem [shape: f32[4,32,8], index: 9, kind: input, shape index: {}]   ;;  %s13137_s11 = inlined_call_operand.vmem [shape: f32[4,32,8], index: 11, kind: input, shape index: {}]   ;;  %s13138_s3 = inlined_call_operand.vmem [shape: f32[1,32], index: 3, kind: input, shape index: {}]   ;;  %s13139_s4 = inlined_call_operand.vmem [shape: f32[1,32], index: 4, kind: input, shape index: {}]   ;;  %s13140_s13 = inlined_call_operand.vmem [shape: f32[4,32,8], index: 13, kind: input, shape index: {}]   ;;  %s13141_s6 = inlined_call_operand.vmem [shape: f32[4,1,8], index: 6, kind: input, shape index: {}]   ;;  %s13142_s8 = inlined_call_operand.vmem [shape: f32[4,1,8], index: 8, kind: input, shape index: {}]   ;;  %s13143_s1 = inlined_call_operand.vmem [shape: f32[8,8], index: 1, kind: input, shape index: {}]   ;;  %s13144_s2 = inlined_call_operand.vmem [shape: f32[8,8], index: 2, kind: input, shape index: {}]   ;;  %s13145_s10 = inlined_call_operand.vmem [shape: f32[4,1,8], index: 10, kind: input, shape index: {}]   ;;  %s13146_s12 = inlined_call_operand.vmem [shape: f32[4,1,8], index: 12, kind: input, shape index: {}]   ;;  %s13147_s14 = inlined_call_operand.vmem [shape: f32[4,1,8], index: 14, kind: input, shape index: {}]   ;;  %s13148_s15 = inlined_call_operand.vmem [shape: f32[4,8,32], index: 15, kind: input, shape index: {}]   ;;  %s13149_s16 = inlined_call_operand.vmem [shape: f32[1,32], index: 16, kind: input, shape index: {}]   ;;  %s13150_s19 = inlined_call_operand.vmem [shape: f32[32,128], index: 19, kind: input, shape index: {}]   ;;  %s13151_s21 = inlined_call_operand.vmem [shape: f32[128,32], index: 21, kind: input, shape index: {}]   ;;  %s13152_s17 = inlined_call_operand.vmem [shape: f32[1,32], index: 17, kind: input, shape index: {}]   ;;  %s13153_s18 = inlined_call_operand.vmem [shape: f32[1,32], index: 18, kind: input, shape index: {}]   ;;  %s13154_s20 = inlined_call_operand.vmem [shape: f32[1,128], index: 20, kind: input, shape index: {}]   ;;  %s13155_s22 = inlined_call_operand.vmem [shape: f32[1,32], index: 22, kind: input, shape index: {}]   ;;  %s13156_s23 = inlined_call_operand.vmem [shape: f32[64,32], index: 23, kind: output, shape index: {}]  }
   0x1   :  { %13163 = sst [smem:[#allocation2_spill]] %s13133_s0 }
   0x2   :  { %13164 = sst [smem:[#allocation3_spill]] %s13134_s5  ;;  %s13171_s24 = sld [smem:[#allocation2_spill]] }
   0x3   :  { %13165 = sst [smem:[#allocation4_spill]] %s13135_s7  ;;  %s13172_s5 = sld [smem:[#allocation3_spill]] }
   0x4   :  { %13166 = sst [smem:[#allocation5_spill]] %s13136_s9 }
   0x5   :  { %13167 = sst [smem:[#allocation6_spill]] %s13137_s11  ;;  %s13174_s28 = sld [smem:[#allocation5_spill]] }
   0x6   :  { %13168 = sst [smem:[#allocation7_spill]] %s13138_s3  ;;  %s13175_s30 = sld [smem:[#allocation6_spill]] }
   0x7   :  { %13169 = sst [smem:[#allocation8_spill]] %s13139_s4  ;;  %s13176_s7 = sld [smem:[#allocation7_spill]] }
   0x8   :  { %13170 = sst [smem:[#allocation9_spill]] %s13140_s13  ;;  %v74_v0 = vld [vmem:[%s13171_s24] sm:$0xff]  ;;  %v76_v1 = vld [vmem:[%s13171_s24 + $0x10] sm:$0xff]  ;;  %v75_v2 = vld [vmem:[%s13171_s24 + $0x8] sm:$0xff]  ;;  %s13173_s13 = sld [smem:[#allocation4_spill]] }
   0x9   :  { %v85_v3 = vsel %vm84_vm0, %v74_v0, 0.0  ;;  %v91_v4 = vsel %vm84_vm0, %v76_v1, 0.0  ;;  %v77_v5 = vld [vmem:[%s13171_s24 + $0x18] sm:$0xff]  ;;  %v88_v6 = vsel %vm84_vm0, %v75_v2, 0.0  ;;  %v78_v8 = vld [vmem:[%s13171_s24 + $0x20] sm:$0xff]  ;;  %v79_v9 = vld [vmem:[%s13171_s24 + $0x28] sm:$0xff] }
   0xa   :  { %86 = vadd.xlane.f32.xlu0 %v85_v3  ;;  %92 = vadd.xlane.f32.xlu1 %v91_v4  ;;  %v94_v7 = vsel %vm84_vm0, %v77_v5, 0.0  ;;  %v97_v10 = vsel %vm84_vm0, %v78_v8, 0.0  ;;  %v100_v11 = vsel %vm84_vm0, %v79_v9, 0.0  ;;  %v80_v12 = vld [vmem:[%s13171_s24 + $0x30] sm:$0xff]  ;;  %v81_v13 = vld [vmem:[%s13171_s24 + $0x38] sm:$0xff]  ;;  %v220_v56 = vld [vmem:[%s13172_s5] sm:$0xff] }
   0xb   :  { %v103_v14 = vsel %vm84_vm0, %v80_v12, 0.0  ;;  %v106_v15 = vsel %vm84_vm0, %v81_v13, 0.0  ;;  %v221_v57 = vld [vmem:[%s13172_s5 + $0x8] sm:$0xff]  ;;  %v222_v62 = vld [vmem:[%s13172_s5 + $0x10] sm:$0xff]  ;;  %v223_v63 = vld [vmem:[%s13172_s5 + $0x18] sm:$0xff]  ;;  %s13177_s9 = sld [smem:[#allocation8_spill]] }
   0xc   :  { %v10604_v59 = vpack.c.bf16 %v221_v57, %v220_v56  ;;  %v260_v4 = vld [vmem:[%s13174_s28] sm:$0xff]  ;;  %s13178_s0 = sld [smem:[#allocation9_spill]] }
   0xe   :  { %89 = vadd.xlane.f32.xlu0 %v88_v6  ;;  %95 = vadd.xlane.f32.xlu1 %v94_v7  ;;  %v240_v58 = vld [vmem:[%s13173_s13] sm:$0xff]  ;;  %v241_v60 = vld [vmem:[%s13173_s13 + $0x8] sm:$0xff] }
   0xf   :  { %v10612_v61 = vpack.c.bf16 %v241_v60, %v240_v58  ;;  %10605 = vmatprep.subr.bf16.mxu0 %v10604_v59  ;;  %v280_v6 = vld [vmem:[%s13175_s30] sm:$0xff] }
  0x10   :  { %10607 = vmatpush3.bf16.msra.mxu0 %v10604_v59 }
  0x11   :  { %10613 = vmatprep.subr.bf16.mxu1 %v10612_v61 }
  0x12   :  { %98 = vadd.xlane.f32.xlu0 %v97_v10  ;;  %101 = vadd.xlane.f32.xlu1 %v100_v11 }
  0x13   :  { %10615 = vmatpush3.bf16.msra.mxu1 %v10612_v61 }
  0x16   :  { %104 = vadd.xlane.f32.xlu0 %v103_v14  ;;  %107 = vadd.xlane.f32.xlu1 %v106_v15 }
  0x97   :  { %v87_v16 = vpop.xlane.xlu0 %86  ;;  %v93_v17 = vpop.xlane.xlu1 %92 }
  0x98   :  { %v110_v18 = vmul.f32 0.03125, %v87_v16  ;;  %v112_v19 = vmul.f32 0.03125, %v93_v17 }
  0x9a   :  { %v11172_v20 = vsub.f32 %v74_v0, %v110_v18  ;;  %v11174_v21 = vsub.f32 %v76_v1, %v112_v19  ;;  %v242_v0 = vld [vmem:[%s13173_s13 + $0x10] sm:$0xff]  ;;  %v10608_v1 = vpack.c.bf16 %v223_v63, %v222_v62 }
  0x9b   :  { %v90_v22 = vpop.xlane.xlu0 %89  ;;  %v96_v23 = vpop.xlane.xlu1 %95 }
  0x9c   :  { %v111_v24 = vmul.f32 0.03125, %v90_v22  ;;  %v113_v25 = vmul.f32 0.03125, %v96_v23  ;;  %v126_v26 = vmul.f32 %v11172_v20, %v11172_v20  ;;  %v128_v27 = vmul.f32 %v11174_v21, %v11174_v21  ;;  %10609 = vmatprep.subr.bf16.mxu0 %v10608_v1 }
  0x9d   :  { %10611 = vmatpush3.bf16.msra.mxu0 %v10608_v1 }
  0x9e   :  { %v11180_v28 = vsub.f32 %v75_v2, %v111_v24  ;;  %v11182_v29 = vsub.f32 %v77_v5, %v113_v25  ;;  %v134_v30 = vsel %vm84_vm0, %v126_v26, 0.0  ;;  %v140_v33 = vsel %vm84_vm0, %v128_v27, 0.0  ;;  %v243_v2 = vld [vmem:[%s13173_s13 + $0x18] sm:$0xff]  ;;  %v261_v5 = vld [vmem:[%s13174_s28 + $0x8] sm:$0xff] }
  0x9f   :  { %135 = vadd.xlane.f32.xlu0 %v134_v30  ;;  %v99_v31 = vpop.xlane.xlu0 %98  ;;  %v102_v32 = vpop.xlane.xlu1 %101  ;;  %v10616_v3 = vpack.c.bf16 %v243_v2, %v242_v0  ;;  %v11245_v7 = vpack.c.bf16 %v261_v5, %v260_v4  ;;  %v300_v0 = vld [vmem:[%s13178_s0] sm:$0xff] }
  0xa0   :  { %v114_v34 = vmul.f32 0.03125, %v99_v31  ;;  %v115_v35 = vmul.f32 0.03125, %v102_v32  ;;  %v127_v36 = vmul.f32 %v11180_v28, %v11180_v28  ;;  %v129_v37 = vmul.f32 %v11182_v29, %v11182_v29 }
  0xa1   :  { %10617 = vmatprep.subr.bf16.mxu1 %v10616_v3  ;;  %10621 = vmatprep.subr.bf16.mxu0 %v11245_v7 }
  0xa2   :  { %v11190_v38 = vsub.f32 %v78_v8, %v114_v34  ;;  %v11192_v39 = vsub.f32 %v79_v9, %v115_v35  ;;  %v137_v40 = vsel %vm84_vm0, %v127_v36, 0.0  ;;  %v143_v43 = vsel %vm84_vm0, %v129_v37, 0.0  ;;  %10619 = vmatpush3.bf16.msra.mxu1 %v10616_v3  ;;  %v281_v8 = vld [vmem:[%s13175_s30 + $0x8] sm:$0xff]  ;;  %v11257_v34 = vld [vmem:[%s13176_s7] ss:$0 sm:$0xff] }
  0xa3   :  { %141 = vadd.xlane.f32.xlu0 %v140_v33  ;;  %138 = vadd.xlane.f32.xlu1 %v137_v40  ;;  %v105_v41 = vpop.xlane.xlu0 %104  ;;  %v108_v42 = vpop.xlane.xlu1 %107  ;;  %v11250_v9 = vpack.c.bf16 %v281_v8, %v280_v6 }
  0xa4   :  { %v116_v44 = vmul.f32 0.03125, %v105_v41  ;;  %v117_v45 = vmul.f32 0.03125, %v108_v42  ;;  %v130_v46 = vmul.f32 %v11190_v38, %v11190_v38  ;;  %v131_v47 = vmul.f32 %v11192_v39, %v11192_v39  ;;  %v11263_v41 = vld [vmem:[%s13177_s9] ss:$0 sm:$0xff] }
  0xa5   :  { %10629 = vmatprep.subr.bf16.mxu1 %v11250_v9 }
  0xa6   :  { %v11200_v48 = vsub.f32 %v80_v12, %v116_v44  ;;  %v11202_v49 = vsub.f32 %v81_v13, %v117_v45  ;;  %v146_v50 = vsel %vm84_vm0, %v130_v46, 0.0  ;;  %v149_v51 = vsel %vm84_vm0, %v131_v47, 0.0 }
  0xa7   :  { %144 = vadd.xlane.f32.xlu1 %v143_v43  ;;  %147 = vadd.xlane.f32.xlu0 %v146_v50 }
  0xa8   :  { %v132_v52 = vmul.f32 %v11200_v48, %v11200_v48  ;;  %v133_v53 = vmul.f32 %v11202_v49, %v11202_v49 }
  0xaa   :  { %v152_v54 = vsel %vm84_vm0, %v132_v52, 0.0  ;;  %v155_v55 = vsel %vm84_vm0, %v133_v53, 0.0  ;;  %v263_v53 = vld [vmem:[%s13174_s28 + $0x18] sm:$0xff] }
  0xab   :  { %150 = vadd.xlane.f32.xlu1 %v149_v51  ;;  %153 = vadd.xlane.f32.xlu0 %v152_v54  ;;  %v262_v51 = vld [vmem:[%s13174_s28 + $0x10] sm:$0xff] }
  0xac   :  { %v10624_v61 = vpack.c.bf16 %v263_v53, %v262_v51 }
  0xaf   :  { %156 = vadd.xlane.f32.xlu1 %v155_v55 }
 0x12c   :  { %v136_v10 = vpop.xlane.xlu0 %135 }
 0x12d   :  { %v158_v11 = vmul.f32 0.03125, %v136_v10 }
 0x12f   :  { %v166_v12 = vadd.f32 1e-05, %v158_v11 }
 0x130   :  { %v139_v13 = vpop.xlane.xlu1 %138  ;;  %v142_v14 = vpop.xlane.xlu0 %141 }
 0x131   :  { %10830 = vrsqrt.f32 %v166_v12  ;;  %v159_v15 = vmul.f32 0.03125, %v139_v13  ;;  %v160_v16 = vmul.f32 0.03125, %v142_v14  ;;  %v302_v13 = vld [vmem:[%s13178_s0 + $0x10] sm:$0xff]  ;;  %v303_v14 = vld [vmem:[%s13178_s0 + $0x18] sm:$0xff] }
 0x133   :  { %v167_v17 = vadd.f32 1e-05, %v159_v15  ;;  %v168_v18 = vadd.f32 1e-05, %v160_v16  ;;  %v10640_v15 = vpack.c.bf16 %v303_v14, %v302_v13  ;;  %v11018_v16 = vmov 0.0  }
 0x134   :  { %v145_v19 = vpop.xlane.xlu1 %144  ;;  %v148_v22 = vpop.xlane.xlu0 %147 }
 0x135   :  { %10832 = vrsqrt.f32 %v167_v17  ;;  %v161_v23 = vmul.f32 0.03125, %v145_v19  ;;  %v162_v24 = vmul.f32 0.03125, %v148_v22  ;;  %v9003_v17 = vld [vmem:[%s13141_s6] ss:$0 sm:$0xff] }
 0x136   :  { %10834 = vrsqrt.f32 %v168_v18  ;;  %v9012_v18 = vld [vmem:[%s13142_s8] ss:$0 sm:$0xff] }
 0x137   :  { %v169_v25 = vadd.f32 1e-05, %v161_v23  ;;  %v170_v26 = vadd.f32 1e-05, %v162_v24  ;;  %v11425_v19 = vld [vmem:[%s13143_s1] sm:$0xff] }
 0x138   :  { %v151_v27 = vpop.xlane.xlu1 %150  ;;  %v154_v30 = vpop.xlane.xlu0 %153  ;;  %v11430_v23 = vld [vmem:[%s13144_s2] sm:$0xff] }
 0x139   :  { %10836 = vrsqrt.f32 %v169_v25  ;;  %v163_v31 = vmul.f32 0.03125, %v151_v27  ;;  %v164_v32 = vmul.f32 0.03125, %v154_v30 }
 0x13a   :  { %10838 = vrsqrt.f32 %v170_v26 }
 0x13b   :  { %v10831_v33 = vpop.eup %10830  ;;  %v171_v35 = vadd.f32 1e-05, %v163_v31  ;;  %v172_v36 = vadd.f32 1e-05, %v164_v32 }
 0x13c   :  { %v182_v37 = vmul.f32 %v10831_v33, %v11172_v20  ;;  %v157_v40 = vpop.xlane.xlu1 %156 }
 0x13d   :  { %10840 = vrsqrt.f32 %v171_v35  ;;  %v165_v42 = vmul.f32 0.03125, %v157_v40 }
 0x13e   :  { %v196_v43 = vmul.f32 %v11257_v34, %v182_v37  ;;  %10842 = vrsqrt.f32 %v172_v36 }
 0x13f   :  { %v10833_v44 = vpop.eup %10832  ;;  %v173_v45 = vadd.f32 1e-05, %v165_v42 }
 0x140   :  { %v10835_v46 = vpop.eup %10834  ;;  %v11267_v47 = vadd.f32 %v11263_v41, %v196_v43  ;;  %v183_v50 = vmul.f32 %v10833_v44, %v11180_v28  ;;  %v283_v28 = vld [vmem:[%s13175_s30 + $0x18] sm:$0xff] }
 0x141   :  { %v184_v20 = vmul.f32 %v10835_v46, %v11174_v21  ;;  %10844 = vrsqrt.f32 %v173_v45  ;;  %v282_v21 = vld [vmem:[%s13175_s30 + $0x10] sm:$0xff] }
 0x142   :  { %v197_v52 = vmul.f32 %v11257_v34, %v183_v50  ;;  %9772 = vmatprep.mubr.msk.f32.mxu0 %vm84_vm0, %v11267_v47  ;;  %9792 = vmatprep.mubr.msk.f32.mxu1 %vm84_vm0, %v11267_v47  ;;  %v10632_v62 = vpack.c.bf16 %v283_v28, %v282_v21 }
 0x143   :  { %v10837_v54 = vpop.eup %10836  ;;  %v198_v55 = vmul.f32 %v11257_v34, %v184_v20 }
 0x144   :  { %v10839_v56 = vpop.eup %10838  ;;  %v11290_v57 = vadd.f32 %v11263_v41, %v197_v52  ;;  %v185_v58 = vmul.f32 %v10837_v54, %v11182_v29  ;;  %v301_v29 = vld [vmem:[%s13178_s0 + $0x8] sm:$0xff] }
 0x145   :  { %v11294_v59 = vadd.f32 %v11263_v41, %v198_v55  ;;  %v186_v60 = vmul.f32 %v10839_v56, %v11190_v38  ;;  %v10636_v8 = vpack.c.bf16 %v301_v29, %v300_v0 }
 0x146   :  { %v199_v63 = vmul.f32 %v11257_v34, %v185_v58  ;;  %9773 = vmatmul.mubr.msk.f32.vlgmr.msra.gmra.mrb[0].mxu0 %vm84_vm0, %v11290_v57  ;;  %9793 = vmatmul.mubr.msk.f32.vlgmr.msra.gmra.mrb[0].mxu1 %vm84_vm0, %v11290_v57 }
 0x147   :  { %v10841_v1 = vpop.eup %10840  ;;  %v200_v38 = vmul.f32 %v11257_v34, %v186_v60  ;;  %9775 = vmatprep.mubr.msk.f32.mxu0 %vm84_vm0, %v11294_v59  ;;  %9795 = vmatprep.mubr.msk.f32.mxu1 %vm84_vm0, %v11294_v59 }
 0x148   :  { %v10843_v2 = vpop.eup %10842  ;;  %v11314_v3 = vadd.f32 %v11263_v41, %v199_v63  ;;  %v187_v4 = vmul.f32 %v10841_v1, %v11192_v39  ;;  %10623 = vmatpush3.bf16.msra.mxu0 %v11245_v7  ;;  %10631 = vmatpush3.bf16.msra.mxu1 %v11250_v9 }
 0x149   :  { %v11320_v5 = vadd.f32 %v11263_v41, %v200_v38  ;;  %v188_v6 = vmul.f32 %v10843_v2, %v11200_v48  ;;  %10625 = vmatprep.subr.bf16.mxu0 %v10624_v61  ;;  %10633 = vmatprep.subr.bf16.mxu1 %v10632_v62 }
 0x14a   :  { %v201_v10 = vmul.f32 %v11257_v34, %v187_v4  ;;  %9776 = vmatmul.mubr.msk.f32.gmra.mrb[2].mxu0 %vm84_vm0, %v11314_v3  ;;  %9796 = vmatmul.mubr.msk.f32.gmra.mrb[2].mxu1 %vm84_vm0, %v11314_v3 }
 0x14b   :  { %v10845_v39 = vpop.eup %10844  ;;  %v202_v7 = vmul.f32 %v11257_v34, %v188_v6  ;;  %9778 = vmatprep.mubr.msk.f32.mxu0 %vm84_vm0, %v11320_v5  ;;  %9798 = vmatprep.mubr.msk.f32.mxu1 %vm84_vm0, %v11320_v5 }
 0x14c   :  { %v11334_v48 = vadd.f32 %v11263_v41, %v201_v10  ;;  %v189_v9 = vmul.f32 %v10845_v39, %v11202_v49  ;;  %10627 = vmatpush3.bf16.msra.mxu0 %v10624_v61  ;;  %10635 = vmatpush3.bf16.msra.mxu1 %v10632_v62 }
 0x14d   :  { %v11338_v11 = vadd.f32 %v11263_v41, %v202_v7  ;;  %10637 = vmatprep.subr.bf16.mxu0 %v10636_v8  ;;  %9864 = vmatprep.subr.mxu1 %v11018_v16 }
 0x14e   :  { %v203_v12 = vmul.f32 %v11257_v34, %v189_v9  ;;  %9779 = vmatmul.mubr.msk.f32.gmra.mrb[4].mxu0 %vm84_vm0, %v11334_v48  ;;  %9799 = vmatmul.mubr.msk.f32.gmra.mrb[4].mxu1 %vm84_vm0, %v11334_v48 }
 0x14f   :  { %9781 = vmatprep.mubr.msk.f32.mxu0 %vm84_vm0, %v11338_v11  ;;  %9801 = vmatprep.mubr.msk.f32.mxu1 %vm84_vm0, %v11338_v11 }
 0x150   :  { %v11350_v49 = vadd.f32 %v11263_v41, %v203_v12 }
 0x152   :  { %9782 = vmatmul.mubr.msk.f32.gmra.mrb[6].mxu0 %vm84_vm0, %v11350_v49  ;;  %9802 = vmatmul.mubr.msk.f32.gmra.mrb[6].mxu1 %vm84_vm0, %v11350_v49 }
 0x153   :  { %9812 = vmatprep.mubr.msk.f32.mxu0 %vm84_vm0, %v11267_v47  ;;  %9832 = vmatprep.mubr.msk.f32.mxu1 %vm84_vm0, %v11267_v47 }
 0x156   :  { %9813 = vmatmul.mubr.msk.f32.vlgmr.msra.gmra.mrb[8].mxu0 %vm84_vm0, %v11290_v57  ;;  %9833 = vmatmul.mubr.msk.f32.vlgmr.msra.gmra.mrb[8].mxu1 %vm84_vm0, %v11290_v57 }
 0x157   :  { %9815 = vmatprep.mubr.msk.f32.mxu0 %vm84_vm0, %v11294_v59  ;;  %9835 = vmatprep.mubr.msk.f32.mxu1 %vm84_vm0, %v11294_v59 }
 0x158   :  { %10639 = vmatpush3.bf16.msra.mxu0 %v10636_v8 }
 0x159   :  { %10641 = vmatprep.subr.bf16.mxu0 %v10640_v15 }
 0x15a   :  { %9816 = vmatmul.mubr.msk.f32.gmra.mrb[10].mxu0 %vm84_vm0, %v11314_v3  ;;  %9836 = vmatmul.mubr.msk.f32.gmra.mrb[10].mxu1 %vm84_vm0, %v11314_v3 }
 0x15b   :  { %9818 = vmatprep.mubr.msk.f32.mxu0 %vm84_vm0, %v11320_v5  ;;  %9838 = vmatprep.mubr.msk.f32.mxu1 %vm84_vm0, %v11320_v5 }
 0x15c   :  { %10643 = vmatpush3.bf16.msra.mxu0 %v10640_v15  ;;  %v11459_v15 = vld [vmem:[%s13145_s10] ss:$0 sm:$0xff] }
 0x15d   :  { %9884 = vmatprep.subr.mxu0 %v11018_v16 }
 0x15e   :  { %9819 = vmatmul.mubr.msk.f32.gmra.mrb[12].mxu0 %vm84_vm0, %v11334_v48  ;;  %9839 = vmatmul.mubr.msk.f32.gmra.mrb[12].mxu1 %vm84_vm0, %v11334_v48 }
 0x15f   :  { %9821 = vmatprep.mubr.msk.f32.mxu0 %vm84_vm0, %v11338_v11  ;;  %9841 = vmatprep.mubr.msk.f32.mxu1 %vm84_vm0, %v11338_v11 }
 0x162   :  { %9822 = vmatmul.mubr.msk.f32.gmra.mrb[14].mxu0 %vm84_vm0, %v11350_v49  ;;  %9842 = vmatmul.mubr.msk.f32.gmra.mrb[14].mxu1 %vm84_vm0, %v11350_v49 }
 0x163   :  { %9852 = vmatprep.mubr.msk.f32.mxu0 %vm84_vm0, %v11267_v47  ;;  %9866 = vmatprep.mubr.msk.f32.mxu1 %vm11019_vm1, %v11018_v16 }
 0x166   :  { %9853 = vmatmul.mubr.msk.f32.vlgmr.msra.gmra.mrb[16].mxu0 %vm84_vm0, %v11290_v57 }
 0x167   :  { %9855 = vmatprep.mubr.msk.f32.mxu0 %vm84_vm0, %v11294_v59 }
 0x16a   :  { %9856 = vmatmul.mubr.msk.f32.gmra.mrb[18].mxu0 %vm84_vm0, %v11314_v3 }
 0x16b   :  { %9858 = vmatprep.mubr.msk.f32.mxu0 %vm84_vm0, %v11320_v5 }
 0x16e   :  { %9859 = vmatmul.mubr.msk.f32.gmra.mrb[20].mxu0 %vm84_vm0, %v11334_v48 }
 0x16f   :  { %9861 = vmatprep.mubr.msk.f32.mxu0 %vm84_vm0, %v11338_v11 }
 0x172   :  { %9862 = vmatmul.mubr.msk.f32.gmra.mrb[22].mxu0 %vm84_vm0, %v11350_v49 }
 0x173   :  { %9886 = vmatprep.mubr.msk.f32.mxu0 %vm11019_vm1, %v11018_v16 }
 0x219   :  { %v9774_v22 = vpop.f32.mrb[0].mxu0  ;;  %v9794_v24 = vpop.f32.mrb[0].mxu1 }
 0x21a   :  { %v432_v25 = vadd.f32 %v9774_v22, %v9003_v17  ;;  %v543_v26 = vadd.f32 %v9794_v24, %v9012_v18  ;;  %v426_v27 = vpop.f32.mrb[1].mxu0  ;;  %v537_v30 = vpop.f32.mrb[1].mxu1  ;;  %v11464_v22 = vld [vmem:[%s13146_s12] ss:$0 sm:$0xff] }
 0x21b   :  { %v427_v31 = vadd.f32 %v9003_v17, %v426_v27  ;;  %v538_v32 = vadd.f32 %v9012_v18, %v537_v30 }
 0x21c   :  { %v910_v33 = vmul.f32 %v432_v25, %v11425_v19  ;;  %v918_v34 = vmul.f32 %v543_v26, %v11430_v23 }
 0x21d   :  { %v909_v35 = vmul.f32 %v427_v31, %v11425_v19  ;;  %v917_v36 = vmul.f32 %v538_v32, %v11430_v23  ;;  %v9777_v37 = vpop.f32.mrb[2].mxu0  ;;  %v9797_v40 = vpop.f32.mrb[2].mxu1 }
 0x21e   :  { %v11436_v41 = vadd.f32 %v918_v34, %v910_v33  ;;  %v442_v42 = vadd.f32 %v9777_v37, %v9003_v17  ;;  %v553_v43 = vadd.f32 %v9797_v40, %v9012_v18  ;;  %v436_v44 = vpop.f32.mrb[3].mxu0  ;;  %v547_v45 = vpop.f32.mrb[3].mxu1 }
 0x21f   :  { %v11438_v46 = vadd.f32 %v917_v36, %v909_v35  ;;  %v437_v50 = vadd.f32 %v9003_v17, %v436_v44  ;;  %v548_v20 = vadd.f32 %v9012_v18, %v547_v45 }
 0x220   :  { %v912_v51 = vmul.f32 %v442_v42, %v11425_v19  ;;  %v920_v52 = vmul.f32 %v553_v43, %v11430_v23 }
 0x221   :  { %v911_v53 = vmul.f32 %v437_v50, %v11425_v19  ;;  %v919_v21 = vmul.f32 %v548_v20, %v11430_v23  ;;  %v9780_v28 = vpop.f32.mrb[4].mxu0  ;;  %v9800_v54 = vpop.f32.mrb[4].mxu1 }
 0x222   :  { %v11444_v55 = vadd.f32 %v920_v52, %v912_v51  ;;  %v452_v56 = vadd.f32 %v9780_v28, %v9003_v17  ;;  %v563_v58 = vadd.f32 %v9800_v54, %v9012_v18  ;;  %v446_v60 = vpop.f32.mrb[5].mxu0  ;;  %v557_v61 = vpop.f32.mrb[5].mxu1 }
 0x223   :  { %v11446_v62 = vadd.f32 %v919_v21, %v911_v53  ;;  %v447_v63 = vadd.f32 %v9003_v17, %v446_v60  ;;  %v558_v0 = vadd.f32 %v9012_v18, %v557_v61 }
 0x224   :  { %v914_v29 = vmul.f32 %v452_v56, %v11425_v19  ;;  %v922_v1 = vmul.f32 %v563_v58, %v11430_v23 }
 0x225   :  { %v913_v38 = vmul.f32 %v447_v63, %v11425_v19  ;;  %v921_v2 = vmul.f32 %v558_v0, %v11430_v23  ;;  %v9783_v4 = vpop.f32.mrb[6].mxu0  ;;  %v9803_v6 = vpop.f32.mrb[6].mxu1 }
 0x226   :  { %v11452_v8 = vadd.f32 %v922_v1, %v914_v29  ;;  %v462_v10 = vadd.f32 %v9783_v4, %v9003_v17  ;;  %v573_v39 = vadd.f32 %v9803_v6, %v9012_v18  ;;  %v456_v7 = vpop.f32.mrb[7].mxu0  ;;  %v567_v9 = vpop.f32.mrb[7].mxu1 }
 0x227   :  { %v11454_v12 = vadd.f32 %v921_v2, %v913_v38  ;;  %v457_v13 = vadd.f32 %v9003_v17, %v456_v7  ;;  %v568_v14 = vadd.f32 %v9012_v18, %v567_v9 }
 0x228   :  { %v916_v24 = vmul.f32 %v462_v10, %v11425_v19  ;;  %v924_v25 = vmul.f32 %v573_v39, %v11430_v23 }
 0x229   :  { %v915_v26 = vmul.f32 %v457_v13, %v11425_v19  ;;  %v923_v27 = vmul.f32 %v568_v14, %v11430_v23  ;;  %v9814_v17 = vpop.f32.mrb[8].mxu0  ;;  %v9834_v18 = vpop.f32.mrb[8].mxu1 }
 0x22a   :  { %v11470_v30 = vadd.f32 %v924_v25, %v916_v24  ;;  %v654_v31 = vadd.f32 %v9814_v17, %v11459_v15  ;;  %v765_v32 = vadd.f32 %v9834_v18, %v11464_v22  ;;  %v648_v33 = vpop.f32.mrb[9].mxu0  ;;  %v759_v34 = vpop.f32.mrb[9].mxu1 }
 0x22b   :  { %v11474_v35 = vadd.f32 %v923_v27, %v915_v26  ;;  %v649_v36 = vadd.f32 %v11459_v15, %v648_v33  ;;  %v760_v37 = vadd.f32 %v11464_v22, %v759_v34 }
 0x22c   :  { %v934_v40 = vmul.f32 %v654_v31, %v11425_v19  ;;  %v942_v42 = vmul.f32 %v765_v32, %v11430_v23 }
 0x22d   :  { %v933_v43 = vmul.f32 %v649_v36, %v11425_v19  ;;  %v941_v44 = vmul.f32 %v760_v37, %v11430_v23  ;;  %v9817_v45 = vpop.f32.mrb[10].mxu0  ;;  %v9837_v50 = vpop.f32.mrb[10].mxu1 }
 0x22e   :  { %v950_v20 = vadd.f32 %v942_v42, %v934_v40  ;;  %v664_v51 = vadd.f32 %v9817_v45, %v11459_v15  ;;  %v775_v52 = vadd.f32 %v9837_v50, %v11464_v22  ;;  %v658_v53 = vpop.f32.mrb[11].mxu0  ;;  %v769_v21 = vpop.f32.mrb[11].mxu1 }
 0x22f   :  { %v949_v28 = vadd.f32 %v941_v44, %v933_v43  ;;  %v659_v54 = vadd.f32 %v11459_v15, %v658_v53  ;;  %v770_v56 = vadd.f32 %v11464_v22, %v769_v21 }
 0x230   :  { %v936_v58 = vmul.f32 %v664_v51, %v11425_v19  ;;  %v944_v60 = vmul.f32 %v775_v52, %v11430_v23 }
 0x231   :  { %v935_v61 = vmul.f32 %v659_v54, %v11425_v19  ;;  %v943_v63 = vmul.f32 %v770_v56, %v11430_v23  ;;  %v9820_v0 = vpop.f32.mrb[12].mxu0  ;;  %v9840_v29 = vpop.f32.mrb[12].mxu1  ;;  %9865 = vmatpush3.xpose.msk.msra.mxu1 %vm957_vm2, %v949_v28 }
 0x232   :  { %v952_v1 = vadd.f32 %v944_v60, %v936_v58  ;;  %v674_v38 = vadd.f32 %v9820_v0, %v11459_v15  ;;  %v785_v2 = vadd.f32 %v9840_v29, %v11464_v22  ;;  %v668_v4 = vpop.f32.mrb[13].mxu0  ;;  %v779_v6 = vpop.f32.mrb[13].mxu1  ;;  %9869 = vmatprep.subr.mxu1 %v11018_v16 }
 0x233   :  { %v951_v10 = vadd.f32 %v943_v63, %v935_v61  ;;  %v669_v39 = vadd.f32 %v11459_v15, %v668_v4  ;;  %v780_v7 = vadd.f32 %v11464_v22, %v779_v6 }
 0x234   :  { %v938_v9 = vmul.f32 %v674_v38, %v11425_v19  ;;  %v946_v13 = vmul.f32 %v785_v2, %v11430_v23  ;;  %9867 = vmatmul.mubr.msk.f32.vlgmr.msra.gmra.mrb[16].mxu1 %vm957_vm2, %v11438_v46 }
 0x235   :  { %v937_v14 = vmul.f32 %v669_v39, %v11425_v19  ;;  %v945_v24 = vmul.f32 %v780_v7, %v11430_v23  ;;  %v9823_v25 = vpop.f32.mrb[14].mxu0  ;;  %v9843_v26 = vpop.f32.mrb[14].mxu1  ;;  %9870 = vmatpush3.xpose.msk.msra.mxu1 %vm957_vm2, %v950_v20  ;;  %9871 = vmatprep.mubr.msk.f32.mxu1 %vm11019_vm1, %v11018_v16 }
 0x236   :  { %v954_v27 = vadd.f32 %v946_v13, %v938_v9  ;;  %v684_v17 = vadd.f32 %v9823_v25, %v11459_v15  ;;  %v795_v18 = vadd.f32 %v9843_v26, %v11464_v22  ;;  %v678_v31 = vpop.f32.mrb[15].mxu0  ;;  %v789_v32 = vpop.f32.mrb[15].mxu1  ;;  %9874 = vmatprep.subr.mxu1 %v11018_v16 }
 0x237   :  { %v953_v46 = vadd.f32 %v945_v24, %v937_v14  ;;  %v679_v33 = vadd.f32 %v11459_v15, %v678_v31  ;;  %v790_v34 = vadd.f32 %v11464_v22, %v789_v32 }
 0x238   :  { %v940_v36 = vmul.f32 %v684_v17, %v11425_v19  ;;  %v948_v37 = vmul.f32 %v795_v18, %v11430_v23  ;;  %9872 = vmatmul.mubr.msk.f32.vlgmr.msra.gmra.mrb[18].mxu1 %vm957_vm2, %v11436_v41  ;;  %v9039_v41 = vld [vmem:[%s13147_s14] ss:$0 sm:$0xff] }
 0x239   :  { %v939_v40 = vmul.f32 %v679_v33, %v11425_v19  ;;  %v947_v42 = vmul.f32 %v790_v34, %v11430_v23  ;;  %v9854_v43 = vpop.f32.mrb[16].mxu0  ;;  %9875 = vmatpush3.xpose.msk.msra.mxu1 %vm957_vm2, %v951_v10  ;;  %9885 = vmatpush3.xpose.msk.msra.mxu0 %vm957_vm2, %v953_v46 }
 0x23a   :  { %v956_v44 = vadd.f32 %v948_v37, %v940_v36  ;;  %v870_v15 = vpop.f32.mrb[17].mxu0  ;;  %9876 = vmatprep.mubr.msk.f32.mxu1 %vm11019_vm1, %v11018_v16  ;;  %9879 = vmatprep.subr.mxu1 %v11018_v16  ;;  %v876_v54 = vadd.f32 %v9854_v43, %v9039_v41 }
 0x23b   :  { %v955_v22 = vadd.f32 %v947_v42, %v939_v40  ;;  %9894 = vmatprep.subr.mxu0 %v11018_v16  ;;  %v871_v51 = vadd.f32 %v9039_v41, %v870_v15 }
 0x23c   :  { %9877 = vmatmul.mubr.msk.f32.vlgmr.msra.gmra.mrb[20].mxu1 %vm957_vm2, %v11446_v62  ;;  %9887 = vmatmul.mubr.msk.f32.vlgmr.msra.gmra.mrb[24].mxu0 %vm957_vm2, %v11454_v12 }
 0x23d   :  { %v9857_v45 = vpop.f32.mrb[18].mxu0  ;;  %9880 = vmatpush3.xpose.msk.msra.mxu1 %vm957_vm2, %v952_v1  ;;  %9895 = vmatpush3.xpose.msk.msra.mxu0 %vm957_vm2, %v955_v22 }
 0x23e   :  { %v11531_v50 = vadd.f32 %v9857_v45, %v9039_v41  ;;  %v880_v20 = vpop.f32.mrb[19].mxu0  ;;  %9881 = vmatprep.mubr.msk.f32.mxu1 %vm11019_vm1, %v11018_v16  ;;  %9896 = vmatprep.mubr.msk.f32.mxu0 %vm11019_vm1, %v11018_v16 }
 0x23f   :  { %v11537_v52 = vadd.f32 %v9039_v41, %v880_v20  ;;  %9889 = vmatprep.subr.mxu1 %v11018_v16  ;;  %9904 = vmatprep.subr.mxu0 %v11018_v16 }
 0x240   :  { %9882 = vmatmul.mubr.msk.f32.vlgmr.msra.gmra.mrb[22].mxu1 %vm957_vm2, %v11444_v55  ;;  %9897 = vmatmul.mubr.msk.f32.vlgmr.msra.gmra.mrb[26].mxu0 %vm957_vm2, %v11474_v35 }
 0x241   :  { %v9860_v62 = vpop.f32.mrb[20].mxu0  ;;  %9890 = vmatpush3.xpose.msk.msra.mxu1 %vm957_vm2, %v954_v27  ;;  %9905 = vmatpush3.msra.mxu0 %v871_v51 }
 0x242   :  { %v11546_v12 = vadd.f32 %v9860_v62, %v9039_v41  ;;  %v890_v53 = vpop.f32.mrb[21].mxu0  ;;  %9891 = vmatprep.mubr.msk.f32.mxu1 %vm11019_vm1, %v11018_v16  ;;  %9899 = vmatprep.subr.mxu1 %v11018_v16 }
 0x243   :  { %v11551_v21 = vadd.f32 %v9039_v41, %v890_v53  ;;  %9906 = vmatprep.mubr.msk.f32.mxu0 %vm11019_vm1, %v11018_v16  ;;  %9914 = vmatprep.subr.mxu0 %v11018_v16 }
 0x244   :  { %9892 = vmatmul.mubr.msk.f32.vlgmr.msra.gmra.mrb[24].mxu1 %vm957_vm2, %v11452_v8  ;;  %v325_v8 = vlaneseq }
 0x245   :  { %v9863_v55 = vpop.f32.mrb[22].mxu0  ;;  %9900 = vmatpush3.xpose.msk.msra.mxu1 %vm957_vm2, %v956_v44  ;;  %9901 = vmatprep.mubr.msk.f32.mxu1 %vm11019_vm1, %v11018_v16 }
 0x246   :  { %v11561_v35 = vadd.f32 %v9863_v55, %v9039_v41  ;;  %v900_v28 = vpop.f32.mrb[23].mxu0  ;;  %9909 = vmatprep.subr.mxu1 %v11018_v16  ;;  %v326_v58 = vshrl.u32 %v325_v8, 7  ;;  %v328_v60 = vand.u32 127, %v325_v8 }
 0x247   :  { %v11564_v56 = vadd.f32 %v9039_v41, %v900_v28 }
 0x248   :  { %9902 = vmatmul.mubr.msk.f32.vlgmr.msra.gmra.mrb[26].mxu1 %vm957_vm2, %v11470_v30  ;;  %vm11571_vm3 = vcmp.le.s32.totalorder %v328_v60, %v326_v58 }
 0x249   :  { %9910 = vmatpush3.msra.mxu1 %v876_v54  ;;  %9911 = vmatprep.mubr.msk.f32.mxu1 %vm11019_vm1, %v11018_v16 }
 0x24a   :  { %9919 = vmatprep.subr.mxu1 %v11018_v16 }
 0x307   :  { %v1030_v61 = vpop.f32.mrb[16].mxu1 }
 0x308   :  { %v1566_v0 = vmul.f32 0.35355338, %v1030_v61  ;;  %v9868_v29 = vpop.f32.mrb[17].mxu1 }
 0x30a   :  { %v1576_v1 = vsel %vm11571_vm3, %v1566_v0, -inf }
 0x30b   :  { %v1106_v30 = vpop.f32.mrb[18].mxu1  ;;  %v1584_v38 = vsel %vm957_vm2, %v1576_v1, -inf }
 0x30c   :  { %v1567_v2 = vmul.f32 0.35355338, %v1106_v30  ;;  %1585 = vmax.xlane.f32.xlu0 %v1584_v38  ;;  %v9873_v4 = vpop.f32.mrb[19].mxu1 }
 0x30e   :  { %v1577_v6 = vsel %vm11571_vm3, %v1567_v2, -inf }
 0x30f   :  { %v1182_v10 = vpop.f32.mrb[20].mxu1  ;;  %v1334_v39 = vpop.f32.mrb[24].mxu0  ;;  %v1587_v7 = vsel %vm957_vm2, %v1577_v6, -inf }
 0x310   :  { %v1568_v9 = vmul.f32 0.35355338, %v1182_v10  ;;  %v1570_v13 = vmul.f32 0.35355338, %v1334_v39  ;;  %v9888_v14 = vpop.f32.mrb[25].mxu0  ;;  %1588 = vmax.xlane.f32.xlu1 %v1587_v7  ;;  %v9878_v24 = vpop.f32.mrb[21].mxu1 }
 0x312   :  { %v1578_v25 = vsel %vm11571_vm3, %v1568_v9, -inf  ;;  %v1580_v18 = vsel %vm11571_vm3, %v1570_v13, -inf }
 0x313   :  { %v1258_v26 = vpop.f32.mrb[22].mxu1  ;;  %v1486_v27 = vpop.f32.mrb[26].mxu0  ;;  %v1590_v17 = vsel %vm957_vm2, %v1578_v25, -inf  ;;  %v1596_v37 = vsel %vm957_vm2, %v1580_v18, -inf }
 0x314   :  { %v1569_v31 = vmul.f32 0.35355338, %v1258_v26  ;;  %v1572_v32 = vmul.f32 0.35355338, %v1486_v27  ;;  %1591 = vmax.xlane.f32.xlu0 %v1590_v17  ;;  %v9883_v46 = vpop.f32.mrb[23].mxu1  ;;  %v9898_v33 = vpop.f32.mrb[27].mxu0 }
 0x316   :  { %v1579_v34 = vsel %vm11571_vm3, %v1569_v31, -inf  ;;  %v1582_v44 = vsel %vm11571_vm3, %v1572_v32, -inf }
 0x317   :  { %v1410_v36 = vpop.f32.mrb[24].mxu1  ;;  %v1593_v40 = vsel %vm957_vm2, %v1579_v34, -inf  ;;  %v1602_v45 = vsel %vm957_vm2, %v1582_v44, -inf }
 0x318   :  { %v1571_v42 = vmul.f32 0.35355338, %v1410_v36  ;;  %1597 = vmax.xlane.f32.xlu0 %v1596_v37  ;;  %1594 = vmax.xlane.f32.xlu1 %v1593_v40  ;;  %v9893_v43 = vpop.f32.mrb[25].mxu1 }
 0x31a   :  { %v1581_v15 = vsel %vm11571_vm3, %v1571_v42, -inf }
 0x31b   :  { %v1562_v22 = vpop.f32.mrb[26].mxu1  ;;  %v1599_v41 = vsel %vm957_vm2, %v1581_v15, -inf }
 0x31c   :  { %v1573_v20 = vmul.f32 0.35355338, %v1562_v22  ;;  %1600 = vmax.xlane.f32.xlu1 %v1599_v41  ;;  %v9903_v51 = vpop.f32.mrb[27].mxu1  ;;  %1603 = vmax.xlane.f32.xlu0 %v1602_v45 }
 0x31e   :  { %v1583_v62 = vsel %vm11571_vm3, %v1573_v20, -inf }
 0x31f   :  { %v1605_v53 = vsel %vm957_vm2, %v1583_v62, -inf }
 0x320   :  { %1606 = vmax.xlane.f32.xlu1 %v1605_v53 }
 0x399   :  { %v1586_v55 = vpop.xlane.xlu0 %1585 }
 0x39a   :  { %v1608_v28 = vsub.f32 %v1576_v1, %v1586_v55 }
 0x39c   :  { %v1616_v54 = vmul.f32 1.442695, %v1608_v28 }
 0x39d   :  { %v1589_v8 = vpop.xlane.xlu1 %1588 }
 0x39e   :  { %10846 = vpow2.f32 %v1616_v54  ;;  %v1609_v58 = vsub.f32 %v1577_v6, %v1589_v8 }
 0x3a0   :  { %v1618_v60 = vmul.f32 1.442695, %v1609_v58 }
 0x3a1   :  { %v1592_v61 = vpop.xlane.xlu0 %1591 }
 0x3a2   :  { %10848 = vpow2.f32 %v1618_v60  ;;  %v1610_v0 = vsub.f32 %v1578_v25, %v1592_v61 }
 0x3a4   :  { %v1620_v29 = vmul.f32 1.442695, %v1610_v0 }
 0x3a5   :  { %v1598_v30 = vpop.xlane.xlu0 %1597  ;;  %v1595_v38 = vpop.xlane.xlu1 %1594 }
 0x3a6   :  { %10850 = vpow2.f32 %v1620_v29  ;;  %v1612_v2 = vsub.f32 %v1580_v18, %v1598_v30  ;;  %v1611_v4 = vsub.f32 %v1579_v34, %v1595_v38  ;;  %v225_v29 = vld [vmem:[%s13172_s5 + $0x28] sm:$0xff] }
 0x3a8   :  { %v10847_v10 = vpop.eup %10846  ;;  %v1624_v39 = vmul.f32 1.442695, %v1612_v2  ;;  %v1622_v7 = vmul.f32 1.442695, %v1611_v4 }
 0x3a9   :  { %v1601_v9 = vpop.xlane.xlu1 %1600  ;;  %v1604_v13 = vpop.xlane.xlu0 %1603  ;;  %v1632_v1 = vsel %vm957_vm2, %v10847_v10, 0.0 }
 0x3aa   :  { %10852 = vpow2.f32 %v1624_v39  ;;  %v1613_v14 = vsub.f32 %v1581_v15, %v1601_v9  ;;  %v1614_v6 = vsub.f32 %v1582_v44, %v1604_v13  ;;  %1633 = vadd.xlane.f32.xlu0 %v1632_v1 }
 0x3ab   :  { %10854 = vpow2.f32 %v1622_v7  ;;  %v244_v7 = vld [vmem:[%s13173_s13 + $0x20] sm:$0xff] }
 0x3ac   :  { %v10849_v24 = vpop.eup %10848  ;;  %v1626_v25 = vmul.f32 1.442695, %v1613_v14  ;;  %v1628_v26 = vmul.f32 1.442695, %v1614_v6  ;;  %v246_v14 = vld [vmem:[%s13173_s13 + $0x30] sm:$0xff]  ;;  %v247_v6 = vld [vmem:[%s13173_s13 + $0x38] sm:$0xff] }
 0x3ad   :  { %v1607_v27 = vpop.xlane.xlu1 %1606  ;;  %v1635_v17 = vsel %vm957_vm2, %v10849_v24, 0.0 }
 0x3ae   :  { %10856 = vpow2.f32 %v1626_v25  ;;  %v1615_v18 = vsub.f32 %v1583_v62, %v1607_v27  ;;  %1636 = vadd.xlane.f32.xlu1 %v1635_v17  ;;  %v264_v25 = vld [vmem:[%s13174_s28 + $0x20] sm:$0xff] }
 0x3af   :  { %10858 = vpow2.f32 %v1628_v26  ;;  %v265_v26 = vld [vmem:[%s13174_s28 + $0x28] sm:$0xff] }
 0x3b0   :  { %v10851_v31 = vpop.eup %10850  ;;  %v1630_v32 = vmul.f32 1.442695, %v1615_v18  ;;  %v10656_v18 = vpack.c.bf16 %v247_v6, %v246_v14 }
 0x3b1   :  { %v1638_v46 = vsel %vm957_vm2, %v10851_v31, 0.0 }
 0x3b2   :  { %10860 = vpow2.f32 %v1630_v32  ;;  %1639 = vadd.xlane.f32.xlu0 %v1638_v46  ;;  %v266_v32 = vld [vmem:[%s13174_s28 + $0x30] sm:$0xff]  ;;  %v284_v46 = vld [vmem:[%s13175_s30 + $0x20] sm:$0xff] }
 0x3b4   :  { %v10853_v33 = vpop.eup %10852 }
 0x3b5   :  { %v10855_v34 = vpop.eup %10854  ;;  %v1644_v36 = vsel %vm957_vm2, %v10853_v33, 0.0 }
 0x3b6   :  { %v1641_v37 = vsel %vm957_vm2, %v10855_v34, 0.0  ;;  %1645 = vadd.xlane.f32.xlu0 %v1644_v36 }
 0x3b7   :  { %1642 = vadd.xlane.f32.xlu1 %v1641_v37  ;;  %v304_v37 = vld [vmem:[%s13178_s0 + $0x20] sm:$0xff] }
 0x3b8   :  { %v10857_v40 = vpop.eup %10856 }
 0x3b9   :  { %v11604_v42 = vpop.eup %10858  ;;  %v1647_v43 = vsel %vm957_vm2, %v10857_v40, 0.0 }
 0x3ba   :  { %v1650_v44 = vsel %vm957_vm2, %v11604_v42, 0.0 }
 0x3bb   :  { %1648 = vadd.xlane.f32.xlu1 %v1647_v43  ;;  %1651 = vadd.xlane.f32.xlu0 %v1650_v44  ;;  %v287_v43 = vld [vmem:[%s13175_s30 + $0x38] sm:$0xff] }
 0x3bc   :  { %v11609_v15 = vpop.eup %10860 }
 0x3bd   :  { %v1653_v22 = vsel %vm957_vm2, %v11609_v15, 0.0 }
 0x3bf   :  { %1654 = vadd.xlane.f32.xlu1 %v1653_v22  ;;  %v306_v22 = vld [vmem:[%s13178_s0 + $0x30] sm:$0xff] }
 0x437   :  { %v1634_v41 = vpop.xlane.xlu0 %1633 }
 0x438   :  { %10862 = vrcp.f32 %v1634_v41  ;;  %v307_v41 = vld [vmem:[%s13178_s0 + $0x38] sm:$0xff] }
 0x43b   :  { %v1637_v45 = vpop.xlane.xlu1 %1636 }
 0x43c   :  { %10864 = vrcp.f32 %v1637_v45  ;;  %v10680_v45 = vpack.c.bf16 %v307_v41, %v306_v22 }
 0x43f   :  { %v1640_v20 = vpop.xlane.xlu0 %1639 }
 0x440   :  { %10866 = vrcp.f32 %v1640_v20 }
 0x442   :  { %v10863_v51 = vpop.eup %10862 }
 0x443   :  { %v1657_v62 = vmul.f32 %v10863_v51, %v10847_v10  ;;  %v1646_v53 = vpop.xlane.xlu0 %1645  ;;  %v227_v10 = vld [vmem:[%s13172_s5 + $0x38] sm:$0xff] }
 0x444   :  { %v1643_v55 = vpop.xlane.xlu1 %1642  ;;  %10868 = vrcp.f32 %v1646_v53 }
 0x445   :  { %10870 = vrcp.f32 %v1643_v55  ;;  %9907 = vmatmul.mubr.msk.f32.vlgmr.msra.gmra.mrb[28].mxu0 %vm957_vm2, %v1657_v62 }
 0x446   :  { %v10865_v28 = vpop.eup %10864  ;;  %9915 = vmatpush3.msra.mxu0 %v11537_v52  ;;  %9916 = vmatprep.mubr.msk.f32.mxu0 %vm11019_vm1, %v11018_v16 }
 0x447   :  { %v1659_v54 = vmul.f32 %v10865_v28, %v10849_v24  ;;  %9924 = vmatprep.subr.mxu0 %v11018_v16 }
 0x448   :  { %v1649_v8 = vpop.xlane.xlu1 %1648  ;;  %v1652_v58 = vpop.xlane.xlu0 %1651 }
 0x449   :  { %10872 = vrcp.f32 %v1649_v8  ;;  %9912 = vmatmul.mubr.msk.f32.vlgmr.msra.gmra.mrb[28].mxu1 %vm957_vm2, %v1659_v54 }
 0x44a   :  { %v10867_v60 = vpop.eup %10866  ;;  %10874 = vrcp.f32 %v1652_v58  ;;  %9920 = vmatpush3.msra.mxu1 %v11531_v50  ;;  %9921 = vmatprep.mubr.msk.f32.mxu1 %vm11019_vm1, %v11018_v16  ;;  %v224_v50 = vld [vmem:[%s13172_s5 + $0x20] sm:$0xff] }
 0x44b   :  { %v1661_v61 = vmul.f32 %v10867_v60, %v10851_v31  ;;  %9929 = vmatprep.subr.mxu1 %v11018_v16  ;;  %v10644_v4 = vpack.c.bf16 %v225_v29, %v224_v50  ;;  %v10660_v31 = vpack.c.bf16 %v265_v26, %v264_v25 }
 0x44c   :  { %v1655_v52 = vpop.xlane.xlu1 %1654 }
 0x44d   :  { %10876 = vrcp.f32 %v1655_v52  ;;  %9917 = vmatmul.mubr.msk.f32.vlgmr.msra.gmra.mrb[30].mxu0 %vm957_vm2, %v1661_v61 }
 0x44e   :  { %v10869_v0 = vpop.eup %10868  ;;  %9925 = vmatpush3.msra.mxu0 %v11551_v21  ;;  %9926 = vmatprep.mubr.msk.f32.mxu0 %vm11019_vm1, %v11018_v16  ;;  %v226_v21 = vld [vmem:[%s13172_s5 + $0x30] sm:$0xff] }
 0x44f   :  { %v10871_v30 = vpop.eup %10870  ;;  %v1665_v38 = vmul.f32 %v10869_v0, %v10853_v33  ;;  %9934 = vmatprep.subr.mxu0 %v11018_v16  ;;  %v10648_v1 = vpack.c.bf16 %v227_v10, %v226_v21  ;;  %v285_v33 = vld [vmem:[%s13175_s30 + $0x28] sm:$0xff]  ;;  %v9081_v21 = vld [vmem:[%s13142_s8 + $0x1] ss:$0 sm:$0xff] }
 0x450   :  { %v1663_v2 = vmul.f32 %v10871_v30, %v10855_v34  ;;  %v10668_v36 = vpack.c.bf16 %v285_v33, %v284_v46 }
 0x451   :  { %9927 = vmatmul.mubr.msk.f32.vlgmr.msra.gmra.mrb[32].mxu0 %vm957_vm2, %v1665_v38  ;;  %v9072_v38 = vld [vmem:[%s13141_s6 + $0x1] ss:$0 sm:$0xff] }
 0x452   :  { %9922 = vmatmul.mubr.msk.f32.vlgmr.msra.gmra.mrb[30].mxu1 %vm957_vm2, %v1663_v2  ;;  %9935 = vmatpush3.msra.mxu0 %v11564_v56  ;;  %v245_v56 = vld [vmem:[%s13173_s13 + $0x28] sm:$0xff] }
 0x453   :  { %v10873_v39 = vpop.eup %10872  ;;  %9930 = vmatpush3.msra.mxu1 %v11546_v12  ;;  %9931 = vmatprep.mubr.msk.f32.mxu1 %vm11019_vm1, %v11018_v16  ;;  %v10652_v24 = vpack.c.bf16 %v245_v56, %v244_v7 }
 0x454   :  { %v10875_v9 = vpop.eup %10874  ;;  %v1667_v13 = vmul.f32 %v10873_v39, %v10857_v40  ;;  %9936 = vmatprep.mubr.msk.f32.mxu0 %vm11019_vm1, %v11018_v16  ;;  %9939 = vmatprep.subr.mxu1 %v11018_v16  ;;  %v305_v40 = vld [vmem:[%s13178_s0 + $0x28] sm:$0xff] }
 0x455   :  { %v1669_v12 = vmul.f32 %v10875_v9, %v11604_v42  ;;  %10645 = vmatprep.subr.bf16.mxu0 %v10644_v4  ;;  %v286_v42 = vld [vmem:[%s13175_s30 + $0x30] sm:$0xff]  ;;  %v10676_v44 = vpack.c.bf16 %v305_v40, %v304_v37 }
 0x456   :  { %9932 = vmatmul.mubr.msk.f32.vlgmr.msra.gmra.mrb[32].mxu1 %vm957_vm2, %v1667_v13 }
 0x457   :  { %v10877_v27 = vpop.eup %10876  ;;  %9937 = vmatmul.mubr.msk.f32.vlgmr.msra.gmra.mrb[34].mxu0 %vm957_vm2, %v1669_v12  ;;  %9940 = vmatpush3.msra.mxu1 %v11561_v35  ;;  %v267_v35 = vld [vmem:[%s13174_s28 + $0x38] sm:$0xff] }
 0x458   :  { %v1671_v17 = vmul.f32 %v10877_v27, %v11609_v15  ;;  %10647 = vmatpush3.bf16.msra.mxu0 %v10644_v4  ;;  %9952 = vmatprep.mubr.msk.f32.mxu0 %vm84_vm0, %v11267_v47  ;;  %v10664_v34 = vpack.c.bf16 %v267_v35, %v266_v32  ;;  %v10672_v15 = vpack.c.bf16 %v287_v43, %v286_v42 }
 0x459   :  { %9941 = vmatprep.mubr.msk.f32.mxu1 %vm11019_vm1, %v11018_v16  ;;  %10649 = vmatprep.subr.bf16.mxu0 %v10648_v1 }
 0x45a   :  { %10653 = vmatprep.subr.bf16.mxu1 %v10652_v24  ;;  %9942 = vmatmul.mubr.msk.f32.vlgmr.msra.gmra.mrb[34].mxu1 %vm957_vm2, %v1671_v17 }
 0x45b   :  { %10655 = vmatpush3.bf16.msra.mxu1 %v10652_v24  ;;  %9972 = vmatprep.mubr.msk.f32.mxu1 %vm84_vm0, %v11267_v47 }
 0x45c   :  { %10651 = vmatpush3.bf16.msra.mxu0 %v10648_v1  ;;  %10657 = vmatprep.subr.bf16.mxu1 %v10656_v18 }
 0x45d   :  { %10661 = vmatprep.subr.bf16.mxu0 %v10660_v31 }
 0x45f   :  { %9953 = vmatmul.mubr.msk.f32.vlgmr.msra.gmra.mrb[36].mxu0 %vm84_vm0, %v11290_v57  ;;  %10659 = vmatpush3.bf16.msra.mxu1 %v10656_v18 }
 0x460   :  { %9955 = vmatprep.mubr.msk.f32.mxu0 %vm84_vm0, %v11294_v59  ;;  %10663 = vmatpush3.bf16.msra.mxu0 %v10660_v31 }
 0x461   :  { %10665 = vmatprep.subr.bf16.mxu0 %v10664_v34  ;;  %10669 = vmatprep.subr.bf16.mxu1 %v10668_v36 }
 0x462   :  { %9973 = vmatmul.mubr.msk.f32.vlgmr.msra.gmra.mrb[36].mxu1 %vm84_vm0, %v11290_v57 }
 0x463   :  { %9956 = vmatmul.mubr.msk.f32.gmra.mrb[38].mxu0 %vm84_vm0, %v11314_v3  ;;  %9975 = vmatprep.mubr.msk.f32.mxu1 %vm84_vm0, %v11294_v59 }
 0x464   :  { %9958 = vmatprep.mubr.msk.f32.mxu0 %vm84_vm0, %v11320_v5  ;;  %10667 = vmatpush3.bf16.msra.mxu0 %v10664_v34 }
 0x465   :  { %10671 = vmatpush3.bf16.msra.mxu1 %v10668_v36  ;;  %10677 = vmatprep.subr.bf16.mxu0 %v10676_v44 }
 0x466   :  { %9976 = vmatmul.mubr.msk.f32.gmra.mrb[38].mxu1 %vm84_vm0, %v11314_v3  ;;  %10673 = vmatprep.subr.bf16.mxu1 %v10672_v15 }
 0x467   :  { %9959 = vmatmul.mubr.msk.f32.gmra.mrb[40].mxu0 %vm84_vm0, %v11334_v48  ;;  %9978 = vmatprep.mubr.msk.f32.mxu1 %vm84_vm0, %v11320_v5 }
 0x468   :  { %9961 = vmatprep.mubr.msk.f32.mxu0 %vm84_vm0, %v11338_v11 }
 0x469   :  { %10675 = vmatpush3.bf16.msra.mxu1 %v10672_v15 }
 0x46a   :  { %9979 = vmatmul.mubr.msk.f32.gmra.mrb[40].mxu1 %vm84_vm0, %v11334_v48  ;;  %10044 = vmatprep.subr.mxu1 %v11018_v16 }
 0x46b   :  { %9962 = vmatmul.mubr.msk.f32.gmra.mrb[42].mxu0 %vm84_vm0, %v11350_v49  ;;  %9981 = vmatprep.mubr.msk.f32.mxu1 %vm84_vm0, %v11338_v11 }
 0x46c   :  { %9992 = vmatprep.mubr.msk.f32.mxu0 %vm84_vm0, %v11267_v47 }
 0x46e   :  { %9982 = vmatmul.mubr.msk.f32.gmra.mrb[42].mxu1 %vm84_vm0, %v11350_v49 }
 0x46f   :  { %9993 = vmatmul.mubr.msk.f32.vlgmr.msra.gmra.mrb[44].mxu0 %vm84_vm0, %v11290_v57  ;;  %10012 = vmatprep.mubr.msk.f32.mxu1 %vm84_vm0, %v11267_v47 }
 0x470   :  { %9995 = vmatprep.mubr.msk.f32.mxu0 %vm84_vm0, %v11294_v59  ;;  %10679 = vmatpush3.bf16.msra.mxu0 %v10676_v44 }
 0x471   :  { %10681 = vmatprep.subr.bf16.mxu0 %v10680_v45 }
 0x472   :  { %10013 = vmatmul.mubr.msk.f32.vlgmr.msra.gmra.mrb[44].mxu1 %vm84_vm0, %v11290_v57 }
 0x473   :  { %9996 = vmatmul.mubr.msk.f32.gmra.mrb[46].mxu0 %vm84_vm0, %v11314_v3  ;;  %10015 = vmatprep.mubr.msk.f32.mxu1 %vm84_vm0, %v11294_v59 }
 0x474   :  { %9998 = vmatprep.mubr.msk.f32.mxu0 %vm84_vm0, %v11320_v5  ;;  %10683 = vmatpush3.bf16.msra.mxu0 %v10680_v45 }
 0x475   :  { %10064 = vmatprep.subr.mxu0 %v11018_v16 }
 0x476   :  { %10016 = vmatmul.mubr.msk.f32.gmra.mrb[46].mxu1 %vm84_vm0, %v11314_v3 }
 0x477   :  { %9999 = vmatmul.mubr.msk.f32.gmra.mrb[48].mxu0 %vm84_vm0, %v11334_v48  ;;  %10018 = vmatprep.mubr.msk.f32.mxu1 %vm84_vm0, %v11320_v5 }
 0x478   :  { %10001 = vmatprep.mubr.msk.f32.mxu0 %vm84_vm0, %v11338_v11 }
 0x47a   :  { %10019 = vmatmul.mubr.msk.f32.gmra.mrb[48].mxu1 %vm84_vm0, %v11334_v48 }
 0x47b   :  { %10002 = vmatmul.mubr.msk.f32.gmra.mrb[50].mxu0 %vm84_vm0, %v11350_v49  ;;  %10021 = vmatprep.mubr.msk.f32.mxu1 %vm84_vm0, %v11338_v11 }
 0x47c   :  { %10032 = vmatprep.mubr.msk.f32.mxu0 %vm84_vm0, %v11267_v47 }
 0x47e   :  { %10022 = vmatmul.mubr.msk.f32.gmra.mrb[50].mxu1 %vm84_vm0, %v11350_v49 }
 0x47f   :  { %10033 = vmatmul.mubr.msk.f32.vlgmr.msra.gmra.mrb[52].mxu0 %vm84_vm0, %v11290_v57  ;;  %10046 = vmatprep.mubr.msk.f32.mxu1 %vm11019_vm1, %v11018_v16 }
 0x480   :  { %10035 = vmatprep.mubr.msk.f32.mxu0 %vm84_vm0, %v11294_v59 }
 0x483   :  { %10036 = vmatmul.mubr.msk.f32.gmra.mrb[54].mxu0 %vm84_vm0, %v11314_v3 }
 0x484   :  { %10038 = vmatprep.mubr.msk.f32.mxu0 %vm84_vm0, %v11320_v5 }
 0x487   :  { %10039 = vmatmul.mubr.msk.f32.gmra.mrb[56].mxu0 %vm84_vm0, %v11334_v48 }
 0x488   :  { %10041 = vmatprep.mubr.msk.f32.mxu0 %vm84_vm0, %v11338_v11 }
 0x48b   :  { %10042 = vmatmul.mubr.msk.f32.gmra.mrb[58].mxu0 %vm84_vm0, %v11350_v49 }
 0x48c   :  { %10066 = vmatprep.mubr.msk.f32.mxu0 %vm11019_vm1, %v11018_v16 }
 0x518   :  { %v11791_v20 = vpop.f32.mrb[28].mxu0 }
 0x519   :  { %v9908_v51 = vpop.f32.mrb[29].mxu0 }
 0x51c   :  { %v11793_v62 = vpop.f32.mrb[28].mxu1 }
 0x51d   :  { %v9913_v53 = vpop.f32.mrb[29].mxu1 }
 0x520   :  { %v11795_v55 = vpop.f32.mrb[30].mxu0 }
 0x521   :  { %v9918_v28 = vpop.f32.mrb[31].mxu0 }
 0x524   :  { %v11797_v54 = vpop.f32.mrb[32].mxu0 }
 0x525   :  { %v11799_v8 = vpop.f32.mrb[30].mxu1  ;;  %v9928_v58 = vpop.f32.mrb[33].mxu0 }
 0x526   :  { %v9923_v60 = vpop.f32.mrb[31].mxu1 }
 0x529   :  { %v11801_v61 = vpop.f32.mrb[32].mxu1 }
 0x52a   :  { %v11803_v52 = vpop.f32.mrb[34].mxu0  ;;  %v9933_v0 = vpop.f32.mrb[33].mxu1 }
 0x52b   :  { %v9938_v50 = vpop.f32.mrb[35].mxu0 }
 0x52d   :  { %v11805_v29 = vpop.f32.mrb[34].mxu1 }
 0x52e   :  { %v9943_v30 = vpop.f32.mrb[35].mxu1 }
 0x532   :  { %v9954_v2 = vpop.f32.mrb[36].mxu0 }
 0x533   :  { %v2328_v4 = vpop.f32.mrb[37].mxu0  ;;  %v2334_v10 = vadd.f32 %v9954_v2, %v9072_v38 }
 0x534   :  { %v2329_v39 = vadd.f32 %v9072_v38, %v2328_v4 }
 0x535   :  { %v9974_v7 = vpop.f32.mrb[36].mxu1  ;;  %v2812_v14 = vmul.f32 %v2334_v10, %v11425_v19 }
 0x536   :  { %v9957_v56 = vpop.f32.mrb[38].mxu0  ;;  %v2445_v9 = vadd.f32 %v9974_v7, %v9081_v21  ;;  %v2439_v13 = vpop.f32.mrb[37].mxu1  ;;  %v2811_v25 = vmul.f32 %v2329_v39, %v11425_v19  ;;  %v9090_v39 = vld [vmem:[%s13145_s10 + $0x1] ss:$0 sm:$0xff] }
 0x537   :  { %v2338_v12 = vpop.f32.mrb[39].mxu0  ;;  %v2440_v1 = vadd.f32 %v9081_v21, %v2439_v13  ;;  %v2344_v6 = vadd.f32 %v9957_v56, %v9072_v38 }
 0x538   :  { %v2820_v24 = vmul.f32 %v2445_v9, %v11430_v23  ;;  %v2339_v26 = vadd.f32 %v9072_v38, %v2338_v12 }
 0x539   :  { %v2819_v27 = vmul.f32 %v2440_v1, %v11430_v23  ;;  %v9977_v17 = vpop.f32.mrb[38].mxu1  ;;  %v2814_v36 = vmul.f32 %v2344_v6, %v11425_v19 }
 0x53a   :  { %v11817_v18 = vadd.f32 %v2820_v24, %v2812_v14  ;;  %v9960_v31 = vpop.f32.mrb[40].mxu0  ;;  %v2455_v32 = vadd.f32 %v9977_v17, %v9081_v21  ;;  %v2449_v35 = vpop.f32.mrb[39].mxu1  ;;  %v2813_v42 = vmul.f32 %v2339_v26, %v11425_v19 }
 0x53b   :  { %v11819_v46 = vadd.f32 %v2819_v27, %v2811_v25  ;;  %v2348_v33 = vpop.f32.mrb[41].mxu0  ;;  %v2450_v34 = vadd.f32 %v9081_v21, %v2449_v35  ;;  %v2354_v37 = vadd.f32 %v9960_v31, %v9072_v38 }
 0x53c   :  { %v2822_v40 = vmul.f32 %v2455_v32, %v11430_v23  ;;  %v2349_v43 = vadd.f32 %v9072_v38, %v2348_v33 }
 0x53d   :  { %v2821_v44 = vmul.f32 %v2450_v34, %v11430_v23  ;;  %v9980_v15 = vpop.f32.mrb[40].mxu1  ;;  %v2816_v60 = vmul.f32 %v2354_v37, %v11425_v19 }
 0x53e   :  { %v11825_v22 = vadd.f32 %v2822_v40, %v2814_v36  ;;  %v9963_v41 = vpop.f32.mrb[42].mxu0  ;;  %v2465_v45 = vadd.f32 %v9980_v15, %v9081_v21  ;;  %v2459_v51 = vpop.f32.mrb[41].mxu1  ;;  %v2815_v30 = vmul.f32 %v2349_v43, %v11425_v19  ;;  %v11858_v40 = vld [vmem:[%s13143_s1] sm:$0xff] }
 0x53f   :  { %v11827_v53 = vadd.f32 %v2821_v44, %v2813_v42  ;;  %v2358_v28 = vpop.f32.mrb[43].mxu0  ;;  %v2460_v58 = vadd.f32 %v9081_v21, %v2459_v51  ;;  %v2364_v0 = vadd.f32 %v9963_v41, %v9072_v38  ;;  %v11864_v42 = vld [vmem:[%s13144_s2] sm:$0xff] }
 0x540   :  { %v2824_v50 = vmul.f32 %v2465_v45, %v11430_v23  ;;  %v2359_v2 = vadd.f32 %v9072_v38, %v2358_v28  ;;  %v11843_v38 = vld [vmem:[%s13146_s12 + $0x1] ss:$0 sm:$0xff] }
 0x541   :  { %v2823_v4 = vmul.f32 %v2460_v58, %v11430_v23  ;;  %v9983_v10 = vpop.f32.mrb[42].mxu1  ;;  %v2818_v6 = vmul.f32 %v2364_v0, %v11425_v19 }
 0x542   :  { %v11836_v7 = vadd.f32 %v2824_v50, %v2816_v60  ;;  %v2475_v56 = vadd.f32 %v9983_v10, %v9081_v21  ;;  %v9994_v9 = vpop.f32.mrb[44].mxu0  ;;  %v2469_v13 = vpop.f32.mrb[43].mxu1  ;;  %v2817_v26 = vmul.f32 %v2359_v2, %v11425_v19 }
 0x543   :  { %v11838_v12 = vadd.f32 %v2823_v4, %v2815_v30  ;;  %v2470_v1 = vadd.f32 %v9081_v21, %v2469_v13  ;;  %v2550_v14 = vpop.f32.mrb[45].mxu0  ;;  %v2556_v25 = vadd.f32 %v9994_v9, %v9090_v39 }
 0x544   :  { %v2826_v24 = vmul.f32 %v2475_v56, %v11430_v23  ;;  %v2551_v17 = vadd.f32 %v9090_v39, %v2550_v14 }
 0x545   :  { %v2825_v27 = vmul.f32 %v2470_v1, %v11430_v23  ;;  %v10014_v31 = vpop.f32.mrb[44].mxu1  ;;  %v2836_v19 = vmul.f32 %v11858_v40, %v2556_v25 }
 0x546   :  { %v11849_v32 = vadd.f32 %v2826_v24, %v2818_v6  ;;  %v9997_v21 = vpop.f32.mrb[46].mxu0  ;;  %v2667_v35 = vadd.f32 %v10014_v31, %v11843_v38  ;;  %v2661_v33 = vpop.f32.mrb[45].mxu1  ;;  %v2835_v44 = vmul.f32 %v11858_v40, %v2551_v17 }
 0x547   :  { %v11852_v34 = vadd.f32 %v2825_v27, %v2817_v26  ;;  %v2560_v36 = vpop.f32.mrb[47].mxu0  ;;  %v2662_v37 = vadd.f32 %v11843_v38, %v2661_v33  ;;  %v2566_v23 = vadd.f32 %v9997_v21, %v9090_v39 }
 0x548   :  { %v2844_v43 = vmul.f32 %v11864_v42, %v2667_v35  ;;  %v2561_v15 = vadd.f32 %v9090_v39, %v2560_v36 }
 0x549   :  { %v2843_v41 = vmul.f32 %v11864_v42, %v2662_v37  ;;  %v10017_v45 = vpop.f32.mrb[46].mxu1  ;;  %v2838_v2 = vmul.f32 %v11858_v40, %v2566_v23 }
 0x54a   :  { %v2852_v51 = vadd.f32 %v2844_v43, %v2836_v19  ;;  %v10000_v28 = vpop.f32.mrb[48].mxu0  ;;  %v2677_v58 = vadd.f32 %v10017_v45, %v11843_v38  ;;  %v2671_v60 = vpop.f32.mrb[47].mxu1  ;;  %v2837_v56 = vmul.f32 %v11858_v40, %v2561_v15 }
 0x54b   :  { %v2851_v0 = vadd.f32 %v2843_v41, %v2835_v44  ;;  %v2570_v50 = vpop.f32.mrb[49].mxu0  ;;  %v2672_v30 = vadd.f32 %v11843_v38, %v2671_v60  ;;  %v2576_v4 = vadd.f32 %v10000_v28, %v9090_v39 }
 0x54c   :  { %v2846_v10 = vmul.f32 %v11864_v42, %v2677_v58  ;;  %v2571_v9 = vadd.f32 %v9090_v39, %v2570_v50 }
 0x54d   :  { %v2845_v13 = vmul.f32 %v11864_v42, %v2672_v30  ;;  %v10020_v1 = vpop.f32.mrb[48].mxu1  ;;  %10045 = vmatpush3.xpose.msk.msra.mxu1 %vm957_vm2, %v2851_v0  ;;  %v2840_v31 = vmul.f32 %v11858_v40, %v2576_v4 }
 0x54e   :  { %v2854_v14 = vadd.f32 %v2846_v10, %v2838_v2  ;;  %v10003_v6 = vpop.f32.mrb[50].mxu0  ;;  %v2687_v24 = vadd.f32 %v10020_v1, %v11843_v38  ;;  %v2681_v25 = vpop.f32.mrb[49].mxu1  ;;  %10049 = vmatprep.subr.mxu1 %v11018_v16  ;;  %v2839_v33 = vmul.f32 %v11858_v40, %v2571_v9 }
 0x54f   :  { %v2853_v26 = vadd.f32 %v2845_v13, %v2837_v56  ;;  %v2580_v27 = vpop.f32.mrb[51].mxu0  ;;  %v2682_v17 = vadd.f32 %v11843_v38, %v2681_v25  ;;  %v2586_v21 = vadd.f32 %v10003_v6, %v9090_v39 }
 0x550   :  { %v2848_v35 = vmul.f32 %v11864_v42, %v2687_v24  ;;  %10047 = vmatmul.mubr.msk.f32.vlgmr.msra.gmra.mrb[52].mxu1 %vm957_vm2, %v11819_v46  ;;  %v2581_v36 = vadd.f32 %v9090_v39, %v2580_v27 }
 0x551   :  { %v2847_v37 = vmul.f32 %v11864_v42, %v2682_v17  ;;  %v10023_v19 = vpop.f32.mrb[50].mxu1  ;;  %10050 = vmatpush3.xpose.msk.msra.mxu1 %vm957_vm2, %v2852_v51  ;;  %10051 = vmatprep.mubr.msk.f32.mxu1 %vm11019_vm1, %v11018_v16  ;;  %v2842_v39 = vmul.f32 %v11858_v40, %v2586_v21 }
 0x552   :  { %v2856_v23 = vadd.f32 %v2848_v35, %v2840_v31  ;;  %v2697_v43 = vadd.f32 %v10023_v19, %v11843_v38  ;;  %v10034_v44 = vpop.f32.mrb[52].mxu0  ;;  %v2691_v15 = vpop.f32.mrb[51].mxu1  ;;  %10054 = vmatprep.subr.mxu1 %v11018_v16  ;;  %v2841_v51 = vmul.f32 %v11858_v40, %v2581_v36 }
 0x553   :  { %v2855_v41 = vadd.f32 %v2847_v37, %v2839_v33  ;;  %v2692_v46 = vadd.f32 %v11843_v38, %v2691_v15  ;;  %v2772_v45 = vpop.f32.mrb[53].mxu0  ;;  %v9108_v38 = vld [vmem:[%s13147_s14 + $0x1] ss:$0 sm:$0xff] }
 0x554   :  { %v2850_v28 = vmul.f32 %v11864_v42, %v2697_v43  ;;  %10052 = vmatmul.mubr.msk.f32.vlgmr.msra.gmra.mrb[54].mxu1 %vm957_vm2, %v11817_v18  ;;  %v2773_v10 = vadd.f32 %v9108_v38, %v2772_v45 }
 0x555   :  { %v2849_v58 = vmul.f32 %v11864_v42, %v2692_v46  ;;  %10055 = vmatpush3.xpose.msk.msra.mxu1 %vm957_vm2, %v2853_v26  ;;  %10065 = vmatpush3.xpose.msk.msra.mxu0 %vm957_vm2, %v2855_v41 }
 0x556   :  { %v2858_v60 = vadd.f32 %v2850_v28, %v2842_v39  ;;  %v10037_v0 = vpop.f32.mrb[54].mxu0  ;;  %10056 = vmatprep.mubr.msk.f32.mxu1 %vm11019_vm1, %v11018_v16  ;;  %10059 = vmatprep.subr.mxu1 %v11018_v16 }
 0x557   :  { %v2857_v18 = vadd.f32 %v2849_v58, %v2841_v51  ;;  %v11905_v50 = vadd.f32 %v10037_v0, %v9108_v38  ;;  %v2782_v30 = vpop.f32.mrb[55].mxu0  ;;  %10074 = vmatprep.subr.mxu0 %v11018_v16 }
 0x558   :  { %v11908_v2 = vadd.f32 %v9108_v38, %v2782_v30  ;;  %10057 = vmatmul.mubr.msk.f32.vlgmr.msra.gmra.mrb[56].mxu1 %vm957_vm2, %v11827_v53  ;;  %10067 = vmatmul.mubr.msk.f32.vlgmr.msra.gmra.mrb[60].mxu0 %vm957_vm2, %v11838_v12 }
 0x559   :  { %10060 = vmatpush3.xpose.msk.msra.mxu1 %vm957_vm2, %v2854_v14  ;;  %10075 = vmatpush3.xpose.msk.msra.mxu0 %vm957_vm2, %v2857_v18 }
 0x55a   :  { %v10040_v4 = vpop.f32.mrb[56].mxu0  ;;  %10061 = vmatprep.mubr.msk.f32.mxu1 %vm11019_vm1, %v11018_v16  ;;  %10076 = vmatprep.mubr.msk.f32.mxu0 %vm11019_vm1, %v11018_v16 }
 0x55b   :  { %v11920_v56 = vadd.f32 %v10040_v4, %v9108_v38  ;;  %v2792_v9 = vpop.f32.mrb[57].mxu0  ;;  %10069 = vmatprep.subr.mxu1 %v11018_v16  ;;  %10084 = vmatprep.subr.mxu0 %v11018_v16 }
 0x55c   :  { %v11924_v53 = vadd.f32 %v9108_v38, %v2792_v9  ;;  %10062 = vmatmul.mubr.msk.f32.vlgmr.msra.gmra.mrb[58].mxu1 %vm957_vm2, %v11825_v22  ;;  %10077 = vmatmul.mubr.msk.f32.vlgmr.msra.gmra.mrb[62].mxu0 %vm957_vm2, %v11852_v34  ;;  %v2778_v34 = vadd.f32 %v10034_v44, %v9108_v38 }
 0x55d   :  { %10070 = vmatpush3.xpose.msk.msra.mxu1 %vm957_vm2, %v2856_v23  ;;  %10085 = vmatpush3.msra.mxu0 %v2773_v10 }
 0x55e   :  { %v10043_v12 = vpop.f32.mrb[58].mxu0  ;;  %10071 = vmatprep.mubr.msk.f32.mxu1 %vm11019_vm1, %v11018_v16  ;;  %10079 = vmatprep.subr.mxu1 %v11018_v16 }
 0x55f   :  { %v11934_v13 = vadd.f32 %v10043_v12, %v9108_v38  ;;  %v2802_v1 = vpop.f32.mrb[59].mxu0  ;;  %10086 = vmatprep.mubr.msk.f32.mxu0 %vm11019_vm1, %v11018_v16  ;;  %10094 = vmatprep.subr.mxu0 %v11018_v16 }
 0x560   :  { %v11939_v22 = vadd.f32 %v9108_v38, %v2802_v1  ;;  %10072 = vmatmul.mubr.msk.f32.vlgmr.msra.gmra.mrb[60].mxu1 %vm957_vm2, %v11836_v7 }
 0x561   :  { %10080 = vmatpush3.xpose.msk.msra.mxu1 %vm957_vm2, %v2858_v60  ;;  %10081 = vmatprep.mubr.msk.f32.mxu1 %vm11019_vm1, %v11018_v16 }
 0x562   :  { %10089 = vmatprep.subr.mxu1 %v11018_v16 }
 0x564   :  { %10082 = vmatmul.mubr.msk.f32.vlgmr.msra.gmra.mrb[62].mxu1 %vm957_vm2, %v11849_v32 }
 0x565   :  { %10090 = vmatpush3.msra.mxu1 %v2778_v34  ;;  %10091 = vmatprep.mubr.msk.f32.mxu1 %vm11019_vm1, %v11018_v16 }
 0x566   :  { %10099 = vmatprep.subr.mxu1 %v11018_v16 }
 0x623   :  { %v2931_v14 = vpop.f32.mrb[52].mxu1 }
 0x624   :  { %v3467_v6 = vmul.f32 0.35355338, %v2931_v14  ;;  %v10048_v7 = vpop.f32.mrb[53].mxu1 }
 0x626   :  { %v3475_v24 = vsel %vm11571_vm3, %v3467_v6, -inf }
 0x627   :  { %v3007_v25 = vpop.f32.mrb[54].mxu1  ;;  %v3483_v26 = vsel %vm957_vm2, %v3475_v24, -inf }
 0x628   :  { %v3468_v27 = vmul.f32 0.35355338, %v3007_v25  ;;  %3484 = vmax.xlane.f32.xlu0 %v3483_v26  ;;  %v10053_v17 = vpop.f32.mrb[55].mxu1 }
 0x62a   :  { %v3476_v32 = vsel %vm11571_vm3, %v3468_v27, -inf }
 0x62b   :  { %v3083_v31 = vpop.f32.mrb[56].mxu1  ;;  %v3235_v21 = vpop.f32.mrb[60].mxu0  ;;  %v3486_v35 = vsel %vm957_vm2, %v3476_v32, -inf }
 0x62c   :  { %v3469_v33 = vmul.f32 0.35355338, %v3083_v31  ;;  %v3471_v36 = vmul.f32 0.35355338, %v3235_v21  ;;  %v10068_v37 = vpop.f32.mrb[61].mxu0  ;;  %3487 = vmax.xlane.f32.xlu1 %v3486_v35  ;;  %v10058_v19 = vpop.f32.mrb[57].mxu1 }
 0x62e   :  { %v3477_v23 = vsel %vm11571_vm3, %v3469_v33, -inf  ;;  %v3479_v41 = vsel %vm11571_vm3, %v3471_v36, -inf }
 0x62f   :  { %v3159_v43 = vpop.f32.mrb[58].mxu1  ;;  %v3387_v44 = vpop.f32.mrb[62].mxu0  ;;  %v3489_v15 = vsel %vm957_vm2, %v3477_v23, -inf  ;;  %v3495_v60 = vsel %vm957_vm2, %v3479_v41, -inf }
 0x630   :  { %v3470_v46 = vmul.f32 0.35355338, %v3159_v43  ;;  %v3473_v45 = vmul.f32 0.35355338, %v3387_v44  ;;  %v10078_v39 = vpop.f32.mrb[63].mxu0  ;;  %3490 = vmax.xlane.f32.xlu0 %v3489_v15  ;;  %v10063_v28 = vpop.f32.mrb[59].mxu1 }
 0x632   :  { %v3478_v51 = vsel %vm11571_vm3, %v3470_v46, -inf  ;;  %v3481_v30 = vsel %vm11571_vm3, %v3473_v45, -inf }
 0x633   :  { %v3311_v58 = vpop.f32.mrb[60].mxu1  ;;  %v3492_v38 = vsel %vm957_vm2, %v3478_v51, -inf  ;;  %v3501_v9 = vsel %vm957_vm2, %v3481_v30, -inf }
 0x634   :  { %v3472_v0 = vmul.f32 0.35355338, %v3311_v58  ;;  %3496 = vmax.xlane.f32.xlu0 %v3495_v60  ;;  %3493 = vmax.xlane.f32.xlu1 %v3492_v38  ;;  %v10073_v18 = vpop.f32.mrb[61].mxu1 }
 0x636   :  { %v3480_v4 = vsel %vm11571_vm3, %v3472_v0, -inf }
 0x637   :  { %v3463_v10 = vpop.f32.mrb[62].mxu1  ;;  %v3498_v12 = vsel %vm957_vm2, %v3480_v4, -inf }
 0x638   :  { %v3474_v1 = vmul.f32 0.35355338, %v3463_v10  ;;  %3502 = vmax.xlane.f32.xlu0 %v3501_v9  ;;  %3499 = vmax.xlane.f32.xlu1 %v3498_v12  ;;  %v10083_v34 = vpop.f32.mrb[63].mxu1 }
 0x63a   :  { %v3482_v14 = vsel %vm11571_vm3, %v3474_v1, -inf }
 0x63b   :  { %v3504_v6 = vsel %vm957_vm2, %v3482_v14, -inf }
 0x63c   :  { %3505 = vmax.xlane.f32.xlu1 %v3504_v6 }
 0x6b5   :  { %v3485_v7 = vpop.xlane.xlu0 %3484 }
 0x6b6   :  { %v3507_v25 = vsub.f32 %v3475_v24, %v3485_v7 }
 0x6b8   :  { %v3515_v26 = vmul.f32 1.442695, %v3507_v25 }
 0x6b9   :  { %v3488_v27 = vpop.xlane.xlu1 %3487 }
 0x6ba   :  { %10878 = vpow2.f32 %v3515_v26  ;;  %v3508_v17 = vsub.f32 %v3476_v32, %v3488_v27 }
 0x6bc   :  { %v3517_v31 = vmul.f32 1.442695, %v3508_v17 }
 0x6bd   :  { %v3491_v21 = vpop.xlane.xlu0 %3490 }
 0x6be   :  { %10880 = vpow2.f32 %v3517_v31  ;;  %v3509_v35 = vsub.f32 %v3477_v23, %v3491_v21 }
 0x6c0   :  { %v3519_v33 = vmul.f32 1.442695, %v3509_v35 }
 0x6c1   :  { %v3497_v36 = vpop.xlane.xlu0 %3496  ;;  %v3494_v37 = vpop.xlane.xlu1 %3493 }
 0x6c2   :  { %10882 = vpow2.f32 %v3519_v33  ;;  %v3511_v19 = vsub.f32 %v3479_v41, %v3497_v36  ;;  %v3510_v43 = vsub.f32 %v3478_v51, %v3494_v37 }
 0x6c4   :  { %v10879_v44 = vpop.eup %10878  ;;  %v3523_v15 = vmul.f32 1.442695, %v3511_v19  ;;  %v3521_v46 = vmul.f32 1.442695, %v3510_v43 }
 0x6c5   :  { %v3503_v45 = vpop.xlane.xlu0 %3502  ;;  %v3500_v39 = vpop.xlane.xlu1 %3499  ;;  %v3531_v24 = vsel %vm957_vm2, %v10879_v44, 0.0 }
 0x6c6   :  { %10884 = vpow2.f32 %v3523_v15  ;;  %v3513_v28 = vsub.f32 %v3481_v30, %v3503_v45  ;;  %v3512_v32 = vsub.f32 %v3480_v4, %v3500_v39  ;;  %3532 = vadd.xlane.f32.xlu0 %v3531_v24 }
 0x6c7   :  { %10886 = vpow2.f32 %v3521_v46 }
 0x6c8   :  { %v10881_v58 = vpop.eup %10880  ;;  %v3527_v23 = vmul.f32 1.442695, %v3513_v28  ;;  %v3525_v60 = vmul.f32 1.442695, %v3512_v32  ;;  %v320_v28 = vld [vmem:[%s13148_s15] sm:$0xff]  ;;  %v269_v32 = vld [vmem:[%s13174_s28 + $0x48] sm:$0xff] }
 0x6c9   :  { %v3506_v38 = vpop.xlane.xlu1 %3505  ;;  %v3534_v0 = vsel %vm957_vm2, %v10881_v58, 0.0 }
 0x6ca   :  { %10888 = vpow2.f32 %v3527_v23  ;;  %v3514_v41 = vsub.f32 %v3482_v14, %v3506_v38  ;;  %3535 = vadd.xlane.f32.xlu1 %v3534_v0  ;;  %v270_v38 = vld [vmem:[%s13174_s28 + $0x50] sm:$0xff] }
 0x6cb   :  { %10890 = vpow2.f32 %v3525_v60 }
 0x6cc   :  { %v10883_v51 = vpop.eup %10882  ;;  %v3529_v18 = vmul.f32 1.442695, %v3514_v41 }
 0x6cd   :  { %v3537_v10 = vsel %vm957_vm2, %v10883_v51, 0.0 }
 0x6ce   :  { %10892 = vpow2.f32 %v3529_v18  ;;  %3538 = vadd.xlane.f32.xlu0 %v3537_v10  ;;  %v308_v18 = vld [vmem:[%s13178_s0 + $0x40] sm:$0xff] }
 0x6d0   :  { %v10885_v30 = vpop.eup %10884 }
 0x6d1   :  { %v10887_v4 = vpop.eup %10886  ;;  %v3543_v9 = vsel %vm957_vm2, %v10885_v30, 0.0 }
 0x6d2   :  { %3544 = vadd.xlane.f32.xlu0 %v3543_v9  ;;  %v3540_v12 = vsel %vm957_vm2, %v10887_v4, 0.0 }
 0x6d3   :  { %3541 = vadd.xlane.f32.xlu1 %v3540_v12 }
 0x6d4   :  { %v10889_v1 = vpop.eup %10888 }
 0x6d5   :  { %v10891_v34 = vpop.eup %10890  ;;  %v3549_v14 = vsel %vm957_vm2, %v10889_v1, 0.0 }
 0x6d6   :  { %3550 = vadd.xlane.f32.xlu0 %v3549_v14  ;;  %v3546_v6 = vsel %vm957_vm2, %v10891_v34, 0.0  ;;  %v249_v14 = vld [vmem:[%s13173_s13 + $0x48] sm:$0xff] }
 0x6d7   :  { %3547 = vadd.xlane.f32.xlu1 %v3546_v6 }
 0x6d8   :  { %v11983_v7 = vpop.eup %10892 }
 0x6d9   :  { %v3552_v25 = vsel %vm957_vm2, %v11983_v7, 0.0 }
 0x6db   :  { %3553 = vadd.xlane.f32.xlu1 %v3552_v25 }
 0x753   :  { %v3533_v26 = vpop.xlane.xlu0 %3532 }
 0x754   :  { %10894 = vrcp.f32 %v3533_v26 }
 0x757   :  { %v3536_v27 = vpop.xlane.xlu1 %3535 }
 0x758   :  { %10896 = vrcp.f32 %v3536_v27 }
 0x75b   :  { %v3539_v17 = vpop.xlane.xlu0 %3538 }
 0x75c   :  { %10898 = vrcp.f32 %v3539_v17 }
 0x75e   :  { %v10895_v31 = vpop.eup %10894 }
 0x75f   :  { %v3556_v21 = vmul.f32 %v10895_v31, %v10879_v44  ;;  %v3545_v35 = vpop.xlane.xlu0 %3544 }
 0x760   :  { %10900 = vrcp.f32 %v3545_v35  ;;  %v3542_v33 = vpop.xlane.xlu1 %3541 }
 0x761   :  { %10902 = vrcp.f32 %v3542_v33  ;;  %10087 = vmatmul.mubr.msk.f32.vlgmr.msra.gmra.mrb[64].mxu0 %vm957_vm2, %v3556_v21 }
 0x762   :  { %v10897_v36 = vpop.eup %10896  ;;  %10095 = vmatpush3.msra.mxu0 %v11908_v2  ;;  %10096 = vmatprep.mubr.msk.f32.mxu0 %vm11019_vm1, %v11018_v16 }
 0x763   :  { %v3558_v37 = vmul.f32 %v10897_v36, %v10881_v58  ;;  %v3551_v19 = vpop.xlane.xlu0 %3550  ;;  %10104 = vmatprep.subr.mxu0 %v11018_v16 }
 0x764   :  { %10904 = vrcp.f32 %v3551_v19  ;;  %v3548_v43 = vpop.xlane.xlu1 %3547 }
 0x765   :  { %10906 = vrcp.f32 %v3548_v43  ;;  %10092 = vmatmul.mubr.msk.f32.vlgmr.msra.gmra.mrb[64].mxu1 %vm957_vm2, %v3558_v37  ;;  %v250_v43 = vld [vmem:[%s13173_s13 + $0x50] sm:$0xff] }
 0x766   :  { %v10899_v44 = vpop.eup %10898  ;;  %10100 = vmatpush3.msra.mxu1 %v11905_v50  ;;  %10101 = vmatprep.mubr.msk.f32.mxu1 %vm11019_vm1, %v11018_v16 }
 0x767   :  { %v3560_v15 = vmul.f32 %v10899_v44, %v10883_v51  ;;  %10109 = vmatprep.subr.mxu1 %v11018_v16  ;;  %v251_v44 = vld [vmem:[%s13173_s13 + $0x58] sm:$0xff] }
 0x768   :  { %v3554_v2 = vpop.xlane.xlu1 %3553 }
 0x769   :  { %10908 = vrcp.f32 %v3554_v2  ;;  %10097 = vmatmul.mubr.msk.f32.vlgmr.msra.gmra.mrb[66].mxu0 %vm957_vm2, %v3560_v15  ;;  %v10696_v2 = vpack.c.bf16 %v251_v44, %v250_v43 }
 0x76a   :  { %v10901_v46 = vpop.eup %10900  ;;  %10105 = vmatpush3.msra.mxu0 %v11924_v53  ;;  %10106 = vmatprep.mubr.msk.f32.mxu0 %vm11019_vm1, %v11018_v16  ;;  %v268_v53 = vld [vmem:[%s13174_s28 + $0x40] sm:$0xff] }
 0x76b   :  { %v10903_v45 = vpop.eup %10902  ;;  %v3564_v39 = vmul.f32 %v10901_v46, %v10885_v30  ;;  %10114 = vmatprep.subr.mxu0 %v11018_v16  ;;  %v10700_v60 = vpack.c.bf16 %v269_v32, %v268_v53  ;;  %v230_v30 = vld [vmem:[%s13172_s5 + $0x50] sm:$0xff]  ;;  %v288_v46 = vld [vmem:[%s13175_s30 + $0x40] sm:$0xff]  ;;  %v291_v53 = vld [vmem:[%s13175_s30 + $0x58] sm:$0xff] }
 0x76c   :  { %v3562_v50 = vmul.f32 %v10903_v45, %v10887_v4  ;;  %v231_v4 = vld [vmem:[%s13172_s5 + $0x58] sm:$0xff]  ;;  %v289_v45 = vld [vmem:[%s13175_s30 + $0x48] sm:$0xff] }
 0x76d   :  { %10107 = vmatmul.mubr.msk.f32.vlgmr.msra.gmra.mrb[68].mxu0 %vm957_vm2, %v3564_v39  ;;  %v10688_v12 = vpack.c.bf16 %v231_v4, %v230_v30  ;;  %v10708_v39 = vpack.c.bf16 %v289_v45, %v288_v46 }
 0x76e   :  { %v10905_v24 = vpop.eup %10904  ;;  %10102 = vmatmul.mubr.msk.f32.vlgmr.msra.gmra.mrb[66].mxu1 %vm957_vm2, %v3562_v50  ;;  %10115 = vmatpush3.msra.mxu0 %v11939_v22 }
 0x76f   :  { %v10907_v58 = vpop.eup %10906  ;;  %v3568_v23 = vmul.f32 %v10905_v24, %v10889_v1  ;;  %10110 = vmatpush3.msra.mxu1 %v11920_v56  ;;  %10111 = vmatprep.mubr.msk.f32.mxu1 %vm11019_vm1, %v11018_v16  ;;  %v271_v56 = vld [vmem:[%s13174_s28 + $0x58] sm:$0xff] }
 0x770   :  { %v3566_v22 = vmul.f32 %v10907_v58, %v10891_v34  ;;  %10116 = vmatprep.mubr.msk.f32.mxu0 %vm11019_vm1, %v11018_v16  ;;  %10119 = vmatprep.subr.mxu1 %v11018_v16  ;;  %v10704_v51 = vpack.c.bf16 %v271_v56, %v270_v38  ;;  %v248_v34 = vld [vmem:[%s13173_s13 + $0x40] sm:$0xff] }
 0x771   :  { %10117 = vmatmul.mubr.msk.f32.vlgmr.msra.gmra.mrb[70].mxu0 %vm957_vm2, %v3568_v23  ;;  %10138 = vmatprep.subr.mxu0 %v320_v28 }
 0x772   :  { %10112 = vmatmul.mubr.msk.f32.vlgmr.msra.gmra.mrb[68].mxu1 %vm957_vm2, %v3566_v22  ;;  %10140 = vmatprep.mubr.msk.f32.mxu0 %vm957_vm2, %v11791_v20  ;;  %v309_v20 = vld [vmem:[%s13178_s0 + $0x48] sm:$0xff] }
 0x773   :  { %v10909_v0 = vpop.eup %10908  ;;  %10120 = vmatpush3.msra.mxu1 %v11934_v13  ;;  %10121 = vmatprep.mubr.msk.f32.mxu1 %vm11019_vm1, %v11018_v16  ;;  %v10716_v13 = vpack.c.bf16 %v309_v20, %v308_v18 }
 0x774   :  { %v3570_v41 = vmul.f32 %v10909_v0, %v11983_v7  ;;  %10139 = vmatpush3.msra.mxu0 %v320_v28  ;;  %v10692_v7 = vpack.c.bf16 %v249_v14, %v248_v34  ;;  %v290_v28 = vld [vmem:[%s13175_s30 + $0x50] sm:$0xff] }
 0x775   :  { %10141 = vmatmul.mubr.msk.f32.vlgmr.msra.gmra.mrb[72].mxu0 %vm957_vm2, %v11793_v62  ;;  %10701 = vmatprep.subr.bf16.mxu0 %v10700_v60  ;;  %v310_v62 = vld [vmem:[%s13178_s0 + $0x50] sm:$0xff]  ;;  %v10712_v58 = vpack.c.bf16 %v291_v53, %v290_v28 }
 0x776   :  { %10122 = vmatmul.mubr.msk.f32.vlgmr.msra.gmra.mrb[70].mxu1 %vm957_vm2, %v3570_v41  ;;  %10143 = vmatprep.mubr.msk.f32.mxu0 %vm957_vm2, %v11795_v55  ;;  %v311_v55 = vld [vmem:[%s13178_s0 + $0x58] sm:$0xff] }
 0x777   :  { %10703 = vmatpush3.bf16.msra.mxu0 %v10700_v60 }
 0x778   :  { %10705 = vmatprep.subr.bf16.mxu0 %v10704_v51 }
 0x779   :  { %10144 = vmatmul.mubr.msk.f32.gmra.mrb[74].mxu0 %vm957_vm2, %v11799_v8  ;;  %v321_v8 = vld [vmem:[%s13148_s15 + $0x8] sm:$0xff] }
 0x77a   :  { %10146 = vmatprep.mubr.msk.f32.mxu0 %vm957_vm2, %v11797_v54  ;;  %v10720_v54 = vpack.c.bf16 %v311_v55, %v310_v62  ;;  %10124 = vmatprep.subr.mxu1 %v321_v8 }
 0x77b   :  { %10707 = vmatpush3.bf16.msra.mxu0 %v10704_v51  ;;  %10125 = vmatpush3.msra.mxu1 %v321_v8  ;;  %v12201_v51 = vld [vmem:[%s13147_s14 + $0x2] ss:$0 sm:$0xff] }
 0x77c   :  { %10717 = vmatprep.subr.bf16.mxu0 %v10716_v13 }
 0x77d   :  { %10147 = vmatmul.mubr.msk.f32.gmra.mrb[76].mxu0 %vm957_vm2, %v11801_v61  ;;  %v228_v61 = vld [vmem:[%s13172_s5 + $0x40] sm:$0xff] }
 0x77e   :  { %10149 = vmatprep.mubr.msk.f32.mxu0 %vm957_vm2, %v11803_v52  ;;  %v229_v52 = vld [vmem:[%s13172_s5 + $0x48] sm:$0xff] }
 0x781   :  { %10150 = vmatmul.mubr.msk.f32.gmra.mrb[78].mxu0 %vm957_vm2, %v11805_v29  ;;  %v10684_v29 = vpack.c.bf16 %v229_v52, %v228_v61 }
 0x782   :  { %10200 = vmatprep.mubr.msk.f32.mxu0 %vm84_vm0, %v11267_v47 }
 0x783   :  { %10685 = vmatprep.subr.bf16.mxu1 %v10684_v29 }
 0x785   :  { %10201 = vmatmul.mubr.msk.f32.vlgmr.msra.gmra.mrb[80].mxu0 %vm84_vm0, %v11290_v57 }
 0x786   :  { %10203 = vmatprep.mubr.msk.f32.mxu0 %vm84_vm0, %v11294_v59  ;;  %10719 = vmatpush3.bf16.msra.mxu0 %v10716_v13 }
 0x787   :  { %10721 = vmatprep.subr.bf16.mxu0 %v10720_v54 }
 0x789   :  { %10204 = vmatmul.mubr.msk.f32.gmra.mrb[82].mxu0 %vm84_vm0, %v11314_v3 }
 0x78a   :  { %10206 = vmatprep.mubr.msk.f32.mxu0 %vm84_vm0, %v11320_v5  ;;  %10723 = vmatpush3.bf16.msra.mxu0 %v10720_v54 }
 0x78b   :  { %10267 = vmatprep.subr.mxu0 %v11018_v16 }
 0x78d   :  { %10207 = vmatmul.mubr.msk.f32.gmra.mrb[84].mxu0 %vm84_vm0, %v11334_v48 }
 0x78e   :  { %10209 = vmatprep.mubr.msk.f32.mxu0 %vm84_vm0, %v11338_v11 }
 0x791   :  { %10210 = vmatmul.mubr.msk.f32.gmra.mrb[86].mxu0 %vm84_vm0, %v11350_v49 }
 0x792   :  { %10240 = vmatprep.mubr.msk.f32.mxu0 %vm84_vm0, %v11267_v47 }
 0x795   :  { %10241 = vmatmul.mubr.msk.f32.vlgmr.msra.gmra.mrb[88].mxu0 %vm84_vm0, %v11290_v57 }
 0x796   :  { %10243 = vmatprep.mubr.msk.f32.mxu0 %vm84_vm0, %v11294_v59 }
 0x799   :  { %10244 = vmatmul.mubr.msk.f32.gmra.mrb[90].mxu0 %vm84_vm0, %v11314_v3 }
 0x79a   :  { %10246 = vmatprep.mubr.msk.f32.mxu0 %vm84_vm0, %v11320_v5 }
 0x79d   :  { %10247 = vmatmul.mubr.msk.f32.gmra.mrb[92].mxu0 %vm84_vm0, %v11334_v48 }
 0x79e   :  { %10249 = vmatprep.mubr.msk.f32.mxu0 %vm84_vm0, %v11338_v11 }
 0x7a1   :  { %10250 = vmatmul.mubr.msk.f32.gmra.mrb[94].mxu0 %vm84_vm0, %v11350_v49 }
 0x7a2   :  { %10269 = vmatprep.mubr.msk.f32.mxu0 %vm11019_vm1, %v11018_v16 }
 0x834   :  { %v3640_v10 = vpop.f32.mrb[64].mxu0 }
 0x835   :  { %v10088_v9 = vpop.f32.mrb[65].mxu0  ;;  %10126 = vmatprep.mubr.msk.f32.mxu1 %vm957_vm2, %v3640_v10 }
 0x838   :  { %v3713_v1 = vpop.f32.mrb[64].mxu1 }
 0x839   :  { %v10093_v6 = vpop.f32.mrb[65].mxu1  ;;  %10127 = vmatmul.mubr.msk.f32.vlgmr.msra.gmra.mrb[72].mxu1 %vm957_vm2, %v3713_v1 }
 0x83a   :  { %10687 = vmatpush3.bf16.msra.mxu1 %v10684_v29 }
 0x83b   :  { %10689 = vmatprep.subr.bf16.mxu1 %v10688_v12 }
 0x83c   :  { %v3786_v25 = vpop.f32.mrb[66].mxu0 }
 0x83d   :  { %v10098_v26 = vpop.f32.mrb[67].mxu0  ;;  %10129 = vmatprep.mubr.msk.f32.mxu1 %vm957_vm2, %v3786_v25 }
 0x83e   :  { %10691 = vmatpush3.bf16.msra.mxu1 %v10688_v12 }
 0x83f   :  { %10693 = vmatprep.subr.bf16.mxu1 %v10692_v7 }
 0x840   :  { %v3932_v27 = vpop.f32.mrb[68].mxu0 }
 0x841   :  { %v3859_v17 = vpop.f32.mrb[66].mxu1  ;;  %v10108_v31 = vpop.f32.mrb[69].mxu0 }
 0x842   :  { %v10103_v21 = vpop.f32.mrb[67].mxu1  ;;  %10130 = vmatmul.mubr.msk.f32.gmra.mrb[74].mxu1 %vm957_vm2, %v3859_v17 }
 0x843   :  { %10132 = vmatprep.mubr.msk.f32.mxu1 %vm957_vm2, %v3932_v27 }
 0x844   :  { %v4078_v35 = vpop.f32.mrb[70].mxu0 }
 0x845   :  { %v4005_v33 = vpop.f32.mrb[68].mxu1  ;;  %v10118_v36 = vpop.f32.mrb[71].mxu0 }
 0x846   :  { %v10113_v37 = vpop.f32.mrb[69].mxu1  ;;  %10133 = vmatmul.mubr.msk.f32.gmra.mrb[76].mxu1 %vm957_vm2, %v4005_v33 }
 0x847   :  { %10135 = vmatprep.mubr.msk.f32.mxu1 %vm957_vm2, %v4078_v35  ;;  %v9157_v35 = vld [vmem:[%s13141_s6 + $0x2] ss:$0 sm:$0xff] }
 0x848   :  { %v9166_v37 = vld [vmem:[%s13142_s8 + $0x2] ss:$0 sm:$0xff] }
 0x849   :  { %v4151_v19 = vpop.f32.mrb[70].mxu1 }
 0x84a   :  { %v10123_v15 = vpop.f32.mrb[71].mxu1  ;;  %10136 = vmatmul.mubr.msk.f32.gmra.mrb[78].mxu1 %vm957_vm2, %v4151_v19 }
 0x84b   :  { %10160 = vmatprep.mubr.msk.f32.mxu1 %vm84_vm0, %v11267_v47 }
 0x84e   :  { %10161 = vmatmul.mubr.msk.f32.vlgmr.msra.gmra.mrb[80].mxu1 %vm84_vm0, %v11290_v57 }
 0x84f   :  { %10163 = vmatprep.mubr.msk.f32.mxu1 %vm84_vm0, %v11294_v59  ;;  %10695 = vmatpush3.bf16.msra.mxu1 %v10692_v7 }
 0x850   :  { %10697 = vmatprep.subr.bf16.mxu1 %v10696_v2 }
 0x852   :  { %10164 = vmatmul.mubr.msk.f32.gmra.mrb[82].mxu1 %vm84_vm0, %v11314_v3 }
 0x853   :  { %10166 = vmatprep.mubr.msk.f32.mxu1 %vm84_vm0, %v11320_v5  ;;  %10699 = vmatpush3.bf16.msra.mxu1 %v10696_v2 }
 0x854   :  { %10709 = vmatprep.subr.bf16.mxu1 %v10708_v39 }
 0x856   :  { %10167 = vmatmul.mubr.msk.f32.gmra.mrb[84].mxu1 %vm84_vm0, %v11334_v48 }
 0x857   :  { %10169 = vmatprep.mubr.msk.f32.mxu1 %vm84_vm0, %v11338_v11 }
 0x858   :  { %v12151_v50 = vpop.f32.mrb[80].mxu0 }
 0x859   :  { %v12153_v24 = vpop.f32.mrb[81].mxu0 }
 0x85a   :  { %10170 = vmatmul.mubr.msk.f32.gmra.mrb[86].mxu1 %vm84_vm0, %v11350_v49 }
 0x85b   :  { %10180 = vmatprep.mubr.msk.f32.mxu1 %vm84_vm0, %v11267_v47 }
 0x85c   :  { %v12165_v32 = vpop.f32.mrb[82].mxu0 }
 0x85d   :  { %v12167_v23 = vpop.f32.mrb[83].mxu0 }
 0x85e   :  { %10181 = vmatmul.mubr.msk.f32.vlgmr.msra.gmra.mrb[88].mxu1 %vm84_vm0, %v11290_v57 }
 0x85f   :  { %10183 = vmatprep.mubr.msk.f32.mxu1 %vm84_vm0, %v11294_v59  ;;  %10711 = vmatpush3.bf16.msra.mxu1 %v10708_v39 }
 0x860   :  { %v12173_v22 = vpop.f32.mrb[84].mxu0  ;;  %10713 = vmatprep.subr.bf16.mxu1 %v10712_v58 }
 0x861   :  { %v12175_v60 = vpop.f32.mrb[85].mxu0 }
 0x862   :  { %10184 = vmatmul.mubr.msk.f32.gmra.mrb[90].mxu1 %vm84_vm0, %v11314_v3 }
 0x863   :  { %10186 = vmatprep.mubr.msk.f32.mxu1 %vm84_vm0, %v11320_v5  ;;  %10715 = vmatpush3.bf16.msra.mxu1 %v10712_v58 }
 0x864   :  { %v12181_v38 = vpop.f32.mrb[86].mxu0  ;;  %10252 = vmatprep.subr.mxu1 %v11018_v16 }
 0x865   :  { %v12184_v56 = vpop.f32.mrb[87].mxu0 }
 0x866   :  { %10187 = vmatmul.mubr.msk.f32.gmra.mrb[92].mxu1 %vm84_vm0, %v11334_v48 }
 0x867   :  { %10189 = vmatprep.mubr.msk.f32.mxu1 %vm84_vm0, %v11338_v11 }
 0x868   :  { %v12190_v0 = vpop.f32.mrb[88].mxu0 }
 0x869   :  { %v12192_v41 = vpop.f32.mrb[89].mxu0 }
 0x86a   :  { %10190 = vmatmul.mubr.msk.f32.gmra.mrb[94].mxu1 %vm84_vm0, %v11350_v49 }
 0x86b   :  { %10220 = vmatprep.mubr.msk.f32.mxu1 %vm84_vm0, %v11267_v47 }
 0x86c   :  { %v10245_v18 = vpop.f32.mrb[90].mxu0 }
 0x86d   :  { %v12204_v20 = vadd.f32 %v10245_v18, %v12201_v51  ;;  %v4939_v13 = vpop.f32.mrb[91].mxu0 }
 0x86e   :  { %10221 = vmatmul.mubr.msk.f32.vlgmr.msra.gmra.mrb[96].mxu1 %vm84_vm0, %v11290_v57  ;;  %v12209_v62 = vadd.f32 %v12201_v51, %v4939_v13 }
 0x86f   :  { %10223 = vmatprep.mubr.msk.f32.mxu1 %vm84_vm0, %v11294_v59 }
 0x870   :  { %v10248_v55 = vpop.f32.mrb[92].mxu0 }
 0x871   :  { %v12214_v54 = vadd.f32 %v10248_v55, %v12201_v51  ;;  %v4949_v8 = vpop.f32.mrb[93].mxu0 }
 0x872   :  { %10224 = vmatmul.mubr.msk.f32.gmra.mrb[98].mxu1 %vm84_vm0, %v11314_v3  ;;  %v12219_v61 = vadd.f32 %v12201_v51, %v4949_v8 }
 0x873   :  { %10226 = vmatprep.mubr.msk.f32.mxu1 %vm84_vm0, %v11320_v5 }
 0x874   :  { %v10251_v52 = vpop.f32.mrb[94].mxu0 }
 0x875   :  { %v12224_v29 = vadd.f32 %v10251_v52, %v12201_v51  ;;  %v4959_v10 = vpop.f32.mrb[95].mxu0 }
 0x876   :  { %10227 = vmatmul.mubr.msk.f32.gmra.mrb[100].mxu1 %vm84_vm0, %v11334_v48  ;;  %v12229_v30 = vadd.f32 %v12201_v51, %v4959_v10 }
 0x877   :  { %10229 = vmatprep.mubr.msk.f32.mxu1 %vm84_vm0, %v11338_v11 }
 0x87a   :  { %10230 = vmatmul.mubr.msk.f32.gmra.mrb[102].mxu1 %vm84_vm0, %v11350_v49 }
 0x87b   :  { %10254 = vmatprep.mubr.msk.f32.mxu1 %vm11019_vm1, %v11018_v16 }
 0x90c   :  { %v12237_v4 = vpop.f32.mrb[72].mxu1 }
 0x90d   :  { %v12239_v9 = vpop.f32.mrb[73].mxu1 }
 0x915   :  { %v12241_v12 = vpop.f32.mrb[74].mxu1 }
 0x916   :  { %v12243_v1 = vpop.f32.mrb[75].mxu1 }
 0x919   :  { %v12245_v34 = vpop.f32.mrb[76].mxu1 }
 0x91a   :  { %v12247_v14 = vpop.f32.mrb[77].mxu1 }
 0x91d   :  { %v12249_v6 = vpop.f32.mrb[78].mxu1 }
 0x91e   :  { %v12251_v7 = vpop.f32.mrb[79].mxu1 }
 0x921   :  { %v10162_v25 = vpop.f32.mrb[80].mxu1 }
 0x922   :  { %v4485_v26 = vpop.f32.mrb[81].mxu1  ;;  %v4491_v19 = vadd.f32 %v10162_v25, %v9157_v35 }
 0x923   :  { %v4486_v43 = vadd.f32 %v9157_v35, %v4485_v26 }
 0x924   :  { %v4969_v45 = vmul.f32 %v11858_v40, %v4491_v19 }
 0x925   :  { %v10165_v27 = vpop.f32.mrb[82].mxu1  ;;  %v4968_v53 = vmul.f32 %v11858_v40, %v4486_v43 }
 0x926   :  { %v4495_v17 = vpop.f32.mrb[83].mxu1  ;;  %v4501_v39 = vadd.f32 %v10165_v27, %v9157_v35 }
 0x927   :  { %v4496_v58 = vadd.f32 %v9157_v35, %v4495_v17 }
 0x928   :  { %v4971_v26 = vmul.f32 %v11858_v40, %v4501_v39  ;;  %v9175_v39 = vld [vmem:[%s13145_s10 + $0x2] ss:$0 sm:$0xff] }
 0x929   :  { %v10168_v31 = vpop.f32.mrb[84].mxu1  ;;  %v4970_v19 = vmul.f32 %v11858_v40, %v4496_v58 }
 0x92a   :  { %v4505_v21 = vpop.f32.mrb[85].mxu1 }
 0x92d   :  { %v10171_v33 = vpop.f32.mrb[86].mxu1 }
 0x92e   :  { %v4515_v36 = vpop.f32.mrb[87].mxu1 }
 0x92f   :  { %v4516_v58 = vadd.f32 %v9157_v35, %v4515_v36  ;;  %v4708_v36 = vadd.f32 %v9175_v39, %v12153_v24 }
 0x931   :  { %v10182_v44 = vpop.f32.mrb[88].mxu1  ;;  %v4992_v24 = vmul.f32 %v11858_v40, %v4708_v36  ;;  %v4728_v36 = vadd.f32 %v9175_v39, %v12175_v60  ;;  %v4743_v60 = vadd.f32 %v12181_v38, %v9175_v39 }
 0x932   :  { %v4602_v15 = vadd.f32 %v10182_v44, %v9166_v37  ;;  %v4596_v2 = vpop.f32.mrb[89].mxu1  ;;  %v4511_v44 = vadd.f32 %v10168_v31, %v9157_v35 }
 0x933   :  { %v4597_v46 = vadd.f32 %v9166_v37, %v4596_v2 }
 0x934   :  { %v4977_v28 = vmul.f32 %v11864_v42, %v4602_v15  ;;  %v4506_v15 = vadd.f32 %v9157_v35, %v4505_v21 }
 0x935   :  { %v4976_v18 = vmul.f32 %v11864_v42, %v4597_v46  ;;  %v10185_v13 = vpop.f32.mrb[90].mxu1 }
 0x936   :  { %v12263_v55 = vadd.f32 %v4977_v28, %v4969_v45  ;;  %v4612_v8 = vadd.f32 %v10185_v13, %v9166_v37  ;;  %v4606_v52 = vpop.f32.mrb[91].mxu1  ;;  %v4521_v13 = vadd.f32 %v10171_v33, %v9157_v35  ;;  %v4972_v21 = vmul.f32 %v11858_v40, %v4506_v15  ;;  %v9184_v33 = vld [vmem:[%s13146_s12 + $0x2] ss:$0 sm:$0xff] }
 0x937   :  { %v12265_v10 = vadd.f32 %v4976_v18, %v4968_v53  ;;  %v4607_v25 = vadd.f32 %v9166_v37, %v4606_v52  ;;  %v4973_v18 = vmul.f32 %v11858_v40, %v4511_v44  ;;  %v4974_v15 = vmul.f32 %v11858_v40, %v4516_v58 }
 0x938   :  { %v4979_v27 = vmul.f32 %v11864_v42, %v4612_v8  ;;  %v4718_v58 = vadd.f32 %v9175_v39, %v12167_v23 }
 0x939   :  { %v4978_v17 = vmul.f32 %v11864_v42, %v4607_v25  ;;  %v10188_v43 = vpop.f32.mrb[92].mxu1 }
 0x93a   :  { %v12271_v2 = vadd.f32 %v4979_v27, %v4971_v26  ;;  %v4622_v46 = vadd.f32 %v10188_v43, %v9166_v37  ;;  %v4616_v45 = vpop.f32.mrb[93].mxu1  ;;  %v4975_v43 = vmul.f32 %v11858_v40, %v4521_v13  ;;  %v4723_v13 = vadd.f32 %v12165_v32, %v9175_v39 }
 0x93b   :  { %v12273_v28 = vadd.f32 %v4978_v17, %v4970_v19  ;;  %v4617_v53 = vadd.f32 %v9166_v37, %v4616_v45  ;;  %v4713_v17 = vadd.f32 %v12151_v50, %v9175_v39 }
 0x93c   :  { %v4981_v31 = vmul.f32 %v11864_v42, %v4622_v46 }
 0x93d   :  { %v4980_v8 = vmul.f32 %v11864_v42, %v4617_v53  ;;  %v10191_v52 = vpop.f32.mrb[94].mxu1  ;;  %v4993_v50 = vmul.f32 %v11858_v40, %v4713_v17  ;;  %v4733_v17 = vadd.f32 %v12173_v22, %v9175_v39  ;;  %v12316_v22 = vld [vmem:[%s13143_s1] sm:$0xff] }
 0x93e   :  { %v12282_v25 = vadd.f32 %v4981_v31, %v4973_v18  ;;  %v4632_v26 = vadd.f32 %v10191_v52, %v9166_v37  ;;  %v4626_v27 = vpop.f32.mrb[95].mxu1 }
 0x93f   :  { %v12284_v19 = vadd.f32 %v4980_v8, %v4972_v21  ;;  %v4627_v44 = vadd.f32 %v9166_v37, %v4626_v27 }
 0x940   :  { %v4983_v35 = vmul.f32 %v11864_v42, %v4632_v26 }
 0x941   :  { %v4982_v46 = vmul.f32 %v11864_v42, %v4627_v44  ;;  %v10222_v45 = vpop.f32.mrb[96].mxu1 }
 0x942   :  { %v12295_v53 = vadd.f32 %v4983_v35, %v4975_v43  ;;  %v4824_v37 = vadd.f32 %v10222_v45, %v9184_v33  ;;  %v4818_v18 = vpop.f32.mrb[97].mxu1  ;;  %v4994_v45 = vmul.f32 %v11858_v40, %v4718_v58  ;;  %v4996_v58 = vmul.f32 %v12316_v22, %v4728_v36 }
 0x943   :  { %v12297_v31 = vadd.f32 %v4982_v46, %v4974_v15  ;;  %v4819_v21 = vadd.f32 %v9184_v33, %v4818_v18  ;;  %v4995_v46 = vmul.f32 %v11858_v40, %v4723_v13  ;;  %v4997_v40 = vmul.f32 %v12316_v22, %v4733_v17 }
 0x944   :  { %v5001_v8 = vmul.f32 %v11864_v42, %v4824_v37 }
 0x945   :  { %v5000_v52 = vmul.f32 %v11864_v42, %v4819_v21  ;;  %v10225_v26 = vpop.f32.mrb[98].mxu1 }
 0x946   :  { %v5009_v27 = vadd.f32 %v5001_v8, %v4993_v50  ;;  %v4834_v44 = vadd.f32 %v10225_v26, %v9184_v33  ;;  %v4828_v43 = vpop.f32.mrb[99].mxu1 }
 0x947   :  { %v5008_v35 = vadd.f32 %v5000_v52, %v4992_v24  ;;  %v4829_v15 = vadd.f32 %v9184_v33, %v4828_v43  ;;  %v4738_v52 = vadd.f32 %v9175_v39, %v12184_v56  ;;  %v4999_v56 = vmul.f32 %v12316_v22, %v4743_v60 }
 0x948   :  { %v5003_v32 = vmul.f32 %v11864_v42, %v4834_v44 }
 0x949   :  { %v5002_v23 = vmul.f32 %v11864_v42, %v4829_v15  ;;  %v10228_v37 = vpop.f32.mrb[100].mxu1  ;;  %10253 = vmatpush3.xpose.msk.msra.mxu1 %vm957_vm2, %v5008_v35  ;;  %v12323_v42 = vld [vmem:[%s13144_s2] sm:$0xff] }
 0x94a   :  { %v5011_v18 = vadd.f32 %v5003_v32, %v4995_v46  ;;  %v4844_v21 = vadd.f32 %v10228_v37, %v9184_v33  ;;  %v4838_v50 = vpop.f32.mrb[101].mxu1  ;;  %10257 = vmatprep.subr.mxu1 %v11018_v16 }
 0x94b   :  { %v5010_v8 = vadd.f32 %v5002_v23, %v4994_v45  ;;  %v4839_v13 = vadd.f32 %v9184_v33, %v4838_v50 }
 0x94c   :  { %v5005_v24 = vmul.f32 %v12323_v42, %v4844_v21  ;;  %10255 = vmatmul.mubr.msk.f32.vlgmr.msra.gmra.mrb[104].mxu1 %vm957_vm2, %v12265_v10  ;;  %10268 = vmatpush3.xpose.msk.msra.mxu0 %vm957_vm2, %v5011_v18 }
 0x94d   :  { %v5004_v26 = vmul.f32 %v12323_v42, %v4839_v13  ;;  %v10231_v44 = vpop.f32.mrb[102].mxu1  ;;  %10258 = vmatpush3.xpose.msk.msra.mxu1 %vm957_vm2, %v5009_v27  ;;  %10259 = vmatprep.mubr.msk.f32.mxu1 %vm11019_vm1, %v11018_v16  ;;  %v4998_v27 = vmul.f32 %v12316_v22, %v4738_v52 }
 0x94e   :  { %v5013_v38 = vadd.f32 %v5005_v24, %v4997_v40  ;;  %v4854_v43 = vadd.f32 %v10231_v44, %v9184_v33  ;;  %v4848_v35 = vpop.f32.mrb[103].mxu1  ;;  %10277 = vmatprep.subr.mxu0 %v11018_v16  ;;  %10262 = vmatprep.subr.mxu1 %v11018_v16 }
 0x94f   :  { %v5012_v10 = vadd.f32 %v5004_v26, %v4996_v58  ;;  %v4849_v15 = vadd.f32 %v9184_v33, %v4848_v35  ;;  %10270 = vmatmul.mubr.msk.f32.vlgmr.msra.gmra.mrb[96].mxu0 %vm957_vm2, %v12271_v2 }
 0x950   :  { %v5007_v39 = vmul.f32 %v12323_v42, %v4854_v43  ;;  %10260 = vmatmul.mubr.msk.f32.vlgmr.msra.gmra.mrb[106].mxu1 %vm957_vm2, %v12263_v55  ;;  %10278 = vmatpush3.xpose.msk.msra.mxu0 %vm957_vm2, %v5013_v38  ;;  %v4935_v55 = vadd.f32 %v12190_v0, %v12201_v51  ;;  %v4930_v0 = vadd.f32 %v12201_v51, %v12192_v41 }
 0x951   :  { %v5006_v46 = vmul.f32 %v12323_v42, %v4849_v15  ;;  %10263 = vmatpush3.xpose.msk.msra.mxu1 %vm957_vm2, %v5010_v8  ;;  %10279 = vmatprep.mubr.msk.f32.mxu0 %vm11019_vm1, %v11018_v16 }
 0x952   :  { %v5015_v33 = vadd.f32 %v5007_v39, %v4999_v56  ;;  %10264 = vmatprep.mubr.msk.f32.mxu1 %vm11019_vm1, %v11018_v16  ;;  %10287 = vmatprep.subr.mxu0 %v11018_v16 }
 0x953   :  { %v5014_v2 = vadd.f32 %v5006_v46, %v4998_v27  ;;  %10280 = vmatmul.mubr.msk.f32.vlgmr.msra.gmra.mrb[98].mxu0 %vm957_vm2, %v12282_v25  ;;  %10272 = vmatprep.subr.mxu1 %v11018_v16 }
 0x954   :  { %10265 = vmatmul.mubr.msk.f32.vlgmr.msra.gmra.mrb[108].mxu1 %vm957_vm2, %v12273_v28  ;;  %10288 = vmatpush3.xpose.msk.msra.mxu0 %vm957_vm2, %v5015_v33 }
 0x955   :  { %10273 = vmatpush3.xpose.msk.msra.mxu1 %vm957_vm2, %v5012_v10  ;;  %10289 = vmatprep.mubr.msk.f32.mxu0 %vm11019_vm1, %v11018_v16 }
 0x956   :  { %10274 = vmatprep.mubr.msk.f32.mxu1 %vm11019_vm1, %v11018_v16  ;;  %10297 = vmatprep.subr.mxu0 %v11018_v16 }
 0x957   :  { %10290 = vmatmul.mubr.msk.f32.vlgmr.msra.gmra.mrb[100].mxu0 %vm957_vm2, %v12295_v53  ;;  %10282 = vmatprep.subr.mxu1 %v11018_v16 }
 0x958   :  { %10275 = vmatmul.mubr.msk.f32.vlgmr.msra.gmra.mrb[110].mxu1 %vm957_vm2, %v12284_v19  ;;  %10298 = vmatpush3.msra.mxu0 %v4935_v55 }
 0x959   :  { %10283 = vmatpush3.xpose.msk.msra.mxu1 %vm957_vm2, %v5014_v2  ;;  %10284 = vmatprep.mubr.msk.f32.mxu1 %vm11019_vm1, %v11018_v16 }
 0x95a   :  { %10292 = vmatprep.subr.mxu1 %v11018_v16  ;;  %10299 = vmatprep.mubr.msk.f32.mxu0 %vm11019_vm1, %v11018_v16 }
 0x95b   :  { %10307 = vmatprep.subr.mxu0 %v11018_v16 }
 0x95c   :  { %10285 = vmatmul.mubr.msk.f32.vlgmr.msra.gmra.mrb[112].mxu1 %vm957_vm2, %v12297_v31 }
 0x95d   :  { %10293 = vmatpush3.msra.mxu1 %v4930_v0  ;;  %10294 = vmatprep.mubr.msk.f32.mxu1 %vm11019_vm1, %v11018_v16 }
 0x95e   :  { %10302 = vmatprep.subr.mxu1 %v11018_v16 }
 0xa1f   :  { %v5088_v28 = vpop.f32.mrb[104].mxu1 }
 0xa20   :  { %v5624_v25 = vmul.f32 0.35355338, %v5088_v28  ;;  %v10256_v19 = vpop.f32.mrb[105].mxu1 }
 0xa22   :  { %v5316_v53 = vpop.f32.mrb[96].mxu0  ;;  %v5632_v17 = vsel %vm11571_vm3, %v5624_v25, -inf }
 0xa23   :  { %v5164_v32 = vpop.f32.mrb[106].mxu1  ;;  %v10271_v41 = vpop.f32.mrb[97].mxu0  ;;  %v5640_v51 = vsel %vm957_vm2, %v5632_v17, -inf  ;;  %v5627_v45 = vmul.f32 0.35355338, %v5316_v53 }
 0xa24   :  { %v5625_v36 = vmul.f32 0.35355338, %v5164_v32  ;;  %5641 = vmax.xlane.f32.xlu0 %v5640_v51  ;;  %v10261_v31 = vpop.f32.mrb[107].mxu1 }
 0xa25   :  { %v5635_v60 = vsel %vm11571_vm3, %v5627_v45, -inf }
 0xa26   :  { %v5468_v23 = vpop.f32.mrb[98].mxu0  ;;  %v5633_v37 = vsel %vm11571_vm3, %v5625_v36, -inf  ;;  %v5649_v44 = vsel %vm957_vm2, %v5635_v60, -inf }
 0xa27   :  { %v5240_v18 = vpop.f32.mrb[108].mxu1  ;;  %v10281_v21 = vpop.f32.mrb[99].mxu0  ;;  %v5643_v50 = vsel %vm957_vm2, %v5633_v37, -inf  ;;  %v5629_v8 = vmul.f32 0.35355338, %v5468_v23 }
 0xa28   :  { %v5626_v13 = vmul.f32 0.35355338, %v5240_v18  ;;  %5644 = vmax.xlane.f32.xlu1 %v5643_v50  ;;  %v10266_v40 = vpop.f32.mrb[109].mxu1 }
 0xa29   :  { %v5637_v15 = vsel %vm11571_vm3, %v5629_v8, -inf }
 0xa2a   :  { %v5620_v24 = vpop.f32.mrb[100].mxu0  ;;  %v5634_v58 = vsel %vm11571_vm3, %v5626_v13, -inf  ;;  %v5655_v27 = vsel %vm957_vm2, %v5637_v15, -inf }
 0xa2b   :  { %v5392_v52 = vpop.f32.mrb[110].mxu1  ;;  %v10291_v26 = vpop.f32.mrb[101].mxu0  ;;  %v5646_v38 = vsel %vm957_vm2, %v5634_v58, -inf  ;;  %v5631_v43 = vmul.f32 0.35355338, %v5620_v24 }
 0xa2c   :  { %v5628_v35 = vmul.f32 0.35355338, %v5392_v52  ;;  %5650 = vmax.xlane.f32.xlu1 %v5649_v44  ;;  %5647 = vmax.xlane.f32.xlu0 %v5646_v38  ;;  %v10276_v10 = vpop.f32.mrb[111].mxu1 }
 0xa2d   :  { %v5639_v55 = vsel %vm11571_vm3, %v5631_v43, -inf }
 0xa2e   :  { %v5636_v56 = vsel %vm11571_vm3, %v5628_v35, -inf  ;;  %v5661_v28 = vsel %vm957_vm2, %v5639_v55, -inf }
 0xa2f   :  { %v5544_v39 = vpop.f32.mrb[112].mxu1  ;;  %v5652_v46 = vsel %vm957_vm2, %v5636_v56, -inf }
 0xa30   :  { %v5630_v33 = vmul.f32 0.35355338, %v5544_v39  ;;  %5656 = vmax.xlane.f32.xlu1 %v5655_v27  ;;  %5653 = vmax.xlane.f32.xlu0 %v5652_v46  ;;  %v10286_v2 = vpop.f32.mrb[113].mxu1 }
 0xa32   :  { %v5638_v0 = vsel %vm11571_vm3, %v5630_v33, -inf }
 0xa33   :  { %v5658_v25 = vsel %vm957_vm2, %v5638_v0, -inf }
 0xa34   :  { %5662 = vmax.xlane.f32.xlu1 %v5661_v28  ;;  %5659 = vmax.xlane.f32.xlu0 %v5658_v25 }
 0xab1   :  { %v5642_v19 = vpop.xlane.xlu0 %5641 }
 0xab2   :  { %v5664_v53 = vsub.f32 %v5632_v17, %v5642_v19 }
 0xab4   :  { %v5672_v32 = vmul.f32 1.442695, %v5664_v53 }
 0xab5   :  { %v5645_v41 = vpop.xlane.xlu1 %5644 }
 0xab6   :  { %10910 = vpow2.f32 %v5672_v32  ;;  %v5665_v51 = vsub.f32 %v5633_v37, %v5645_v41 }
 0xab8   :  { %v5674_v45 = vmul.f32 1.442695, %v5665_v51 }
 0xab9   :  { %v5651_v36 = vpop.xlane.xlu1 %5650  ;;  %v5648_v31 = vpop.xlane.xlu0 %5647 }
 0xaba   :  { %10912 = vpow2.f32 %v5674_v45  ;;  %v5667_v23 = vsub.f32 %v5635_v60, %v5651_v36  ;;  %v5666_v18 = vsub.f32 %v5634_v58, %v5648_v31 }
 0xabc   :  { %v5678_v21 = vmul.f32 1.442695, %v5667_v23  ;;  %v5676_v50 = vmul.f32 1.442695, %v5666_v18 }
 0xabd   :  { %v5657_v8 = vpop.xlane.xlu1 %5656  ;;  %v5654_v13 = vpop.xlane.xlu0 %5653 }
 0xabe   :  { %10914 = vpow2.f32 %v5678_v21  ;;  %v5669_v40 = vsub.f32 %v5637_v15, %v5657_v8  ;;  %v5668_v24 = vsub.f32 %v5636_v56, %v5654_v13 }
 0xabf   :  { %10916 = vpow2.f32 %v5676_v50 }
 0xac0   :  { %v10911_v52 = vpop.eup %10910  ;;  %v5682_v17 = vmul.f32 1.442695, %v5669_v40  ;;  %v5680_v26 = vmul.f32 1.442695, %v5668_v24 }
 0xac1   :  { %v5663_v44 = vpop.xlane.xlu1 %5662  ;;  %v5660_v38 = vpop.xlane.xlu0 %5659  ;;  %v5688_v37 = vsel %vm957_vm2, %v10911_v52, 0.0 }
 0xac2   :  { %10918 = vpow2.f32 %v5682_v17  ;;  %v5671_v43 = vsub.f32 %v5639_v55, %v5663_v44  ;;  %v5670_v35 = vsub.f32 %v5638_v0, %v5660_v38  ;;  %5689 = vadd.xlane.f32.xlu0 %v5688_v37  ;;  %v232_v17 = vld [vmem:[%s13172_s5 + $0x60] sm:$0xff] }
 0xac3   :  { %10920 = vpow2.f32 %v5680_v26  ;;  %v233_v26 = vld [vmem:[%s13172_s5 + $0x68] sm:$0xff] }
 0xac4   :  { %v10913_v60 = vpop.eup %10912  ;;  %v5686_v58 = vmul.f32 1.442695, %v5671_v43  ;;  %v5684_v10 = vmul.f32 1.442695, %v5670_v35  ;;  %v10724_v43 = vpack.c.bf16 %v233_v26, %v232_v17 }
 0xac5   :  { %v5691_v39 = vsel %vm957_vm2, %v10913_v60, 0.0 }
 0xac6   :  { %10922 = vpow2.f32 %v5686_v58  ;;  %5692 = vadd.xlane.f32.xlu1 %v5691_v39 }
 0xac7   :  { %10924 = vpow2.f32 %v5684_v10 }
 0xac8   :  { %v10915_v15 = vpop.eup %10914 }
 0xac9   :  { %v10917_v56 = vpop.eup %10916  ;;  %v5697_v27 = vsel %vm957_vm2, %v10915_v15, 0.0 }
 0xaca   :  { %5698 = vadd.xlane.f32.xlu1 %v5697_v27  ;;  %v5694_v46 = vsel %vm957_vm2, %v10917_v56, 0.0  ;;  %v275_v27 = vld [vmem:[%s13174_s28 + $0x78] sm:$0xff] }
 0xacb   :  { %5695 = vadd.xlane.f32.xlu0 %v5694_v46 }
 0xacc   :  { %v10919_v33 = vpop.eup %10918 }
 0xacd   :  { %v10921_v2 = vpop.eup %10920  ;;  %v5703_v55 = vsel %vm957_vm2, %v10919_v33, 0.0 }
 0xace   :  { %5704 = vadd.xlane.f32.xlu1 %v5703_v55  ;;  %v5700_v0 = vsel %vm957_vm2, %v10921_v2, 0.0 }
 0xacf   :  { %5701 = vadd.xlane.f32.xlu0 %v5700_v0  ;;  %v314_v0 = vld [vmem:[%s13178_s0 + $0x70] sm:$0xff] }
 0xad0   :  { %v10923_v28 = vpop.eup %10922 }
 0xad1   :  { %v10925_v25 = vpop.eup %10924  ;;  %v5709_v19 = vsel %vm957_vm2, %v10923_v28, 0.0 }
 0xad2   :  { %5710 = vadd.xlane.f32.xlu1 %v5709_v19  ;;  %v5706_v53 = vsel %vm957_vm2, %v10925_v25, 0.0  ;;  %v322_v19 = vld [vmem:[%s13148_s15 + $0x10] sm:$0xff] }
 0xad3   :  { %5707 = vadd.xlane.f32.xlu0 %v5706_v53  ;;  %v252_v53 = vld [vmem:[%s13173_s13 + $0x60] sm:$0xff] }
 0xb4f   :  { %v5690_v32 = vpop.xlane.xlu0 %5689 }
 0xb50   :  { %10926 = vrcp.f32 %v5690_v32  ;;  %v253_v32 = vld [vmem:[%s13173_s13 + $0x68] sm:$0xff] }
 0xb53   :  { %v5693_v41 = vpop.xlane.xlu1 %5692 }
 0xb54   :  { %10928 = vrcp.f32 %v5693_v41  ;;  %v10732_v41 = vpack.c.bf16 %v253_v32, %v252_v53 }
 0xb57   :  { %v5699_v51 = vpop.xlane.xlu1 %5698 }
 0xb58   :  { %10930 = vrcp.f32 %v5699_v51  ;;  %v5696_v45 = vpop.xlane.xlu0 %5695 }
 0xb59   :  { %10932 = vrcp.f32 %v5696_v45  ;;  %v254_v45 = vld [vmem:[%s13173_s13 + $0x70] sm:$0xff] }
 0xb5a   :  { %v10927_v36 = vpop.eup %10926 }
 0xb5b   :  { %v5713_v31 = vmul.f32 %v10927_v36, %v10911_v52  ;;  %v5705_v23 = vpop.xlane.xlu1 %5704  ;;  %v255_v36 = vld [vmem:[%s13173_s13 + $0x78] sm:$0xff] }
 0xb5c   :  { %10934 = vrcp.f32 %v5705_v23  ;;  %v5702_v18 = vpop.xlane.xlu0 %5701  ;;  %v10736_v23 = vpack.c.bf16 %v255_v36, %v254_v45 }
 0xb5d   :  { %10936 = vrcp.f32 %v5702_v18  ;;  %10295 = vmatmul.mubr.msk.f32.vlgmr.msra.gmra.mrb[114].mxu1 %vm957_vm2, %v5713_v31 }
 0xb5e   :  { %v10929_v21 = vpop.eup %10928  ;;  %10303 = vmatpush3.msra.mxu1 %v12209_v62  ;;  %10304 = vmatprep.mubr.msk.f32.mxu1 %vm11019_vm1, %v11018_v16 }
 0xb5f   :  { %v5715_v50 = vmul.f32 %v10929_v21, %v10913_v60  ;;  %v5711_v8 = vpop.xlane.xlu1 %5710  ;;  %10312 = vmatprep.subr.mxu1 %v11018_v16  ;;  %v292_v21 = vld [vmem:[%s13175_s30 + $0x60] sm:$0xff] }
 0xb60   :  { %10938 = vrcp.f32 %v5711_v8  ;;  %v5708_v13 = vpop.xlane.xlu0 %5707 }
 0xb61   :  { %10940 = vrcp.f32 %v5708_v13  ;;  %10300 = vmatmul.mubr.msk.f32.vlgmr.msra.gmra.mrb[102].mxu0 %vm957_vm2, %v5715_v50  ;;  %v293_v50 = vld [vmem:[%s13175_s30 + $0x68] sm:$0xff] }
 0xb62   :  { %v10931_v40 = vpop.eup %10930  ;;  %10308 = vmatpush3.msra.mxu0 %v12204_v20  ;;  %10309 = vmatprep.mubr.msk.f32.mxu0 %vm11019_vm1, %v11018_v16  ;;  %v10748_v13 = vpack.c.bf16 %v293_v50, %v292_v21 }
 0xb63   :  { %v10933_v24 = vpop.eup %10932  ;;  %v5719_v62 = vmul.f32 %v10931_v40, %v10915_v15  ;;  %10317 = vmatprep.subr.mxu0 %v11018_v16  ;;  %v272_v15 = vld [vmem:[%s13174_s28 + $0x60] sm:$0xff] }
 0xb64   :  { %v5717_v52 = vmul.f32 %v10933_v24, %v10917_v56  ;;  %v274_v56 = vld [vmem:[%s13174_s28 + $0x70] sm:$0xff] }
 0xb65   :  { %10310 = vmatmul.mubr.msk.f32.vlgmr.msra.gmra.mrb[104].mxu0 %vm957_vm2, %v5719_v62  ;;  %v10744_v46 = vpack.c.bf16 %v275_v27, %v274_v56 }
 0xb66   :  { %v10935_v44 = vpop.eup %10934  ;;  %10305 = vmatmul.mubr.msk.f32.vlgmr.msra.gmra.mrb[116].mxu1 %vm957_vm2, %v5717_v52  ;;  %10318 = vmatpush3.msra.mxu0 %v12214_v54  ;;  %v234_v54 = vld [vmem:[%s13172_s5 + $0x70] sm:$0xff] }
 0xb67   :  { %v10937_v20 = vpop.eup %10936  ;;  %v5723_v38 = vmul.f32 %v10935_v44, %v10919_v33  ;;  %10313 = vmatpush3.msra.mxu1 %v12219_v61  ;;  %10314 = vmatprep.mubr.msk.f32.mxu1 %vm11019_vm1, %v11018_v16  ;;  %v235_v61 = vld [vmem:[%s13172_s5 + $0x78] sm:$0xff]  ;;  %v312_v33 = vld [vmem:[%s13178_s0 + $0x60] sm:$0xff] }
 0xb68   :  { %v5721_v37 = vmul.f32 %v10937_v20, %v10921_v2  ;;  %10319 = vmatprep.mubr.msk.f32.mxu0 %vm11019_vm1, %v11018_v16  ;;  %10322 = vmatprep.subr.mxu1 %v11018_v16  ;;  %v10728_v39 = vpack.c.bf16 %v235_v61, %v234_v54  ;;  %v313_v2 = vld [vmem:[%s13178_s0 + $0x68] sm:$0xff]  ;;  %v294_v61 = vld [vmem:[%s13175_s30 + $0x70] sm:$0xff] }
 0xb69   :  { %10327 = vmatprep.subr.mxu0 %v11018_v16  ;;  %10320 = vmatmul.mubr.msk.f32.vlgmr.msra.gmra.mrb[106].mxu0 %vm957_vm2, %v5723_v38  ;;  %v10756_v55 = vpack.c.bf16 %v313_v2, %v312_v33 }
 0xb6a   :  { %v10939_v35 = vpop.eup %10938  ;;  %10315 = vmatmul.mubr.msk.f32.vlgmr.msra.gmra.mrb[118].mxu1 %vm957_vm2, %v5721_v37  ;;  %10328 = vmatpush3.msra.mxu0 %v12224_v29  ;;  %v273_v29 = vld [vmem:[%s13174_s28 + $0x68] sm:$0xff] }
 0xb6b   :  { %v10941_v60 = vpop.eup %10940  ;;  %v5727_v58 = vmul.f32 %v10939_v35, %v10923_v28  ;;  %10323 = vmatpush3.msra.mxu1 %v12229_v30  ;;  %10324 = vmatprep.mubr.msk.f32.mxu1 %vm11019_vm1, %v11018_v16  ;;  %v10740_v30 = vpack.c.bf16 %v273_v29, %v272_v15  ;;  %v315_v28 = vld [vmem:[%s13178_s0 + $0x78] sm:$0xff] }
 0xb6c   :  { %v5725_v10 = vmul.f32 %v10941_v60, %v10925_v25  ;;  %10329 = vmatprep.mubr.msk.f32.mxu0 %vm11019_vm1, %v11018_v16  ;;  %10725 = vmatprep.subr.bf16.mxu1 %v10724_v43  ;;  %v10760_v25 = vpack.c.bf16 %v315_v28, %v314_v0  ;;  %v295_v35 = vld [vmem:[%s13175_s30 + $0x78] sm:$0xff] }
 0xb6d   :  { %10330 = vmatmul.mubr.msk.f32.vlgmr.msra.gmra.mrb[108].mxu0 %vm957_vm2, %v5727_v58  ;;  %10332 = vmatprep.subr.mxu0 %v322_v19  ;;  %v10752_v60 = vpack.c.bf16 %v295_v35, %v294_v61 }
 0xb6e   :  { %10325 = vmatmul.mubr.msk.f32.vlgmr.msra.gmra.mrb[120].mxu1 %vm957_vm2, %v5725_v10  ;;  %10333 = vmatpush3.msra.mxu0 %v322_v19 }
 0xb6f   :  { %10727 = vmatpush3.bf16.msra.mxu1 %v10724_v43  ;;  %10354 = vmatprep.mubr.msk.f32.mxu1 %vm84_vm0, %v11267_v47 }
 0xb70   :  { %10729 = vmatprep.subr.bf16.mxu1 %v10728_v39  ;;  %10733 = vmatprep.subr.bf16.mxu0 %v10732_v41 }
 0xb73   :  { %10731 = vmatpush3.bf16.msra.mxu1 %v10728_v39 }
 0xb74   :  { %10741 = vmatprep.subr.bf16.mxu1 %v10740_v30 }
 0xb76   :  { %10355 = vmatmul.mubr.msk.f32.vlgmr.msra.gmra.mrb[122].mxu1 %vm84_vm0, %v11290_v57 }
 0xb77   :  { %10357 = vmatprep.mubr.msk.f32.mxu1 %vm84_vm0, %v11294_v59  ;;  %10743 = vmatpush3.bf16.msra.mxu1 %v10740_v30 }
 0xb78   :  { %10745 = vmatprep.subr.bf16.mxu1 %v10744_v46 }
 0xb7a   :  { %10358 = vmatmul.mubr.msk.f32.gmra.mrb[124].mxu1 %vm84_vm0, %v11314_v3 }
 0xb7b   :  { %10360 = vmatprep.mubr.msk.f32.mxu1 %vm84_vm0, %v11320_v5  ;;  %10747 = vmatpush3.bf16.msra.mxu1 %v10744_v46 }
 0xb7c   :  { %10757 = vmatprep.subr.bf16.mxu1 %v10756_v55 }
 0xb7e   :  { %10361 = vmatmul.mubr.msk.f32.gmra.mrb[126].mxu1 %vm84_vm0, %v11334_v48 }
 0xb7f   :  { %10363 = vmatprep.mubr.msk.f32.mxu1 %vm84_vm0, %v11338_v11 }
 0xb82   :  { %10364 = vmatmul.mubr.msk.f32.gmra.mrb[128].mxu1 %vm84_vm0, %v11350_v49 }
 0xb83   :  { %10394 = vmatprep.mubr.msk.f32.mxu1 %vm84_vm0, %v11267_v47 }
 0xb86   :  { %10395 = vmatmul.mubr.msk.f32.vlgmr.msra.gmra.mrb[130].mxu1 %vm84_vm0, %v11290_v57 }
 0xb87   :  { %10397 = vmatprep.mubr.msk.f32.mxu1 %vm84_vm0, %v11294_v59  ;;  %10759 = vmatpush3.bf16.msra.mxu1 %v10756_v55 }
 0xb88   :  { %10761 = vmatprep.subr.bf16.mxu1 %v10760_v25 }
 0xb8a   :  { %10398 = vmatmul.mubr.msk.f32.gmra.mrb[132].mxu1 %vm84_vm0, %v11314_v3 }
 0xb8b   :  { %10400 = vmatprep.mubr.msk.f32.mxu1 %vm84_vm0, %v11320_v5  ;;  %10763 = vmatpush3.bf16.msra.mxu1 %v10760_v25 }
 0xb8c   :  { %10451 = vmatprep.subr.mxu1 %v11018_v16 }
 0xb8e   :  { %10401 = vmatmul.mubr.msk.f32.gmra.mrb[134].mxu1 %vm84_vm0, %v11334_v48 }
 0xb8f   :  { %10403 = vmatprep.mubr.msk.f32.mxu1 %vm84_vm0, %v11338_v11 }
 0xb92   :  { %10404 = vmatmul.mubr.msk.f32.gmra.mrb[136].mxu1 %vm84_vm0, %v11350_v49 }
 0xb93   :  { %10434 = vmatprep.mubr.msk.f32.mxu1 %vm84_vm0, %v11267_v47 }
 0xb96   :  { %10435 = vmatmul.mubr.msk.f32.vlgmr.msra.gmra.mrb[138].mxu1 %vm84_vm0, %v11290_v57 }
 0xb97   :  { %10437 = vmatprep.mubr.msk.f32.mxu1 %vm84_vm0, %v11294_v59 }
 0xb9a   :  { %10438 = vmatmul.mubr.msk.f32.gmra.mrb[140].mxu1 %vm84_vm0, %v11314_v3 }
 0xb9b   :  { %10440 = vmatprep.mubr.msk.f32.mxu1 %vm84_vm0, %v11320_v5 }
 0xb9e   :  { %10441 = vmatmul.mubr.msk.f32.gmra.mrb[142].mxu1 %vm84_vm0, %v11334_v48 }
 0xb9f   :  { %10443 = vmatprep.mubr.msk.f32.mxu1 %vm84_vm0, %v11338_v11 }
 0xba2   :  { %10444 = vmatmul.mubr.msk.f32.gmra.mrb[144].mxu1 %vm84_vm0, %v11350_v49 }
 0xba3   :  { %10453 = vmatprep.mubr.msk.f32.mxu1 %vm11019_vm1, %v11018_v16 }
 0xc30   :  { %v5797_v51 = vpop.f32.mrb[114].mxu1 }
 0xc31   :  { %v10296_v31 = vpop.f32.mrb[115].mxu1  ;;  %10334 = vmatprep.mubr.msk.f32.mxu0 %vm957_vm2, %v5797_v51 }
 0xc34   :  { %v5870_v18 = vpop.f32.mrb[102].mxu0 }
 0xc35   :  { %v10301_v8 = vpop.f32.mrb[103].mxu0  ;;  %10335 = vmatmul.mubr.msk.f32.vlgmr.msra.gmra.mrb[72].mxu0 %vm957_vm2, %v5870_v18  ;;  %v9243_v18 = vld [vmem:[%s13142_s8 + $0x3] ss:$0 sm:$0xff] }
 0xc36   :  { %10735 = vmatpush3.bf16.msra.mxu0 %v10732_v41 }
 0xc37   :  { %10737 = vmatprep.subr.bf16.mxu0 %v10736_v23 }
 0xc38   :  { %v6016_v40 = vpop.f32.mrb[104].mxu0 }
 0xc39   :  { %v5943_v24 = vpop.f32.mrb[116].mxu1  ;;  %v10311_v62 = vpop.f32.mrb[105].mxu0 }
 0xc3a   :  { %v10306_v52 = vpop.f32.mrb[117].mxu1  ;;  %10337 = vmatprep.mubr.msk.f32.mxu0 %vm957_vm2, %v5943_v24  ;;  %10739 = vmatpush3.bf16.msra.mxu0 %v10736_v23  ;;  %v9234_v23 = vld [vmem:[%s13141_s6 + $0x3] ss:$0 sm:$0xff] }
 0xc3b   :  { %10338 = vmatmul.mubr.msk.f32.gmra.mrb[74].mxu0 %vm957_vm2, %v6016_v40  ;;  %10749 = vmatprep.subr.bf16.mxu0 %v10748_v13 }
 0xc3c   :  { %v6162_v17 = vpop.f32.mrb[106].mxu0 }
 0xc3d   :  { %v6089_v26 = vpop.f32.mrb[118].mxu1  ;;  %v10321_v44 = vpop.f32.mrb[107].mxu0 }
 0xc3e   :  { %v10316_v20 = vpop.f32.mrb[119].mxu1  ;;  %10340 = vmatprep.mubr.msk.f32.mxu0 %vm957_vm2, %v6089_v26 }
 0xc3f   :  { %10341 = vmatmul.mubr.msk.f32.gmra.mrb[76].mxu0 %vm957_vm2, %v6162_v17 }
 0xc40   :  { %v6308_v38 = vpop.f32.mrb[108].mxu0 }
 0xc41   :  { %v6235_v37 = vpop.f32.mrb[120].mxu1  ;;  %v10331_v43 = vpop.f32.mrb[109].mxu0 }
 0xc42   :  { %v10326_v54 = vpop.f32.mrb[121].mxu1  ;;  %10343 = vmatprep.mubr.msk.f32.mxu0 %vm957_vm2, %v6235_v37 }
 0xc43   :  { %10344 = vmatmul.mubr.msk.f32.gmra.mrb[78].mxu0 %vm957_vm2, %v6308_v38 }
 0xc44   :  { %10374 = vmatprep.mubr.msk.f32.mxu0 %vm84_vm0, %v11267_v47 }
 0xc47   :  { %10375 = vmatmul.mubr.msk.f32.vlgmr.msra.gmra.mrb[110].mxu0 %vm84_vm0, %v11290_v57 }
 0xc48   :  { %10377 = vmatprep.mubr.msk.f32.mxu0 %vm84_vm0, %v11294_v59  ;;  %10751 = vmatpush3.bf16.msra.mxu0 %v10748_v13 }
 0xc49   :  { %v10356_v58 = vpop.f32.mrb[122].mxu1  ;;  %10753 = vmatprep.subr.bf16.mxu0 %v10752_v60 }
 0xc4a   :  { %v6521_v10 = vpop.f32.mrb[123].mxu1  ;;  %v6527_v21 = vadd.f32 %v10356_v58, %v9234_v23 }
 0xc4b   :  { %10378 = vmatmul.mubr.msk.f32.gmra.mrb[112].mxu0 %vm84_vm0, %v11314_v3  ;;  %v6522_v50 = vadd.f32 %v9234_v23, %v6521_v10 }
 0xc4c   :  { %10380 = vmatprep.mubr.msk.f32.mxu0 %vm84_vm0, %v11320_v5  ;;  %10755 = vmatpush3.bf16.msra.mxu0 %v10752_v60  ;;  %v7005_v62 = vmul.f32 %v12316_v22, %v6527_v21 }
 0xc4d   :  { %v10359_v39 = vpop.f32.mrb[124].mxu1  ;;  %10446 = vmatprep.subr.mxu0 %v11018_v16  ;;  %v7004_v26 = vmul.f32 %v12316_v22, %v6522_v50 }
 0xc4e   :  { %v6531_v15 = vpop.f32.mrb[125].mxu1  ;;  %v6537_v52 = vadd.f32 %v10359_v39, %v9234_v23 }
 0xc4f   :  { %10381 = vmatmul.mubr.msk.f32.gmra.mrb[114].mxu0 %vm84_vm0, %v11334_v48  ;;  %v6532_v44 = vadd.f32 %v9234_v23, %v6531_v15 }
 0xc50   :  { %10383 = vmatprep.mubr.msk.f32.mxu0 %vm84_vm0, %v11338_v11  ;;  %v7007_v60 = vmul.f32 %v12316_v22, %v6537_v52 }
 0xc51   :  { %v10362_v29 = vpop.f32.mrb[126].mxu1  ;;  %v7006_v39 = vmul.f32 %v12316_v22, %v6532_v44 }
 0xc52   :  { %v6541_v30 = vpop.f32.mrb[127].mxu1  ;;  %v6547_v58 = vadd.f32 %v10362_v29, %v9234_v23 }
 0xc53   :  { %10384 = vmatmul.mubr.msk.f32.gmra.mrb[116].mxu0 %vm84_vm0, %v11350_v49 }
 0xc54   :  { %10414 = vmatprep.mubr.msk.f32.mxu0 %vm84_vm0, %v11267_v47  ;;  %v7009_v50 = vmul.f32 %v12316_v22, %v6547_v58 }
 0xc55   :  { %v12588_v56 = vpop.f32.mrb[128].mxu1 }
 0xc56   :  { %v12590_v27 = vpop.f32.mrb[129].mxu1 }
 0xc57   :  { %10415 = vmatmul.mubr.msk.f32.vlgmr.msra.gmra.mrb[118].mxu0 %vm84_vm0, %v11290_v57 }
 0xc58   :  { %10417 = vmatprep.mubr.msk.f32.mxu0 %vm84_vm0, %v11294_v59 }
 0xc59   :  { %v12596_v46 = vpop.f32.mrb[130].mxu1 }
 0xc5a   :  { %v12598_v33 = vpop.f32.mrb[131].mxu1 }
 0xc5b   :  { %10418 = vmatmul.mubr.msk.f32.gmra.mrb[120].mxu0 %vm84_vm0, %v11314_v3 }
 0xc5c   :  { %10420 = vmatprep.mubr.msk.f32.mxu0 %vm84_vm0, %v11320_v5 }
 0xc5d   :  { %v12604_v47 = vpop.f32.mrb[132].mxu1 }
 0xc5e   :  { %v12606_v2 = vpop.f32.mrb[133].mxu1 }
 0xc5f   :  { %10421 = vmatmul.mubr.msk.f32.gmra.mrb[122].mxu0 %vm84_vm0, %v11334_v48 }
 0xc60   :  { %10423 = vmatprep.mubr.msk.f32.mxu0 %vm84_vm0, %v11338_v11  ;;  %v12631_v11 = vld [vmem:[%s13147_s14 + $0x3] ss:$0 sm:$0xff] }
 0xc61   :  { %v12612_v57 = vpop.f32.mrb[134].mxu1 }
 0xc62   :  { %v12614_v59 = vpop.f32.mrb[135].mxu1 }
 0xc63   :  { %10424 = vmatmul.mubr.msk.f32.gmra.mrb[124].mxu0 %vm84_vm0, %v11350_v49 }
 0xc64   :  { %10448 = vmatprep.mubr.msk.f32.mxu0 %vm11019_vm1, %v11018_v16 }
 0xc65   :  { %v12620_v3 = vpop.f32.mrb[136].mxu1 }
 0xc66   :  { %v12622_v5 = vpop.f32.mrb[137].mxu1 }
 0xc69   :  { %v12624_v55 = vpop.f32.mrb[138].mxu1 }
 0xc6a   :  { %v12626_v48 = vpop.f32.mrb[139].mxu1 }
 0xc6d   :  { %v10439_v0 = vpop.f32.mrb[140].mxu1 }
 0xc6e   :  { %v12634_v28 = vadd.f32 %v10439_v0, %v12631_v11  ;;  %v6975_v49 = vpop.f32.mrb[141].mxu1  ;;  %v6542_v0 = vadd.f32 %v9234_v23, %v6541_v30  ;;  %v6552_v30 = vadd.f32 %v9234_v23, %v12590_v27 }
 0xc6f   :  { %v12637_v25 = vadd.f32 %v12631_v11, %v6975_v49 }
 0xc71   :  { %v10442_v19 = vpop.f32.mrb[142].mxu1 }
 0xc72   :  { %v12640_v53 = vadd.f32 %v10442_v19, %v12631_v11  ;;  %v6985_v32 = vpop.f32.mrb[143].mxu1 }
 0xc73   :  { %v12643_v41 = vadd.f32 %v12631_v11, %v6985_v32 }
 0xc75   :  { %v10445_v51 = vpop.f32.mrb[144].mxu1 }
 0xc76   :  { %v12646_v45 = vadd.f32 %v10445_v51, %v12631_v11  ;;  %v6995_v36 = vpop.f32.mrb[145].mxu1 }
 0xc77   :  { %v12649_v31 = vadd.f32 %v12631_v11, %v6995_v36 }
 0xd1a   :  { %v10376_v8 = vpop.f32.mrb[110].mxu0 }
 0xd1b   :  { %v6638_v13 = vadd.f32 %v10376_v8, %v9243_v18  ;;  %v6632_v40 = vpop.f32.mrb[111].mxu0  ;;  %v6557_v8 = vadd.f32 %v12588_v56, %v9234_v23 }
 0xd1c   :  { %v6633_v24 = vadd.f32 %v9243_v18, %v6632_v40  ;;  %v9252_v40 = vld [vmem:[%s13145_s10 + $0x3] ss:$0 sm:$0xff] }
 0xd1d   :  { %v7013_v17 = vmul.f32 %v12323_v42, %v6638_v13  ;;  %v7008_v13 = vmul.f32 %v12316_v22, %v6542_v0  ;;  %v7011_v27 = vmul.f32 %v12316_v22, %v6557_v8  ;;  %v6749_v23 = vadd.f32 %v12596_v46, %v9252_v40 }
 0xd1e   :  { %v7012_v20 = vmul.f32 %v12323_v42, %v6633_v24  ;;  %v10379_v38 = vpop.f32.mrb[112].mxu0  ;;  %v6759_v46 = vadd.f32 %v12604_v47, %v9252_v40 }
 0xd1f   :  { %v12661_v37 = vadd.f32 %v7013_v17, %v7005_v62  ;;  %v6648_v43 = vadd.f32 %v10379_v38, %v9243_v18  ;;  %v6642_v54 = vpop.f32.mrb[113].mxu0 }
 0xd20   :  { %v12663_v61 = vadd.f32 %v7012_v20, %v7004_v26  ;;  %v6643_v35 = vadd.f32 %v9243_v18, %v6642_v54  ;;  %v9261_v20 = vld [vmem:[%s13146_s12 + $0x3] ss:$0 sm:$0xff]  ;;  %v6744_v54 = vadd.f32 %v9252_v40, %v12598_v33  ;;  %v6754_v33 = vadd.f32 %v9252_v40, %v12606_v2 }
 0xd21   :  { %v7015_v10 = vmul.f32 %v12323_v42, %v6648_v43  ;;  %v7010_v43 = vmul.f32 %v12316_v22, %v6552_v30  ;;  %v6764_v2 = vadd.f32 %v9252_v40, %v12614_v59  ;;  %v6779_v59 = vadd.f32 %v12620_v3, %v9252_v40 }
 0xd22   :  { %v7014_v15 = vmul.f32 %v12323_v42, %v6643_v35  ;;  %v10382_v49 = vpop.f32.mrb[114].mxu0 }
 0xd23   :  { %v12669_v19 = vadd.f32 %v7015_v10, %v7007_v60  ;;  %v6658_v32 = vadd.f32 %v10382_v49, %v9243_v18  ;;  %v6652_v51 = vpop.f32.mrb[115].mxu0 }
 0xd24   :  { %v12671_v36 = vadd.f32 %v7014_v15, %v7006_v39  ;;  %v6653_v21 = vadd.f32 %v9243_v18, %v6652_v51  ;;  %v7029_v15 = vmul.f32 %v12316_v22, %v6749_v23 }
 0xd25   :  { %v7017_v29 = vmul.f32 %v12323_v42, %v6658_v32  ;;  %v7028_v32 = vmul.f32 %v12316_v22, %v6744_v54 }
 0xd26   :  { %v7016_v24 = vmul.f32 %v12323_v42, %v6653_v21  ;;  %v10385_v62 = vpop.f32.mrb[116].mxu0 }
 0xd27   :  { %v12682_v52 = vadd.f32 %v7017_v29, %v7009_v50  ;;  %v6668_v17 = vadd.f32 %v10385_v62, %v9243_v18  ;;  %v6662_v26 = vpop.f32.mrb[117].mxu0  ;;  %v6769_v62 = vadd.f32 %v12612_v57, %v9252_v40 }
 0xd28   :  { %v12684_v44 = vadd.f32 %v7016_v24, %v7008_v13  ;;  %v6663_v56 = vadd.f32 %v9243_v18, %v6662_v26  ;;  %v7031_v24 = vmul.f32 %v12316_v22, %v6759_v46 }
 0xd29   :  { %v7019_v38 = vmul.f32 %v12323_v42, %v6668_v17  ;;  %v7030_v17 = vmul.f32 %v12316_v22, %v6754_v33  ;;  %v7033_v54 = vmul.f32 %v12316_v22, %v6769_v62 }
 0xd2a   :  { %v7018_v35 = vmul.f32 %v12323_v42, %v6663_v56  ;;  %v10416_v60 = vpop.f32.mrb[118].mxu0 }
 0xd2b   :  { %v12695_v58 = vadd.f32 %v7019_v38, %v7011_v27  ;;  %v6860_v18 = vadd.f32 %v10416_v60, %v9261_v20  ;;  %v6854_v10 = vpop.f32.mrb[119].mxu0  ;;  %v7032_v60 = vmul.f32 %v12316_v22, %v6764_v2 }
 0xd2c   :  { %v12697_v39 = vadd.f32 %v7018_v35, %v7010_v43  ;;  %v6855_v0 = vadd.f32 %v9261_v20, %v6854_v10 }
 0xd2d   :  { %v7037_v49 = vmul.f32 %v12323_v42, %v6860_v18  ;;  %v6774_v18 = vadd.f32 %v9252_v40, %v12622_v5  ;;  %v7035_v5 = vmul.f32 %v12316_v22, %v6779_v59 }
 0xd2e   :  { %v7036_v51 = vmul.f32 %v12323_v42, %v6855_v0  ;;  %v10419_v21 = vpop.f32.mrb[120].mxu0 }
 0xd2f   :  { %v7045_v50 = vadd.f32 %v7037_v49, %v7029_v15  ;;  %v6870_v8 = vadd.f32 %v10419_v21, %v9261_v20  ;;  %v6864_v29 = vpop.f32.mrb[121].mxu0  ;;  %v7034_v49 = vmul.f32 %v12316_v22, %v6774_v18  ;;  %v6971_v22 = vadd.f32 %v12624_v55, %v12631_v11 }
 0xd30   :  { %v7044_v13 = vadd.f32 %v7036_v51, %v7028_v32  ;;  %v6865_v30 = vadd.f32 %v9261_v20, %v6864_v29 }
 0xd31   :  { %v7039_v47 = vmul.f32 %v12323_v42, %v6870_v8  ;;  %10452 = vmatpush3.xpose.msk.msra.mxu1 %vm957_vm2, %v7045_v50 }
 0xd32   :  { %v7038_v26 = vmul.f32 %v12323_v42, %v6865_v30  ;;  %v10422_v56 = vpop.f32.mrb[122].mxu0  ;;  %10447 = vmatpush3.xpose.msk.msra.mxu0 %vm957_vm2, %v7044_v13  ;;  %10461 = vmatprep.subr.mxu1 %v11018_v16 }
 0xd33   :  { %v7047_v27 = vadd.f32 %v7039_v47, %v7031_v24  ;;  %v6880_v23 = vadd.f32 %v10422_v56, %v9261_v20  ;;  %v6874_v38 = vpop.f32.mrb[123].mxu0  ;;  %10456 = vmatprep.subr.mxu0 %v11018_v16 }
 0xd34   :  { %v7046_v57 = vadd.f32 %v7038_v26, %v7030_v17  ;;  %v6875_v43 = vadd.f32 %v9261_v20, %v6874_v38  ;;  %10454 = vmatmul.mubr.msk.f32.vlgmr.msra.gmra.mrb[146].mxu1 %vm957_vm2, %v12661_v37 }
 0xd35   :  { %v7041_v35 = vmul.f32 %v12323_v42, %v6880_v23  ;;  %10449 = vmatmul.mubr.msk.f32.vlgmr.msra.gmra.mrb[126].mxu0 %vm957_vm2, %v12663_v61  ;;  %10462 = vmatpush3.xpose.msk.msra.mxu1 %vm957_vm2, %v7047_v27 }
 0xd36   :  { %v7040_v10 = vmul.f32 %v12323_v42, %v6875_v43  ;;  %v10425_v0 = vpop.f32.mrb[124].mxu0  ;;  %10457 = vmatpush3.xpose.msk.msra.mxu0 %vm957_vm2, %v7046_v57  ;;  %10463 = vmatprep.mubr.msk.f32.mxu1 %vm11019_vm1, %v11018_v16 }
 0xd37   :  { %v7049_v3 = vadd.f32 %v7041_v35, %v7033_v54  ;;  %v6890_v37 = vadd.f32 %v10425_v0, %v9261_v20  ;;  %v6884_v15 = vpop.f32.mrb[125].mxu0  ;;  %10458 = vmatprep.mubr.msk.f32.mxu0 %vm11019_vm1, %v11018_v16  ;;  %10471 = vmatprep.subr.mxu1 %v11018_v16 }
 0xd38   :  { %v7048_v61 = vadd.f32 %v7040_v10, %v7032_v60  ;;  %v6885_v46 = vadd.f32 %v9261_v20, %v6884_v15  ;;  %10464 = vmatmul.mubr.msk.f32.vlgmr.msra.gmra.mrb[148].mxu1 %vm957_vm2, %v12669_v19  ;;  %10466 = vmatprep.subr.mxu0 %v11018_v16 }
 0xd39   :  { %v7043_v40 = vmul.f32 %v12323_v42, %v6890_v37  ;;  %10459 = vmatmul.mubr.msk.f32.vlgmr.msra.gmra.mrb[128].mxu0 %vm957_vm2, %v12671_v36  ;;  %10472 = vmatpush3.xpose.msk.msra.mxu1 %vm957_vm2, %v7049_v3 }
 0xd3a   :  { %v7042_v32 = vmul.f32 %v12323_v42, %v6885_v46  ;;  %10467 = vmatpush3.xpose.msk.msra.mxu0 %vm957_vm2, %v7048_v61  ;;  %10473 = vmatprep.mubr.msk.f32.mxu1 %vm11019_vm1, %v11018_v16  ;;  %v6966_v42 = vadd.f32 %v12631_v11, %v12626_v48 }
 0xd3b   :  { %v7051_v19 = vadd.f32 %v7043_v40, %v7035_v5  ;;  %10468 = vmatprep.mubr.msk.f32.mxu0 %vm11019_vm1, %v11018_v16  ;;  %10481 = vmatprep.subr.mxu1 %v11018_v16 }
 0xd3c   :  { %v7050_v20 = vadd.f32 %v7042_v32, %v7034_v49  ;;  %10474 = vmatmul.mubr.msk.f32.vlgmr.msra.gmra.mrb[150].mxu1 %vm957_vm2, %v12682_v52  ;;  %10476 = vmatprep.subr.mxu0 %v11018_v16 }
 0xd3d   :  { %10469 = vmatmul.mubr.msk.f32.vlgmr.msra.gmra.mrb[130].mxu0 %vm957_vm2, %v12684_v44  ;;  %10482 = vmatpush3.xpose.msk.msra.mxu1 %vm957_vm2, %v7051_v19 }
 0xd3e   :  { %10477 = vmatpush3.xpose.msk.msra.mxu0 %vm957_vm2, %v7050_v20  ;;  %10483 = vmatprep.mubr.msk.f32.mxu1 %vm11019_vm1, %v11018_v16 }
 0xd3f   :  { %10478 = vmatprep.mubr.msk.f32.mxu0 %vm11019_vm1, %v11018_v16  ;;  %10491 = vmatprep.subr.mxu1 %v11018_v16 }
 0xd40   :  { %10484 = vmatmul.mubr.msk.f32.vlgmr.msra.gmra.mrb[152].mxu1 %vm957_vm2, %v12695_v58  ;;  %10486 = vmatprep.subr.mxu0 %v11018_v16 }
 0xd41   :  { %10479 = vmatmul.mubr.msk.f32.vlgmr.msra.gmra.mrb[132].mxu0 %vm957_vm2, %v12697_v39  ;;  %10492 = vmatpush3.msra.mxu1 %v6971_v22 }
 0xd42   :  { %10487 = vmatpush3.msra.mxu0 %v6966_v42  ;;  %10493 = vmatprep.mubr.msk.f32.mxu1 %vm11019_vm1, %v11018_v16 }
 0xd43   :  { %10501 = vmatprep.subr.mxu1 %v11018_v16  ;;  %10488 = vmatprep.mubr.msk.f32.mxu0 %vm11019_vm1, %v11018_v16 }
 0xd44   :  { %10496 = vmatprep.subr.mxu0 %v11018_v16 }
 0xe07   :  { %v7200_v55 = vpop.f32.mrb[146].mxu1 }
 0xe08   :  { %v7661_v48 = vmul.f32 0.35355338, %v7200_v55  ;;  %v7124_v11 = vpop.f32.mrb[126].mxu0  ;;  %v10455_v36 = vpop.f32.mrb[147].mxu1 }
 0xe09   :  { %v7660_v52 = vmul.f32 0.35355338, %v7124_v11  ;;  %v10450_v44 = vpop.f32.mrb[127].mxu0 }
 0xe0a   :  { %v7669_v58 = vsel %vm11571_vm3, %v7661_v48, -inf }
 0xe0b   :  { %v7352_v39 = vpop.f32.mrb[148].mxu1  ;;  %v7679_v33 = vsel %vm957_vm2, %v7669_v58, -inf  ;;  %v7668_v51 = vsel %vm11571_vm3, %v7660_v52, -inf }
 0xe0c   :  { %v7663_v21 = vmul.f32 0.35355338, %v7352_v39  ;;  %7680 = vmax.xlane.f32.xlu1 %v7679_v33  ;;  %v7276_v50 = vpop.f32.mrb[128].mxu0  ;;  %v10465_v8 = vpop.f32.mrb[149].mxu1  ;;  %v7676_v29 = vsel %vm957_vm2, %v7668_v51, -inf }
 0xe0d   :  { %v7662_v13 = vmul.f32 0.35355338, %v7276_v50  ;;  %7677 = vmax.xlane.f32.xlu0 %v7676_v29  ;;  %v10460_v30 = vpop.f32.mrb[129].mxu0 }
 0xe0e   :  { %v7671_v24 = vsel %vm11571_vm3, %v7663_v21, -inf }
 0xe0f   :  { %v7504_v62 = vpop.f32.mrb[150].mxu1  ;;  %v7685_v47 = vsel %vm957_vm2, %v7671_v24, -inf  ;;  %v7670_v17 = vsel %vm11571_vm3, %v7662_v13, -inf }
 0xe10   :  { %v7665_v2 = vmul.f32 0.35355338, %v7504_v62  ;;  %7686 = vmax.xlane.f32.xlu1 %v7685_v47  ;;  %v7428_v26 = vpop.f32.mrb[130].mxu0  ;;  %v10475_v56 = vpop.f32.mrb[151].mxu1  ;;  %v7682_v27 = vsel %vm957_vm2, %v7670_v17, -inf }
 0xe11   :  { %v7664_v23 = vmul.f32 0.35355338, %v7428_v26  ;;  %7683 = vmax.xlane.f32.xlu0 %v7682_v27  ;;  %v10470_v38 = vpop.f32.mrb[131].mxu0 }
 0xe12   :  { %v7673_v57 = vsel %vm11571_vm3, %v7665_v2, -inf }
 0xe13   :  { %v7656_v43 = vpop.f32.mrb[152].mxu1  ;;  %v7691_v54 = vsel %vm957_vm2, %v7673_v57, -inf  ;;  %v7672_v59 = vsel %vm11571_vm3, %v7664_v23, -inf }
 0xe14   :  { %v7667_v35 = vmul.f32 0.35355338, %v7656_v43  ;;  %7692 = vmax.xlane.f32.xlu1 %v7691_v54  ;;  %v7580_v60 = vpop.f32.mrb[132].mxu0  ;;  %v10485_v18 = vpop.f32.mrb[153].mxu1  ;;  %v7688_v10 = vsel %vm957_vm2, %v7672_v59, -inf }
 0xe15   :  { %v7666_v0 = vmul.f32 0.35355338, %v7580_v60  ;;  %7689 = vmax.xlane.f32.xlu0 %v7688_v10  ;;  %v10480_v3 = vpop.f32.mrb[133].mxu0 }
 0xe16   :  { %v7675_v37 = vsel %vm11571_vm3, %v7667_v35, -inf }
 0xe17   :  { %v7697_v15 = vsel %vm957_vm2, %v7675_v37, -inf  ;;  %v7674_v61 = vsel %vm11571_vm3, %v7666_v0, -inf }
 0xe18   :  { %7698 = vmax.xlane.f32.xlu1 %v7697_v15  ;;  %v7694_v46 = vsel %vm957_vm2, %v7674_v61, -inf }
 0xe19   :  { %7695 = vmax.xlane.f32.xlu0 %v7694_v46 }
 0xe99   :  { %v7681_v5 = vpop.xlane.xlu1 %7680 }
 0xe9a   :  { %v7701_v40 = vsub.f32 %v7669_v58, %v7681_v5  ;;  %v7678_v49 = vpop.xlane.xlu0 %7677 }
 0xe9b   :  { %v7700_v32 = vsub.f32 %v7668_v51, %v7678_v49 }
 0xe9c   :  { %v7710_v19 = vmul.f32 1.442695, %v7701_v40 }
 0xe9d   :  { %v7708_v20 = vmul.f32 1.442695, %v7700_v32  ;;  %v7687_v22 = vpop.xlane.xlu1 %7686 }
 0xe9e   :  { %10942 = vpow2.f32 %v7710_v19  ;;  %v7703_v42 = vsub.f32 %v7671_v24, %v7687_v22  ;;  %v7684_v55 = vpop.xlane.xlu0 %7683 }
 0xe9f   :  { %10944 = vpow2.f32 %v7708_v20  ;;  %v7702_v48 = vsub.f32 %v7670_v17, %v7684_v55 }
 0xea0   :  { %v7714_v11 = vmul.f32 1.442695, %v7703_v42 }
 0xea1   :  { %v7712_v36 = vmul.f32 1.442695, %v7702_v48  ;;  %v7693_v63 = vpop.xlane.xlu1 %7692 }
 0xea2   :  { %10946 = vpow2.f32 %v7714_v11  ;;  %v7705_v52 = vsub.f32 %v7673_v57, %v7693_v63  ;;  %v7690_v44 = vpop.xlane.xlu0 %7689 }
 0xea3   :  { %10948 = vpow2.f32 %v7712_v36  ;;  %v7704_v39 = vsub.f32 %v7672_v59, %v7690_v44 }
 0xea4   :  { %v7718_v33 = vmul.f32 1.442695, %v7705_v52 }
 0xea5   :  { %v7716_v58 = vmul.f32 1.442695, %v7704_v39  ;;  %v7699_v21 = vpop.xlane.xlu1 %7698 }
 0xea6   :  { %10950 = vpow2.f32 %v7718_v33  ;;  %v7707_v51 = vsub.f32 %v7675_v37, %v7699_v21  ;;  %v7696_v50 = vpop.xlane.xlu0 %7695 }
 0xea7   :  { %10952 = vpow2.f32 %v7716_v58  ;;  %v7706_v8 = vsub.f32 %v7674_v61, %v7696_v50 }
 0xea8   :  { %v10943_v29 = vpop.eup %10942  ;;  %v7722_v13 = vmul.f32 1.442695, %v7707_v51 }
 0xea9   :  { %v10945_v30 = vpop.eup %10944  ;;  %v7720_v24 = vmul.f32 1.442695, %v7706_v8  ;;  %v7727_v62 = vsel %vm957_vm2, %v10943_v29, 0.0 }
 0xeaa   :  { %10954 = vpow2.f32 %v7722_v13  ;;  %7728 = vadd.xlane.f32.xlu1 %v7727_v62  ;;  %v7724_v47 = vsel %vm957_vm2, %v10945_v30, 0.0 }
 0xeab   :  { %10956 = vpow2.f32 %v7720_v24  ;;  %7725 = vadd.xlane.f32.xlu0 %v7724_v47  ;;  %v9311_v24 = vld [vmem:[%s13149_s16] ss:$0 sm:$0xff] }
 0xeac   :  { %v10947_v17 = vpop.eup %10946 }
 0xead   :  { %v10949_v2 = vpop.eup %10948  ;;  %v7733_v26 = vsel %vm957_vm2, %v10947_v17, 0.0 }
 0xeae   :  { %7734 = vadd.xlane.f32.xlu1 %v7733_v26  ;;  %v7730_v56 = vsel %vm957_vm2, %v10949_v2, 0.0 }
 0xeaf   :  { %7731 = vadd.xlane.f32.xlu0 %v7730_v56 }
 0xeb0   :  { %v10951_v27 = vpop.eup %10950 }
 0xeb1   :  { %v10953_v23 = vpop.eup %10952  ;;  %v7739_v38 = vsel %vm957_vm2, %v10951_v27, 0.0 }
 0xeb2   :  { %7740 = vadd.xlane.f32.xlu1 %v7739_v38  ;;  %v7736_v57 = vsel %vm957_vm2, %v10953_v23, 0.0 }
 0xeb3   :  { %7737 = vadd.xlane.f32.xlu0 %v7736_v57 }
 0xeb4   :  { %v10955_v43 = vpop.eup %10954 }
 0xeb5   :  { %v10957_v54 = vpop.eup %10956  ;;  %v7745_v59 = vsel %vm957_vm2, %v10955_v43, 0.0 }
 0xeb6   :  { %7746 = vadd.xlane.f32.xlu1 %v7745_v59  ;;  %v7742_v35 = vsel %vm957_vm2, %v10957_v54, 0.0 }
 0xeb7   :  { %7743 = vadd.xlane.f32.xlu0 %v7742_v35 }
 0xf37   :  { %v7729_v60 = vpop.xlane.xlu1 %7728 }
 0xf38   :  { %10958 = vrcp.f32 %v7729_v60  ;;  %v7726_v18 = vpop.xlane.xlu0 %7725 }
 0xf39   :  { %10960 = vrcp.f32 %v7726_v18 }
 0xf3b   :  { %v7735_v10 = vpop.xlane.xlu1 %7734 }
 0xf3c   :  { %10962 = vrcp.f32 %v7735_v10  ;;  %v7732_v0 = vpop.xlane.xlu0 %7731 }
 0xf3d   :  { %10964 = vrcp.f32 %v7732_v0 }
 0xf3f   :  { %v7741_v3 = vpop.xlane.xlu1 %7740 }
 0xf40   :  { %10966 = vrcp.f32 %v7741_v3  ;;  %v7738_v37 = vpop.xlane.xlu0 %7737 }
 0xf41   :  { %10968 = vrcp.f32 %v7738_v37  ;;  %v11013_v37 = vld [vmem:[%s13171_s24 + $0x10] sm:$0xff] }
 0xf42   :  { %v10959_v15 = vpop.eup %10958 }
 0xf43   :  { %v10961_v61 = vpop.eup %10960  ;;  %v7751_v46 = vmul.f32 %v10959_v15, %v10943_v29  ;;  %v7747_v5 = vpop.xlane.xlu1 %7746 }
 0xf44   :  { %v7749_v40 = vmul.f32 %v10961_v61, %v10945_v30  ;;  %10970 = vrcp.f32 %v7747_v5  ;;  %v7744_v49 = vpop.xlane.xlu0 %7743 }
 0xf45   :  { %10972 = vrcp.f32 %v7744_v49  ;;  %10494 = vmatmul.mubr.msk.f32.vlgmr.msra.gmra.mrb[154].mxu1 %vm957_vm2, %v7751_v46 }
 0xf46   :  { %v10963_v32 = vpop.eup %10962  ;;  %10502 = vmatpush3.msra.mxu1 %v12634_v28  ;;  %10489 = vmatmul.mubr.msk.f32.vlgmr.msra.gmra.mrb[134].mxu0 %vm957_vm2, %v7749_v40 }
 0xf47   :  { %v10965_v19 = vpop.eup %10964  ;;  %v7755_v20 = vmul.f32 %v10963_v32, %v10947_v17  ;;  %10497 = vmatpush3.msra.mxu0 %v12637_v25  ;;  %10503 = vmatprep.mubr.msk.f32.mxu1 %vm11019_vm1, %v11018_v16  ;;  %v11014_v32 = vld [vmem:[%s13171_s24 + $0x28] sm:$0xff] }
 0xf48   :  { %v7753_v22 = vmul.f32 %v10965_v19, %v10949_v2  ;;  %10511 = vmatprep.subr.mxu1 %v11018_v16  ;;  %10498 = vmatprep.mubr.msk.f32.mxu0 %vm11019_vm1, %v11018_v16 }
 0xf49   :  { %10504 = vmatmul.mubr.msk.f32.vlgmr.msra.gmra.mrb[156].mxu1 %vm957_vm2, %v7755_v20  ;;  %10506 = vmatprep.subr.mxu0 %v11018_v16 }
 0xf4a   :  { %v10967_v28 = vpop.eup %10966  ;;  %10512 = vmatpush3.msra.mxu1 %v12640_v53  ;;  %10499 = vmatmul.mubr.msk.f32.vlgmr.msra.gmra.mrb[136].mxu0 %vm957_vm2, %v7753_v22  ;;  %v11015_v22 = vld [vmem:[%s13171_s24 + $0x20] sm:$0xff] }
 0xf4b   :  { %v10969_v42 = vpop.eup %10968  ;;  %v7759_v25 = vmul.f32 %v10967_v28, %v10951_v27  ;;  %10507 = vmatpush3.msra.mxu0 %v12643_v41  ;;  %10513 = vmatprep.mubr.msk.f32.mxu1 %vm11019_vm1, %v11018_v16 }
 0xf4c   :  { %v7757_v55 = vmul.f32 %v10969_v42, %v10953_v23  ;;  %10521 = vmatprep.subr.mxu1 %v11018_v16  ;;  %10508 = vmatprep.mubr.msk.f32.mxu0 %vm11019_vm1, %v11018_v16  ;;  %v11010_v23 = vld [vmem:[%s13171_s24 + $0x8] sm:$0xff] }
 0xf4d   :  { %10514 = vmatmul.mubr.msk.f32.vlgmr.msra.gmra.mrb[158].mxu1 %vm957_vm2, %v7759_v25  ;;  %10516 = vmatprep.subr.mxu0 %v11018_v16 }
 0xf4e   :  { %v10971_v53 = vpop.eup %10970  ;;  %10522 = vmatpush3.msra.mxu1 %v12646_v45  ;;  %10509 = vmatmul.mubr.msk.f32.vlgmr.msra.gmra.mrb[138].mxu0 %vm957_vm2, %v7757_v55  ;;  %v323_v45 = vld [vmem:[%s13148_s15 + $0x18] sm:$0xff] }
 0xf4f   :  { %v10973_v48 = vpop.eup %10972  ;;  %v7763_v41 = vmul.f32 %v10971_v53, %v10955_v43  ;;  %10517 = vmatpush3.msra.mxu0 %v12649_v31  ;;  %10523 = vmatprep.mubr.msk.f32.mxu1 %vm11019_vm1, %v11018_v16 }
 0xf50   :  { %v7761_v11 = vmul.f32 %v10973_v48, %v10957_v54  ;;  %10518 = vmatprep.mubr.msk.f32.mxu0 %vm11019_vm1, %v11018_v16  ;;  %10526 = vmatprep.subr.mxu0 %v323_v45  ;;  %v11011_v54 = vld [vmem:[%s13171_s24] sm:$0xff] }
 0xf51   :  { %10524 = vmatmul.mubr.msk.f32.vlgmr.msra.gmra.mrb[160].mxu1 %vm957_vm2, %v7763_v41 }
 0xf52   :  { %10519 = vmatmul.mubr.msk.f32.vlgmr.msra.gmra.mrb[140].mxu0 %vm957_vm2, %v7761_v11 }
 0xf53   :  { %10527 = vmatpush3.msra.mxu0 %v323_v45 }
0x1018   :  { %v7906_v36 = vpop.f32.mrb[154].mxu1 }
0x1019   :  { %v7833_v63 = vpop.f32.mrb[134].mxu0  ;;  %v10495_v31 = vpop.f32.mrb[155].mxu1 }
0x101a   :  { %v10490_v52 = vpop.f32.mrb[135].mxu0  ;;  %10528 = vmatprep.mubr.msk.f32.mxu0 %vm957_vm2, %v7833_v63 }
0x101b   :  { %10529 = vmatmul.mubr.msk.f32.vlgmr.msra.gmra.mrb[72].mxu0 %vm957_vm2, %v7906_v36 }
0x101c   :  { %v8052_v44 = vpop.f32.mrb[156].mxu1 }
0x101d   :  { %v7979_v16 = vpop.f32.mrb[136].mxu0  ;;  %v10505_v39 = vpop.f32.mrb[157].mxu1 }
0x101e   :  { %v10500_v33 = vpop.f32.mrb[137].mxu0  ;;  %10531 = vmatprep.mubr.msk.f32.mxu0 %vm957_vm2, %v7979_v16 }
0x101f   :  { %10532 = vmatmul.mubr.msk.f32.gmra.mrb[74].mxu0 %vm957_vm2, %v8052_v44 }
0x1020   :  { %v8198_v58 = vpop.f32.mrb[158].mxu1 }
0x1021   :  { %v8125_v21 = vpop.f32.mrb[138].mxu0  ;;  %v10515_v51 = vpop.f32.mrb[159].mxu1 }
0x1022   :  { %v10510_v50 = vpop.f32.mrb[139].mxu0  ;;  %10534 = vmatprep.mubr.msk.f32.mxu0 %vm957_vm2, %v8125_v21 }
0x1023   :  { %10535 = vmatmul.mubr.msk.f32.gmra.mrb[76].mxu0 %vm957_vm2, %v8198_v58 }
0x1024   :  { %v8344_v8 = vpop.f32.mrb[160].mxu1 }
0x1025   :  { %v8271_v29 = vpop.f32.mrb[140].mxu0  ;;  %v10525_v13 = vpop.f32.mrb[161].mxu1 }
0x1026   :  { %v10520_v30 = vpop.f32.mrb[141].mxu0  ;;  %10537 = vmatprep.mubr.msk.f32.mxu0 %vm957_vm2, %v8271_v29 }
0x1027   :  { %10538 = vmatmul.mubr.msk.f32.gmra.mrb[78].mxu0 %vm957_vm2, %v8344_v8 }
0x10ee   :  { %v10530_v62 = vpop.f32.mrb[72].mxu0 }
0x10ef   :  { %v10804_v47 = vadd.f32 %v10530_v62, %v12237_v4  ;;  %v8438_v17 = vpop.f32.mrb[73].mxu0 }
0x10f0   :  { %v10805_v2 = vadd.f32 %v8438_v17, %v12239_v9 }
0x10f1   :  { %v8492_v26 = vadd.f32 %v10804_v47, %v9311_v24 }
0x10f2   :  { %v8491_v56 = vadd.f32 %v10805_v2, %v9311_v24  ;;  %v10533_v27 = vpop.f32.mrb[74].mxu0 }
0x10f3   :  { %v12856_v38 = vadd.f32 %v11010_v23, %v8492_v26  ;;  %v10806_v57 = vadd.f32 %v10533_v27, %v12241_v12  ;;  %v8448_v43 = vpop.f32.mrb[75].mxu0  ;;  %v11012_v12 = vld [vmem:[%s13171_s24 + $0x18] sm:$0xff] }
0x10f4   :  { %v12862_v4 = vadd.f32 %v11011_v54, %v8491_v56  ;;  %v10807_v9 = vadd.f32 %v8448_v43, %v12243_v1 }
0x10f5   :  { %v8494_v59 = vadd.f32 %v10806_v57, %v9311_v24  ;;  %v8512_v35 = vsel %vm84_vm0, %v12856_v38, 0.0 }
0x10f6   :  { %v8493_v60 = vadd.f32 %v10807_v9, %v9311_v24  ;;  %8513 = vadd.xlane.f32.xlu1 %v8512_v35  ;;  %v10536_v18 = vpop.f32.mrb[76].mxu0  ;;  %v8509_v10 = vsel %vm84_vm0, %v12862_v4, 0.0 }
0x10f7   :  { %v12872_v0 = vadd.f32 %v11012_v12, %v8494_v59  ;;  %v10808_v3 = vadd.f32 %v10536_v18, %v12245_v34  ;;  %8510 = vadd.xlane.f32.xlu0 %v8509_v10  ;;  %v8458_v1 = vpop.f32.mrb[77].mxu0 }
0x10f8   :  { %v12878_v15 = vadd.f32 %v11013_v37, %v8493_v60  ;;  %v10809_v61 = vadd.f32 %v8458_v1, %v12247_v14 }
0x10f9   :  { %v8496_v46 = vadd.f32 %v10808_v3, %v9311_v24  ;;  %v8518_v5 = vsel %vm84_vm0, %v12872_v0, 0.0 }
0x10fa   :  { %v8495_v40 = vadd.f32 %v10809_v61, %v9311_v24  ;;  %8519 = vadd.xlane.f32.xlu1 %v8518_v5  ;;  %v10539_v49 = vpop.f32.mrb[78].mxu0  ;;  %v8515_v34 = vsel %vm84_vm0, %v12878_v15, 0.0 }
0x10fb   :  { %v12888_v19 = vadd.f32 %v11014_v32, %v8496_v46  ;;  %v10810_v20 = vadd.f32 %v10539_v49, %v12249_v6  ;;  %8516 = vadd.xlane.f32.xlu0 %v8515_v34  ;;  %v8468_v14 = vpop.f32.mrb[79].mxu0  ;;  %v11016_v6 = vld [vmem:[%s13171_s24 + $0x38] sm:$0xff]  ;;  %v8642_v49 = vld [vmem:[%s13150_s19 + $0x8] sm:$0xff]  ;;  %v8643_v32 = vld [vmem:[%s13150_s19 + $0x10] sm:$0xff] }
0x10fc   :  { %v12894_v28 = vadd.f32 %v11015_v22, %v8495_v40  ;;  %v10811_v42 = vadd.f32 %v8468_v14, %v12251_v7  ;;  %v11017_v7 = vld [vmem:[%s13171_s24 + $0x30] sm:$0xff]  ;;  %v8641_v40 = vld [vmem:[%s13150_s19] sm:$0xff] }
0x10fd   :  { %v8498_v25 = vadd.f32 %v10810_v20, %v9311_v24  ;;  %v8524_v55 = vsel %vm84_vm0, %v12888_v19, 0.0  ;;  %v10764_v34 = vpack.c.bf16 %v8642_v49, %v8641_v40  ;;  %v8644_v20 = vld [vmem:[%s13150_s19 + $0x18] sm:$0xff]  ;;  %v8646_v22 = vld [vmem:[%s13151_s21] sm:$0xff] }
0x10fe   :  { %v8497_v53 = vadd.f32 %v10811_v42, %v9311_v24  ;;  %8525 = vadd.xlane.f32.xlu1 %v8524_v55  ;;  %v8521_v48 = vsel %vm84_vm0, %v12894_v28, 0.0  ;;  %v10768_v14 = vpack.c.bf16 %v8644_v20, %v8643_v32  ;;  %v8647_v42 = vld [vmem:[%s13151_s21 + $0x8] sm:$0xff] }
0x10ff   :  { %v12904_v41 = vadd.f32 %v11016_v6, %v8498_v25  ;;  %8522 = vadd.xlane.f32.xlu0 %v8521_v48  ;;  %10765 = vmatprep.subr.bf16.mxu1 %v10764_v34  ;;  %v10772_v25 = vpack.c.bf16 %v8647_v42, %v8646_v22 }
0x1100   :  { %v12909_v11 = vadd.f32 %v11017_v7, %v8497_v53  ;;  %10767 = vmatpush3.bf16.msra.mxu1 %v10764_v34 }
0x1101   :  { %v8530_v45 = vsel %vm84_vm0, %v12904_v41, 0.0  ;;  %10769 = vmatprep.subr.bf16.mxu1 %v10768_v14  ;;  %10773 = vmatprep.subr.bf16.mxu0 %v10772_v25 }
0x1102   :  { %8531 = vadd.xlane.f32.xlu1 %v8530_v45  ;;  %v8527_v36 = vsel %vm84_vm0, %v12909_v11, 0.0  ;;  %10775 = vmatpush3.bf16.msra.mxu0 %v10772_v25 }
0x1103   :  { %8528 = vadd.xlane.f32.xlu0 %v8527_v36 }
0x1104   :  { %10771 = vmatpush3.bf16.msra.mxu1 %v10768_v14 }
0x1183   :  { %v8514_v63 = vpop.xlane.xlu1 %8513 }
0x1184   :  { %v8534_v31 = vmul.f32 0.03125, %v8514_v63  ;;  %v8511_v52 = vpop.xlane.xlu0 %8510 }
0x1185   :  { %v8533_v44 = vmul.f32 0.03125, %v8511_v52 }
0x1186   :  { %v12916_v16 = vsub.f32 %v12856_v38, %v8534_v31 }
0x1187   :  { %v12919_v39 = vsub.f32 %v12862_v4, %v8533_v44  ;;  %v8520_v33 = vpop.xlane.xlu1 %8519 }
0x1188   :  { %v8536_v58 = vmul.f32 0.03125, %v8520_v33  ;;  %v8517_v21 = vpop.xlane.xlu0 %8516  ;;  %v8550_v51 = vmul.f32 %v12916_v16, %v12916_v16 }
0x1189   :  { %v8535_v50 = vmul.f32 0.03125, %v8517_v21  ;;  %v8549_v8 = vmul.f32 %v12919_v39, %v12919_v39 }
0x118a   :  { %v12926_v29 = vsub.f32 %v12872_v0, %v8536_v58  ;;  %v8560_v13 = vsel %vm84_vm0, %v8550_v51, 0.0 }
0x118b   :  { %v12930_v30 = vsub.f32 %v12878_v15, %v8535_v50  ;;  %v8526_v24 = vpop.xlane.xlu1 %8525  ;;  %8561 = vadd.xlane.f32.xlu1 %v8560_v13  ;;  %v8557_v62 = vsel %vm84_vm0, %v8549_v8, 0.0 }
0x118c   :  { %v8538_v47 = vmul.f32 0.03125, %v8526_v24  ;;  %v8523_v17 = vpop.xlane.xlu0 %8522  ;;  %8558 = vadd.xlane.f32.xlu0 %v8557_v62  ;;  %v8552_v2 = vmul.f32 %v12926_v29, %v12926_v29 }
0x118d   :  { %v8537_v26 = vmul.f32 0.03125, %v8523_v17  ;;  %v8551_v56 = vmul.f32 %v12930_v30, %v12930_v30 }
0x118e   :  { %v12938_v27 = vsub.f32 %v12888_v19, %v8538_v47  ;;  %v8566_v23 = vsel %vm84_vm0, %v8552_v2, 0.0 }
0x118f   :  { %v12942_v57 = vsub.f32 %v12894_v28, %v8537_v26  ;;  %8567 = vadd.xlane.f32.xlu1 %v8566_v23  ;;  %v8532_v43 = vpop.xlane.xlu1 %8531  ;;  %v8563_v54 = vsel %vm84_vm0, %v8551_v56, 0.0  ;;  %v9312_v56 = vld [vmem:[%s13152_s17] ss:$0 sm:$0xff] }
0x1190   :  { %v8540_v9 = vmul.f32 0.03125, %v8532_v43  ;;  %8564 = vadd.xlane.f32.xlu0 %v8563_v54  ;;  %v8529_v59 = vpop.xlane.xlu0 %8528  ;;  %v8554_v35 = vmul.f32 %v12938_v27, %v12938_v27 }
0x1191   :  { %v8539_v60 = vmul.f32 0.03125, %v8529_v59  ;;  %v8553_v18 = vmul.f32 %v12942_v57, %v12942_v57  ;;  %v9313_v59 = vld [vmem:[%s13153_s18] ss:$0 sm:$0xff] }
0x1192   :  { %v12950_v10 = vsub.f32 %v12904_v41, %v8540_v9  ;;  %v8572_v12 = vsel %vm84_vm0, %v8554_v35, 0.0 }
0x1193   :  { %v12954_v3 = vsub.f32 %v12909_v11, %v8539_v60  ;;  %8573 = vadd.xlane.f32.xlu1 %v8572_v12  ;;  %v8569_v1 = vsel %vm84_vm0, %v8553_v18, 0.0 }
0x1194   :  { %8570 = vadd.xlane.f32.xlu0 %v8569_v1  ;;  %v8556_v37 = vmul.f32 %v12950_v10, %v12950_v10 }
0x1195   :  { %v8555_v61 = vmul.f32 %v12954_v3, %v12954_v3 }
0x1196   :  { %v8578_v46 = vsel %vm84_vm0, %v8556_v37, 0.0 }
0x1197   :  { %8579 = vadd.xlane.f32.xlu1 %v8578_v46  ;;  %v8575_v5 = vsel %vm84_vm0, %v8555_v61, 0.0 }
0x1198   :  { %8576 = vadd.xlane.f32.xlu0 %v8575_v5 }
0x1218   :  { %v8562_v55 = vpop.xlane.xlu1 %8561 }
0x1219   :  { %v8582_v53 = vmul.f32 0.03125, %v8562_v55  ;;  %v8559_v48 = vpop.xlane.xlu0 %8558 }
0x121a   :  { %v8581_v6 = vmul.f32 0.03125, %v8559_v48 }
0x121b   :  { %v8590_v7 = vadd.f32 1e-05, %v8582_v53 }
0x121c   :  { %v8589_v45 = vadd.f32 1e-05, %v8581_v6  ;;  %v8568_v36 = vpop.xlane.xlu1 %8567 }
0x121d   :  { %10974 = vrsqrt.f32 %v8590_v7  ;;  %v8584_v63 = vmul.f32 0.03125, %v8568_v36  ;;  %v8565_v31 = vpop.xlane.xlu0 %8564  ;;  %v8651_v36 = vld [vmem:[%s13151_s21 + $0x28] sm:$0xff] }
0x121e   :  { %10976 = vrsqrt.f32 %v8589_v45  ;;  %v8583_v52 = vmul.f32 0.03125, %v8565_v31  ;;  %v8650_v45 = vld [vmem:[%s13151_s21 + $0x20] sm:$0xff]  ;;  %v8652_v31 = vld [vmem:[%s13151_s21 + $0x30] sm:$0xff] }
0x121f   :  { %v8592_v44 = vadd.f32 1e-05, %v8584_v63  ;;  %v10780_v63 = vpack.c.bf16 %v8651_v36, %v8650_v45 }
0x1220   :  { %v8591_v33 = vadd.f32 1e-05, %v8583_v52  ;;  %v8574_v58 = vpop.xlane.xlu1 %8573  ;;  %v8653_v52 = vld [vmem:[%s13151_s21 + $0x38] sm:$0xff] }
0x1221   :  { %10978 = vrsqrt.f32 %v8592_v44  ;;  %v8586_v21 = vmul.f32 0.03125, %v8574_v58  ;;  %v8571_v51 = vpop.xlane.xlu0 %8570  ;;  %v10784_v44 = vpack.c.bf16 %v8653_v52, %v8652_v31  ;;  %v8655_v58 = vld [vmem:[%s13151_s21 + $0x48] sm:$0xff] }
0x1222   :  { %10980 = vrsqrt.f32 %v8591_v33  ;;  %v8585_v50 = vmul.f32 0.03125, %v8571_v51  ;;  %v8654_v33 = vld [vmem:[%s13151_s21 + $0x40] sm:$0xff]  ;;  %v8656_v51 = vld [vmem:[%s13151_s21 + $0x50] sm:$0xff] }
0x1223   :  { %v8594_v8 = vadd.f32 1e-05, %v8586_v21  ;;  %v10788_v21 = vpack.c.bf16 %v8655_v58, %v8654_v33 }
0x1224   :  { %v8593_v13 = vadd.f32 1e-05, %v8585_v50  ;;  %v8580_v24 = vpop.xlane.xlu1 %8579  ;;  %v8657_v50 = vld [vmem:[%s13151_s21 + $0x58] sm:$0xff] }
0x1225   :  { %10982 = vrsqrt.f32 %v8594_v8  ;;  %v8588_v62 = vmul.f32 0.03125, %v8580_v24  ;;  %v8577_v47 = vpop.xlane.xlu0 %8576  ;;  %v10792_v8 = vpack.c.bf16 %v8657_v50, %v8656_v51  ;;  %v8659_v24 = vld [vmem:[%s13151_s21 + $0x68] sm:$0xff] }
0x1226   :  { %10984 = vrsqrt.f32 %v8593_v13  ;;  %v8587_v17 = vmul.f32 0.03125, %v8577_v47  ;;  %v8658_v13 = vld [vmem:[%s13151_s21 + $0x60] sm:$0xff] }
0x1227   :  { %v10975_v2 = vpop.eup %10974  ;;  %v8596_v26 = vadd.f32 1e-05, %v8588_v62  ;;  %v8660_v62 = vld [vmem:[%s13151_s21 + $0x70] sm:$0xff]  ;;  %v10796_v47 = vpack.c.bf16 %v8659_v24, %v8658_v13 }
0x1228   :  { %v10977_v23 = vpop.eup %10976  ;;  %v8606_v43 = vmul.f32 %v10975_v2, %v12916_v16  ;;  %v8595_v54 = vadd.f32 1e-05, %v8587_v17  ;;  %v8661_v17 = vld [vmem:[%s13151_s21 + $0x78] sm:$0xff] }
0x1229   :  { %10986 = vrsqrt.f32 %v8596_v26  ;;  %v8605_v9 = vmul.f32 %v10977_v23, %v12919_v39  ;;  %v10800_v2 = vpack.c.bf16 %v8661_v17, %v8660_v62  ;;  %v9314_v26 = vld [vmem:[%s13154_s20] ss:$0 sm:$0xff] }
0x122a   :  { %10988 = vrsqrt.f32 %v8595_v54  ;;  %v8620_v35 = vmul.f32 %v9312_v56, %v8606_v43 }
0x122b   :  { %v10979_v60 = vpop.eup %10978  ;;  %v8619_v18 = vmul.f32 %v9312_v56, %v8605_v9 }
0x122c   :  { %v10981_v12 = vpop.eup %10980  ;;  %v8608_v1 = vmul.f32 %v10979_v60, %v12926_v29  ;;  %v8634_v46 = vadd.f32 %v9313_v59, %v8620_v35 }
0x122d   :  { %v8633_v37 = vadd.f32 %v9313_v59, %v8619_v18  ;;  %v8607_v61 = vmul.f32 %v10981_v12, %v12930_v30 }
0x122e   :  { %v8622_v16 = vmul.f32 %v9312_v56, %v8608_v1 }
0x122f   :  { %v10983_v5 = vpop.eup %10982  ;;  %10548 = vmatprep.mubr.msk.f32.mxu1 %vm84_vm0, %v8633_v37  ;;  %v8621_v39 = vmul.f32 %v9312_v56, %v8607_v61 }
0x1230   :  { %v10985_v40 = vpop.eup %10984  ;;  %10549 = vmatmul.mubr.msk.f32.vlgmr.msra.gmra.mrb[162].mxu1 %vm84_vm0, %v8634_v46  ;;  %v8610_v49 = vmul.f32 %v10983_v5, %v12938_v27  ;;  %v8636_v20 = vadd.f32 %v9313_v59, %v8622_v16 }
0x1231   :  { %v8635_v34 = vadd.f32 %v9313_v59, %v8621_v39  ;;  %v8609_v32 = vmul.f32 %v10985_v40, %v12942_v57 }
0x1232   :  { %v8624_v14 = vmul.f32 %v9312_v56, %v8610_v49 }
0x1233   :  { %v10987_v29 = vpop.eup %10986  ;;  %10551 = vmatprep.mubr.msk.f32.mxu1 %vm84_vm0, %v8635_v34  ;;  %v8623_v30 = vmul.f32 %v9312_v56, %v8609_v32 }
0x1234   :  { %v10989_v22 = vpop.eup %10988  ;;  %10552 = vmatmul.mubr.msk.f32.gmra.mrb[164].mxu1 %vm84_vm0, %v8636_v20  ;;  %v8612_v42 = vmul.f32 %v10987_v29, %v12950_v10  ;;  %v8638_v53 = vadd.f32 %v9313_v59, %v8624_v14  ;;  %v8648_v10 = vld [vmem:[%s13151_s21 + $0x10] sm:$0xff] }
0x1235   :  { %v8637_v25 = vadd.f32 %v9313_v59, %v8623_v30  ;;  %v8611_v55 = vmul.f32 %v10989_v22, %v12954_v3  ;;  %v8649_v3 = vld [vmem:[%s13151_s21 + $0x18] sm:$0xff] }
0x1236   :  { %v8626_v48 = vmul.f32 %v9312_v56, %v8612_v42  ;;  %v10776_v7 = vpack.c.bf16 %v8649_v3, %v8648_v10 }
0x1237   :  { %10554 = vmatprep.mubr.msk.f32.mxu1 %vm84_vm0, %v8637_v25  ;;  %v8625_v27 = vmul.f32 %v9312_v56, %v8611_v55 }
0x1238   :  { %10555 = vmatmul.mubr.msk.f32.gmra.mrb[166].mxu1 %vm84_vm0, %v8638_v53  ;;  %v8640_v6 = vadd.f32 %v9313_v59, %v8626_v48  ;;  %10777 = vmatprep.subr.bf16.mxu0 %v10776_v7 }
0x1239   :  { %v8639_v57 = vadd.f32 %v9313_v59, %v8625_v27  ;;  %10779 = vmatpush3.bf16.msra.mxu0 %v10776_v7 }
0x123a   :  { %10781 = vmatprep.subr.bf16.mxu0 %v10780_v63 }
0x123b   :  { %10557 = vmatprep.mubr.msk.f32.mxu1 %vm84_vm0, %v8639_v57 }
0x123c   :  { %10558 = vmatmul.mubr.msk.f32.gmra.mrb[168].mxu1 %vm84_vm0, %v8640_v6 }
0x123d   :  { %10783 = vmatpush3.bf16.msra.mxu0 %v10780_v63 }
0x123e   :  { %10785 = vmatprep.subr.bf16.mxu0 %v10784_v44 }
0x1241   :  { %10787 = vmatpush3.bf16.msra.mxu0 %v10784_v44 }
0x1242   :  { %10789 = vmatprep.subr.bf16.mxu0 %v10788_v21 }
0x1245   :  { %10791 = vmatpush3.bf16.msra.mxu0 %v10788_v21 }
0x1246   :  { %10793 = vmatprep.subr.bf16.mxu0 %v10792_v8 }
0x1249   :  { %10795 = vmatpush3.bf16.msra.mxu0 %v10792_v8 }
0x124a   :  { %10797 = vmatprep.subr.bf16.mxu0 %v10796_v47 }
0x124d   :  { %10799 = vmatpush3.bf16.msra.mxu0 %v10796_v47 }
0x124e   :  { %10801 = vmatprep.subr.bf16.mxu0 %v10800_v2 }
0x1251   :  { %10803 = vmatpush3.bf16.msra.mxu0 %v10800_v2 }
0x1303   :  { %v10550_v56 = vpop.f32.mrb[162].mxu1 }
0x1304   :  { %v13048_v23 = vadd.f32 %v10550_v56, %v9314_v26  ;;  %v8759_v43 = vpop.f32.mrb[163].mxu1 }
0x1305   :  { %v8760_v54 = vadd.f32 %v9314_v26, %v8759_v43 }
0x1306   :  { %v8807_v9 = vmul.f32 0.044715, %v13048_v23 }
0x1307   :  { %v8806_v59 = vmul.f32 0.044715, %v8760_v54  ;;  %v10553_v35 = vpop.f32.mrb[164].mxu1 }
0x1308   :  { %v8815_v60 = vmul.f32 %v8807_v9, %v13048_v23  ;;  %v13052_v18 = vadd.f32 %v10553_v35, %v9314_v26  ;;  %v8769_v12 = vpop.f32.mrb[165].mxu1 }
0x1309   :  { %v8814_v1 = vmul.f32 %v8806_v59, %v8760_v54  ;;  %v13054_v37 = vadd.f32 %v9314_v26, %v8769_v12  ;;  %v8798_v59 = vmul.f32 0.5, %v8760_v54 }
0x130a   :  { %v8823_v61 = vmul.f32 %v8815_v60, %v13048_v23  ;;  %v8809_v46 = vmul.f32 0.044715, %v13052_v18  ;;  %v8799_v60 = vmul.f32 0.5, %v13048_v23 }
0x130b   :  { %v8808_v16 = vmul.f32 0.044715, %v13054_v37  ;;  %v10556_v5 = vpop.f32.mrb[166].mxu1  ;;  %v8822_v39 = vmul.f32 %v8814_v1, %v8760_v54 }
0x130c   :  { %v8831_v40 = vadd.f32 %v8823_v61, %v13048_v23  ;;  %v8817_v49 = vmul.f32 %v8809_v46, %v13052_v18  ;;  %v13061_v34 = vadd.f32 %v10556_v5, %v9314_v26  ;;  %v8779_v32 = vpop.f32.mrb[167].mxu1  ;;  %v8800_v5 = vmul.f32 0.5, %v13054_v37 }
0x130d   :  { %v8816_v20 = vmul.f32 %v8808_v16, %v13054_v37  ;;  %v13064_v14 = vadd.f32 %v9314_v26, %v8779_v32  ;;  %v8830_v29 = vadd.f32 %v8822_v39, %v8760_v54 }
0x130e   :  { %v8839_v30 = vmul.f32 0.7978846, %v8831_v40  ;;  %v8811_v22 = vmul.f32 0.044715, %v13061_v34  ;;  %v8825_v42 = vmul.f32 %v8817_v49, %v13052_v18  ;;  %v8801_v40 = vmul.f32 0.5, %v13052_v18 }
0x130f   :  { %v8810_v25 = vmul.f32 0.044715, %v13064_v14  ;;  %v10559_v55 = vpop.f32.mrb[168].mxu1  ;;  %v8838_v53 = vmul.f32 0.7978846, %v8830_v29  ;;  %v8824_v48 = vmul.f32 %v8816_v20, %v13054_v37  ;;  %v8802_v23 = vmul.f32 0.5, %v13064_v14 }
0x1310   :  { %10990 = vtanh.f32 %v8839_v30  ;;  %v8819_v27 = vmul.f32 %v8811_v22, %v13061_v34  ;;  %v13071_v57 = vadd.f32 %v10559_v55, %v9314_v26  ;;  %v8789_v6 = vpop.f32.mrb[169].mxu1  ;;  %v8833_v10 = vadd.f32 %v8825_v42, %v13052_v18 }
0x1311   :  { %v8818_v3 = vmul.f32 %v8810_v25, %v13064_v14  ;;  %v8790_v7 = vadd.f32 %v9314_v26, %v8789_v6  ;;  %10992 = vtanh.f32 %v8838_v53  ;;  %v8832_v45 = vadd.f32 %v8824_v48, %v13054_v37 }
0x1312   :  { %v8813_v36 = vmul.f32 0.044715, %v13071_v57  ;;  %v8841_v63 = vmul.f32 0.7978846, %v8833_v10  ;;  %v8827_v31 = vmul.f32 %v8819_v27, %v13061_v34  ;;  %v8803_v22 = vmul.f32 0.5, %v13061_v34 }
0x1313   :  { %v8812_v52 = vmul.f32 0.044715, %v8790_v7  ;;  %v8840_v44 = vmul.f32 0.7978846, %v8832_v45  ;;  %v8826_v33 = vmul.f32 %v8818_v3, %v13064_v14  ;;  %v8804_v48 = vmul.f32 0.5, %v8790_v7 }
0x1314   :  { %v8821_v58 = vmul.f32 %v8813_v36, %v13071_v57  ;;  %10994 = vtanh.f32 %v8841_v63  ;;  %v8835_v21 = vadd.f32 %v8827_v31, %v13061_v34  ;;  %v8805_v27 = vmul.f32 0.5, %v13071_v57 }
0x1315   :  { %v8820_v51 = vmul.f32 %v8812_v52, %v8790_v7  ;;  %10996 = vtanh.f32 %v8840_v44  ;;  %v8834_v50 = vadd.f32 %v8826_v33, %v13064_v14  ;;  %v9323_v14 = vld [vmem:[%s13155_s22] ss:$0 sm:$0xff] }
0x1316   :  { %v8843_v8 = vmul.f32 0.7978846, %v8835_v21  ;;  %v8829_v13 = vmul.f32 %v8821_v58, %v13071_v57 }
0x1317   :  { %v8842_v24 = vmul.f32 0.7978846, %v8834_v50  ;;  %v8828_v62 = vmul.f32 %v8820_v51, %v8790_v7 }
0x1318   :  { %10998 = vtanh.f32 %v8843_v8  ;;  %v8837_v47 = vadd.f32 %v8829_v13, %v13071_v57 }
0x1319   :  { %11000 = vtanh.f32 %v8842_v24  ;;  %v8836_v17 = vadd.f32 %v8828_v62, %v8790_v7 }
0x131a   :  { %v10991_v2 = vpop.eup %10990  ;;  %v8845_v26 = vmul.f32 0.7978846, %v8837_v47 }
0x131b   :  { %v10993_v56 = vpop.eup %10992  ;;  %v8855_v43 = vadd.f32 1.0, %v10991_v2  ;;  %v8844_v9 = vmul.f32 0.7978846, %v8836_v17 }
0x131c   :  { %v8854_v35 = vadd.f32 1.0, %v10993_v56  ;;  %11002 = vtanh.f32 %v8845_v26 }
0x131d   :  { %11004 = vtanh.f32 %v8844_v9  ;;  %v8863_v46 = vmul.f32 %v8855_v43, %v8799_v60 }
0x131e   :  { %v10995_v12 = vpop.eup %10994  ;;  %v8862_v1 = vmul.f32 %v8854_v35, %v8798_v59 }
0x131f   :  { %v10997_v61 = vpop.eup %10996  ;;  %v8857_v16 = vadd.f32 1.0, %v10995_v12 }
0x1320   :  { %10592 = vmatprep.mubr.f32.mxu0 %v8862_v1  ;;  %v8856_v39 = vadd.f32 1.0, %v10997_v61 }
0x1321   :  { %10593 = vmatmul.mubr.f32.vlgmr.msra.gmra.mrb[142].mxu0 %v8863_v46  ;;  %v8865_v20 = vmul.f32 %v8857_v16, %v8801_v40 }
0x1322   :  { %v10999_v49 = vpop.eup %10998  ;;  %v8864_v32 = vmul.f32 %v8856_v39, %v8800_v5 }
0x1323   :  { %v11001_v54 = vpop.eup %11000  ;;  %v8859_v29 = vadd.f32 1.0, %v10999_v49 }
0x1324   :  { %10595 = vmatprep.mubr.f32.mxu0 %v8864_v32  ;;  %v8858_v30 = vadd.f32 1.0, %v11001_v54 }
0x1325   :  { %10596 = vmatmul.mubr.f32.gmra.mrb[144].mxu0 %v8865_v20  ;;  %v8867_v37 = vmul.f32 %v8859_v29, %v8803_v22 }
0x1326   :  { %v11003_v42 = vpop.eup %11002  ;;  %v8866_v25 = vmul.f32 %v8858_v30, %v8802_v23 }
0x1327   :  { %v11005_v55 = vpop.eup %11004  ;;  %v8861_v53 = vadd.f32 1.0, %v11003_v42 }
0x1328   :  { %10598 = vmatprep.mubr.f32.mxu0 %v8866_v25  ;;  %v8860_v18 = vadd.f32 1.0, %v11005_v55 }
0x1329   :  { %10599 = vmatmul.mubr.f32.gmra.mrb[146].mxu0 %v8867_v37  ;;  %v8869_v10 = vmul.f32 %v8861_v53, %v8805_v27 }
0x132a   :  { %v8868_v6 = vmul.f32 %v8860_v18, %v8804_v48 }
0x132c   :  { %10601 = vmatprep.mubr.f32.mxu0 %v8868_v6 }
0x132d   :  { %10602 = vmatmul.mubr.f32.gmra.mrb[148].mxu0 %v8869_v10 }
0x13f4   :  { %v10594_v34 = vpop.f32.mrb[142].mxu0 }
0x13f5   :  { %v8948_v3 = vadd.f32 %v10594_v34, %v9323_v14  ;;  %v8942_v45 = vpop.f32.mrb[143].mxu0 }
0x13f6   :  { %v8943_v36 = vadd.f32 %v9323_v14, %v8942_v45 }
0x13f7   :  { %v8982_v63 = vadd.f32 %v8948_v3, %v12856_v38 }
0x13f8   :  { %v8981_v7 = vadd.f32 %v8943_v36, %v12862_v4  ;;  %v10597_v31 = vpop.f32.mrb[144].mxu0 }
0x13f9   :  { %8990 = vst.msk [vmem:[%s13156_s23 + $0x8] sm:$0xff] %vm84_vm0, %v8982_v63  ;;  %v8958_v57 = vadd.f32 %v10597_v31, %v9323_v14  ;;  %v8952_v52 = vpop.f32.mrb[145].mxu0 }
0x13fa   :  { %8989 = vst.msk [vmem:[%s13156_s23] sm:$0xff] %vm84_vm0, %v8981_v7  ;;  %v8953_v44 = vadd.f32 %v9323_v14, %v8952_v52 }
0x13fb   :  { %v8984_v33 = vadd.f32 %v8958_v57, %v12872_v0 }
0x13fc   :  { %v8983_v38 = vadd.f32 %v8953_v44, %v12878_v15  ;;  %v10600_v58 = vpop.f32.mrb[146].mxu0 }
0x13fd   :  { %8992 = vst.msk [vmem:[%s13156_s23 + $0x18] sm:$0xff] %vm84_vm0, %v8984_v33  ;;  %v8968_v4 = vadd.f32 %v10600_v58, %v9323_v14  ;;  %v8962_v21 = vpop.f32.mrb[147].mxu0 }
0x13fe   :  { %8991 = vst.msk [vmem:[%s13156_s23 + $0x10] sm:$0xff] %vm84_vm0, %v8983_v38  ;;  %v8963_v51 = vadd.f32 %v9323_v14, %v8962_v21 }
0x13ff   :  { %v8986_v50 = vadd.f32 %v8968_v4, %v12888_v19 }
0x1400   :  { %v8985_v0 = vadd.f32 %v8963_v51, %v12894_v28  ;;  %v10603_v8 = vpop.f32.mrb[148].mxu0 }
0x1401   :  { %8994 = vst.msk [vmem:[%s13156_s23 + $0x28] sm:$0xff] %vm84_vm0, %v8986_v50  ;;  %v8978_v15 = vadd.f32 %v10603_v8, %v9323_v14  ;;  %v8972_v13 = vpop.f32.mrb[149].mxu0 }
0x1402   :  { %8993 = vst.msk [vmem:[%s13156_s23 + $0x20] sm:$0xff] %vm84_vm0, %v8985_v0  ;;  %v8973_v24 = vadd.f32 %v9323_v14, %v8972_v13 }
0x1403   :  { %v8988_v62 = vadd.f32 %v8978_v15, %v12904_v41 }
0x1404   :  { %v8987_v19 = vadd.f32 %v8973_v24, %v12909_v11 }
0x1405   :  { %8996 = vst.msk [vmem:[%s13156_s23 + $0x38] sm:$0xff] %vm84_vm0, %v8988_v62 }
0x1406   :  { %8995 = vst.msk [vmem:[%s13156_s23 + $0x30] sm:$0xff] %vm84_vm0, %v8987_v19 }

// kernel: gpt_forward.9
= control target key start
LH: loop header
LB: loop body
LE: loop exit
PB: predicated region body
PF: predicated region fallthrough
CT: control target
= control target key end

     0   :  { %vm140_vm0 = vcmask 261120   ;;  %s12481_s6 = smov 5   ;;  %s12482_s10 = smov 7   ;;  %vm12489_vm1 = vmmov 0   ;;  %vm1013_vm2 = vcmask 64512   ;;  %vm8721_vm4 = vcmask 257024   ;;  %s14697_s0 = inlined_call_operand.smem [shape: u32[32], index: -1, kind: input, shape index: {}] }
   0x1   :  { %s12525_s5 = sld [smem:[%s14697_s0]]   ;;  %s12483_s14 = smov 9   ;;  %vm8878_vm5 = vcmask 1041409   ;;  %vm8880_vm6 = vcmask 1042434   ;;  %vm8882_vm7 = vcmask 1043459   ;;  %vm8884_vm8 = vcmask 1044484  }
   0x2   :  { %s12586_s9 = sld [smem:[%s14697_s0 + %s12481_s6]]   ;;  %s12484_s18 = smov 11   ;;  %vm8886_vm9 = vcmask 1045509   ;;  %vm8888_vm10 = vcmask 1046534   ;;  %vm8890_vm11 = vcmask 1047559   ;;  %vm8987_vm12 = vcmask 130048  }
   0x3   :  { %s12591_s13 = sld [smem:[%s14697_s0 + %s12482_s10]]   ;;  %s12485_s22 = smov 3  }
   0x4   :  { %s12604_s17 = sld [smem:[%s14697_s0 + %s12483_s14]]   ;;  %s12486_s26 = smov 4  }
   0x5   :  { %s12609_s21 = sld [smem:[%s14697_s0 + %s12484_s18]]   ;;  %s12487_s30 = smov 13  }
   0x6   :  { %s10315_s25 = sld [smem:[%s14697_s0 + %s12485_s22]]   ;;  %s12490_s4 = smov 6  }
   0x7   :  { %v130_v0 = vld [vmem:[%s12525_s5] sm:$0xff]  ;;  %v132_v1 = vld [vmem:[%s12525_s5 + $0x10] sm:$0xff]  ;;  %v131_v2 = vld [vmem:[%s12525_s5 + $0x8] sm:$0xff]  ;;  %s10316_s29 = sld [smem:[%s14697_s0 + %s12486_s26]]   ;;  %s12491_s10 = smov 8  }
   0x8   :  { %v141_v3 = vsel %vm140_vm0, %v130_v0, 0.0  ;;  %v147_v4 = vsel %vm140_vm0, %v132_v1, 0.0  ;;  %v133_v5 = vld [vmem:[%s12525_s5 + $0x18] sm:$0xff]  ;;  %v144_v6 = vsel %vm140_vm0, %v131_v2, 0.0  ;;  %v134_v8 = vld [vmem:[%s12525_s5 + $0x20] sm:$0xff]  ;;  %v135_v9 = vld [vmem:[%s12525_s5 + $0x28] sm:$0xff]  ;;  %s12697_s3 = sld [smem:[%s14697_s0 + %s12487_s30]]  }
   0x9   :  { %142 = vadd.xlane.f32.xlu0 %v141_v3  ;;  %148 = vadd.xlane.f32.xlu1 %v147_v4  ;;  %v150_v7 = vsel %vm140_vm0, %v133_v5, 0.0  ;;  %v153_v10 = vsel %vm140_vm0, %v134_v8, 0.0  ;;  %v156_v11 = vsel %vm140_vm0, %v135_v9, 0.0  ;;  %v136_v12 = vld [vmem:[%s12525_s5 + $0x30] sm:$0xff]  ;;  %v137_v13 = vld [vmem:[%s12525_s5 + $0x38] sm:$0xff]  ;;  %v276_v56 = vld [vmem:[%s12586_s9] sm:$0xff]  ;;  %s12777_s8 = sld [smem:[%s14697_s0 + %s12490_s4]]  }
   0xa   :  { %v159_v14 = vsel %vm140_vm0, %v136_v12, 0.0  ;;  %v162_v15 = vsel %vm140_vm0, %v137_v13, 0.0  ;;  %v277_v57 = vld [vmem:[%s12586_s9 + $0x8] sm:$0xff]  ;;  %v296_v58 = vld [vmem:[%s12591_s13] sm:$0xff]  ;;  %v278_v62 = vld [vmem:[%s12586_s9 + $0x10] sm:$0xff]  ;;  %s12782_s14 = sld [smem:[%s14697_s0 + %s12491_s10]]   ;;  %s12492_s15 = smov 1  }
   0xb   :  { %v11985_v59 = vpack.c.bf16 %v277_v57, %v276_v56  ;;  %v297_v60 = vld [vmem:[%s12591_s13 + $0x8] sm:$0xff]  ;;  %v279_v63 = vld [vmem:[%s12586_s9 + $0x18] sm:$0xff]  ;;  %v316_v4 = vld [vmem:[%s12604_s17] sm:$0xff]  ;;  %s12787_s19 = sld [smem:[%s14697_s0 + %s12492_s15]]   ;;  %s12493_s20 = smov 2  }
   0xc   :  { %v11993_v61 = vpack.c.bf16 %v297_v60, %v296_v58  ;;  %s12792_s24 = sld [smem:[%s14697_s0 + %s12493_s20]]   ;;  %s12496_s4 = smov 14  }
   0xd   :  { %145 = vadd.xlane.f32.xlu0 %v144_v6  ;;  %151 = vadd.xlane.f32.xlu1 %v150_v7  ;;  %v336_v6 = vld [vmem:[%s12609_s21] sm:$0xff]  ;;  %s12864_s10 = sld [smem:[%s14697_s0 + %s12496_s4]]   ;;  %s12497_s11 = smov 15  }
   0xe   :  { %11986 = vmatprep.subr.bf16.mxu0 %v11985_v59  ;;  %11994 = vmatprep.subr.bf16.mxu1 %v11993_v61  ;;  %s13395_s16 = sld [smem:[%s14697_s0 + %s12497_s11]]   ;;  %s12500_s18 = smov 17  }
   0xf   :  { %11988 = vmatpush3.bf16.msra.mxu0 %v11985_v59  ;;  %11996 = vmatpush3.bf16.msra.mxu1 %v11993_v61  ;;  %s10329_s22 = sld [smem:[%s14697_s0 + %s12500_s18]]   ;;  %s12501_s23 = smov 18  }
  0x10   :  { %s10330_s26 = sld [smem:[%s14697_s0 + %s12501_s23]]   ;;  %s12502_s27 = smov 21  }
  0x11   :  { %154 = vadd.xlane.f32.xlu0 %v153_v10  ;;  %157 = vadd.xlane.f32.xlu1 %v156_v11  ;;  %s10333_s30 = sld [smem:[%s14697_s0 + %s12502_s27]]   ;;  %s12503_s1 = smov 20  }
  0x12   :  { %s10332_s6 = sld [smem:[%s14697_s0 + %s12503_s1]]   ;;  %s12504_s7 = smov 22  }
  0x13   :  { %s10334_s12 = sld [smem:[%s14697_s0 + %s12504_s7]]   ;;  %s12508_s15 = smov 23  }
  0x14   :  { %s12511_s20 = smov 29   ;;  %s12514_s4 = smov 28  }
  0x15   :  { %160 = vadd.xlane.f32.xlu0 %v159_v14  ;;  %163 = vadd.xlane.f32.xlu1 %v162_v15  ;;  %s12515_s11 = smov 30  }
  0x96   :  { %v143_v16 = vpop.xlane.xlu0 %142  ;;  %v149_v17 = vpop.xlane.xlu1 %148 }
  0x97   :  { %v166_v18 = vmul.f32 0.03125, %v143_v16  ;;  %v168_v19 = vmul.f32 0.03125, %v149_v17 }
  0x99   :  { %v12543_v20 = vsub.f32 %v130_v0, %v166_v18  ;;  %v12545_v21 = vsub.f32 %v132_v1, %v168_v19  ;;  %v298_v0 = vld [vmem:[%s12591_s13 + $0x10] sm:$0xff]  ;;  %v11989_v1 = vpack.c.bf16 %v279_v63, %v278_v62 }
  0x9a   :  { %v146_v22 = vpop.xlane.xlu0 %145  ;;  %v152_v23 = vpop.xlane.xlu1 %151 }
  0x9b   :  { %v167_v24 = vmul.f32 0.03125, %v146_v22  ;;  %v169_v25 = vmul.f32 0.03125, %v152_v23  ;;  %v182_v26 = vmul.f32 %v12543_v20, %v12543_v20  ;;  %v184_v27 = vmul.f32 %v12545_v21, %v12545_v21  ;;  %11990 = vmatprep.subr.bf16.mxu0 %v11989_v1 }
  0x9c   :  { %11992 = vmatpush3.bf16.msra.mxu0 %v11989_v1 }
  0x9d   :  { %v12551_v28 = vsub.f32 %v131_v2, %v167_v24  ;;  %v12553_v29 = vsub.f32 %v133_v5, %v169_v25  ;;  %v190_v30 = vsel %vm140_vm0, %v182_v26, 0.0  ;;  %v196_v33 = vsel %vm140_vm0, %v184_v27, 0.0  ;;  %v299_v2 = vld [vmem:[%s12591_s13 + $0x18] sm:$0xff]  ;;  %v317_v5 = vld [vmem:[%s12604_s17 + $0x8] sm:$0xff] }
  0x9e   :  { %191 = vadd.xlane.f32.xlu0 %v190_v30  ;;  %v155_v31 = vpop.xlane.xlu0 %154  ;;  %v158_v32 = vpop.xlane.xlu1 %157  ;;  %v11997_v3 = vpack.c.bf16 %v299_v2, %v298_v0  ;;  %v12614_v7 = vpack.c.bf16 %v317_v5, %v316_v4 }
  0x9f   :  { %v170_v34 = vmul.f32 0.03125, %v155_v31  ;;  %v171_v35 = vmul.f32 0.03125, %v158_v32  ;;  %v183_v36 = vmul.f32 %v12551_v28, %v12551_v28  ;;  %v185_v37 = vmul.f32 %v12553_v29, %v12553_v29 }
  0xa0   :  { %11998 = vmatprep.subr.bf16.mxu1 %v11997_v3  ;;  %12002 = vmatprep.subr.bf16.mxu0 %v12614_v7 }
  0xa1   :  { %v12561_v38 = vsub.f32 %v134_v8, %v170_v34  ;;  %v12563_v39 = vsub.f32 %v135_v9, %v171_v35  ;;  %v193_v40 = vsel %vm140_vm0, %v183_v36, 0.0  ;;  %v199_v43 = vsel %vm140_vm0, %v185_v37, 0.0  ;;  %12000 = vmatpush3.bf16.msra.mxu1 %v11997_v3  ;;  %v337_v8 = vld [vmem:[%s12609_s21 + $0x8] sm:$0xff]  ;;  %v12627_v34 = vld [vmem:[%s10315_s25] ss:$0 sm:$0xff]  ;;  %s12494_s25 = smov 12  }
  0xa2   :  { %197 = vadd.xlane.f32.xlu0 %v196_v33  ;;  %194 = vadd.xlane.f32.xlu1 %v193_v40  ;;  %v161_v41 = vpop.xlane.xlu0 %160  ;;  %v164_v42 = vpop.xlane.xlu1 %163  ;;  %v12617_v9 = vpack.c.bf16 %v337_v8, %v336_v6  ;;  %s12833_s28 = sld [smem:[%s14697_s0 + %s12494_s25]]   ;;  %s12512_s25 = smov 25  }
  0xa3   :  { %v172_v44 = vmul.f32 0.03125, %v161_v41  ;;  %v173_v45 = vmul.f32 0.03125, %v164_v42  ;;  %v186_v46 = vmul.f32 %v12561_v38, %v12561_v38  ;;  %v187_v47 = vmul.f32 %v12563_v39, %v12563_v39  ;;  %v12630_v41 = vld [vmem:[%s10316_s29] ss:$0 sm:$0xff]  ;;  %s12495_s29 = smov 10  }
  0xa4   :  { %12197 = vmatprep.subr.bf16.mxu1 %v12617_v9  ;;  %s12842_s2 = sld [smem:[%s14697_s0 + %s12495_s29]]   ;;  %s12513_s29 = smov 26  }
  0xa5   :  { %v12571_v48 = vsub.f32 %v136_v12, %v172_v44  ;;  %v12573_v49 = vsub.f32 %v137_v13, %v173_v45  ;;  %v202_v50 = vsel %vm140_vm0, %v186_v46, 0.0  ;;  %v205_v51 = vsel %vm140_vm0, %v187_v47, 0.0 }
  0xa6   :  { %200 = vadd.xlane.f32.xlu1 %v199_v43  ;;  %203 = vadd.xlane.f32.xlu0 %v202_v50 }
  0xa7   :  { %v188_v52 = vmul.f32 %v12571_v48, %v12571_v48  ;;  %v189_v53 = vmul.f32 %v12573_v49, %v12573_v49 }
  0xa9   :  { %v208_v54 = vsel %vm140_vm0, %v188_v52, 0.0  ;;  %v211_v55 = vsel %vm140_vm0, %v189_v53, 0.0  ;;  %v319_v53 = vld [vmem:[%s12604_s17 + $0x18] sm:$0xff] }
  0xaa   :  { %206 = vadd.xlane.f32.xlu1 %v205_v51  ;;  %209 = vadd.xlane.f32.xlu0 %v208_v54  ;;  %v318_v51 = vld [vmem:[%s12604_s17 + $0x10] sm:$0xff] }
  0xab   :  { %v338_v54 = vld [vmem:[%s12609_s21 + $0x10] sm:$0xff]  ;;  %v12005_v61 = vpack.c.bf16 %v319_v53, %v318_v51 }
  0xae   :  { %212 = vadd.xlane.f32.xlu1 %v211_v55  ;;  %v339_v55 = vld [vmem:[%s12609_s21 + $0x18] sm:$0xff] }
  0xaf   :  { %v12013_v62 = vpack.c.bf16 %v339_v55, %v338_v54 }
 0x12b   :  { %v192_v10 = vpop.xlane.xlu0 %191 }
 0x12c   :  { %v214_v11 = vmul.f32 0.03125, %v192_v10 }
 0x12e   :  { %v222_v12 = vadd.f32 1e-05, %v214_v11  ;;  %v356_v11 = vld [vmem:[%s12697_s3] sm:$0xff] }
 0x12f   :  { %v195_v13 = vpop.xlane.xlu1 %194  ;;  %v198_v14 = vpop.xlane.xlu0 %197 }
 0x130   :  { %12261 = vrsqrt.f32 %v222_v12  ;;  %v215_v15 = vmul.f32 0.03125, %v195_v13  ;;  %v216_v16 = vmul.f32 0.03125, %v198_v14  ;;  %v357_v12 = vld [vmem:[%s12697_s3 + $0x8] sm:$0xff]  ;;  %v358_v14 = vld [vmem:[%s12697_s3 + $0x10] sm:$0xff] }
 0x131   :  { %v12017_v13 = vpack.c.bf16 %v357_v12, %v356_v11 }
 0x132   :  { %v223_v17 = vadd.f32 1e-05, %v215_v15  ;;  %v224_v18 = vadd.f32 1e-05, %v216_v16  ;;  %v359_v15 = vld [vmem:[%s12697_s3 + $0x18] sm:$0xff]  ;;  %v12488_v16 = vmov 0.0  }
 0x133   :  { %v201_v19 = vpop.xlane.xlu1 %200  ;;  %v204_v22 = vpop.xlane.xlu0 %203 }
 0x134   :  { %12263 = vrsqrt.f32 %v223_v17  ;;  %v217_v23 = vmul.f32 0.03125, %v201_v19  ;;  %v218_v24 = vmul.f32 0.03125, %v204_v22  ;;  %v10346_v17 = vld [vmem:[%s12777_s8] ss:$0 sm:$0xff] }
 0x135   :  { %12265 = vrsqrt.f32 %v224_v18  ;;  %v10355_v18 = vld [vmem:[%s12782_s14] ss:$0 sm:$0xff] }
 0x136   :  { %v225_v25 = vadd.f32 1e-05, %v217_v23  ;;  %v226_v26 = vadd.f32 1e-05, %v218_v24  ;;  %v12797_v19 = vld [vmem:[%s12787_s19] sm:$0xff] }
 0x137   :  { %v207_v27 = vpop.xlane.xlu1 %206  ;;  %v210_v30 = vpop.xlane.xlu0 %209  ;;  %v12800_v23 = vld [vmem:[%s12792_s24] sm:$0xff] }
 0x138   :  { %12267 = vrsqrt.f32 %v225_v25  ;;  %v219_v31 = vmul.f32 0.03125, %v207_v27  ;;  %v220_v32 = vmul.f32 0.03125, %v210_v30 }
 0x139   :  { %12269 = vrsqrt.f32 %v226_v26 }
 0x13a   :  { %v12262_v33 = vpop.eup %12261  ;;  %v227_v35 = vadd.f32 1e-05, %v219_v31  ;;  %v228_v36 = vadd.f32 1e-05, %v220_v32 }
 0x13b   :  { %v238_v37 = vmul.f32 %v12262_v33, %v12543_v20  ;;  %v213_v40 = vpop.xlane.xlu1 %212 }
 0x13c   :  { %12271 = vrsqrt.f32 %v227_v35  ;;  %v221_v42 = vmul.f32 0.03125, %v213_v40 }
 0x13d   :  { %v252_v43 = vmul.f32 %v12627_v34, %v238_v37  ;;  %12273 = vrsqrt.f32 %v228_v36 }
 0x13e   :  { %v12264_v44 = vpop.eup %12263  ;;  %v229_v45 = vadd.f32 1e-05, %v221_v42 }
 0x13f   :  { %v12266_v46 = vpop.eup %12265  ;;  %v12634_v47 = vadd.f32 %v12630_v41, %v252_v43  ;;  %v239_v50 = vmul.f32 %v12264_v44, %v12551_v28 }
 0x140   :  { %v240_v20 = vmul.f32 %v12266_v46, %v12545_v21  ;;  %12275 = vrsqrt.f32 %v229_v45 }
 0x141   :  { %v253_v52 = vmul.f32 %v12627_v34, %v239_v50  ;;  %11135 = vmatprep.mubr.msk.f32.mxu0 %vm140_vm0, %v12634_v47  ;;  %11155 = vmatprep.mubr.msk.f32.mxu1 %vm140_vm0, %v12634_v47 }
 0x142   :  { %v12268_v56 = vpop.eup %12267  ;;  %v254_v57 = vmul.f32 %v12627_v34, %v240_v20 }
 0x143   :  { %v12270_v58 = vpop.eup %12269  ;;  %v12649_v28 = vadd.f32 %v12630_v41, %v253_v52  ;;  %v241_v21 = vmul.f32 %v12268_v56, %v12553_v29 }
 0x144   :  { %v12653_v59 = vadd.f32 %v12630_v41, %v254_v57  ;;  %v242_v60 = vmul.f32 %v12270_v58, %v12561_v38 }
 0x145   :  { %v255_v63 = vmul.f32 %v12627_v34, %v241_v21  ;;  %11136 = vmatmul.mubr.msk.f32.vlgmr.msra.gmra.mrb[0].mxu0 %vm140_vm0, %v12649_v28  ;;  %11156 = vmatmul.mubr.msk.f32.vlgmr.msra.gmra.mrb[0].mxu1 %vm140_vm0, %v12649_v28 }
 0x146   :  { %v12272_v0 = vpop.eup %12271  ;;  %v256_v1 = vmul.f32 %v12627_v34, %v242_v60  ;;  %11138 = vmatprep.mubr.msk.f32.mxu0 %vm140_vm0, %v12653_v59  ;;  %11158 = vmatprep.mubr.msk.f32.mxu1 %vm140_vm0, %v12653_v59 }
 0x147   :  { %v12274_v29 = vpop.eup %12273  ;;  %v12667_v38 = vadd.f32 %v12630_v41, %v255_v63  ;;  %v243_v2 = vmul.f32 %v12272_v0, %v12563_v39  ;;  %12004 = vmatpush3.bf16.msra.mxu0 %v12614_v7  ;;  %12199 = vmatpush3.bf16.msra.mxu1 %v12617_v9 }
 0x148   :  { %v12673_v3 = vadd.f32 %v12630_v41, %v256_v1  ;;  %v244_v4 = vmul.f32 %v12274_v29, %v12571_v48  ;;  %12006 = vmatprep.subr.bf16.mxu0 %v12005_v61  ;;  %12198 = vmatprep.subr.bf16.mxu1 %v12013_v62 }
 0x149   :  { %v257_v5 = vmul.f32 %v12627_v34, %v243_v2  ;;  %11139 = vmatmul.mubr.msk.f32.gmra.mrb[2].mxu0 %vm140_vm0, %v12667_v38  ;;  %11159 = vmatmul.mubr.msk.f32.gmra.mrb[2].mxu1 %vm140_vm0, %v12667_v38 }
 0x14a   :  { %v12276_v39 = vpop.eup %12275  ;;  %v258_v6 = vmul.f32 %v12627_v34, %v244_v4  ;;  %11141 = vmatprep.mubr.msk.f32.mxu0 %vm140_vm0, %v12673_v3  ;;  %11161 = vmatprep.mubr.msk.f32.mxu1 %vm140_vm0, %v12673_v3 }
 0x14b   :  { %v12687_v48 = vadd.f32 %v12630_v41, %v257_v5  ;;  %v245_v7 = vmul.f32 %v12276_v39, %v12573_v49  ;;  %12008 = vmatpush3.bf16.msra.mxu0 %v12005_v61  ;;  %12200 = vmatpush3.bf16.msra.mxu1 %v12013_v62 }
 0x14c   :  { %v12691_v8 = vadd.f32 %v12630_v41, %v258_v6  ;;  %12010 = vmatprep.subr.bf16.mxu0 %v12617_v9  ;;  %11227 = vmatprep.subr.mxu1 %v12488_v16 }
 0x14d   :  { %v259_v10 = vmul.f32 %v12627_v34, %v245_v7  ;;  %11142 = vmatmul.mubr.msk.f32.gmra.mrb[4].mxu0 %vm140_vm0, %v12687_v48  ;;  %11162 = vmatmul.mubr.msk.f32.gmra.mrb[4].mxu1 %vm140_vm0, %v12687_v48 }
 0x14e   :  { %11144 = vmatprep.mubr.msk.f32.mxu0 %vm140_vm0, %v12691_v8  ;;  %11164 = vmatprep.mubr.msk.f32.mxu1 %vm140_vm0, %v12691_v8 }
 0x14f   :  { %v12709_v49 = vadd.f32 %v12630_v41, %v259_v10 }
 0x151   :  { %11145 = vmatmul.mubr.msk.f32.gmra.mrb[6].mxu0 %vm140_vm0, %v12709_v49  ;;  %11165 = vmatmul.mubr.msk.f32.gmra.mrb[6].mxu1 %vm140_vm0, %v12709_v49 }
 0x152   :  { %11175 = vmatprep.mubr.msk.f32.mxu0 %vm140_vm0, %v12634_v47  ;;  %11204 = vmatprep.mubr.msk.f32.mxu1 %vm140_vm0, %v12691_v8 }
 0x155   :  { %11176 = vmatmul.mubr.msk.f32.vlgmr.msra.gmra.mrb[8].mxu0 %vm140_vm0, %v12649_v28  ;;  %11205 = vmatmul.mubr.msk.f32.vlgmr.msra.gmra.mrb[8].mxu1 %vm140_vm0, %v12709_v49 }
 0x156   :  { %11178 = vmatprep.mubr.msk.f32.mxu0 %vm140_vm0, %v12653_v59  ;;  %12012 = vmatpush3.bf16.msra.mxu0 %v12617_v9  ;;  %v12021_v9 = vpack.c.bf16 %v359_v15, %v358_v14 }
 0x157   :  { %12014 = vmatprep.subr.bf16.mxu0 %v12013_v62  ;;  %11229 = vmatprep.mubr.msk.f32.mxu1 %vm12489_vm1, %v12488_v16 }
 0x159   :  { %11179 = vmatmul.mubr.msk.f32.gmra.mrb[10].mxu0 %vm140_vm0, %v12667_v38 }
 0x15a   :  { %11181 = vmatprep.mubr.msk.f32.mxu0 %vm140_vm0, %v12673_v3  ;;  %12016 = vmatpush3.bf16.msra.mxu0 %v12013_v62 }
 0x15b   :  { %12018 = vmatprep.subr.bf16.mxu0 %v12017_v13 }
 0x15d   :  { %11182 = vmatmul.mubr.msk.f32.gmra.mrb[12].mxu0 %vm140_vm0, %v12687_v48 }
 0x15e   :  { %11184 = vmatprep.mubr.msk.f32.mxu0 %vm140_vm0, %v12691_v8 }
 0x161   :  { %11185 = vmatmul.mubr.msk.f32.gmra.mrb[14].mxu0 %vm140_vm0, %v12709_v49 }
 0x162   :  { %11195 = vmatprep.mubr.msk.f32.mxu0 %vm140_vm0, %v12634_v47 }
 0x165   :  { %11196 = vmatmul.mubr.msk.f32.vlgmr.msra.gmra.mrb[16].mxu0 %vm140_vm0, %v12649_v28 }
 0x166   :  { %11198 = vmatprep.mubr.msk.f32.mxu0 %vm140_vm0, %v12653_v59  ;;  %12020 = vmatpush3.bf16.msra.mxu0 %v12017_v13 }
 0x167   :  { %12022 = vmatprep.subr.bf16.mxu0 %v12021_v9 }
 0x169   :  { %11199 = vmatmul.mubr.msk.f32.gmra.mrb[18].mxu0 %vm140_vm0, %v12667_v38 }
 0x16a   :  { %11201 = vmatprep.mubr.msk.f32.mxu0 %vm140_vm0, %v12673_v3  ;;  %12024 = vmatpush3.bf16.msra.mxu0 %v12021_v9 }
 0x16b   :  { %11247 = vmatprep.subr.mxu0 %v12488_v16 }
 0x16d   :  { %11202 = vmatmul.mubr.msk.f32.gmra.mrb[20].mxu0 %vm140_vm0, %v12687_v48 }
 0x16e   :  { %11215 = vmatprep.mubr.msk.f32.mxu0 %vm140_vm0, %v12634_v47 }
 0x171   :  { %11216 = vmatmul.mubr.msk.f32.vlgmr.msra.gmra.mrb[22].mxu0 %vm140_vm0, %v12649_v28 }
 0x172   :  { %11218 = vmatprep.mubr.msk.f32.mxu0 %vm140_vm0, %v12653_v59 }
 0x175   :  { %11219 = vmatmul.mubr.msk.f32.gmra.mrb[24].mxu0 %vm140_vm0, %v12667_v38 }
 0x176   :  { %11221 = vmatprep.mubr.msk.f32.mxu0 %vm140_vm0, %v12673_v3 }
 0x179   :  { %11222 = vmatmul.mubr.msk.f32.gmra.mrb[26].mxu0 %vm140_vm0, %v12687_v48 }
 0x17a   :  { %11224 = vmatprep.mubr.msk.f32.mxu0 %vm140_vm0, %v12691_v8 }
 0x17d   :  { %11225 = vmatmul.mubr.msk.f32.gmra.mrb[28].mxu0 %vm140_vm0, %v12709_v49 }
 0x17e   :  { %11249 = vmatprep.mubr.msk.f32.mxu0 %vm12489_vm1, %v12488_v16 }
 0x218   :  { %v11137_v22 = vpop.f32.mrb[0].mxu0  ;;  %v11157_v24 = vpop.f32.mrb[0].mxu1 }
 0x219   :  { %v488_v25 = vadd.f32 %v11137_v22, %v10346_v17  ;;  %v599_v26 = vadd.f32 %v11157_v24, %v10355_v18  ;;  %v482_v27 = vpop.f32.mrb[1].mxu0  ;;  %v593_v30 = vpop.f32.mrb[1].mxu1 }
 0x21a   :  { %v483_v31 = vadd.f32 %v10346_v17, %v482_v27  ;;  %v594_v32 = vadd.f32 %v10355_v18, %v593_v30 }
 0x21b   :  { %v966_v33 = vmul.f32 %v488_v25, %v12797_v19  ;;  %v974_v34 = vmul.f32 %v599_v26, %v12800_v23 }
 0x21c   :  { %v965_v35 = vmul.f32 %v483_v31, %v12797_v19  ;;  %v973_v36 = vmul.f32 %v594_v32, %v12800_v23  ;;  %v11140_v37 = vpop.f32.mrb[2].mxu0  ;;  %v11160_v40 = vpop.f32.mrb[2].mxu1 }
 0x21d   :  { %v12806_v41 = vadd.f32 %v974_v34, %v966_v33  ;;  %v498_v42 = vadd.f32 %v11140_v37, %v10346_v17  ;;  %v609_v43 = vadd.f32 %v11160_v40, %v10355_v18  ;;  %v492_v44 = vpop.f32.mrb[3].mxu0  ;;  %v603_v45 = vpop.f32.mrb[3].mxu1  ;;  %v10373_v34 = vld [vmem:[%s12833_s28] ss:$0 sm:$0xff] }
 0x21e   :  { %v12808_v46 = vadd.f32 %v973_v36, %v965_v35  ;;  %v493_v50 = vadd.f32 %v10346_v17, %v492_v44  ;;  %v604_v20 = vadd.f32 %v10355_v18, %v603_v45  ;;  %v10364_v40 = vld [vmem:[%s12842_s2] ss:$0 sm:$0xff] }
 0x21f   :  { %v968_v51 = vmul.f32 %v498_v42, %v12797_v19  ;;  %v976_v52 = vmul.f32 %v609_v43, %v12800_v23 }
 0x220   :  { %v967_v53 = vmul.f32 %v493_v50, %v12797_v19  ;;  %v975_v54 = vmul.f32 %v604_v20, %v12800_v23  ;;  %v11143_v55 = vpop.f32.mrb[4].mxu0  ;;  %v11163_v56 = vpop.f32.mrb[4].mxu1 }
 0x221   :  { %v12814_v57 = vadd.f32 %v976_v52, %v968_v51  ;;  %v508_v58 = vadd.f32 %v11143_v55, %v10346_v17  ;;  %v619_v21 = vadd.f32 %v11163_v56, %v10355_v18  ;;  %v502_v60 = vpop.f32.mrb[5].mxu0  ;;  %v613_v61 = vpop.f32.mrb[5].mxu1 }
 0x222   :  { %v12816_v62 = vadd.f32 %v975_v54, %v967_v53  ;;  %v503_v63 = vadd.f32 %v10346_v17, %v502_v60  ;;  %v614_v0 = vadd.f32 %v10355_v18, %v613_v61 }
 0x223   :  { %v970_v1 = vmul.f32 %v508_v58, %v12797_v19  ;;  %v978_v29 = vmul.f32 %v619_v21, %v12800_v23 }
 0x224   :  { %v969_v2 = vmul.f32 %v503_v63, %v12797_v19  ;;  %v977_v4 = vmul.f32 %v614_v0, %v12800_v23  ;;  %v11146_v5 = vpop.f32.mrb[6].mxu0  ;;  %v11166_v39 = vpop.f32.mrb[6].mxu1 }
 0x225   :  { %v12822_v6 = vadd.f32 %v978_v29, %v970_v1  ;;  %v518_v7 = vadd.f32 %v11146_v5, %v10346_v17  ;;  %v629_v10 = vadd.f32 %v11166_v39, %v10355_v18  ;;  %v512_v11 = vpop.f32.mrb[7].mxu0  ;;  %v623_v12 = vpop.f32.mrb[7].mxu1 }
 0x226   :  { %v12824_v13 = vadd.f32 %v977_v4, %v969_v2  ;;  %v513_v14 = vadd.f32 %v10346_v17, %v512_v11  ;;  %v624_v15 = vadd.f32 %v10355_v18, %v623_v12 }
 0x227   :  { %v972_v9 = vmul.f32 %v518_v7, %v12797_v19  ;;  %v980_v22 = vmul.f32 %v629_v10, %v12800_v23 }
 0x228   :  { %v971_v24 = vmul.f32 %v513_v14, %v12797_v19  ;;  %v979_v25 = vmul.f32 %v624_v15, %v12800_v23  ;;  %v11177_v26 = vpop.f32.mrb[8].mxu0  ;;  %v11206_v27 = vpop.f32.mrb[8].mxu1 }
 0x229   :  { %v12835_v30 = vadd.f32 %v980_v22, %v972_v9  ;;  %v704_v17 = vpop.f32.mrb[9].mxu0  ;;  %v845_v18 = vpop.f32.mrb[9].mxu1  ;;  %v851_v37 = vadd.f32 %v11206_v27, %v10373_v34  ;;  %v710_v20 = vadd.f32 %v11177_v26, %v10364_v40 }
 0x22a   :  { %v12837_v31 = vadd.f32 %v979_v25, %v971_v24  ;;  %v846_v42 = vadd.f32 %v10373_v34, %v845_v18  ;;  %v705_v53 = vadd.f32 %v10364_v40, %v704_v17 }
 0x22b   :  { %v1004_v51 = vmul.f32 %v851_v37, %v12800_v23  ;;  %v990_v0 = vmul.f32 %v710_v20, %v12797_v19 }
 0x22c   :  { %v11180_v32 = vpop.f32.mrb[10].mxu0  ;;  %v1003_v54 = vmul.f32 %v846_v42, %v12800_v23  ;;  %v989_v2 = vmul.f32 %v705_v53, %v12797_v19 }
 0x22d   :  { %v714_v33 = vpop.f32.mrb[11].mxu0  ;;  %v720_v1 = vadd.f32 %v11180_v32, %v10364_v40 }
 0x22e   :  { %v715_v4 = vadd.f32 %v10364_v40, %v714_v33 }
 0x22f   :  { %v992_v15 = vmul.f32 %v720_v1, %v12797_v19 }
 0x230   :  { %v11183_v35 = vpop.f32.mrb[12].mxu0  ;;  %v991_v24 = vmul.f32 %v715_v4, %v12797_v19 }
 0x231   :  { %v724_v36 = vpop.f32.mrb[13].mxu0  ;;  %v730_v9 = vadd.f32 %v11183_v35, %v10364_v40 }
 0x232   :  { %v725_v25 = vadd.f32 %v10364_v40, %v724_v36 }
 0x233   :  { %v994_v36 = vmul.f32 %v730_v9, %v12797_v19 }
 0x234   :  { %v11186_v43 = vpop.f32.mrb[14].mxu0 }
 0x235   :  { %v740_v44 = vadd.f32 %v11186_v43, %v10364_v40  ;;  %v734_v45 = vpop.f32.mrb[15].mxu0 }
 0x236   :  { %v735_v50 = vadd.f32 %v10364_v40, %v734_v45  ;;  %v993_v40 = vmul.f32 %v725_v25, %v12797_v19 }
 0x237   :  { %v996_v52 = vmul.f32 %v740_v44, %v12797_v19 }
 0x238   :  { %v995_v55 = vmul.f32 %v735_v50, %v12797_v19  ;;  %v11197_v56 = vpop.f32.mrb[16].mxu0  ;;  %v10382_v50 = vld [vmem:[%s12864_s10] ss:$0 sm:$0xff] }
 0x239   :  { %v12850_v58 = vadd.f32 %v1004_v51, %v996_v52  ;;  %v821_v21 = vadd.f32 %v11197_v56, %v10373_v34  ;;  %v815_v60 = vpop.f32.mrb[17].mxu0 }
 0x23a   :  { %v1011_v61 = vadd.f32 %v1003_v54, %v995_v55  ;;  %v816_v63 = vadd.f32 %v10373_v34, %v815_v60 }
 0x23b   :  { %v998_v29 = vmul.f32 %v821_v21, %v12800_v23 }
 0x23c   :  { %v997_v5 = vmul.f32 %v816_v63, %v12800_v23  ;;  %v11200_v39 = vpop.f32.mrb[18].mxu0 }
 0x23d   :  { %v1006_v7 = vadd.f32 %v998_v29, %v990_v0  ;;  %v831_v10 = vadd.f32 %v11200_v39, %v10373_v34  ;;  %v825_v11 = vpop.f32.mrb[19].mxu0 }
 0x23e   :  { %v1005_v12 = vadd.f32 %v997_v5, %v989_v2  ;;  %v826_v14 = vadd.f32 %v10373_v34, %v825_v11 }
 0x23f   :  { %v1000_v22 = vmul.f32 %v831_v10, %v12800_v23 }
 0x240   :  { %v999_v26 = vmul.f32 %v826_v14, %v12800_v23  ;;  %v11203_v27 = vpop.f32.mrb[20].mxu0  ;;  %11228 = vmatpush3.xpose.msk.msra.mxu1 %vm1013_vm2, %v1005_v12 }
 0x241   :  { %v1008_v17 = vadd.f32 %v1000_v22, %v992_v15  ;;  %v841_v18 = vadd.f32 %v11203_v27, %v10373_v34  ;;  %v835_v32 = vpop.f32.mrb[21].mxu0  ;;  %11232 = vmatprep.subr.mxu1 %v12488_v16 }
 0x242   :  { %v1007_v33 = vadd.f32 %v999_v26, %v991_v24  ;;  %v836_v35 = vadd.f32 %v10373_v34, %v835_v32 }
 0x243   :  { %v1002_v37 = vmul.f32 %v841_v18, %v12800_v23  ;;  %11230 = vmatmul.mubr.msk.f32.vlgmr.msra.gmra.mrb[10].mxu1 %vm1013_vm2, %v12808_v46 }
 0x244   :  { %v1001_v42 = vmul.f32 %v836_v35, %v12800_v23  ;;  %v11217_v43 = vpop.f32.mrb[22].mxu0  ;;  %11233 = vmatpush3.xpose.msk.msra.mxu1 %vm1013_vm2, %v1006_v7  ;;  %11234 = vmatprep.mubr.msk.f32.mxu1 %vm12489_vm1, %v12488_v16 }
 0x245   :  { %v1010_v44 = vadd.f32 %v1002_v37, %v994_v36  ;;  %v926_v45 = vpop.f32.mrb[23].mxu0  ;;  %11237 = vmatprep.subr.mxu1 %v12488_v16 }
 0x246   :  { %v1009_v34 = vadd.f32 %v1001_v42, %v993_v40  ;;  %v927_v55 = vadd.f32 %v10382_v50, %v926_v45 }
 0x247   :  { %11235 = vmatmul.mubr.msk.f32.vlgmr.msra.gmra.mrb[12].mxu1 %vm1013_vm2, %v12806_v41 }
 0x248   :  { %v11220_v46 = vpop.f32.mrb[24].mxu0  ;;  %11238 = vmatpush3.xpose.msk.msra.mxu1 %vm1013_vm2, %v1007_v33  ;;  %11248 = vmatpush3.xpose.msk.msra.mxu0 %vm1013_vm2, %v1009_v34 }
 0x249   :  { %v12882_v20 = vadd.f32 %v11220_v46, %v10382_v50  ;;  %v936_v51 = vpop.f32.mrb[25].mxu0  ;;  %11239 = vmatprep.mubr.msk.f32.mxu1 %vm12489_vm1, %v12488_v16  ;;  %11242 = vmatprep.subr.mxu1 %v12488_v16 }
 0x24a   :  { %v12887_v52 = vadd.f32 %v10382_v50, %v936_v51  ;;  %11257 = vmatprep.subr.mxu0 %v12488_v16 }
 0x24b   :  { %11240 = vmatmul.mubr.msk.f32.vlgmr.msra.gmra.mrb[14].mxu1 %vm1013_vm2, %v12816_v62  ;;  %11250 = vmatmul.mubr.msk.f32.vlgmr.msra.gmra.mrb[30].mxu0 %vm1013_vm2, %v12824_v13 }
 0x24c   :  { %v11223_v41 = vpop.f32.mrb[26].mxu0  ;;  %11243 = vmatpush3.xpose.msk.msra.mxu1 %vm1013_vm2, %v1008_v17  ;;  %11258 = vmatpush3.xpose.msk.msra.mxu0 %vm1013_vm2, %v1011_v61 }
 0x24d   :  { %v12896_v53 = vadd.f32 %v11223_v41, %v10382_v50  ;;  %v946_v54 = vpop.f32.mrb[27].mxu0  ;;  %11244 = vmatprep.mubr.msk.f32.mxu1 %vm12489_vm1, %v12488_v16  ;;  %11259 = vmatprep.mubr.msk.f32.mxu0 %vm12489_vm1, %v12488_v16 }
 0x24e   :  { %v12902_v56 = vadd.f32 %v10382_v50, %v946_v54  ;;  %11252 = vmatprep.subr.mxu1 %v12488_v16  ;;  %11267 = vmatprep.subr.mxu0 %v12488_v16 }
 0x24f   :  { %11245 = vmatmul.mubr.msk.f32.vlgmr.msra.gmra.mrb[16].mxu1 %vm1013_vm2, %v12814_v57  ;;  %11260 = vmatmul.mubr.msk.f32.vlgmr.msra.gmra.mrb[32].mxu0 %vm1013_vm2, %v12837_v31  ;;  %v932_v57 = vadd.f32 %v11217_v43, %v10382_v50  ;;  %v381_v31 = vlaneseq }
 0x250   :  { %v11226_v62 = vpop.f32.mrb[28].mxu0  ;;  %11253 = vmatpush3.xpose.msk.msra.mxu1 %vm1013_vm2, %v1010_v44  ;;  %11268 = vmatpush3.msra.mxu0 %v927_v55 }
 0x251   :  { %v12911_v13 = vadd.f32 %v11226_v62, %v10382_v50  ;;  %v956_v21 = vpop.f32.mrb[29].mxu0  ;;  %11254 = vmatprep.mubr.msk.f32.mxu1 %vm12489_vm1, %v12488_v16  ;;  %11262 = vmatprep.subr.mxu1 %v12488_v16  ;;  %v384_v61 = vand.u32 127, %v381_v31 }
 0x252   :  { %v12916_v60 = vadd.f32 %v10382_v50, %v956_v21  ;;  %11269 = vmatprep.mubr.msk.f32.mxu0 %vm12489_vm1, %v12488_v16  ;;  %11277 = vmatprep.subr.mxu0 %v12488_v16 }
 0x253   :  { %11255 = vmatmul.mubr.msk.f32.vlgmr.msra.gmra.mrb[18].mxu1 %vm1013_vm2, %v12822_v6  ;;  %v12933_v6 = vshrl.u32 %v381_v31, 7 }
 0x254   :  { %11263 = vmatpush3.xpose.msk.msra.mxu1 %vm1013_vm2, %v12850_v58  ;;  %11264 = vmatprep.mubr.msk.f32.mxu1 %vm12489_vm1, %v12488_v16 }
 0x255   :  { %11272 = vmatprep.subr.mxu1 %v12488_v16  ;;  %vm12936_vm3 = vcmp.le.s32.totalorder %v384_v61, %v12933_v6 }
 0x257   :  { %11265 = vmatmul.mubr.msk.f32.vlgmr.msra.gmra.mrb[20].mxu1 %vm1013_vm2, %v12835_v30 }
 0x258   :  { %11273 = vmatpush3.msra.mxu1 %v932_v57  ;;  %11274 = vmatprep.mubr.msk.f32.mxu1 %vm12489_vm1, %v12488_v16 }
 0x259   :  { %11282 = vmatprep.subr.mxu1 %v12488_v16 }
 0x316   :  { %v1086_v58 = vpop.f32.mrb[10].mxu1 }
 0x317   :  { %v1622_v0 = vmul.f32 0.35355338, %v1086_v58  ;;  %v11231_v1 = vpop.f32.mrb[11].mxu1 }
 0x319   :  { %v1632_v30 = vsel %vm12936_vm3, %v1622_v0, -inf }
 0x31a   :  { %v1162_v29 = vpop.f32.mrb[12].mxu1  ;;  %v1640_v2 = vsel %vm1013_vm2, %v1632_v30, -inf }
 0x31b   :  { %v1623_v4 = vmul.f32 0.35355338, %v1162_v29  ;;  %1641 = vmax.xlane.f32.xlu0 %v1640_v2  ;;  %v11236_v5 = vpop.f32.mrb[13].mxu1 }
 0x31d   :  { %v1633_v39 = vsel %vm12936_vm3, %v1623_v4, -inf }
 0x31e   :  { %v1238_v7 = vpop.f32.mrb[14].mxu1  ;;  %v1390_v10 = vpop.f32.mrb[30].mxu0  ;;  %v1643_v11 = vsel %vm1013_vm2, %v1633_v39, -inf }
 0x31f   :  { %v1624_v12 = vmul.f32 0.35355338, %v1238_v7  ;;  %v1626_v14 = vmul.f32 0.35355338, %v1390_v10  ;;  %v11251_v15 = vpop.f32.mrb[31].mxu0  ;;  %1644 = vmax.xlane.f32.xlu1 %v1643_v11  ;;  %v11241_v9 = vpop.f32.mrb[15].mxu1 }
 0x321   :  { %v1634_v22 = vsel %vm12936_vm3, %v1624_v12, -inf  ;;  %v1636_v27 = vsel %vm12936_vm3, %v1626_v14, -inf }
 0x322   :  { %v1314_v24 = vpop.f32.mrb[16].mxu1  ;;  %v1542_v25 = vpop.f32.mrb[32].mxu0  ;;  %v1646_v26 = vsel %vm1013_vm2, %v1634_v22, -inf  ;;  %v1652_v37 = vsel %vm1013_vm2, %v1636_v27, -inf }
 0x323   :  { %v1625_v17 = vmul.f32 0.35355338, %v1314_v24  ;;  %v1628_v18 = vmul.f32 0.35355338, %v1542_v25  ;;  %1647 = vmax.xlane.f32.xlu0 %v1646_v26  ;;  %v11246_v32 = vpop.f32.mrb[17].mxu1  ;;  %v11261_v33 = vpop.f32.mrb[33].mxu0 }
 0x325   :  { %v1635_v35 = vsel %vm12936_vm3, %v1625_v17, -inf  ;;  %v1638_v44 = vsel %vm12936_vm3, %v1628_v18, -inf }
 0x326   :  { %v1466_v36 = vpop.f32.mrb[18].mxu1  ;;  %v1649_v40 = vsel %vm1013_vm2, %v1635_v35, -inf  ;;  %v1658_v46 = vsel %vm1013_vm2, %v1638_v44, -inf }
 0x327   :  { %v1627_v42 = vmul.f32 0.35355338, %v1466_v36  ;;  %1653 = vmax.xlane.f32.xlu0 %v1652_v37  ;;  %1650 = vmax.xlane.f32.xlu1 %v1649_v40  ;;  %v11256_v43 = vpop.f32.mrb[19].mxu1 }
 0x329   :  { %v1637_v45 = vsel %vm12936_vm3, %v1627_v42, -inf }
 0x32a   :  { %v1618_v34 = vpop.f32.mrb[20].mxu1  ;;  %v1655_v50 = vsel %vm1013_vm2, %v1637_v45, -inf }
 0x32b   :  { %v1629_v51 = vmul.f32 0.35355338, %v1618_v34  ;;  %1656 = vmax.xlane.f32.xlu1 %v1655_v50  ;;  %v11266_v41 = vpop.f32.mrb[21].mxu1  ;;  %1659 = vmax.xlane.f32.xlu0 %v1658_v46 }
 0x32d   :  { %v1639_v54 = vsel %vm12936_vm3, %v1629_v51, -inf }
 0x32e   :  { %v1661_v55 = vsel %vm1013_vm2, %v1639_v54, -inf }
 0x32f   :  { %1662 = vmax.xlane.f32.xlu1 %v1661_v55 }
 0x3a8   :  { %v1642_v62 = vpop.xlane.xlu0 %1641 }
 0x3a9   :  { %v1664_v21 = vsub.f32 %v1632_v30, %v1642_v62 }
 0x3ab   :  { %v1672_v57 = vmul.f32 1.442695, %v1664_v21 }
 0x3ac   :  { %v1645_v31 = vpop.xlane.xlu1 %1644 }
 0x3ad   :  { %12277 = vpow2.f32 %v1672_v57  ;;  %v1665_v61 = vsub.f32 %v1633_v39, %v1645_v31 }
 0x3af   :  { %v1674_v58 = vmul.f32 1.442695, %v1665_v61 }
 0x3b0   :  { %v1648_v0 = vpop.xlane.xlu0 %1647 }
 0x3b1   :  { %12279 = vpow2.f32 %v1674_v58  ;;  %v1666_v1 = vsub.f32 %v1634_v22, %v1648_v0 }
 0x3b3   :  { %v1676_v29 = vmul.f32 1.442695, %v1666_v1 }
 0x3b4   :  { %v1654_v2 = vpop.xlane.xlu0 %1653  ;;  %v1651_v4 = vpop.xlane.xlu1 %1650 }
 0x3b5   :  { %12281 = vpow2.f32 %v1676_v29  ;;  %v1668_v5 = vsub.f32 %v1636_v27, %v1654_v2  ;;  %v1667_v7 = vsub.f32 %v1635_v35, %v1651_v4  ;;  %v281_v2 = vld [vmem:[%s12586_s9 + $0x28] sm:$0xff] }
 0x3b7   :  { %v12278_v10 = vpop.eup %12277  ;;  %v1680_v11 = vmul.f32 1.442695, %v1668_v5  ;;  %v1678_v12 = vmul.f32 1.442695, %v1667_v7 }
 0x3b8   :  { %v1657_v14 = vpop.xlane.xlu1 %1656  ;;  %v1660_v15 = vpop.xlane.xlu0 %1659  ;;  %v1688_v30 = vsel %vm1013_vm2, %v12278_v10, 0.0 }
 0x3b9   :  { %12283 = vpow2.f32 %v1680_v11  ;;  %v1669_v9 = vsub.f32 %v1637_v45, %v1657_v14  ;;  %v1670_v39 = vsub.f32 %v1638_v44, %v1660_v15  ;;  %1689 = vadd.xlane.f32.xlu0 %v1688_v30  ;;  %v283_v11 = vld [vmem:[%s12586_s9 + $0x38] sm:$0xff]  ;;  %v300_v14 = vld [vmem:[%s12591_s13 + $0x20] sm:$0xff]  ;;  %v301_v15 = vld [vmem:[%s12591_s13 + $0x28] sm:$0xff] }
 0x3ba   :  { %12285 = vpow2.f32 %v1678_v12 }
 0x3bb   :  { %v12280_v24 = vpop.eup %12279  ;;  %v1682_v22 = vmul.f32 1.442695, %v1669_v9  ;;  %v1684_v25 = vmul.f32 1.442695, %v1670_v39 }
 0x3bc   :  { %v1663_v26 = vpop.xlane.xlu1 %1662  ;;  %v1691_v17 = vsel %vm1013_vm2, %v12280_v24, 0.0 }
 0x3bd   :  { %12287 = vpow2.f32 %v1682_v22  ;;  %v1671_v27 = vsub.f32 %v1639_v54, %v1663_v26  ;;  %1692 = vadd.xlane.f32.xlu1 %v1691_v17  ;;  %v12033_v22 = vpack.c.bf16 %v301_v15, %v300_v14  ;;  %v321_v26 = vld [vmem:[%s12604_s17 + $0x28] sm:$0xff] }
 0x3be   :  { %12289 = vpow2.f32 %v1684_v25  ;;  %v320_v25 = vld [vmem:[%s12604_s17 + $0x20] sm:$0xff] }
 0x3bf   :  { %v12282_v18 = vpop.eup %12281  ;;  %v1686_v32 = vmul.f32 1.442695, %v1671_v27 }
 0x3c0   :  { %v1694_v33 = vsel %vm1013_vm2, %v12282_v18, 0.0 }
 0x3c1   :  { %12291 = vpow2.f32 %v1686_v32  ;;  %1695 = vadd.xlane.f32.xlu0 %v1694_v33  ;;  %v12041_v32 = vpack.c.bf16 %v321_v26, %v320_v25  ;;  %v322_v33 = vld [vmem:[%s12604_s17 + $0x30] sm:$0xff] }
 0x3c3   :  { %v12284_v35 = vpop.eup %12283 }
 0x3c4   :  { %v12286_v36 = vpop.eup %12285  ;;  %v1700_v37 = vsel %vm1013_vm2, %v12284_v35, 0.0 }
 0x3c5   :  { %v1697_v40 = vsel %vm1013_vm2, %v12286_v36, 0.0  ;;  %1701 = vadd.xlane.f32.xlu0 %v1700_v37 }
 0x3c6   :  { %1698 = vadd.xlane.f32.xlu1 %v1697_v40 }
 0x3c7   :  { %v12969_v42 = vpop.eup %12287 }
 0x3c8   :  { %v12971_v43 = vpop.eup %12289  ;;  %v1703_v44 = vsel %vm1013_vm2, %v12969_v42, 0.0 }
 0x3c9   :  { %v1706_v45 = vsel %vm1013_vm2, %v12971_v43, 0.0 }
 0x3ca   :  { %1704 = vadd.xlane.f32.xlu1 %v1703_v44  ;;  %1707 = vadd.xlane.f32.xlu0 %v1706_v45  ;;  %v342_v44 = vld [vmem:[%s12609_s21 + $0x30] sm:$0xff]  ;;  %v343_v45 = vld [vmem:[%s12609_s21 + $0x38] sm:$0xff] }
 0x3cb   :  { %v12977_v34 = vpop.eup %12291 }
 0x3cc   :  { %v1709_v50 = vsel %vm1013_vm2, %v12977_v34, 0.0 }
 0x3ce   :  { %1710 = vadd.xlane.f32.xlu1 %v1709_v50  ;;  %v12053_v50 = vpack.c.bf16 %v343_v45, %v342_v44 }
 0x446   :  { %v1690_v46 = vpop.xlane.xlu0 %1689 }
 0x447   :  { %12293 = vrcp.f32 %v1690_v46  ;;  %v362_v46 = vld [vmem:[%s12697_s3 + $0x30] sm:$0xff] }
 0x44a   :  { %v1693_v51 = vpop.xlane.xlu1 %1692 }
 0x44b   :  { %12295 = vrcp.f32 %v1693_v51  ;;  %v363_v51 = vld [vmem:[%s12697_s3 + $0x38] sm:$0xff] }
 0x44e   :  { %v1696_v41 = vpop.xlane.xlu0 %1695 }
 0x44f   :  { %12297 = vrcp.f32 %v1696_v41  ;;  %v12061_v41 = vpack.c.bf16 %v363_v51, %v362_v46 }
 0x451   :  { %v12294_v54 = vpop.eup %12293 }
 0x452   :  { %v1702_v55 = vpop.xlane.xlu0 %1701  ;;  %v1713_v62 = vmul.f32 %v12294_v54, %v12278_v10 }
 0x453   :  { %v1699_v21 = vpop.xlane.xlu1 %1698  ;;  %12299 = vrcp.f32 %v1702_v55 }
 0x454   :  { %12301 = vrcp.f32 %v1699_v21  ;;  %11270 = vmatmul.mubr.msk.f32.vlgmr.msra.gmra.mrb[34].mxu0 %vm1013_vm2, %v1713_v62 }
 0x455   :  { %v12296_v57 = vpop.eup %12295  ;;  %11278 = vmatpush3.msra.mxu0 %v12887_v52  ;;  %11279 = vmatprep.mubr.msk.f32.mxu0 %vm12489_vm1, %v12488_v16 }
 0x456   :  { %v1715_v31 = vmul.f32 %v12296_v57, %v12280_v24  ;;  %11287 = vmatprep.subr.mxu0 %v12488_v16  ;;  %v302_v24 = vld [vmem:[%s12591_s13 + $0x30] sm:$0xff] }
 0x457   :  { %v1705_v61 = vpop.xlane.xlu1 %1704  ;;  %v1708_v58 = vpop.xlane.xlu0 %1707 }
 0x458   :  { %12303 = vrcp.f32 %v1705_v61  ;;  %11275 = vmatmul.mubr.msk.f32.vlgmr.msra.gmra.mrb[22].mxu1 %vm1013_vm2, %v1715_v31 }
 0x459   :  { %v12298_v0 = vpop.eup %12297  ;;  %12305 = vrcp.f32 %v1708_v58  ;;  %11283 = vmatpush3.msra.mxu1 %v12882_v20  ;;  %11284 = vmatprep.mubr.msk.f32.mxu1 %vm12489_vm1, %v12488_v16  ;;  %v280_v20 = vld [vmem:[%s12586_s9 + $0x20] sm:$0xff] }
 0x45a   :  { %v1717_v52 = vmul.f32 %v12298_v0, %v12282_v18  ;;  %11292 = vmatprep.subr.mxu1 %v12488_v16  ;;  %v12025_v10 = vpack.c.bf16 %v281_v2, %v280_v20 }
 0x45b   :  { %v1711_v1 = vpop.xlane.xlu1 %1710 }
 0x45c   :  { %12307 = vrcp.f32 %v1711_v1  ;;  %11280 = vmatmul.mubr.msk.f32.vlgmr.msra.gmra.mrb[36].mxu0 %vm1013_vm2, %v1717_v52 }
 0x45d   :  { %v12300_v29 = vpop.eup %12299  ;;  %11288 = vmatpush3.msra.mxu0 %v12902_v56  ;;  %11289 = vmatprep.mubr.msk.f32.mxu0 %vm12489_vm1, %v12488_v16  ;;  %v282_v56 = vld [vmem:[%s12586_s9 + $0x30] sm:$0xff] }
 0x45e   :  { %v12302_v4 = vpop.eup %12301  ;;  %11297 = vmatprep.subr.mxu0 %v12488_v16  ;;  %v1721_v5 = vmul.f32 %v12300_v29, %v12284_v35  ;;  %v12029_v39 = vpack.c.bf16 %v283_v11, %v282_v56  ;;  %v340_v35 = vld [vmem:[%s12609_s21 + $0x20] sm:$0xff] }
 0x45f   :  { %v1719_v7 = vmul.f32 %v12302_v4, %v12286_v36  ;;  %v341_v36 = vld [vmem:[%s12609_s21 + $0x28] sm:$0xff]  ;;  %v10424_v11 = vld [vmem:[%s12782_s14 + $0x1] ss:$0 sm:$0xff] }
 0x460   :  { %11290 = vmatmul.mubr.msk.f32.vlgmr.msra.gmra.mrb[38].mxu0 %vm1013_vm2, %v1721_v5  ;;  %v12049_v40 = vpack.c.bf16 %v341_v36, %v340_v35 }
 0x461   :  { %11285 = vmatmul.mubr.msk.f32.vlgmr.msra.gmra.mrb[24].mxu1 %vm1013_vm2, %v1719_v7  ;;  %11298 = vmatpush3.msra.mxu0 %v12916_v60  ;;  %v10415_v7 = vld [vmem:[%s12777_s8 + $0x1] ss:$0 sm:$0xff] }
 0x462   :  { %v12304_v12 = vpop.eup %12303  ;;  %11293 = vmatpush3.msra.mxu1 %v12896_v53  ;;  %11294 = vmatprep.mubr.msk.f32.mxu1 %vm12489_vm1, %v12488_v16  ;;  %v303_v53 = vld [vmem:[%s12591_s13 + $0x38] sm:$0xff] }
 0x463   :  { %v12306_v30 = vpop.eup %12305  ;;  %11299 = vmatprep.mubr.msk.f32.mxu0 %vm12489_vm1, %v12488_v16  ;;  %11302 = vmatprep.subr.mxu1 %v12488_v16  ;;  %v1723_v60 = vmul.f32 %v12304_v12, %v12969_v42  ;;  %v12037_v18 = vpack.c.bf16 %v303_v53, %v302_v24  ;;  %v360_v42 = vld [vmem:[%s12697_s3 + $0x20] sm:$0xff] }
 0x464   :  { %v1725_v9 = vmul.f32 %v12306_v30, %v12971_v43  ;;  %12026 = vmatprep.subr.bf16.mxu0 %v12025_v10  ;;  %v361_v43 = vld [vmem:[%s12697_s3 + $0x28] sm:$0xff] }
 0x465   :  { %11295 = vmatmul.mubr.msk.f32.vlgmr.msra.gmra.mrb[26].mxu1 %vm1013_vm2, %v1723_v60 }
 0x466   :  { %v12308_v17 = vpop.eup %12307  ;;  %11300 = vmatmul.mubr.msk.f32.vlgmr.msra.gmra.mrb[40].mxu0 %vm1013_vm2, %v1725_v9  ;;  %11303 = vmatpush3.msra.mxu1 %v12911_v13  ;;  %v323_v13 = vld [vmem:[%s12604_s17 + $0x38] sm:$0xff] }
 0x467   :  { %v1727_v27 = vmul.f32 %v12308_v17, %v12977_v34  ;;  %12028 = vmatpush3.bf16.msra.mxu0 %v12025_v10  ;;  %11315 = vmatprep.mubr.msk.f32.mxu0 %vm140_vm0, %v12634_v47  ;;  %v12045_v37 = vpack.c.bf16 %v323_v13, %v322_v33  ;;  %v12057_v34 = vpack.c.bf16 %v361_v43, %v360_v42 }
 0x468   :  { %11304 = vmatprep.mubr.msk.f32.mxu1 %vm12489_vm1, %v12488_v16  ;;  %12030 = vmatprep.subr.bf16.mxu0 %v12029_v39 }
 0x469   :  { %12034 = vmatprep.subr.bf16.mxu1 %v12033_v22  ;;  %11305 = vmatmul.mubr.msk.f32.vlgmr.msra.gmra.mrb[28].mxu1 %vm1013_vm2, %v1727_v27 }
 0x46a   :  { %12036 = vmatpush3.bf16.msra.mxu1 %v12033_v22  ;;  %11335 = vmatprep.mubr.msk.f32.mxu1 %vm140_vm0, %v12634_v47 }
 0x46b   :  { %12032 = vmatpush3.bf16.msra.mxu0 %v12029_v39  ;;  %12038 = vmatprep.subr.bf16.mxu1 %v12037_v18 }
 0x46c   :  { %12042 = vmatprep.subr.bf16.mxu0 %v12041_v32 }
 0x46e   :  { %11316 = vmatmul.mubr.msk.f32.vlgmr.msra.gmra.mrb[42].mxu0 %vm140_vm0, %v12649_v28  ;;  %12040 = vmatpush3.bf16.msra.mxu1 %v12037_v18 }
 0x46f   :  { %11318 = vmatprep.mubr.msk.f32.mxu0 %vm140_vm0, %v12653_v59  ;;  %12044 = vmatpush3.bf16.msra.mxu0 %v12041_v32 }
 0x470   :  { %12046 = vmatprep.subr.bf16.mxu0 %v12045_v37  ;;  %12050 = vmatprep.subr.bf16.mxu1 %v12049_v40 }
 0x471   :  { %11336 = vmatmul.mubr.msk.f32.vlgmr.msra.gmra.mrb[30].mxu1 %vm140_vm0, %v12649_v28 }
 0x472   :  { %11319 = vmatmul.mubr.msk.f32.gmra.mrb[44].mxu0 %vm140_vm0, %v12667_v38  ;;  %11338 = vmatprep.mubr.msk.f32.mxu1 %vm140_vm0, %v12653_v59 }
 0x473   :  { %11321 = vmatprep.mubr.msk.f32.mxu0 %vm140_vm0, %v12673_v3  ;;  %12048 = vmatpush3.bf16.msra.mxu0 %v12045_v37 }
 0x474   :  { %12052 = vmatpush3.bf16.msra.mxu1 %v12049_v40  ;;  %12058 = vmatprep.subr.bf16.mxu0 %v12057_v34 }
 0x475   :  { %11339 = vmatmul.mubr.msk.f32.gmra.mrb[32].mxu1 %vm140_vm0, %v12667_v38  ;;  %12054 = vmatprep.subr.bf16.mxu1 %v12053_v50 }
 0x476   :  { %11322 = vmatmul.mubr.msk.f32.gmra.mrb[46].mxu0 %vm140_vm0, %v12687_v48  ;;  %11341 = vmatprep.mubr.msk.f32.mxu1 %vm140_vm0, %v12673_v3 }
 0x477   :  { %11324 = vmatprep.mubr.msk.f32.mxu0 %vm140_vm0, %v12691_v8 }
 0x478   :  { %12056 = vmatpush3.bf16.msra.mxu1 %v12053_v50 }
 0x479   :  { %11342 = vmatmul.mubr.msk.f32.gmra.mrb[34].mxu1 %vm140_vm0, %v12687_v48  ;;  %11407 = vmatprep.subr.mxu1 %v12488_v16 }
 0x47a   :  { %11325 = vmatmul.mubr.msk.f32.gmra.mrb[48].mxu0 %vm140_vm0, %v12709_v49  ;;  %11344 = vmatprep.mubr.msk.f32.mxu1 %vm140_vm0, %v12691_v8 }
 0x47b   :  { %11355 = vmatprep.mubr.msk.f32.mxu0 %vm140_vm0, %v12634_v47 }
 0x47d   :  { %11345 = vmatmul.mubr.msk.f32.gmra.mrb[36].mxu1 %vm140_vm0, %v12709_v49 }
 0x47e   :  { %11356 = vmatmul.mubr.msk.f32.vlgmr.msra.gmra.mrb[50].mxu0 %vm140_vm0, %v12649_v28  ;;  %11375 = vmatprep.mubr.msk.f32.mxu1 %vm140_vm0, %v12634_v47 }
 0x47f   :  { %11358 = vmatprep.mubr.msk.f32.mxu0 %vm140_vm0, %v12653_v59  ;;  %12060 = vmatpush3.bf16.msra.mxu0 %v12057_v34 }
 0x480   :  { %12062 = vmatprep.subr.bf16.mxu0 %v12061_v41 }
 0x481   :  { %11376 = vmatmul.mubr.msk.f32.vlgmr.msra.gmra.mrb[38].mxu1 %vm140_vm0, %v12649_v28 }
 0x482   :  { %11359 = vmatmul.mubr.msk.f32.gmra.mrb[52].mxu0 %vm140_vm0, %v12667_v38  ;;  %11378 = vmatprep.mubr.msk.f32.mxu1 %vm140_vm0, %v12653_v59 }
 0x483   :  { %11361 = vmatprep.mubr.msk.f32.mxu0 %vm140_vm0, %v12673_v3  ;;  %12064 = vmatpush3.bf16.msra.mxu0 %v12061_v41 }
 0x484   :  { %11427 = vmatprep.subr.mxu0 %v12488_v16 }
 0x485   :  { %11379 = vmatmul.mubr.msk.f32.gmra.mrb[40].mxu1 %vm140_vm0, %v12667_v38 }
 0x486   :  { %11362 = vmatmul.mubr.msk.f32.gmra.mrb[54].mxu0 %vm140_vm0, %v12687_v48  ;;  %11381 = vmatprep.mubr.msk.f32.mxu1 %vm140_vm0, %v12673_v3 }
 0x487   :  { %11364 = vmatprep.mubr.msk.f32.mxu0 %vm140_vm0, %v12691_v8 }
 0x489   :  { %11382 = vmatmul.mubr.msk.f32.gmra.mrb[42].mxu1 %vm140_vm0, %v12687_v48 }
 0x48a   :  { %11365 = vmatmul.mubr.msk.f32.gmra.mrb[56].mxu0 %vm140_vm0, %v12709_v49  ;;  %11384 = vmatprep.mubr.msk.f32.mxu1 %vm140_vm0, %v12691_v8 }
 0x48b   :  { %11395 = vmatprep.mubr.msk.f32.mxu0 %vm140_vm0, %v12634_v47 }
 0x48d   :  { %11385 = vmatmul.mubr.msk.f32.gmra.mrb[44].mxu1 %vm140_vm0, %v12709_v49 }
 0x48e   :  { %11396 = vmatmul.mubr.msk.f32.vlgmr.msra.gmra.mrb[58].mxu0 %vm140_vm0, %v12649_v28  ;;  %11409 = vmatprep.mubr.msk.f32.mxu1 %vm12489_vm1, %v12488_v16 }
 0x48f   :  { %11398 = vmatprep.mubr.msk.f32.mxu0 %vm140_vm0, %v12653_v59 }
 0x492   :  { %11399 = vmatmul.mubr.msk.f32.gmra.mrb[60].mxu0 %vm140_vm0, %v12667_v38 }
 0x493   :  { %11401 = vmatprep.mubr.msk.f32.mxu0 %vm140_vm0, %v12673_v3 }
 0x496   :  { %11402 = vmatmul.mubr.msk.f32.gmra.mrb[62].mxu0 %vm140_vm0, %v12687_v48 }
 0x497   :  { %11404 = vmatprep.mubr.msk.f32.mxu0 %vm140_vm0, %v12691_v8 }
 0x49a   :  { %11405 = vmatmul.mubr.msk.f32.gmra.mrb[64].mxu0 %vm140_vm0, %v12709_v49 }
 0x49b   :  { %11429 = vmatprep.mubr.msk.f32.mxu0 %vm12489_vm1, %v12488_v16 }
 0x527   :  { %v13120_v54 = vpop.f32.mrb[34].mxu0 }
 0x528   :  { %v11271_v55 = vpop.f32.mrb[35].mxu0 }
 0x52b   :  { %v13122_v62 = vpop.f32.mrb[22].mxu1 }
 0x52c   :  { %v11276_v21 = vpop.f32.mrb[23].mxu1 }
 0x52f   :  { %v13124_v57 = vpop.f32.mrb[36].mxu0 }
 0x530   :  { %v11281_v31 = vpop.f32.mrb[37].mxu0 }
 0x533   :  { %v13126_v61 = vpop.f32.mrb[38].mxu0 }
 0x534   :  { %v13128_v58 = vpop.f32.mrb[24].mxu1  ;;  %v11291_v0 = vpop.f32.mrb[39].mxu0 }
 0x535   :  { %v11286_v52 = vpop.f32.mrb[25].mxu1 }
 0x538   :  { %v13130_v1 = vpop.f32.mrb[26].mxu1 }
 0x539   :  { %v13132_v29 = vpop.f32.mrb[40].mxu0  ;;  %v11296_v20 = vpop.f32.mrb[27].mxu1 }
 0x53a   :  { %v11301_v2 = vpop.f32.mrb[41].mxu0 }
 0x53c   :  { %v13134_v4 = vpop.f32.mrb[28].mxu1 }
 0x53d   :  { %v11306_v5 = vpop.f32.mrb[29].mxu1 }
 0x541   :  { %v11317_v10 = vpop.f32.mrb[42].mxu0 }
 0x542   :  { %v2384_v56 = vpop.f32.mrb[43].mxu0  ;;  %v2390_v12 = vadd.f32 %v11317_v10, %v10415_v7 }
 0x543   :  { %v2385_v14 = vadd.f32 %v10415_v7, %v2384_v56 }
 0x544   :  { %v11337_v15 = vpop.f32.mrb[30].mxu1  ;;  %v2868_v53 = vmul.f32 %v2390_v12, %v12797_v19 }
 0x545   :  { %v11320_v30 = vpop.f32.mrb[44].mxu0  ;;  %v2501_v60 = vadd.f32 %v11337_v15, %v10424_v11  ;;  %v2495_v9 = vpop.f32.mrb[31].mxu1  ;;  %v2867_v26 = vmul.f32 %v2385_v14, %v12797_v19  ;;  %v10433_v15 = vld [vmem:[%s12842_s2 + $0x1] ss:$0 sm:$0xff] }
 0x546   :  { %v2394_v39 = vpop.f32.mrb[45].mxu0  ;;  %v2496_v24 = vadd.f32 %v10424_v11, %v2495_v9  ;;  %v2400_v22 = vadd.f32 %v11320_v30, %v10415_v7 }
 0x547   :  { %v2876_v25 = vmul.f32 %v2501_v60, %v12800_v23  ;;  %v2395_v17 = vadd.f32 %v10415_v7, %v2394_v39 }
 0x548   :  { %v2875_v27 = vmul.f32 %v2496_v24, %v12800_v23  ;;  %v11340_v18 = vpop.f32.mrb[32].mxu1  ;;  %v2870_v42 = vmul.f32 %v2400_v22, %v12797_v19 }
 0x549   :  { %v13142_v32 = vadd.f32 %v2876_v25, %v2868_v53  ;;  %v11323_v33 = vpop.f32.mrb[46].mxu0  ;;  %v2511_v13 = vadd.f32 %v11340_v18, %v10424_v11  ;;  %v2505_v35 = vpop.f32.mrb[33].mxu1  ;;  %v2869_v45 = vmul.f32 %v2395_v17, %v12797_v19  ;;  %v13164_v25 = vld [vmem:[%s12833_s28 + $0x1] ss:$0 sm:$0xff] }
 0x54a   :  { %v13144_v36 = vadd.f32 %v2875_v27, %v2867_v26  ;;  %v2404_v37 = vpop.f32.mrb[47].mxu0  ;;  %v2506_v40 = vadd.f32 %v10424_v11, %v2505_v35  ;;  %v2410_v43 = vadd.f32 %v11323_v33, %v10415_v7 }
 0x54b   :  { %v2878_v44 = vmul.f32 %v2511_v13, %v12800_v23  ;;  %v2405_v34 = vadd.f32 %v10415_v7, %v2404_v37 }
 0x54c   :  { %v2877_v50 = vmul.f32 %v2506_v40, %v12800_v23  ;;  %v11343_v46 = vpop.f32.mrb[34].mxu1  ;;  %v2872_v20 = vmul.f32 %v2410_v43, %v12797_v19 }
 0x54d   :  { %v13150_v51 = vadd.f32 %v2878_v44, %v2870_v42  ;;  %v11326_v41 = vpop.f32.mrb[48].mxu0  ;;  %v2521_v55 = vadd.f32 %v11343_v46, %v10424_v11  ;;  %v2515_v21 = vpop.f32.mrb[35].mxu1  ;;  %v2871_v10 = vmul.f32 %v2405_v34, %v12797_v19 }
 0x54e   :  { %v13152_v31 = vadd.f32 %v2877_v50, %v2869_v45  ;;  %v2414_v0 = vpop.f32.mrb[49].mxu0  ;;  %v2516_v52 = vadd.f32 %v10424_v11, %v2515_v21  ;;  %v2420_v2 = vadd.f32 %v11326_v41, %v10415_v7  ;;  %v13177_v45 = vld [vmem:[%s12787_s19] sm:$0xff] }
 0x54f   :  { %v2880_v5 = vmul.f32 %v2521_v55, %v12800_v23  ;;  %v2415_v56 = vadd.f32 %v10415_v7, %v2414_v0  ;;  %v13181_v50 = vld [vmem:[%s12792_s24] sm:$0xff] }
 0x550   :  { %v2879_v12 = vmul.f32 %v2516_v52, %v12800_v23  ;;  %v11346_v14 = vpop.f32.mrb[36].mxu1  ;;  %v2874_v26 = vmul.f32 %v2420_v2, %v12797_v19 }
 0x551   :  { %v13159_v30 = vadd.f32 %v2880_v5, %v2872_v20  ;;  %v2531_v60 = vadd.f32 %v11346_v14, %v10424_v11  ;;  %v11357_v9 = vpop.f32.mrb[50].mxu0  ;;  %v2525_v39 = vpop.f32.mrb[37].mxu1  ;;  %v2873_v27 = vmul.f32 %v2415_v56, %v12797_v19 }
 0x552   :  { %v13161_v24 = vadd.f32 %v2879_v12, %v2871_v10  ;;  %v2526_v53 = vadd.f32 %v10424_v11, %v2525_v39  ;;  %v2606_v22 = vpop.f32.mrb[51].mxu0  ;;  %v2612_v17 = vadd.f32 %v11357_v9, %v10433_v15 }
 0x553   :  { %v2882_v7 = vmul.f32 %v2531_v60, %v12800_v23  ;;  %v2607_v33 = vadd.f32 %v10433_v15, %v2606_v22 }
 0x554   :  { %v2881_v18 = vmul.f32 %v2526_v53, %v12800_v23  ;;  %v11377_v13 = vpop.f32.mrb[38].mxu1  ;;  %v2892_v34 = vmul.f32 %v13177_v45, %v2612_v17 }
 0x555   :  { %v13170_v35 = vadd.f32 %v2882_v7, %v2874_v26  ;;  %v11360_v37 = vpop.f32.mrb[52].mxu0  ;;  %v2723_v11 = vadd.f32 %v11377_v13, %v13164_v25  ;;  %v2717_v40 = vpop.f32.mrb[39].mxu1  ;;  %v2891_v46 = vmul.f32 %v13177_v45, %v2607_v33 }
 0x556   :  { %v13173_v42 = vadd.f32 %v2881_v18, %v2873_v27  ;;  %v2616_v43 = vpop.f32.mrb[53].mxu0  ;;  %v2718_v44 = vadd.f32 %v13164_v25, %v2717_v40  ;;  %v2622_v19 = vadd.f32 %v11360_v37, %v10433_v15 }
 0x557   :  { %v2900_v23 = vmul.f32 %v13181_v50, %v2723_v11  ;;  %v2617_v41 = vadd.f32 %v10433_v15, %v2616_v43 }
 0x558   :  { %v2899_v55 = vmul.f32 %v13181_v50, %v2718_v44  ;;  %v11380_v21 = vpop.f32.mrb[40].mxu1  ;;  %v2894_v12 = vmul.f32 %v13177_v45, %v2622_v19 }
 0x559   :  { %v2908_v0 = vadd.f32 %v2900_v23, %v2892_v34  ;;  %v11363_v52 = vpop.f32.mrb[54].mxu0  ;;  %v2733_v20 = vadd.f32 %v11380_v21, %v13164_v25  ;;  %v2727_v2 = vpop.f32.mrb[41].mxu1  ;;  %v2893_v9 = vmul.f32 %v13177_v45, %v2617_v41 }
 0x55a   :  { %v2907_v5 = vadd.f32 %v2899_v55, %v2891_v46  ;;  %v2626_v10 = vpop.f32.mrb[55].mxu0  ;;  %v2728_v56 = vadd.f32 %v13164_v25, %v2727_v2  ;;  %v2632_v14 = vadd.f32 %v11363_v52, %v10433_v15 }
 0x55b   :  { %v2902_v60 = vmul.f32 %v13181_v50, %v2733_v20  ;;  %v2627_v39 = vadd.f32 %v10433_v15, %v2626_v10  ;;  %v10451_v10 = vld [vmem:[%s12864_s10 + $0x1] ss:$0 sm:$0xff] }
 0x55c   :  { %v2901_v53 = vmul.f32 %v13181_v50, %v2728_v56  ;;  %v11383_v22 = vpop.f32.mrb[42].mxu1  ;;  %11408 = vmatpush3.xpose.msk.msra.mxu1 %vm1013_vm2, %v2907_v5  ;;  %v2896_v37 = vmul.f32 %v13177_v45, %v2632_v14 }
 0x55d   :  { %v2910_v26 = vadd.f32 %v2902_v60, %v2894_v12  ;;  %v11366_v7 = vpop.f32.mrb[56].mxu0  ;;  %v2743_v17 = vadd.f32 %v11383_v22, %v13164_v25  ;;  %v2737_v27 = vpop.f32.mrb[43].mxu1  ;;  %11412 = vmatprep.subr.mxu1 %v12488_v16  ;;  %v2895_v43 = vmul.f32 %v13177_v45, %v2627_v39 }
 0x55e   :  { %v2909_v18 = vadd.f32 %v2901_v53, %v2893_v9  ;;  %v2636_v33 = vpop.f32.mrb[57].mxu0  ;;  %v2738_v13 = vadd.f32 %v13164_v25, %v2737_v27  ;;  %v2642_v11 = vadd.f32 %v11366_v7, %v10433_v15 }
 0x55f   :  { %v2904_v40 = vmul.f32 %v13181_v50, %v2743_v17  ;;  %11410 = vmatmul.mubr.msk.f32.vlgmr.msra.gmra.mrb[46].mxu1 %vm1013_vm2, %v13144_v36  ;;  %v2637_v44 = vadd.f32 %v10433_v15, %v2636_v33 }
 0x560   :  { %v2903_v34 = vmul.f32 %v13181_v50, %v2738_v13  ;;  %v11386_v19 = vpop.f32.mrb[44].mxu1  ;;  %11413 = vmatpush3.xpose.msk.msra.mxu1 %vm1013_vm2, %v2908_v0  ;;  %11414 = vmatprep.mubr.msk.f32.mxu1 %vm12489_vm1, %v12488_v16  ;;  %v2898_v52 = vmul.f32 %v13177_v45, %v2642_v11 }
 0x561   :  { %v2912_v23 = vadd.f32 %v2904_v40, %v2896_v37  ;;  %v2753_v46 = vadd.f32 %v11386_v19, %v13164_v25  ;;  %v11397_v41 = vpop.f32.mrb[58].mxu0  ;;  %v2747_v55 = vpop.f32.mrb[45].mxu1  ;;  %11417 = vmatprep.subr.mxu1 %v12488_v16  ;;  %v2897_v0 = vmul.f32 %v13177_v45, %v2637_v44 }
 0x562   :  { %v2911_v36 = vadd.f32 %v2903_v34, %v2895_v43  ;;  %v2748_v21 = vadd.f32 %v13164_v25, %v2747_v55  ;;  %v2828_v15 = vpop.f32.mrb[59].mxu0 }
 0x563   :  { %v2906_v20 = vmul.f32 %v13181_v50, %v2753_v46  ;;  %11415 = vmatmul.mubr.msk.f32.vlgmr.msra.gmra.mrb[48].mxu1 %vm1013_vm2, %v13142_v32  ;;  %v2829_v9 = vadd.f32 %v10451_v10, %v2828_v15 }
 0x564   :  { %v2905_v2 = vmul.f32 %v13181_v50, %v2748_v21  ;;  %11418 = vmatpush3.xpose.msk.msra.mxu1 %vm1013_vm2, %v2909_v18  ;;  %11428 = vmatpush3.xpose.msk.msra.mxu0 %vm1013_vm2, %v2911_v36 }
 0x565   :  { %v2914_v5 = vadd.f32 %v2906_v20, %v2898_v52  ;;  %v11400_v56 = vpop.f32.mrb[60].mxu0  ;;  %11419 = vmatprep.mubr.msk.f32.mxu1 %vm12489_vm1, %v12488_v16  ;;  %11422 = vmatprep.subr.mxu1 %v12488_v16 }
 0x566   :  { %v2913_v25 = vadd.f32 %v2905_v2, %v2897_v0  ;;  %v13220_v12 = vadd.f32 %v11400_v56, %v10451_v10  ;;  %v2838_v32 = vpop.f32.mrb[61].mxu0  ;;  %11437 = vmatprep.subr.mxu0 %v12488_v16 }
 0x567   :  { %v13223_v14 = vadd.f32 %v10451_v10, %v2838_v32  ;;  %11420 = vmatmul.mubr.msk.f32.vlgmr.msra.gmra.mrb[50].mxu1 %vm1013_vm2, %v13152_v31  ;;  %11430 = vmatmul.mubr.msk.f32.vlgmr.msra.gmra.mrb[66].mxu0 %vm1013_vm2, %v13161_v24 }
 0x568   :  { %11423 = vmatpush3.xpose.msk.msra.mxu1 %vm1013_vm2, %v2910_v26  ;;  %11438 = vmatpush3.xpose.msk.msra.mxu0 %vm1013_vm2, %v2913_v25 }
 0x569   :  { %v11403_v60 = vpop.f32.mrb[62].mxu0  ;;  %11424 = vmatprep.mubr.msk.f32.mxu1 %vm12489_vm1, %v12488_v16  ;;  %11439 = vmatprep.mubr.msk.f32.mxu0 %vm12489_vm1, %v12488_v16 }
 0x56a   :  { %v13235_v39 = vadd.f32 %v11403_v60, %v10451_v10  ;;  %v2848_v53 = vpop.f32.mrb[63].mxu0  ;;  %11432 = vmatprep.subr.mxu1 %v12488_v16  ;;  %11447 = vmatprep.subr.mxu0 %v12488_v16 }
 0x56b   :  { %v13239_v31 = vadd.f32 %v10451_v10, %v2848_v53  ;;  %11425 = vmatmul.mubr.msk.f32.vlgmr.msra.gmra.mrb[52].mxu1 %vm1013_vm2, %v13150_v51  ;;  %11440 = vmatmul.mubr.msk.f32.vlgmr.msra.gmra.mrb[68].mxu0 %vm1013_vm2, %v13173_v42  ;;  %v2834_v42 = vadd.f32 %v11397_v41, %v10451_v10 }
 0x56c   :  { %11433 = vmatpush3.xpose.msk.msra.mxu1 %vm1013_vm2, %v2912_v23  ;;  %11448 = vmatpush3.msra.mxu0 %v2829_v9 }
 0x56d   :  { %v11406_v24 = vpop.f32.mrb[64].mxu0  ;;  %11434 = vmatprep.mubr.msk.f32.mxu1 %vm12489_vm1, %v12488_v16  ;;  %11442 = vmatprep.subr.mxu1 %v12488_v16 }
 0x56e   :  { %v13249_v22 = vadd.f32 %v11406_v24, %v10451_v10  ;;  %v2858_v26 = vpop.f32.mrb[65].mxu0  ;;  %11449 = vmatprep.mubr.msk.f32.mxu0 %vm12489_vm1, %v12488_v16  ;;  %11457 = vmatprep.subr.mxu0 %v12488_v16 }
 0x56f   :  { %v13254_v51 = vadd.f32 %v10451_v10, %v2858_v26  ;;  %11435 = vmatmul.mubr.msk.f32.vlgmr.msra.gmra.mrb[54].mxu1 %vm1013_vm2, %v13159_v30 }
 0x570   :  { %11443 = vmatpush3.xpose.msk.msra.mxu1 %vm1013_vm2, %v2914_v5  ;;  %11444 = vmatprep.mubr.msk.f32.mxu1 %vm12489_vm1, %v12488_v16 }
 0x571   :  { %11452 = vmatprep.subr.mxu1 %v12488_v16 }
 0x573   :  { %11445 = vmatmul.mubr.msk.f32.vlgmr.msra.gmra.mrb[56].mxu1 %vm1013_vm2, %v13170_v35 }
 0x574   :  { %11453 = vmatpush3.msra.mxu1 %v2834_v42  ;;  %11454 = vmatprep.mubr.msk.f32.mxu1 %vm12489_vm1, %v12488_v16 }
 0x575   :  { %11462 = vmatprep.subr.mxu1 %v12488_v16 }
 0x632   :  { %v2987_v7 = vpop.f32.mrb[46].mxu1 }
 0x633   :  { %v3523_v17 = vmul.f32 0.35355338, %v2987_v7  ;;  %v11411_v30 = vpop.f32.mrb[47].mxu1 }
 0x635   :  { %v3531_v27 = vsel %vm12936_vm3, %v3523_v17, -inf }
 0x636   :  { %v3063_v18 = vpop.f32.mrb[48].mxu1  ;;  %v3539_v33 = vsel %vm1013_vm2, %v3531_v27, -inf }
 0x637   :  { %v3524_v13 = vmul.f32 0.35355338, %v3063_v18  ;;  %3540 = vmax.xlane.f32.xlu0 %v3539_v33  ;;  %v11416_v37 = vpop.f32.mrb[49].mxu1 }
 0x639   :  { %v3532_v35 = vsel %vm12936_vm3, %v3524_v13, -inf }
 0x63a   :  { %v3139_v11 = vpop.f32.mrb[50].mxu1  ;;  %v3291_v40 = vpop.f32.mrb[66].mxu0  ;;  %v3542_v43 = vsel %vm1013_vm2, %v3532_v35, -inf }
 0x63b   :  { %v3525_v44 = vmul.f32 0.35355338, %v3139_v11  ;;  %v3527_v34 = vmul.f32 0.35355338, %v3291_v40  ;;  %v11431_v19 = vpop.f32.mrb[67].mxu0  ;;  %3543 = vmax.xlane.f32.xlu1 %v3542_v43  ;;  %v11421_v23 = vpop.f32.mrb[51].mxu1 }
 0x63d   :  { %v3533_v46 = vsel %vm12936_vm3, %v3525_v44, -inf  ;;  %v3535_v21 = vsel %vm12936_vm3, %v3527_v34, -inf }
 0x63e   :  { %v3215_v41 = vpop.f32.mrb[52].mxu1  ;;  %v3443_v55 = vpop.f32.mrb[68].mxu0  ;;  %v3545_v36 = vsel %vm1013_vm2, %v3533_v46, -inf  ;;  %v3551_v10 = vsel %vm1013_vm2, %v3535_v21, -inf }
 0x63f   :  { %v3526_v15 = vmul.f32 0.35355338, %v3215_v41  ;;  %v3529_v52 = vmul.f32 0.35355338, %v3443_v55  ;;  %v11441_v20 = vpop.f32.mrb[69].mxu0  ;;  %3546 = vmax.xlane.f32.xlu0 %v3545_v36  ;;  %v11426_v0 = vpop.f32.mrb[53].mxu1 }
 0x641   :  { %v3534_v2 = vsel %vm12936_vm3, %v3526_v15, -inf  ;;  %v3537_v60 = vsel %vm12936_vm3, %v3529_v52, -inf }
 0x642   :  { %v3367_v5 = vpop.f32.mrb[54].mxu1  ;;  %v3548_v56 = vsel %vm1013_vm2, %v3534_v2, -inf  ;;  %v3557_v24 = vsel %vm1013_vm2, %v3537_v60, -inf }
 0x643   :  { %v3528_v25 = vmul.f32 0.35355338, %v3367_v5  ;;  %3552 = vmax.xlane.f32.xlu0 %v3551_v10  ;;  %3549 = vmax.xlane.f32.xlu1 %v3548_v56  ;;  %v11436_v32 = vpop.f32.mrb[55].mxu1 }
 0x645   :  { %v3536_v9 = vsel %vm12936_vm3, %v3528_v25, -inf }
 0x646   :  { %v3519_v53 = vpop.f32.mrb[56].mxu1  ;;  %v3554_v26 = vsel %vm1013_vm2, %v3536_v9, -inf }
 0x647   :  { %v3530_v42 = vmul.f32 0.35355338, %v3519_v53  ;;  %3558 = vmax.xlane.f32.xlu0 %v3557_v24  ;;  %3555 = vmax.xlane.f32.xlu1 %v3554_v26  ;;  %v11446_v7 = vpop.f32.mrb[57].mxu1 }
 0x649   :  { %v3538_v17 = vsel %vm12936_vm3, %v3530_v42, -inf }
 0x64a   :  { %v3560_v30 = vsel %vm1013_vm2, %v3538_v17, -inf }
 0x64b   :  { %3561 = vmax.xlane.f32.xlu1 %v3560_v30 }
 0x6c4   :  { %v3541_v18 = vpop.xlane.xlu0 %3540 }
 0x6c5   :  { %v3563_v33 = vsub.f32 %v3531_v27, %v3541_v18 }
 0x6c7   :  { %v3571_v13 = vmul.f32 1.442695, %v3563_v33 }
 0x6c8   :  { %v3544_v37 = vpop.xlane.xlu1 %3543 }
 0x6c9   :  { %12309 = vpow2.f32 %v3571_v13  ;;  %v3564_v11 = vsub.f32 %v3532_v35, %v3544_v37 }
 0x6cb   :  { %v3573_v40 = vmul.f32 1.442695, %v3564_v11 }
 0x6cc   :  { %v3547_v43 = vpop.xlane.xlu0 %3546 }
 0x6cd   :  { %12311 = vpow2.f32 %v3573_v40  ;;  %v3565_v44 = vsub.f32 %v3533_v46, %v3547_v43 }
 0x6cf   :  { %v3575_v34 = vmul.f32 1.442695, %v3565_v44 }
 0x6d0   :  { %v3553_v19 = vpop.xlane.xlu0 %3552  ;;  %v3550_v23 = vpop.xlane.xlu1 %3549 }
 0x6d1   :  { %12313 = vpow2.f32 %v3575_v34  ;;  %v3567_v41 = vsub.f32 %v3535_v21, %v3553_v19  ;;  %v3566_v55 = vsub.f32 %v3534_v2, %v3550_v23 }
 0x6d3   :  { %v12310_v36 = vpop.eup %12309  ;;  %v3579_v15 = vmul.f32 1.442695, %v3567_v41  ;;  %v3577_v52 = vmul.f32 1.442695, %v3566_v55 }
 0x6d4   :  { %v3559_v20 = vpop.xlane.xlu0 %3558  ;;  %v3556_v0 = vpop.xlane.xlu1 %3555  ;;  %v3587_v27 = vsel %vm1013_vm2, %v12310_v36, 0.0 }
 0x6d5   :  { %12315 = vpow2.f32 %v3579_v15  ;;  %v3569_v5 = vsub.f32 %v3537_v60, %v3559_v20  ;;  %v3568_v35 = vsub.f32 %v3536_v9, %v3556_v0  ;;  %3588 = vadd.xlane.f32.xlu0 %v3587_v27 }
 0x6d6   :  { %12317 = vpow2.f32 %v3577_v52 }
 0x6d7   :  { %v12312_v10 = vpop.eup %12311  ;;  %v3583_v46 = vmul.f32 1.442695, %v3569_v5  ;;  %v3581_v56 = vmul.f32 1.442695, %v3568_v35  ;;  %v284_v5 = vld [vmem:[%s12586_s9 + $0x40] sm:$0xff]  ;;  %v285_v35 = vld [vmem:[%s12586_s9 + $0x48] sm:$0xff] }
 0x6d8   :  { %v3562_v25 = vpop.xlane.xlu1 %3561  ;;  %v3590_v32 = vsel %vm1013_vm2, %v12312_v10, 0.0 }
 0x6d9   :  { %12319 = vpow2.f32 %v3583_v46  ;;  %v3570_v21 = vsub.f32 %v3538_v17, %v3562_v25  ;;  %3591 = vadd.xlane.f32.xlu1 %v3590_v32  ;;  %v12065_v25 = vpack.c.bf16 %v285_v35, %v284_v5  ;;  %v286_v32 = vld [vmem:[%s12586_s9 + $0x50] sm:$0xff] }
 0x6da   :  { %12321 = vpow2.f32 %v3581_v56  ;;  %v326_v35 = vld [vmem:[%s12604_s17 + $0x50] sm:$0xff] }
 0x6db   :  { %v12314_v2 = vpop.eup %12313  ;;  %v3585_v53 = vmul.f32 1.442695, %v3570_v21 }
 0x6dc   :  { %v3593_v24 = vsel %vm1013_vm2, %v12314_v2, 0.0 }
 0x6dd   :  { %12323 = vpow2.f32 %v3585_v53  ;;  %3594 = vadd.xlane.f32.xlu0 %v3593_v24  ;;  %v304_v53 = vld [vmem:[%s12591_s13 + $0x40] sm:$0xff]  ;;  %v305_v24 = vld [vmem:[%s12591_s13 + $0x48] sm:$0xff] }
 0x6df   :  { %v12316_v60 = vpop.eup %12315 }
 0x6e0   :  { %v12318_v9 = vpop.eup %12317  ;;  %v3599_v26 = vsel %vm1013_vm2, %v12316_v60, 0.0 }
 0x6e1   :  { %3600 = vadd.xlane.f32.xlu0 %v3599_v26  ;;  %v3596_v42 = vsel %vm1013_vm2, %v12318_v9, 0.0 }
 0x6e2   :  { %3597 = vadd.xlane.f32.xlu1 %v3596_v42  ;;  %v344_v42 = vld [vmem:[%s12609_s21 + $0x40] sm:$0xff] }
 0x6e3   :  { %v12320_v7 = vpop.eup %12319 }
 0x6e4   :  { %v12322_v30 = vpop.eup %12321  ;;  %v3605_v17 = vsel %vm1013_vm2, %v12320_v7, 0.0 }
 0x6e5   :  { %3606 = vadd.xlane.f32.xlu0 %v3605_v17  ;;  %v3602_v18 = vsel %vm1013_vm2, %v12322_v30, 0.0  ;;  %v346_v17 = vld [vmem:[%s12609_s21 + $0x50] sm:$0xff] }
 0x6e6   :  { %3603 = vadd.xlane.f32.xlu1 %v3602_v18  ;;  %v347_v18 = vld [vmem:[%s12609_s21 + $0x58] sm:$0xff] }
 0x6e7   :  { %v12324_v33 = vpop.eup %12323 }
 0x6e8   :  { %v3608_v13 = vsel %vm1013_vm2, %v12324_v33, 0.0 }
 0x6ea   :  { %3609 = vadd.xlane.f32.xlu1 %v3608_v13  ;;  %v377_v13 = vld [vmem:[%s13395_s16 + $0x8] sm:$0xff] }
 0x762   :  { %v3589_v37 = vpop.xlane.xlu0 %3588 }
 0x763   :  { %12325 = vrcp.f32 %v3589_v37  ;;  %v376_v37 = vld [vmem:[%s13395_s16] sm:$0xff] }
 0x766   :  { %v3592_v11 = vpop.xlane.xlu1 %3591 }
 0x767   :  { %12327 = vrcp.f32 %v3592_v11 }
 0x76a   :  { %v3595_v40 = vpop.xlane.xlu0 %3594 }
 0x76b   :  { %12329 = vrcp.f32 %v3595_v40  ;;  %v324_v40 = vld [vmem:[%s12604_s17 + $0x40] sm:$0xff] }
 0x76d   :  { %v12326_v43 = vpop.eup %12325 }
 0x76e   :  { %v3612_v44 = vmul.f32 %v12326_v43, %v12310_v36  ;;  %v3601_v34 = vpop.xlane.xlu0 %3600  ;;  %v325_v43 = vld [vmem:[%s12604_s17 + $0x48] sm:$0xff] }
 0x76f   :  { %12331 = vrcp.f32 %v3601_v34  ;;  %v3598_v19 = vpop.xlane.xlu1 %3597  ;;  %v12081_v34 = vpack.c.bf16 %v325_v43, %v324_v40 }
 0x770   :  { %12333 = vrcp.f32 %v3598_v19  ;;  %11450 = vmatmul.mubr.msk.f32.vlgmr.msra.gmra.mrb[70].mxu0 %vm1013_vm2, %v3612_v44 }
 0x771   :  { %v12328_v23 = vpop.eup %12327  ;;  %11458 = vmatpush3.msra.mxu0 %v13223_v14  ;;  %11459 = vmatprep.mubr.msk.f32.mxu0 %vm12489_vm1, %v12488_v16 }
 0x772   :  { %v3614_v41 = vmul.f32 %v12328_v23, %v12312_v10  ;;  %v3607_v55 = vpop.xlane.xlu0 %3606  ;;  %11467 = vmatprep.subr.mxu0 %v12488_v16 }
 0x773   :  { %12335 = vrcp.f32 %v3607_v55  ;;  %v3604_v15 = vpop.xlane.xlu1 %3603 }
 0x774   :  { %12337 = vrcp.f32 %v3604_v15  ;;  %11455 = vmatmul.mubr.msk.f32.vlgmr.msra.gmra.mrb[58].mxu1 %vm1013_vm2, %v3614_v41 }
 0x775   :  { %v12330_v36 = vpop.eup %12329  ;;  %11463 = vmatpush3.msra.mxu1 %v13220_v12  ;;  %11464 = vmatprep.mubr.msk.f32.mxu1 %vm12489_vm1, %v12488_v16 }
 0x776   :  { %v3616_v14 = vmul.f32 %v12330_v36, %v12314_v2  ;;  %11472 = vmatprep.subr.mxu1 %v12488_v16 }
 0x777   :  { %v3610_v52 = vpop.xlane.xlu1 %3609 }
 0x778   :  { %12339 = vrcp.f32 %v3610_v52  ;;  %11460 = vmatmul.mubr.msk.f32.vlgmr.msra.gmra.mrb[72].mxu0 %vm1013_vm2, %v3616_v14 }
 0x779   :  { %v12332_v20 = vpop.eup %12331  ;;  %11468 = vmatpush3.msra.mxu0 %v13239_v31  ;;  %11469 = vmatprep.mubr.msk.f32.mxu0 %vm12489_vm1, %v12488_v16 }
 0x77a   :  { %v12334_v0 = vpop.eup %12333  ;;  %v3620_v27 = vmul.f32 %v12332_v20, %v12316_v60  ;;  %11477 = vmatprep.subr.mxu0 %v12488_v16  ;;  %v12073_v60 = vpack.c.bf16 %v305_v24, %v304_v53 }
 0x77b   :  { %v3618_v12 = vmul.f32 %v12334_v0, %v12318_v9  ;;  %v306_v9 = vld [vmem:[%s12591_s13 + $0x50] sm:$0xff] }
 0x77c   :  { %11470 = vmatmul.mubr.msk.f32.vlgmr.msra.gmra.mrb[74].mxu0 %vm1013_vm2, %v3620_v27 }
 0x77d   :  { %v12336_v10 = vpop.eup %12335  ;;  %11465 = vmatmul.mubr.msk.f32.vlgmr.msra.gmra.mrb[60].mxu1 %vm1013_vm2, %v3618_v12  ;;  %11478 = vmatpush3.msra.mxu0 %v13254_v51  ;;  %v287_v51 = vld [vmem:[%s12586_s9 + $0x58] sm:$0xff] }
 0x77e   :  { %v12338_v31 = vpop.eup %12337  ;;  %v3624_v46 = vmul.f32 %v12336_v10, %v12320_v7  ;;  %11473 = vmatpush3.msra.mxu1 %v13235_v39  ;;  %11474 = vmatprep.mubr.msk.f32.mxu1 %vm12489_vm1, %v12488_v16  ;;  %v12069_v2 = vpack.c.bf16 %v287_v51, %v286_v32  ;;  %v345_v7 = vld [vmem:[%s12609_s21 + $0x48] sm:$0xff]  ;;  %v327_v10 = vld [vmem:[%s12604_s17 + $0x58] sm:$0xff] }
 0x77f   :  { %v3622_v56 = vmul.f32 %v12338_v31, %v12322_v30  ;;  %11479 = vmatprep.mubr.msk.f32.mxu0 %vm12489_vm1, %v12488_v16  ;;  %11482 = vmatprep.subr.mxu1 %v12488_v16  ;;  %v12089_v30 = vpack.c.bf16 %v345_v7, %v344_v42 }
 0x780   :  { %11480 = vmatmul.mubr.msk.f32.vlgmr.msra.gmra.mrb[76].mxu0 %vm1013_vm2, %v3624_v46  ;;  %11487 = vmatprep.subr.mxu0 %v377_v13  ;;  %v12085_v46 = vpack.c.bf16 %v327_v10, %v326_v35 }
 0x781   :  { %11475 = vmatmul.mubr.msk.f32.vlgmr.msra.gmra.mrb[62].mxu1 %vm1013_vm2, %v3622_v56  ;;  %11488 = vmatpush3.msra.mxu0 %v377_v13  ;;  %v364_v56 = vld [vmem:[%s12697_s3 + $0x40] sm:$0xff] }
 0x782   :  { %v12340_v39 = vpop.eup %12339  ;;  %11483 = vmatpush3.msra.mxu1 %v13249_v22  ;;  %11484 = vmatprep.mubr.msk.f32.mxu1 %vm12489_vm1, %v12488_v16  ;;  %v307_v22 = vld [vmem:[%s12591_s13 + $0x58] sm:$0xff] }
 0x783   :  { %v3626_v21 = vmul.f32 %v12340_v39, %v12324_v33  ;;  %12066 = vmatprep.subr.bf16.mxu1 %v12065_v25  ;;  %v12077_v26 = vpack.c.bf16 %v307_v22, %v306_v9  ;;  %v12093_v33 = vpack.c.bf16 %v347_v18, %v346_v17  ;;  %11501 = vmatprep.subr.mxu0 %v376_v37 }
 0x785   :  { %11485 = vmatmul.mubr.msk.f32.vlgmr.msra.gmra.mrb[64].mxu1 %vm1013_vm2, %v3626_v21  ;;  %v366_v21 = vld [vmem:[%s12697_s3 + $0x50] sm:$0xff] }
 0x786   :  { %12068 = vmatpush3.bf16.msra.mxu1 %v12065_v25  ;;  %11523 = vmatprep.mubr.msk.f32.mxu1 %vm140_vm0, %v12634_v47  ;;  %v365_v25 = vld [vmem:[%s12697_s3 + $0x48] sm:$0xff] }
 0x787   :  { %12070 = vmatprep.subr.bf16.mxu1 %v12069_v2  ;;  %v12097_v32 = vpack.c.bf16 %v365_v25, %v364_v56 }
 0x78a   :  { %12072 = vmatpush3.bf16.msra.mxu1 %v12069_v2  ;;  %v367_v2 = vld [vmem:[%s12697_s3 + $0x58] sm:$0xff] }
 0x78b   :  { %12074 = vmatprep.subr.bf16.mxu1 %v12073_v60 }
 0x78d   :  { %11524 = vmatmul.mubr.msk.f32.vlgmr.msra.gmra.mrb[66].mxu1 %vm140_vm0, %v12649_v28 }
 0x78e   :  { %11526 = vmatprep.mubr.msk.f32.mxu1 %vm140_vm0, %v12653_v59  ;;  %12076 = vmatpush3.bf16.msra.mxu1 %v12073_v60 }
 0x78f   :  { %12078 = vmatprep.subr.bf16.mxu1 %v12077_v26 }
 0x791   :  { %11527 = vmatmul.mubr.msk.f32.gmra.mrb[68].mxu1 %vm140_vm0, %v12667_v38 }
 0x792   :  { %11529 = vmatprep.mubr.msk.f32.mxu1 %vm140_vm0, %v12673_v3  ;;  %12080 = vmatpush3.bf16.msra.mxu1 %v12077_v26 }
 0x793   :  { %12090 = vmatprep.subr.bf16.mxu1 %v12089_v30 }
 0x795   :  { %11530 = vmatmul.mubr.msk.f32.gmra.mrb[70].mxu1 %vm140_vm0, %v12687_v48 }
 0x796   :  { %11532 = vmatprep.mubr.msk.f32.mxu1 %vm140_vm0, %v12691_v8 }
 0x799   :  { %11533 = vmatmul.mubr.msk.f32.gmra.mrb[72].mxu1 %vm140_vm0, %v12709_v49 }
 0x79a   :  { %11543 = vmatprep.mubr.msk.f32.mxu1 %vm140_vm0, %v12634_v47 }
 0x79d   :  { %11544 = vmatmul.mubr.msk.f32.vlgmr.msra.gmra.mrb[74].mxu1 %vm140_vm0, %v12649_v28 }
 0x79e   :  { %11546 = vmatprep.mubr.msk.f32.mxu1 %vm140_vm0, %v12653_v59  ;;  %12092 = vmatpush3.bf16.msra.mxu1 %v12089_v30 }
 0x79f   :  { %12094 = vmatprep.subr.bf16.mxu1 %v12093_v33 }
 0x7a1   :  { %11547 = vmatmul.mubr.msk.f32.gmra.mrb[76].mxu1 %vm140_vm0, %v12667_v38 }
 0x7a2   :  { %11549 = vmatprep.mubr.msk.f32.mxu1 %vm140_vm0, %v12673_v3  ;;  %12096 = vmatpush3.bf16.msra.mxu1 %v12093_v33 }
 0x7a3   :  { %11615 = vmatprep.subr.mxu1 %v12488_v16 }
 0x7a5   :  { %11550 = vmatmul.mubr.msk.f32.gmra.mrb[78].mxu1 %vm140_vm0, %v12687_v48 }
 0x7a6   :  { %11552 = vmatprep.mubr.msk.f32.mxu1 %vm140_vm0, %v12691_v8 }
 0x7a9   :  { %11553 = vmatmul.mubr.msk.f32.gmra.mrb[80].mxu1 %vm140_vm0, %v12709_v49 }
 0x7aa   :  { %11583 = vmatprep.mubr.msk.f32.mxu1 %vm140_vm0, %v12634_v47 }
 0x7ad   :  { %11584 = vmatmul.mubr.msk.f32.vlgmr.msra.gmra.mrb[82].mxu1 %vm140_vm0, %v12649_v28 }
 0x7ae   :  { %11586 = vmatprep.mubr.msk.f32.mxu1 %vm140_vm0, %v12653_v59 }
 0x7b1   :  { %11587 = vmatmul.mubr.msk.f32.gmra.mrb[84].mxu1 %vm140_vm0, %v12667_v38 }
 0x7b2   :  { %11589 = vmatprep.mubr.msk.f32.mxu1 %vm140_vm0, %v12673_v3 }
 0x7b5   :  { %11590 = vmatmul.mubr.msk.f32.gmra.mrb[86].mxu1 %vm140_vm0, %v12687_v48 }
 0x7b6   :  { %11592 = vmatprep.mubr.msk.f32.mxu1 %vm140_vm0, %v12691_v8 }
 0x7b9   :  { %11593 = vmatmul.mubr.msk.f32.gmra.mrb[88].mxu1 %vm140_vm0, %v12709_v49 }
 0x7ba   :  { %11617 = vmatprep.mubr.msk.f32.mxu1 %vm12489_vm1, %v12488_v16 }
 0x843   :  { %v3696_v11 = vpop.f32.mrb[70].mxu0 }
 0x844   :  { %v11451_v44 = vpop.f32.mrb[71].mxu0  ;;  %11489 = vmatprep.mubr.msk.f32.mxu0 %vm1013_vm2, %v3696_v11 }
 0x847   :  { %v3769_v19 = vpop.f32.mrb[58].mxu1 }
 0x848   :  { %v11456_v23 = vpop.f32.mrb[59].mxu1  ;;  %11490 = vmatmul.mubr.msk.f32.vlgmr.msra.gmra.mrb[78].mxu0 %vm1013_vm2, %v3769_v19 }
 0x849   :  { %11502 = vmatpush3.msra.mxu0 %v376_v37 }
 0x84a   :  { %12082 = vmatprep.subr.bf16.mxu0 %v12081_v34 }
 0x84b   :  { %v3842_v41 = vpop.f32.mrb[72].mxu0 }
 0x84c   :  { %v11461_v55 = vpop.f32.mrb[73].mxu0  ;;  %11492 = vmatprep.mubr.msk.f32.mxu0 %vm1013_vm2, %v3842_v41 }
 0x84f   :  { %v3988_v15 = vpop.f32.mrb[74].mxu0 }
 0x850   :  { %v3915_v36 = vpop.f32.mrb[60].mxu1  ;;  %v11471_v14 = vpop.f32.mrb[75].mxu0 }
 0x851   :  { %v11466_v52 = vpop.f32.mrb[61].mxu1  ;;  %11493 = vmatmul.mubr.msk.f32.gmra.mrb[80].mxu0 %vm1013_vm2, %v3915_v36 }
 0x852   :  { %11495 = vmatprep.mubr.msk.f32.mxu0 %vm1013_vm2, %v3988_v15 }
 0x853   :  { %v4134_v20 = vpop.f32.mrb[76].mxu0 }
 0x854   :  { %v4061_v0 = vpop.f32.mrb[62].mxu1  ;;  %v11481_v27 = vpop.f32.mrb[77].mxu0 }
 0x855   :  { %v11476_v12 = vpop.f32.mrb[63].mxu1  ;;  %11496 = vmatmul.mubr.msk.f32.gmra.mrb[82].mxu0 %vm1013_vm2, %v4061_v0 }
 0x856   :  { %11498 = vmatprep.mubr.msk.f32.mxu0 %vm1013_vm2, %v4134_v20 }
 0x858   :  { %v4207_v5 = vpop.f32.mrb[64].mxu1 }
 0x859   :  { %v11486_v31 = vpop.f32.mrb[65].mxu1  ;;  %11499 = vmatmul.mubr.msk.f32.gmra.mrb[84].mxu0 %vm1013_vm2, %v4207_v5 }
 0x85a   :  { %11503 = vmatprep.mubr.msk.f32.mxu0 %vm1013_vm2, %v13120_v54 }
 0x85d   :  { %11504 = vmatmul.mubr.msk.f32.vlgmr.msra.gmra.mrb[78].mxu0 %vm1013_vm2, %v13122_v62 }
 0x85e   :  { %11506 = vmatprep.mubr.msk.f32.mxu0 %vm1013_vm2, %v13124_v57  ;;  %12084 = vmatpush3.bf16.msra.mxu0 %v12081_v34 }
 0x85f   :  { %12086 = vmatprep.subr.bf16.mxu0 %v12085_v46 }
 0x860   :  { %v11525_v51 = vpop.f32.mrb[66].mxu1 }
 0x861   :  { %v4541_v39 = vpop.f32.mrb[67].mxu1  ;;  %11507 = vmatmul.mubr.msk.f32.gmra.mrb[80].mxu0 %vm1013_vm2, %v13128_v58  ;;  %v10500_v58 = vld [vmem:[%s12777_s8 + $0x2] ss:$0 sm:$0xff] }
 0x862   :  { %11509 = vmatprep.mubr.msk.f32.mxu0 %vm1013_vm2, %v13126_v61  ;;  %12088 = vmatpush3.bf16.msra.mxu0 %v12085_v46  ;;  %v12101_v61 = vpack.c.bf16 %v367_v2, %v366_v21  ;;  %v4542_v9 = vadd.f32 %v10500_v58, %v4541_v39 }
 0x863   :  { %12098 = vmatprep.subr.bf16.mxu0 %v12097_v32 }
 0x864   :  { %v11528_v54 = vpop.f32.mrb[68].mxu1  ;;  %v5024_v18 = vmul.f32 %v13177_v45, %v4542_v9 }
 0x865   :  { %v4551_v62 = vpop.f32.mrb[69].mxu1  ;;  %11510 = vmatmul.mubr.msk.f32.gmra.mrb[82].mxu0 %vm1013_vm2, %v13130_v1  ;;  %v10509_v1 = vld [vmem:[%s12782_s14 + $0x2] ss:$0 sm:$0xff]  ;;  %v4557_v30 = vadd.f32 %v11528_v54, %v10500_v58 }
 0x866   :  { %11512 = vmatprep.mubr.msk.f32.mxu0 %vm1013_vm2, %v13132_v29  ;;  %v4547_v29 = vadd.f32 %v11525_v51, %v10500_v58  ;;  %v4552_v33 = vadd.f32 %v10500_v58, %v4551_v62 }
 0x867   :  { %v5027_v19 = vmul.f32 %v13177_v45, %v4557_v30 }
 0x868   :  { %v11531_v57 = vpop.f32.mrb[70].mxu1  ;;  %v5025_v7 = vmul.f32 %v13177_v45, %v4547_v29  ;;  %v5026_v55 = vmul.f32 %v13177_v45, %v4552_v33 }
 0x869   :  { %v4561_v53 = vpop.f32.mrb[71].mxu1  ;;  %11513 = vmatmul.mubr.msk.f32.gmra.mrb[84].mxu0 %vm1013_vm2, %v13134_v4  ;;  %v4567_v23 = vadd.f32 %v11531_v57, %v10500_v58 }
 0x86a   :  { %11563 = vmatprep.mubr.msk.f32.mxu0 %vm140_vm0, %v12634_v47  ;;  %v4562_v15 = vadd.f32 %v10500_v58, %v4561_v53 }
 0x86b   :  { %v5029_v5 = vmul.f32 %v13177_v45, %v4567_v23 }
 0x86c   :  { %v11534_v24 = vpop.f32.mrb[72].mxu1  ;;  %v5028_v31 = vmul.f32 %v13177_v45, %v4562_v15 }
 0x86d   :  { %v4571_v60 = vpop.f32.mrb[73].mxu1  ;;  %11564 = vmatmul.mubr.msk.f32.vlgmr.msra.gmra.mrb[86].mxu0 %vm140_vm0, %v12649_v28  ;;  %v4577_v35 = vadd.f32 %v11534_v24, %v10500_v58 }
 0x86e   :  { %11566 = vmatprep.mubr.msk.f32.mxu0 %vm140_vm0, %v12653_v59  ;;  %12100 = vmatpush3.bf16.msra.mxu0 %v12097_v32  ;;  %v4572_v46 = vadd.f32 %v10500_v58, %v4571_v60 }
 0x86f   :  { %12102 = vmatprep.subr.bf16.mxu0 %v12101_v61  ;;  %v5031_v57 = vmul.f32 %v13177_v45, %v4577_v35 }
 0x870   :  { %v11545_v22 = vpop.f32.mrb[74].mxu1  ;;  %v5030_v2 = vmul.f32 %v13177_v45, %v4572_v46 }
 0x871   :  { %v4658_v4 = vadd.f32 %v11545_v22, %v10509_v1  ;;  %v4652_v26 = vpop.f32.mrb[75].mxu1  ;;  %11567 = vmatmul.mubr.msk.f32.gmra.mrb[88].mxu0 %vm140_vm0, %v12667_v38 }
 0x872   :  { %v4653_v42 = vadd.f32 %v10509_v1, %v4652_v26  ;;  %11569 = vmatprep.mubr.msk.f32.mxu0 %vm140_vm0, %v12673_v3  ;;  %12104 = vmatpush3.bf16.msra.mxu0 %v12101_v61 }
 0x873   :  { %v5033_v17 = vmul.f32 %v13181_v50, %v4658_v4  ;;  %11630 = vmatprep.subr.mxu0 %v12488_v16 }
 0x874   :  { %v5032_v13 = vmul.f32 %v13181_v50, %v4653_v42  ;;  %v11548_v37 = vpop.f32.mrb[76].mxu1  ;;  %v10527_v42 = vld [vmem:[%s12833_s28 + $0x2] ss:$0 sm:$0xff] }
 0x875   :  { %v13448_v11 = vadd.f32 %v5033_v17, %v5025_v7  ;;  %v4668_v40 = vadd.f32 %v11548_v37, %v10509_v1  ;;  %v4662_v43 = vpop.f32.mrb[77].mxu1  ;;  %11570 = vmatmul.mubr.msk.f32.gmra.mrb[90].mxu0 %vm140_vm0, %v12687_v48  ;;  %v10518_v7 = vld [vmem:[%s12842_s2 + $0x2] ss:$0 sm:$0xff] }
 0x876   :  { %v13452_v44 = vadd.f32 %v5032_v13, %v5024_v18  ;;  %v4663_v34 = vadd.f32 %v10509_v1, %v4662_v43  ;;  %11572 = vmatprep.mubr.msk.f32.mxu0 %vm140_vm0, %v12691_v8 }
 0x877   :  { %v5035_v41 = vmul.f32 %v13181_v50, %v4668_v40 }
 0x878   :  { %v5034_v36 = vmul.f32 %v13181_v50, %v4663_v34  ;;  %v11551_v14 = vpop.f32.mrb[78].mxu1 }
 0x879   :  { %v13460_v52 = vadd.f32 %v5035_v41, %v5027_v19  ;;  %v4678_v20 = vadd.f32 %v11551_v14, %v10509_v1  ;;  %v4672_v0 = vpop.f32.mrb[79].mxu1  ;;  %11573 = vmatmul.mubr.msk.f32.gmra.mrb[92].mxu0 %vm140_vm0, %v12709_v49 }
 0x87a   :  { %v13464_v27 = vadd.f32 %v5034_v36, %v5026_v55  ;;  %v4673_v12 = vadd.f32 %v10509_v1, %v4672_v0  ;;  %11603 = vmatprep.mubr.msk.f32.mxu0 %vm140_vm0, %v12634_v47 }
 0x87b   :  { %v5037_v10 = vmul.f32 %v13181_v50, %v4678_v20 }
 0x87c   :  { %v5036_v56 = vmul.f32 %v13181_v50, %v4673_v12  ;;  %v11554_v25 = vpop.f32.mrb[80].mxu1 }
 0x87d   :  { %v13472_v32 = vadd.f32 %v5037_v10, %v5029_v5  ;;  %v4688_v51 = vadd.f32 %v11554_v25, %v10509_v1  ;;  %v4682_v39 = vpop.f32.mrb[81].mxu1  ;;  %11604 = vmatmul.mubr.msk.f32.vlgmr.msra.gmra.mrb[94].mxu0 %vm140_vm0, %v12649_v28 }
 0x87e   :  { %v13476_v54 = vadd.f32 %v5036_v56, %v5028_v31  ;;  %v4683_v62 = vadd.f32 %v10509_v1, %v4682_v39  ;;  %11606 = vmatprep.mubr.msk.f32.mxu0 %vm140_vm0, %v12653_v59 }
 0x87f   :  { %v5039_v21 = vmul.f32 %v13181_v50, %v4688_v51 }
 0x880   :  { %v5038_v53 = vmul.f32 %v13181_v50, %v4683_v62  ;;  %v11585_v61 = vpop.f32.mrb[82].mxu1 }
 0x881   :  { %v13484_v58 = vadd.f32 %v5039_v21, %v5031_v57  ;;  %v4874_v24 = vpop.f32.mrb[83].mxu1  ;;  %11607 = vmatmul.mubr.msk.f32.gmra.mrb[96].mxu0 %vm140_vm0, %v12667_v38  ;;  %v4880_v30 = vadd.f32 %v11585_v61, %v10527_v42 }
 0x882   :  { %v13488_v60 = vadd.f32 %v5038_v53, %v5030_v2  ;;  %11609 = vmatprep.mubr.msk.f32.mxu0 %vm140_vm0, %v12673_v3  ;;  %v4875_v17 = vadd.f32 %v10527_v42, %v4874_v24 }
 0x883   :  { %v5057_v40 = vmul.f32 %v13181_v50, %v4880_v30 }
 0x884   :  { %v11588_v1 = vpop.f32.mrb[84].mxu1  ;;  %v5056_v19 = vmul.f32 %v13181_v50, %v4875_v17  ;;  %v13535_v17 = vld [vmem:[%s12792_s24] sm:$0xff]  ;;  %s14601_s24 = sld [smem:[%s14697_s0 + %s12511_s20]]  }
 0x885   :  { %v4884_v29 = vpop.f32.mrb[85].mxu1  ;;  %11610 = vmatmul.mubr.msk.f32.gmra.mrb[98].mxu0 %vm140_vm0, %v12687_v48  ;;  %v4890_v43 = vadd.f32 %v11588_v1, %v10527_v42 }
 0x886   :  { %11612 = vmatprep.mubr.msk.f32.mxu0 %vm140_vm0, %v12691_v8  ;;  %v4885_v23 = vadd.f32 %v10527_v42, %v4884_v29 }
 0x887   :  { %v5059_v12 = vmul.f32 %v13181_v50, %v4890_v43 }
 0x888   :  { %v11591_v9 = vpop.f32.mrb[86].mxu1  ;;  %v5058_v10 = vmul.f32 %v13181_v50, %v4885_v23 }
 0x889   :  { %v4894_v22 = vpop.f32.mrb[87].mxu1  ;;  %11613 = vmatmul.mubr.msk.f32.gmra.mrb[100].mxu0 %vm140_vm0, %v12709_v49  ;;  %v4900_v5 = vadd.f32 %v11591_v9, %v10527_v42 }
 0x88a   :  { %11632 = vmatprep.mubr.msk.f32.mxu0 %vm12489_vm1, %v12488_v16  ;;  %v4895_v31 = vadd.f32 %v10527_v42, %v4894_v22 }
 0x88b   :  { %v5061_v21 = vmul.f32 %v13181_v50, %v4900_v5 }
 0x88c   :  { %v11594_v4 = vpop.f32.mrb[88].mxu1  ;;  %v5060_v61 = vmul.f32 %v13181_v50, %v4895_v31 }
 0x88d   :  { %v4904_v26 = vpop.f32.mrb[89].mxu1  ;;  %v4910_v2 = vadd.f32 %v11594_v4, %v10527_v42 }
 0x88e   :  { %v4905_v24 = vadd.f32 %v10527_v42, %v4904_v26  ;;  %v13528_v26 = vld [vmem:[%s12787_s19] sm:$0xff] }
 0x940   :  { %v11565_v18 = vpop.f32.mrb[86].mxu0 }
 0x941   :  { %v4769_v33 = vadd.f32 %v11565_v18, %v10518_v7  ;;  %v4763_v13 = vpop.f32.mrb[87].mxu0  ;;  %v5062_v18 = vmul.f32 %v13535_v17, %v4905_v24 }
 0x942   :  { %v4764_v37 = vadd.f32 %v10518_v7, %v4763_v13  ;;  %v10536_v13 = vld [vmem:[%s12864_s10 + $0x2] ss:$0 sm:$0xff] }
 0x943   :  { %v5049_v34 = vmul.f32 %v13177_v45, %v4769_v33 }
 0x944   :  { %v5048_v41 = vmul.f32 %v13177_v45, %v4764_v37  ;;  %v11568_v55 = vpop.f32.mrb[88].mxu0 }
 0x945   :  { %v5065_v15 = vadd.f32 %v5057_v40, %v5049_v34  ;;  %v4779_v36 = vadd.f32 %v11568_v55, %v10518_v7  ;;  %v4773_v14 = vpop.f32.mrb[89].mxu0 }
 0x946   :  { %v5064_v20 = vadd.f32 %v5056_v19, %v5048_v41  ;;  %v4774_v0 = vadd.f32 %v10518_v7, %v4773_v14 }
 0x947   :  { %v5051_v35 = vmul.f32 %v13177_v45, %v4779_v36 }
 0x948   :  { %v5050_v46 = vmul.f32 %v13177_v45, %v4774_v0  ;;  %v11571_v56 = vpop.f32.mrb[90].mxu0  ;;  %11616 = vmatpush3.xpose.msk.msra.mxu1 %vm1013_vm2, %v5064_v20 }
 0x949   :  { %v5067_v25 = vadd.f32 %v5059_v12, %v5051_v35  ;;  %v4789_v51 = vadd.f32 %v11571_v56, %v10518_v7  ;;  %v4783_v39 = vpop.f32.mrb[91].mxu0  ;;  %11620 = vmatprep.subr.mxu1 %v12488_v16 }
 0x94a   :  { %v5066_v62 = vadd.f32 %v5058_v10, %v5050_v46  ;;  %v4784_v57 = vadd.f32 %v10518_v7, %v4783_v39 }
 0x94b   :  { %v5053_v53 = vmul.f32 %v13177_v45, %v4789_v51  ;;  %11618 = vmatmul.mubr.msk.f32.vlgmr.msra.gmra.mrb[90].mxu1 %vm1013_vm2, %v13452_v44  ;;  %11631 = vmatpush3.xpose.msk.msra.mxu0 %vm1013_vm2, %v5067_v25 }
 0x94c   :  { %v5052_v1 = vmul.f32 %v13177_v45, %v4784_v57  ;;  %v11574_v29 = vpop.f32.mrb[92].mxu0  ;;  %11621 = vmatpush3.xpose.msk.msra.mxu1 %vm1013_vm2, %v5065_v15  ;;  %11622 = vmatprep.mubr.msk.f32.mxu1 %vm12489_vm1, %v12488_v16  ;;  %v5063_v45 = vmul.f32 %v13181_v50, %v4910_v2 }
 0x94d   :  { %v5069_v9 = vadd.f32 %v5061_v21, %v5053_v53  ;;  %v4799_v22 = vadd.f32 %v11574_v29, %v10518_v7  ;;  %v4793_v4 = vpop.f32.mrb[93].mxu0  ;;  %11640 = vmatprep.subr.mxu0 %v12488_v16  ;;  %11625 = vmatprep.subr.mxu1 %v12488_v16 }
 0x94e   :  { %v5068_v44 = vadd.f32 %v5060_v61, %v5052_v1  ;;  %v4794_v30 = vadd.f32 %v10518_v7, %v4793_v4  ;;  %11633 = vmatmul.mubr.msk.f32.vlgmr.msra.gmra.mrb[102].mxu0 %vm1013_vm2, %v13460_v52 }
 0x94f   :  { %v5055_v42 = vmul.f32 %v13528_v26, %v4799_v22  ;;  %11623 = vmatmul.mubr.msk.f32.vlgmr.msra.gmra.mrb[92].mxu1 %vm1013_vm2, %v13448_v11  ;;  %11641 = vmatpush3.xpose.msk.msra.mxu0 %vm1013_vm2, %v5069_v9 }
 0x950   :  { %v5054_v7 = vmul.f32 %v13528_v26, %v4794_v30  ;;  %v11605_v33 = vpop.f32.mrb[94].mxu0  ;;  %11626 = vmatpush3.xpose.msk.msra.mxu1 %vm1013_vm2, %v5066_v62  ;;  %11642 = vmatprep.mubr.msk.f32.mxu0 %vm12489_vm1, %v12488_v16 }
 0x951   :  { %v5071_v50 = vadd.f32 %v5063_v45, %v5055_v42  ;;  %v4985_v52 = vpop.f32.mrb[95].mxu0  ;;  %11627 = vmatprep.mubr.msk.f32.mxu1 %vm12489_vm1, %v12488_v16  ;;  %11650 = vmatprep.subr.mxu0 %v12488_v16  ;;  %v4991_v40 = vadd.f32 %v11605_v33, %v10536_v13 }
 0x952   :  { %v5070_v11 = vadd.f32 %v5062_v18, %v5054_v7  ;;  %11643 = vmatmul.mubr.msk.f32.vlgmr.msra.gmra.mrb[104].mxu0 %vm1013_vm2, %v13472_v32  ;;  %11635 = vmatprep.subr.mxu1 %v12488_v16 }
 0x953   :  { %11628 = vmatmul.mubr.msk.f32.vlgmr.msra.gmra.mrb[94].mxu1 %vm1013_vm2, %v13464_v27  ;;  %11651 = vmatpush3.xpose.msk.msra.mxu0 %vm1013_vm2, %v5071_v50 }
 0x954   :  { %v11608_v37 = vpop.f32.mrb[96].mxu0  ;;  %11636 = vmatpush3.xpose.msk.msra.mxu1 %vm1013_vm2, %v5068_v44  ;;  %11652 = vmatprep.mubr.msk.f32.mxu0 %vm12489_vm1, %v12488_v16 }
 0x955   :  { %v13555_v43 = vadd.f32 %v11608_v37, %v10536_v13  ;;  %v4995_v34 = vpop.f32.mrb[97].mxu0  ;;  %11637 = vmatprep.mubr.msk.f32.mxu1 %vm12489_vm1, %v12488_v16  ;;  %11660 = vmatprep.subr.mxu0 %v12488_v16 }
 0x956   :  { %v13560_v32 = vadd.f32 %v10536_v13, %v4995_v34  ;;  %11653 = vmatmul.mubr.msk.f32.vlgmr.msra.gmra.mrb[106].mxu0 %vm1013_vm2, %v13484_v58  ;;  %11645 = vmatprep.subr.mxu1 %v12488_v16  ;;  %v4986_v58 = vadd.f32 %v10536_v13, %v4985_v52 }
 0x957   :  { %11638 = vmatmul.mubr.msk.f32.vlgmr.msra.gmra.mrb[96].mxu1 %vm1013_vm2, %v13476_v54  ;;  %11661 = vmatpush3.msra.mxu0 %v4991_v40 }
 0x958   :  { %v11611_v27 = vpop.f32.mrb[98].mxu0  ;;  %11646 = vmatpush3.xpose.msk.msra.mxu1 %vm1013_vm2, %v5070_v11  ;;  %11647 = vmatprep.mubr.msk.f32.mxu1 %vm12489_vm1, %v12488_v16 }
 0x959   :  { %v13570_v19 = vadd.f32 %v11611_v27, %v10536_v13  ;;  %v5005_v23 = vpop.f32.mrb[99].mxu0  ;;  %11655 = vmatprep.subr.mxu1 %v12488_v16  ;;  %11662 = vmatprep.mubr.msk.f32.mxu0 %vm12489_vm1, %v12488_v16 }
 0x95a   :  { %v13575_v41 = vadd.f32 %v10536_v13, %v5005_v23  ;;  %11670 = vmatprep.subr.mxu0 %v12488_v16 }
 0x95b   :  { %11648 = vmatmul.mubr.msk.f32.vlgmr.msra.gmra.mrb[98].mxu1 %vm1013_vm2, %v13488_v60 }
 0x95c   :  { %v11614_v54 = vpop.f32.mrb[100].mxu0  ;;  %11656 = vmatpush3.msra.mxu1 %v4986_v58  ;;  %11657 = vmatprep.mubr.msk.f32.mxu1 %vm12489_vm1, %v12488_v16 }
 0x95d   :  { %v13582_v55 = vadd.f32 %v11614_v54, %v10536_v13  ;;  %v5015_v15 = vpop.f32.mrb[101].mxu0  ;;  %11665 = vmatprep.subr.mxu1 %v12488_v16 }
 0x95e   :  { %v13585_v36 = vadd.f32 %v10536_v13, %v5015_v15 }
 0xa1e   :  { %v5144_v14 = vpop.f32.mrb[90].mxu1 }
 0xa1f   :  { %v5680_v20 = vmul.f32 0.35355338, %v5144_v14  ;;  %v11619_v0 = vpop.f32.mrb[91].mxu1 }
 0xa21   :  { %v5372_v12 = vpop.f32.mrb[102].mxu0  ;;  %v5688_v5 = vsel %vm12936_vm3, %v5680_v20, -inf }
 0xa22   :  { %v5220_v60 = vpop.f32.mrb[92].mxu1  ;;  %v11634_v35 = vpop.f32.mrb[103].mxu0  ;;  %v5696_v10 = vsel %vm1013_vm2, %v5688_v5, -inf  ;;  %v5683_v31 = vmul.f32 0.35355338, %v5372_v12 }
 0xa23   :  { %v5681_v46 = vmul.f32 0.35355338, %v5220_v60  ;;  %5697 = vmax.xlane.f32.xlu0 %v5696_v10  ;;  %v11624_v56 = vpop.f32.mrb[93].mxu1 }
 0xa24   :  { %v5691_v61 = vsel %vm12936_vm3, %v5683_v31, -inf }
 0xa25   :  { %v5524_v25 = vpop.f32.mrb[104].mxu0  ;;  %v5689_v51 = vsel %vm12936_vm3, %v5681_v46, -inf  ;;  %v5705_v22 = vsel %vm1013_vm2, %v5691_v61, -inf }
 0xa26   :  { %v5296_v39 = vpop.f32.mrb[94].mxu1  ;;  %v11644_v62 = vpop.f32.mrb[105].mxu0  ;;  %v5699_v57 = vsel %vm1013_vm2, %v5689_v51, -inf  ;;  %v5685_v21 = vmul.f32 0.35355338, %v5524_v25 }
 0xa27   :  { %v5682_v2 = vmul.f32 0.35355338, %v5296_v39  ;;  %5700 = vmax.xlane.f32.xlu1 %v5699_v57  ;;  %v11629_v53 = vpop.f32.mrb[95].mxu1 }
 0xa28   :  { %v5693_v42 = vsel %vm12936_vm3, %v5685_v21, -inf }
 0xa29   :  { %v5676_v24 = vpop.f32.mrb[106].mxu0  ;;  %v5690_v1 = vsel %vm12936_vm3, %v5682_v2, -inf  ;;  %v5711_v33 = vsel %vm1013_vm2, %v5693_v42, -inf }
 0xa2a   :  { %v5448_v29 = vpop.f32.mrb[96].mxu1  ;;  %v11654_v9 = vpop.f32.mrb[107].mxu0  ;;  %v5702_v4 = vsel %vm1013_vm2, %v5690_v1, -inf  ;;  %v5687_v44 = vmul.f32 0.35355338, %v5676_v24 }
 0xa2b   :  { %v5684_v30 = vmul.f32 0.35355338, %v5448_v29  ;;  %5706 = vmax.xlane.f32.xlu1 %v5705_v22  ;;  %5703 = vmax.xlane.f32.xlu0 %v5702_v4  ;;  %v11639_v45 = vpop.f32.mrb[97].mxu1 }
 0xa2c   :  { %v5695_v13 = vsel %vm12936_vm3, %v5687_v44, -inf }
 0xa2d   :  { %v5692_v18 = vsel %vm12936_vm3, %v5684_v30, -inf  ;;  %v5717_v40 = vsel %vm1013_vm2, %v5695_v13, -inf }
 0xa2e   :  { %v5600_v7 = vpop.f32.mrb[98].mxu1  ;;  %v5708_v50 = vsel %vm1013_vm2, %v5692_v18, -inf }
 0xa2f   :  { %v5686_v52 = vmul.f32 0.35355338, %v5600_v7  ;;  %5712 = vmax.xlane.f32.xlu1 %v5711_v33  ;;  %5709 = vmax.xlane.f32.xlu0 %v5708_v50  ;;  %v11649_v11 = vpop.f32.mrb[99].mxu1 }
 0xa31   :  { %v5694_v37 = vsel %vm12936_vm3, %v5686_v52, -inf }
 0xa32   :  { %v5714_v34 = vsel %vm1013_vm2, %v5694_v37, -inf }
 0xa33   :  { %5718 = vmax.xlane.f32.xlu1 %v5717_v40  ;;  %5715 = vmax.xlane.f32.xlu0 %v5714_v34 }
 0xab0   :  { %v5698_v27 = vpop.xlane.xlu0 %5697 }
 0xab1   :  { %v5720_v23 = vsub.f32 %v5688_v5, %v5698_v27 }
 0xab3   :  { %v5728_v58 = vmul.f32 1.442695, %v5720_v23 }
 0xab4   :  { %v5701_v54 = vpop.xlane.xlu1 %5700 }
 0xab5   :  { %12341 = vpow2.f32 %v5728_v58  ;;  %v5721_v15 = vsub.f32 %v5689_v51, %v5701_v54 }
 0xab7   :  { %v5730_v14 = vmul.f32 1.442695, %v5721_v15 }
 0xab8   :  { %v5707_v20 = vpop.xlane.xlu1 %5706  ;;  %v5704_v0 = vpop.xlane.xlu0 %5703 }
 0xab9   :  { %12343 = vpow2.f32 %v5730_v14  ;;  %v5723_v12 = vsub.f32 %v5691_v61, %v5707_v20  ;;  %v5722_v60 = vsub.f32 %v5690_v1, %v5704_v0 }
 0xabb   :  { %v5734_v35 = vmul.f32 1.442695, %v5723_v12  ;;  %v5732_v10 = vmul.f32 1.442695, %v5722_v60 }
 0xabc   :  { %v5713_v31 = vpop.xlane.xlu1 %5712  ;;  %v5710_v46 = vpop.xlane.xlu0 %5709 }
 0xabd   :  { %12345 = vpow2.f32 %v5734_v35  ;;  %v5725_v56 = vsub.f32 %v5693_v42, %v5713_v31  ;;  %v5724_v25 = vsub.f32 %v5692_v18, %v5710_v46  ;;  %v288_v35 = vld [vmem:[%s12586_s9 + $0x60] sm:$0xff] }
 0xabe   :  { %12347 = vpow2.f32 %v5732_v10  ;;  %v289_v10 = vld [vmem:[%s12586_s9 + $0x68] sm:$0xff] }
 0xabf   :  { %v12342_v39 = vpop.eup %12341  ;;  %v5738_v5 = vmul.f32 1.442695, %v5725_v56  ;;  %v5736_v62 = vmul.f32 1.442695, %v5724_v25  ;;  %v12105_v25 = vpack.c.bf16 %v289_v10, %v288_v35  ;;  %v350_v10 = vld [vmem:[%s12609_s21 + $0x70] sm:$0xff] }
 0xac0   :  { %v5719_v57 = vpop.xlane.xlu1 %5718  ;;  %v5716_v21 = vpop.xlane.xlu0 %5715  ;;  %v5744_v51 = vsel %vm1013_vm2, %v12342_v39, 0.0 }
 0xac1   :  { %12349 = vpow2.f32 %v5738_v5  ;;  %v5727_v2 = vsub.f32 %v5695_v13, %v5719_v57  ;;  %v5726_v53 = vsub.f32 %v5694_v37, %v5716_v21  ;;  %5745 = vadd.xlane.f32.xlu0 %v5744_v51  ;;  %v329_v51 = vld [vmem:[%s12604_s17 + $0x68] sm:$0xff] }
 0xac2   :  { %12351 = vpow2.f32 %v5736_v62 }
 0xac3   :  { %v12344_v61 = vpop.eup %12343  ;;  %v5742_v24 = vmul.f32 1.442695, %v5727_v2  ;;  %v5740_v1 = vmul.f32 1.442695, %v5726_v53  ;;  %v330_v2 = vld [vmem:[%s12604_s17 + $0x70] sm:$0xff]  ;;  %v331_v53 = vld [vmem:[%s12604_s17 + $0x78] sm:$0xff] }
 0xac4   :  { %v5747_v29 = vsel %vm1013_vm2, %v12344_v61, 0.0 }
 0xac5   :  { %12353 = vpow2.f32 %v5742_v24  ;;  %5748 = vadd.xlane.f32.xlu1 %v5747_v29  ;;  %v368_v24 = vld [vmem:[%s12697_s3 + $0x60] sm:$0xff] }
 0xac6   :  { %12355 = vpow2.f32 %v5740_v1  ;;  %v369_v1 = vld [vmem:[%s12697_s3 + $0x68] sm:$0xff] }
 0xac7   :  { %v12346_v9 = vpop.eup %12345  ;;  %v12137_v29 = vpack.c.bf16 %v369_v1, %v368_v24 }
 0xac8   :  { %v12348_v22 = vpop.eup %12347  ;;  %v5753_v4 = vsel %vm1013_vm2, %v12346_v9, 0.0 }
 0xac9   :  { %5754 = vadd.xlane.f32.xlu1 %v5753_v4  ;;  %v5750_v44 = vsel %vm1013_vm2, %v12348_v22, 0.0 }
 0xaca   :  { %5751 = vadd.xlane.f32.xlu0 %v5750_v44  ;;  %v378_v44 = vld [vmem:[%s13395_s16 + $0x10] sm:$0xff] }
 0xacb   :  { %v12350_v30 = vpop.eup %12349 }
 0xacc   :  { %v12352_v45 = vpop.eup %12351  ;;  %v5759_v42 = vsel %vm1013_vm2, %v12350_v30, 0.0 }
 0xacd   :  { %5760 = vadd.xlane.f32.xlu1 %v5759_v42  ;;  %v5756_v18 = vsel %vm1013_vm2, %v12352_v45, 0.0 }
 0xace   :  { %5757 = vadd.xlane.f32.xlu0 %v5756_v18 }
 0xacf   :  { %v12354_v7 = vpop.eup %12353 }
 0xad0   :  { %v12356_v33 = vpop.eup %12355  ;;  %v5765_v50 = vsel %vm1013_vm2, %v12354_v7, 0.0 }
 0xad1   :  { %5766 = vadd.xlane.f32.xlu1 %v5765_v50  ;;  %v5762_v52 = vsel %vm1013_vm2, %v12356_v33, 0.0 }
 0xad2   :  { %5763 = vadd.xlane.f32.xlu0 %v5762_v52 }
 0xb4e   :  { %v5746_v11 = vpop.xlane.xlu0 %5745 }
 0xb4f   :  { %12357 = vrcp.f32 %v5746_v11 }
 0xb52   :  { %v5749_v13 = vpop.xlane.xlu1 %5748 }
 0xb53   :  { %12359 = vrcp.f32 %v5749_v13  ;;  %v348_v13 = vld [vmem:[%s12609_s21 + $0x60] sm:$0xff] }
 0xb56   :  { %v5755_v37 = vpop.xlane.xlu1 %5754 }
 0xb57   :  { %12361 = vrcp.f32 %v5755_v37  ;;  %v5752_v40 = vpop.xlane.xlu0 %5751  ;;  %v349_v37 = vld [vmem:[%s12609_s21 + $0x68] sm:$0xff] }
 0xb58   :  { %12363 = vrcp.f32 %v5752_v40 }
 0xb59   :  { %v12358_v34 = vpop.eup %12357 }
 0xb5a   :  { %v5769_v27 = vmul.f32 %v12358_v34, %v12342_v39  ;;  %v5761_v23 = vpop.xlane.xlu1 %5760  ;;  %v291_v39 = vld [vmem:[%s12586_s9 + $0x78] sm:$0xff]  ;;  %v12129_v34 = vpack.c.bf16 %v349_v37, %v348_v13 }
 0xb5b   :  { %12365 = vrcp.f32 %v5761_v23  ;;  %v5758_v58 = vpop.xlane.xlu0 %5757 }
 0xb5c   :  { %12367 = vrcp.f32 %v5758_v58  ;;  %11658 = vmatmul.mubr.msk.f32.vlgmr.msra.gmra.mrb[100].mxu1 %vm1013_vm2, %v5769_v27 }
 0xb5d   :  { %v12360_v54 = vpop.eup %12359  ;;  %11666 = vmatpush3.msra.mxu1 %v13560_v32  ;;  %11667 = vmatprep.mubr.msk.f32.mxu1 %vm12489_vm1, %v12488_v16 }
 0xb5e   :  { %v5771_v15 = vmul.f32 %v12360_v54, %v12344_v61  ;;  %v5767_v14 = vpop.xlane.xlu1 %5766  ;;  %11675 = vmatprep.subr.mxu1 %v12488_v16  ;;  %v12125_v61 = vpack.c.bf16 %v331_v53, %v330_v2 }
 0xb5f   :  { %12369 = vrcp.f32 %v5767_v14  ;;  %v5764_v20 = vpop.xlane.xlu0 %5763 }
 0xb60   :  { %12371 = vrcp.f32 %v5764_v20  ;;  %11663 = vmatmul.mubr.msk.f32.vlgmr.msra.gmra.mrb[108].mxu0 %vm1013_vm2, %v5771_v15 }
 0xb61   :  { %v12362_v0 = vpop.eup %12361  ;;  %11671 = vmatpush3.msra.mxu0 %v13555_v43  ;;  %11672 = vmatprep.mubr.msk.f32.mxu0 %vm12489_vm1, %v12488_v16 }
 0xb62   :  { %v12364_v32 = vpop.eup %12363  ;;  %v5775_v12 = vmul.f32 %v12362_v0, %v12346_v9  ;;  %11680 = vmatprep.subr.mxu0 %v12488_v16  ;;  %v370_v9 = vld [vmem:[%s12697_s3 + $0x70] sm:$0xff] }
 0xb63   :  { %v5773_v60 = vmul.f32 %v12364_v32, %v12348_v22  ;;  %v371_v22 = vld [vmem:[%s12697_s3 + $0x78] sm:$0xff] }
 0xb64   :  { %11673 = vmatmul.mubr.msk.f32.vlgmr.msra.gmra.mrb[110].mxu0 %vm1013_vm2, %v5775_v12  ;;  %v12141_v4 = vpack.c.bf16 %v371_v22, %v370_v9 }
 0xb65   :  { %v12366_v31 = vpop.eup %12365  ;;  %11668 = vmatmul.mubr.msk.f32.vlgmr.msra.gmra.mrb[102].mxu1 %vm1013_vm2, %v5773_v60  ;;  %11681 = vmatpush3.msra.mxu0 %v13570_v19  ;;  %v290_v19 = vld [vmem:[%s12586_s9 + $0x70] sm:$0xff]  ;;  %s12498_s9 = smov 16  }
 0xb66   :  { %v12368_v43 = vpop.eup %12367  ;;  %v5779_v46 = vmul.f32 %v12366_v31, %v12350_v30  ;;  %11676 = vmatpush3.msra.mxu1 %v13575_v41  ;;  %11677 = vmatprep.mubr.msk.f32.mxu1 %vm12489_vm1, %v12488_v16  ;;  %v12109_v21 = vpack.c.bf16 %v291_v39, %v290_v19  ;;  %v308_v30 = vld [vmem:[%s12591_s13 + $0x60] sm:$0xff]  ;;  %v351_v31 = vld [vmem:[%s12609_s21 + $0x78] sm:$0xff]  ;;  %s10328_s21 = sld [smem:[%s14697_s0 + %s12498_s9]]   ;;  %s12516_s9 = smov 31  }
 0xb67   :  { %v5777_v56 = vmul.f32 %v12368_v43, %v12352_v45  ;;  %11682 = vmatprep.mubr.msk.f32.mxu0 %vm12489_vm1, %v12488_v16  ;;  %11685 = vmatprep.subr.mxu1 %v12488_v16  ;;  %v309_v45 = vld [vmem:[%s12591_s13 + $0x68] sm:$0xff]  ;;  %v12133_v43 = vpack.c.bf16 %v351_v31, %v350_v10 }
 0xb68   :  { %11690 = vmatprep.subr.mxu0 %v12488_v16  ;;  %11683 = vmatmul.mubr.msk.f32.vlgmr.msra.gmra.mrb[112].mxu0 %vm1013_vm2, %v5779_v46  ;;  %v12113_v42 = vpack.c.bf16 %v309_v45, %v308_v30  ;;  %v10577_v30 = vld [vmem:[%s12777_s8 + $0x3] ss:$0 sm:$0xff]  ;;  %s12510_s8 = smov 27  }
 0xb69   :  { %v12370_v5 = vpop.eup %12369  ;;  %11678 = vmatmul.mubr.msk.f32.vlgmr.msra.gmra.mrb[104].mxu1 %vm1013_vm2, %v5777_v56  ;;  %11691 = vmatpush3.msra.mxu0 %v13582_v55  ;;  %v328_v55 = vld [vmem:[%s12604_s17 + $0x60] sm:$0xff]  ;;  %s12509_s17 = smov 24   ;;  %s10339_s19 = sld [smem:[%s14697_s0 + %s12510_s8]]  }
 0xb6a   :  { %v12372_v41 = vpop.eup %12371  ;;  %v5783_v62 = vmul.f32 %v12370_v5, %v12354_v7  ;;  %11686 = vmatpush3.msra.mxu1 %v13585_v36  ;;  %11687 = vmatprep.mubr.msk.f32.mxu1 %vm12489_vm1, %v12488_v16  ;;  %v12121_v36 = vpack.c.bf16 %v329_v51, %v328_v55  ;;  %v310_v7 = vld [vmem:[%s12591_s13 + $0x70] sm:$0xff]  ;;  %v10586_v45 = vld [vmem:[%s12782_s14 + $0x3] ss:$0 sm:$0xff]  ;;  %s10336_s3 = sld [smem:[%s14697_s0 + %s12509_s17]]  }
 0xb6b   :  { %v5781_v57 = vmul.f32 %v12372_v41, %v12356_v33  ;;  %11692 = vmatprep.mubr.msk.f32.mxu0 %vm12489_vm1, %v12488_v16  ;;  %12106 = vmatprep.subr.bf16.mxu1 %v12105_v25  ;;  %v311_v33 = vld [vmem:[%s12591_s13 + $0x78] sm:$0xff]  ;;  %s10335_s13 = sld [smem:[%s14697_s0 + %s12508_s15]]  }
 0xb6c   :  { %11693 = vmatmul.mubr.msk.f32.vlgmr.msra.gmra.mrb[114].mxu0 %vm1013_vm2, %v5783_v62  ;;  %11695 = vmatprep.subr.mxu0 %v378_v44  ;;  %v12117_v52 = vpack.c.bf16 %v311_v33, %v310_v7 }
 0xb6d   :  { %11688 = vmatmul.mubr.msk.f32.vlgmr.msra.gmra.mrb[106].mxu1 %vm1013_vm2, %v5781_v57  ;;  %11696 = vmatpush3.msra.mxu0 %v378_v44 }
 0xb6e   :  { %12108 = vmatpush3.bf16.msra.mxu1 %v12105_v25  ;;  %11717 = vmatprep.mubr.msk.f32.mxu1 %vm140_vm0, %v12634_v47 }
 0xb6f   :  { %12110 = vmatprep.subr.bf16.mxu1 %v12109_v21  ;;  %12114 = vmatprep.subr.bf16.mxu0 %v12113_v42 }
 0xb72   :  { %12112 = vmatpush3.bf16.msra.mxu1 %v12109_v21 }
 0xb73   :  { %12122 = vmatprep.subr.bf16.mxu1 %v12121_v36 }
 0xb75   :  { %11718 = vmatmul.mubr.msk.f32.vlgmr.msra.gmra.mrb[108].mxu1 %vm140_vm0, %v12649_v28 }
 0xb76   :  { %11720 = vmatprep.mubr.msk.f32.mxu1 %vm140_vm0, %v12653_v59  ;;  %12124 = vmatpush3.bf16.msra.mxu1 %v12121_v36 }
 0xb77   :  { %12126 = vmatprep.subr.bf16.mxu1 %v12125_v61 }
 0xb79   :  { %11721 = vmatmul.mubr.msk.f32.gmra.mrb[110].mxu1 %vm140_vm0, %v12667_v38 }
 0xb7a   :  { %11723 = vmatprep.mubr.msk.f32.mxu1 %vm140_vm0, %v12673_v3  ;;  %12128 = vmatpush3.bf16.msra.mxu1 %v12125_v61 }
 0xb7b   :  { %12138 = vmatprep.subr.bf16.mxu1 %v12137_v29 }
 0xb7d   :  { %11724 = vmatmul.mubr.msk.f32.gmra.mrb[112].mxu1 %vm140_vm0, %v12687_v48 }
 0xb7e   :  { %11726 = vmatprep.mubr.msk.f32.mxu1 %vm140_vm0, %v12691_v8 }
 0xb81   :  { %11727 = vmatmul.mubr.msk.f32.gmra.mrb[114].mxu1 %vm140_vm0, %v12709_v49 }
 0xb82   :  { %11757 = vmatprep.mubr.msk.f32.mxu1 %vm140_vm0, %v12634_v47 }
 0xb85   :  { %11758 = vmatmul.mubr.msk.f32.vlgmr.msra.gmra.mrb[116].mxu1 %vm140_vm0, %v12649_v28 }
 0xb86   :  { %11760 = vmatprep.mubr.msk.f32.mxu1 %vm140_vm0, %v12653_v59  ;;  %12140 = vmatpush3.bf16.msra.mxu1 %v12137_v29 }
 0xb87   :  { %12142 = vmatprep.subr.bf16.mxu1 %v12141_v4 }
 0xb89   :  { %11761 = vmatmul.mubr.msk.f32.gmra.mrb[118].mxu1 %vm140_vm0, %v12667_v38 }
 0xb8a   :  { %11763 = vmatprep.mubr.msk.f32.mxu1 %vm140_vm0, %v12673_v3  ;;  %12144 = vmatpush3.bf16.msra.mxu1 %v12141_v4 }
 0xb8b   :  { %11814 = vmatprep.subr.mxu1 %v12488_v16 }
 0xb8d   :  { %11764 = vmatmul.mubr.msk.f32.gmra.mrb[120].mxu1 %vm140_vm0, %v12687_v48 }
 0xb8e   :  { %11766 = vmatprep.mubr.msk.f32.mxu1 %vm140_vm0, %v12691_v8 }
 0xb91   :  { %11767 = vmatmul.mubr.msk.f32.gmra.mrb[122].mxu1 %vm140_vm0, %v12709_v49 }
 0xb92   :  { %11797 = vmatprep.mubr.msk.f32.mxu1 %vm140_vm0, %v12634_v47 }
 0xb95   :  { %11798 = vmatmul.mubr.msk.f32.vlgmr.msra.gmra.mrb[124].mxu1 %vm140_vm0, %v12649_v28 }
 0xb96   :  { %11800 = vmatprep.mubr.msk.f32.mxu1 %vm140_vm0, %v12653_v59 }
 0xb99   :  { %11801 = vmatmul.mubr.msk.f32.gmra.mrb[126].mxu1 %vm140_vm0, %v12667_v38 }
 0xb9a   :  { %11803 = vmatprep.mubr.msk.f32.mxu1 %vm140_vm0, %v12673_v3 }
 0xb9d   :  { %11804 = vmatmul.mubr.msk.f32.gmra.mrb[128].mxu1 %vm140_vm0, %v12687_v48 }
 0xb9e   :  { %11806 = vmatprep.mubr.msk.f32.mxu1 %vm140_vm0, %v12691_v8 }
 0xba1   :  { %11807 = vmatmul.mubr.msk.f32.gmra.mrb[130].mxu1 %vm140_vm0, %v12709_v49 }
 0xba2   :  { %11816 = vmatprep.mubr.msk.f32.mxu1 %vm12489_vm1, %v12488_v16 }
 0xc2f   :  { %v5853_v18 = vpop.f32.mrb[100].mxu1 }
 0xc30   :  { %v11659_v50 = vpop.f32.mrb[101].mxu1  ;;  %11697 = vmatprep.mubr.msk.f32.mxu0 %vm1013_vm2, %v5853_v18 }
 0xc33   :  { %v5926_v11 = vpop.f32.mrb[108].mxu0 }
 0xc34   :  { %v11664_v40 = vpop.f32.mrb[109].mxu0  ;;  %11698 = vmatmul.mubr.msk.f32.vlgmr.msra.gmra.mrb[78].mxu0 %vm1013_vm2, %v5926_v11 }
 0xc35   :  { %12116 = vmatpush3.bf16.msra.mxu0 %v12113_v42 }
 0xc36   :  { %12118 = vmatprep.subr.bf16.mxu0 %v12117_v52 }
 0xc37   :  { %v6072_v27 = vpop.f32.mrb[110].mxu0 }
 0xc38   :  { %v5999_v23 = vpop.f32.mrb[102].mxu1  ;;  %v11674_v58 = vpop.f32.mrb[111].mxu0 }
 0xc39   :  { %v11669_v54 = vpop.f32.mrb[103].mxu1  ;;  %11700 = vmatprep.mubr.msk.f32.mxu0 %vm1013_vm2, %v5999_v23  ;;  %12120 = vmatpush3.bf16.msra.mxu0 %v12117_v52 }
 0xc3a   :  { %11701 = vmatmul.mubr.msk.f32.gmra.mrb[80].mxu0 %vm1013_vm2, %v6072_v27  ;;  %12130 = vmatprep.subr.bf16.mxu0 %v12129_v34 }
 0xc3b   :  { %v6218_v15 = vpop.f32.mrb[112].mxu0 }
 0xc3c   :  { %v6145_v14 = vpop.f32.mrb[104].mxu1  ;;  %v11684_v20 = vpop.f32.mrb[113].mxu0 }
 0xc3d   :  { %v11679_v0 = vpop.f32.mrb[105].mxu1  ;;  %11703 = vmatprep.mubr.msk.f32.mxu0 %vm1013_vm2, %v6145_v14 }
 0xc3e   :  { %11704 = vmatmul.mubr.msk.f32.gmra.mrb[82].mxu0 %vm1013_vm2, %v6218_v15 }
 0xc3f   :  { %v6364_v32 = vpop.f32.mrb[114].mxu0 }
 0xc40   :  { %v6291_v12 = vpop.f32.mrb[106].mxu1  ;;  %v11694_v60 = vpop.f32.mrb[115].mxu0 }
 0xc41   :  { %v11689_v35 = vpop.f32.mrb[107].mxu1  ;;  %11706 = vmatprep.mubr.msk.f32.mxu0 %vm1013_vm2, %v6291_v12 }
 0xc42   :  { %11707 = vmatmul.mubr.msk.f32.gmra.mrb[84].mxu0 %vm1013_vm2, %v6364_v32 }
 0xc43   :  { %11737 = vmatprep.mubr.msk.f32.mxu0 %vm140_vm0, %v12634_v47 }
 0xc46   :  { %11738 = vmatmul.mubr.msk.f32.vlgmr.msra.gmra.mrb[116].mxu0 %vm140_vm0, %v12649_v28 }
 0xc47   :  { %11740 = vmatprep.mubr.msk.f32.mxu0 %vm140_vm0, %v12653_v59  ;;  %12132 = vmatpush3.bf16.msra.mxu0 %v12129_v34 }
 0xc48   :  { %v11719_v46 = vpop.f32.mrb[108].mxu1  ;;  %12134 = vmatprep.subr.bf16.mxu0 %v12133_v43 }
 0xc49   :  { %v6577_v56 = vpop.f32.mrb[109].mxu1  ;;  %v6583_v42 = vadd.f32 %v11719_v46, %v10577_v30 }
 0xc4a   :  { %11741 = vmatmul.mubr.msk.f32.gmra.mrb[118].mxu0 %vm140_vm0, %v12667_v38  ;;  %v6578_v18 = vadd.f32 %v10577_v30, %v6577_v56 }
 0xc4b   :  { %11743 = vmatprep.mubr.msk.f32.mxu0 %vm140_vm0, %v12673_v3  ;;  %12136 = vmatpush3.bf16.msra.mxu0 %v12133_v43  ;;  %v7061_v11 = vmul.f32 %v13528_v26, %v6583_v42 }
 0xc4c   :  { %v11722_v25 = vpop.f32.mrb[110].mxu1  ;;  %11809 = vmatprep.subr.mxu0 %v12488_v16  ;;  %v7060_v40 = vmul.f32 %v13528_v26, %v6578_v18 }
 0xc4d   :  { %v6587_v19 = vpop.f32.mrb[111].mxu1  ;;  %v6593_v13 = vadd.f32 %v11722_v25, %v10577_v30 }
 0xc4e   :  { %11744 = vmatmul.mubr.msk.f32.gmra.mrb[120].mxu0 %vm140_vm0, %v12687_v48  ;;  %v6588_v34 = vadd.f32 %v10577_v30, %v6587_v19 }
 0xc4f   :  { %11746 = vmatprep.mubr.msk.f32.mxu0 %vm140_vm0, %v12691_v8  ;;  %v7063_v0 = vmul.f32 %v13528_v26, %v6593_v13 }
 0xc50   :  { %v11725_v39 = vpop.f32.mrb[112].mxu1  ;;  %v7062_v60 = vmul.f32 %v13528_v26, %v6588_v34 }
 0xc51   :  { %v6597_v5 = vpop.f32.mrb[113].mxu1  ;;  %v6603_v32 = vadd.f32 %v11725_v39, %v10577_v30 }
 0xc52   :  { %11747 = vmatmul.mubr.msk.f32.gmra.mrb[122].mxu0 %vm140_vm0, %v12709_v49  ;;  %v6598_v35 = vadd.f32 %v10577_v30, %v6597_v5 }
 0xc53   :  { %11777 = vmatprep.mubr.msk.f32.mxu0 %vm140_vm0, %v12634_v47 }
 0xc54   :  { %v13748_v41 = vpop.f32.mrb[114].mxu1 }
 0xc55   :  { %v13750_v62 = vpop.f32.mrb[115].mxu1  ;;  %v6613_v39 = vadd.f32 %v13748_v41, %v10577_v30 }
 0xc56   :  { %11778 = vmatmul.mubr.msk.f32.vlgmr.msra.gmra.mrb[124].mxu0 %vm140_vm0, %v12649_v28  ;;  %v6608_v5 = vadd.f32 %v10577_v30, %v13750_v62 }
 0xc57   :  { %11780 = vmatprep.mubr.msk.f32.mxu0 %vm140_vm0, %v12653_v59  ;;  %v7067_v41 = vmul.f32 %v13528_v26, %v6613_v39 }
 0xc58   :  { %v13756_v57 = vpop.f32.mrb[116].mxu1  ;;  %v7066_v62 = vmul.f32 %v13528_v26, %v6608_v5 }
 0xc59   :  { %v13758_v21 = vpop.f32.mrb[117].mxu1 }
 0xc5a   :  { %11781 = vmatmul.mubr.msk.f32.gmra.mrb[126].mxu0 %vm140_vm0, %v12667_v38 }
 0xc5b   :  { %11783 = vmatprep.mubr.msk.f32.mxu0 %vm140_vm0, %v12673_v3 }
 0xc5c   :  { %v13764_v47 = vpop.f32.mrb[118].mxu1 }
 0xc5d   :  { %v13766_v55 = vpop.f32.mrb[119].mxu1 }
 0xc5e   :  { %11784 = vmatmul.mubr.msk.f32.gmra.mrb[128].mxu0 %vm140_vm0, %v12687_v48 }
 0xc5f   :  { %11786 = vmatprep.mubr.msk.f32.mxu0 %vm140_vm0, %v12691_v8  ;;  %v13789_v8 = vld [vmem:[%s12864_s10 + $0x3] ss:$0 sm:$0xff]  ;;  %s10340_s10 = sld [smem:[%s14697_s0 + %s12514_s4]]  }
 0xc60   :  { %v13772_v28 = vpop.f32.mrb[120].mxu1 }
 0xc61   :  { %v13774_v59 = vpop.f32.mrb[121].mxu1 }
 0xc62   :  { %11787 = vmatmul.mubr.msk.f32.gmra.mrb[130].mxu0 %vm140_vm0, %v12709_v49 }
 0xc63   :  { %11811 = vmatprep.mubr.msk.f32.mxu0 %vm12489_vm1, %v12488_v16 }
 0xc64   :  { %v13780_v38 = vpop.f32.mrb[122].mxu1 }
 0xc65   :  { %v13782_v3 = vpop.f32.mrb[123].mxu1 }
 0xc68   :  { %v13784_v51 = vpop.f32.mrb[124].mxu1 }
 0xc69   :  { %v13786_v48 = vpop.f32.mrb[125].mxu1 }
 0xc6c   :  { %v11802_v36 = vpop.f32.mrb[126].mxu1 }
 0xc6d   :  { %v13792_v2 = vadd.f32 %v11802_v36, %v13789_v8  ;;  %v7031_v49 = vpop.f32.mrb[127].mxu1  ;;  %v7065_v36 = vmul.f32 %v13528_v26, %v6603_v32 }
 0xc6e   :  { %v13795_v53 = vadd.f32 %v13789_v8, %v7031_v49 }
 0xc70   :  { %v11805_v61 = vpop.f32.mrb[128].mxu1 }
 0xc71   :  { %v13798_v24 = vadd.f32 %v11805_v61, %v13789_v8  ;;  %v7041_v1 = vpop.f32.mrb[129].mxu1  ;;  %v7064_v61 = vmul.f32 %v13528_v26, %v6598_v35 }
 0xc72   :  { %v13801_v29 = vadd.f32 %v13789_v8, %v7041_v1  ;;  %v10595_v1 = vld [vmem:[%s12842_s2 + $0x3] ss:$0 sm:$0xff]  ;;  %s10338_s2 = sld [smem:[%s14697_s0 + %s12513_s29]]  }
 0xc73   :  { %v6800_v30 = vadd.f32 %v10595_v1, %v13758_v21  ;;  %v6810_v21 = vadd.f32 %v10595_v1, %v13766_v55  ;;  %v6820_v55 = vadd.f32 %v10595_v1, %v13774_v59  ;;  %v6835_v59 = vadd.f32 %v13780_v38, %v10595_v1 }
 0xc74   :  { %v11808_v9 = vpop.f32.mrb[130].mxu1 }
 0xc75   :  { %v13804_v22 = vadd.f32 %v11808_v9, %v13789_v8  ;;  %v7051_v4 = vpop.f32.mrb[131].mxu1 }
 0xc76   :  { %v13807_v44 = vadd.f32 %v13789_v8, %v7051_v4 }
 0xd19   :  { %v11739_v7 = vpop.f32.mrb[116].mxu0 }
 0xd1a   :  { %v6694_v33 = vadd.f32 %v11739_v7, %v10586_v45  ;;  %v6688_v50 = vpop.f32.mrb[117].mxu0 }
 0xd1b   :  { %v6689_v52 = vadd.f32 %v10586_v45, %v6688_v50 }
 0xd1c   :  { %v7069_v37 = vmul.f32 %v13535_v17, %v6694_v33 }
 0xd1d   :  { %v7068_v27 = vmul.f32 %v13535_v17, %v6689_v52  ;;  %v11742_v23 = vpop.f32.mrb[118].mxu0  ;;  %v10604_v52 = vld [vmem:[%s12833_s28 + $0x3] ss:$0 sm:$0xff]  ;;  %s10337_s28 = sld [smem:[%s14697_s0 + %s12512_s25]]  }
 0xd1e   :  { %v13815_v58 = vadd.f32 %v7069_v37, %v7061_v11  ;;  %v6704_v54 = vadd.f32 %v11742_v23, %v10586_v45  ;;  %v6698_v15 = vpop.f32.mrb[119].mxu0  ;;  %v6805_v11 = vadd.f32 %v13756_v57, %v10595_v1  ;;  %v6815_v57 = vadd.f32 %v13764_v47, %v10595_v1 }
 0xd1f   :  { %v13817_v14 = vadd.f32 %v7068_v27, %v7060_v40  ;;  %v6699_v20 = vadd.f32 %v10586_v45, %v6698_v15 }
 0xd20   :  { %v7071_v12 = vmul.f32 %v13535_v17, %v6704_v54  ;;  %v7085_v15 = vmul.f32 %v13528_v26, %v6805_v11 }
 0xd21   :  { %v7070_v10 = vmul.f32 %v13535_v17, %v6699_v20  ;;  %v11745_v31 = vpop.f32.mrb[120].mxu0 }
 0xd22   :  { %v13823_v43 = vadd.f32 %v7071_v12, %v7063_v0  ;;  %v6714_v46 = vadd.f32 %v11745_v31, %v10586_v45  ;;  %v6708_v56 = vpop.f32.mrb[121].mxu0  ;;  %v7084_v0 = vmul.f32 %v13528_v26, %v6800_v30 }
 0xd23   :  { %v13825_v25 = vadd.f32 %v7070_v10, %v7062_v60  ;;  %v6709_v19 = vadd.f32 %v10586_v45, %v6708_v56  ;;  %v7087_v56 = vmul.f32 %v13528_v26, %v6815_v57 }
 0xd24   :  { %v7073_v49 = vmul.f32 %v13535_v17, %v6714_v46 }
 0xd25   :  { %v7072_v9 = vmul.f32 %v13535_v17, %v6709_v19  ;;  %v11748_v4 = vpop.f32.mrb[122].mxu0  ;;  %v6825_v19 = vadd.f32 %v13772_v28, %v10595_v1 }
 0xd26   :  { %v13834_v42 = vadd.f32 %v7073_v49, %v7065_v36  ;;  %v6724_v18 = vadd.f32 %v11748_v4, %v10586_v45  ;;  %v6718_v7 = vpop.f32.mrb[123].mxu0  ;;  %v7086_v36 = vmul.f32 %v13528_v26, %v6810_v21 }
 0xd27   :  { %v13836_v33 = vadd.f32 %v7072_v9, %v7064_v61  ;;  %v6719_v50 = vadd.f32 %v10586_v45, %v6718_v7 }
 0xd28   :  { %v7075_v13 = vmul.f32 %v13535_v17, %v6724_v18  ;;  %v7089_v18 = vmul.f32 %v13528_v26, %v6825_v19 }
 0xd29   :  { %v7074_v37 = vmul.f32 %v13535_v17, %v6719_v50  ;;  %v11779_v40 = vpop.f32.mrb[124].mxu0  ;;  %v7088_v50 = vmul.f32 %v13528_v26, %v6820_v55 }
 0xd2a   :  { %v13845_v34 = vadd.f32 %v7075_v13, %v7067_v41  ;;  %v6916_v27 = vadd.f32 %v11779_v40, %v10604_v52  ;;  %v6910_v23 = vpop.f32.mrb[125].mxu0  ;;  %v6830_v41 = vadd.f32 %v10595_v1, %v13782_v3  ;;  %v7091_v3 = vmul.f32 %v13528_v26, %v6835_v59 }
 0xd2b   :  { %v13847_v54 = vadd.f32 %v7074_v37, %v7066_v62  ;;  %v6911_v45 = vadd.f32 %v10604_v52, %v6910_v23 }
 0xd2c   :  { %v7093_v20 = vmul.f32 %v13535_v17, %v6916_v27  ;;  %v7090_v37 = vmul.f32 %v13528_v26, %v6830_v41  ;;  %v7027_v26 = vadd.f32 %v13784_v51, %v13789_v8 }
 0xd2d   :  { %v7092_v32 = vmul.f32 %v13535_v17, %v6911_v45  ;;  %v11782_v12 = vpop.f32.mrb[126].mxu0 }
 0xd2e   :  { %v7101_v60 = vadd.f32 %v7093_v20, %v7085_v15  ;;  %v6926_v35 = vadd.f32 %v11782_v12, %v10604_v52  ;;  %v6920_v10 = vpop.f32.mrb[127].mxu0 }
 0xd2f   :  { %v7100_v31 = vadd.f32 %v7092_v32, %v7084_v0  ;;  %v6921_v46 = vadd.f32 %v10604_v52, %v6920_v10 }
 0xd30   :  { %v7095_v47 = vmul.f32 %v13535_v17, %v6926_v35  ;;  %11815 = vmatpush3.xpose.msk.msra.mxu1 %vm1013_vm2, %v7101_v60 }
 0xd31   :  { %v7094_v39 = vmul.f32 %v13535_v17, %v6921_v46  ;;  %v11785_v49 = vpop.f32.mrb[128].mxu0  ;;  %11810 = vmatpush3.xpose.msk.msra.mxu0 %vm1013_vm2, %v7100_v31  ;;  %11824 = vmatprep.subr.mxu1 %v12488_v16 }
 0xd32   :  { %v7103_v61 = vadd.f32 %v7095_v47, %v7087_v56  ;;  %v6936_v5 = vadd.f32 %v11785_v49, %v10604_v52  ;;  %v6930_v9 = vpop.f32.mrb[129].mxu0  ;;  %11819 = vmatprep.subr.mxu0 %v12488_v16 }
 0xd33   :  { %v7102_v28 = vadd.f32 %v7094_v39, %v7086_v36  ;;  %v6931_v4 = vadd.f32 %v10604_v52, %v6930_v9  ;;  %11817 = vmatmul.mubr.msk.f32.vlgmr.msra.gmra.mrb[132].mxu1 %vm1013_vm2, %v13815_v58 }
 0xd34   :  { %v7097_v7 = vmul.f32 %v13535_v17, %v6936_v5  ;;  %11812 = vmatmul.mubr.msk.f32.vlgmr.msra.gmra.mrb[132].mxu0 %vm1013_vm2, %v13817_v14  ;;  %11825 = vmatpush3.xpose.msk.msra.mxu1 %vm1013_vm2, %v7103_v61 }
 0xd35   :  { %v7096_v11 = vmul.f32 %v13535_v17, %v6931_v4  ;;  %v11788_v13 = vpop.f32.mrb[130].mxu0  ;;  %11820 = vmatpush3.xpose.msk.msra.mxu0 %vm1013_vm2, %v7102_v28  ;;  %11826 = vmatprep.mubr.msk.f32.mxu1 %vm12489_vm1, %v12488_v16 }
 0xd36   :  { %v7105_v38 = vadd.f32 %v7097_v7, %v7089_v18  ;;  %v6946_v58 = vadd.f32 %v11788_v13, %v10604_v52  ;;  %v6940_v62 = vpop.f32.mrb[131].mxu0  ;;  %11821 = vmatprep.mubr.msk.f32.mxu0 %vm12489_vm1, %v12488_v16  ;;  %11834 = vmatprep.subr.mxu1 %v12488_v16 }
 0xd37   :  { %v7104_v14 = vadd.f32 %v7096_v11, %v7088_v50  ;;  %v6941_v30 = vadd.f32 %v10604_v52, %v6940_v62  ;;  %11827 = vmatmul.mubr.msk.f32.vlgmr.msra.gmra.mrb[134].mxu1 %vm1013_vm2, %v13823_v43  ;;  %11829 = vmatprep.subr.mxu0 %v12488_v16 }
 0xd38   :  { %v7099_v1 = vmul.f32 %v13535_v17, %v6946_v58  ;;  %11822 = vmatmul.mubr.msk.f32.vlgmr.msra.gmra.mrb[134].mxu0 %vm1013_vm2, %v13825_v25  ;;  %11835 = vmatpush3.xpose.msk.msra.mxu1 %vm1013_vm2, %v7105_v38 }
 0xd39   :  { %v7098_v40 = vmul.f32 %v13535_v17, %v6941_v30  ;;  %11830 = vmatpush3.xpose.msk.msra.mxu0 %vm1013_vm2, %v7104_v14  ;;  %11836 = vmatprep.mubr.msk.f32.mxu1 %vm12489_vm1, %v12488_v16  ;;  %v7022_v17 = vadd.f32 %v13789_v8, %v13786_v48 }
 0xd3a   :  { %v7107_v43 = vadd.f32 %v7099_v1, %v7091_v3  ;;  %11831 = vmatprep.mubr.msk.f32.mxu0 %vm12489_vm1, %v12488_v16  ;;  %11844 = vmatprep.subr.mxu1 %v12488_v16 }
 0xd3b   :  { %v7106_v52 = vadd.f32 %v7098_v40, %v7090_v37  ;;  %11837 = vmatmul.mubr.msk.f32.vlgmr.msra.gmra.mrb[136].mxu1 %vm1013_vm2, %v13834_v42  ;;  %11839 = vmatprep.subr.mxu0 %v12488_v16 }
 0xd3c   :  { %11832 = vmatmul.mubr.msk.f32.vlgmr.msra.gmra.mrb[136].mxu0 %vm1013_vm2, %v13836_v33  ;;  %11845 = vmatpush3.xpose.msk.msra.mxu1 %vm1013_vm2, %v7107_v43 }
 0xd3d   :  { %11840 = vmatpush3.xpose.msk.msra.mxu0 %vm1013_vm2, %v7106_v52  ;;  %11846 = vmatprep.mubr.msk.f32.mxu1 %vm12489_vm1, %v12488_v16 }
 0xd3e   :  { %11841 = vmatprep.mubr.msk.f32.mxu0 %vm12489_vm1, %v12488_v16  ;;  %11854 = vmatprep.subr.mxu1 %v12488_v16 }
 0xd3f   :  { %11847 = vmatmul.mubr.msk.f32.vlgmr.msra.gmra.mrb[138].mxu1 %vm1013_vm2, %v13845_v34  ;;  %11849 = vmatprep.subr.mxu0 %v12488_v16 }
 0xd40   :  { %11842 = vmatmul.mubr.msk.f32.vlgmr.msra.gmra.mrb[138].mxu0 %vm1013_vm2, %v13847_v54  ;;  %11855 = vmatpush3.msra.mxu1 %v7027_v26 }
 0xd41   :  { %11850 = vmatpush3.msra.mxu0 %v7022_v17  ;;  %11856 = vmatprep.mubr.msk.f32.mxu1 %vm12489_vm1, %v12488_v16 }
 0xd42   :  { %11864 = vmatprep.subr.mxu1 %v12488_v16  ;;  %11851 = vmatprep.mubr.msk.f32.mxu0 %vm12489_vm1, %v12488_v16 }
 0xd43   :  { %11859 = vmatprep.subr.mxu0 %v12488_v16 }
 0xe06   :  { %v7256_v51 = vpop.f32.mrb[132].mxu1 }
 0xe07   :  { %v7717_v48 = vmul.f32 0.35355338, %v7256_v51  ;;  %v7180_v8 = vpop.f32.mrb[132].mxu0  ;;  %v11818_v25 = vpop.f32.mrb[133].mxu1 }
 0xe08   :  { %v7716_v42 = vmul.f32 0.35355338, %v7180_v8  ;;  %v11813_v33 = vpop.f32.mrb[133].mxu0 }
 0xe09   :  { %v7725_v34 = vsel %vm12936_vm3, %v7717_v48, -inf }
 0xe0a   :  { %v7408_v27 = vpop.f32.mrb[134].mxu1  ;;  %v7735_v23 = vsel %vm1013_vm2, %v7725_v34, -inf  ;;  %v7724_v54 = vsel %vm12936_vm3, %v7716_v42, -inf }
 0xe0b   :  { %v7719_v45 = vmul.f32 0.35355338, %v7408_v27  ;;  %7736 = vmax.xlane.f32.xlu1 %v7735_v23  ;;  %v7332_v15 = vpop.f32.mrb[134].mxu0  ;;  %v11828_v57 = vpop.f32.mrb[135].mxu1  ;;  %v7732_v20 = vsel %vm1013_vm2, %v7724_v54, -inf }
 0xe0c   :  { %v7718_v0 = vmul.f32 0.35355338, %v7332_v15  ;;  %7733 = vmax.xlane.f32.xlu0 %v7732_v20  ;;  %v11823_v21 = vpop.f32.mrb[135].mxu0 }
 0xe0d   :  { %v7727_v32 = vsel %vm12936_vm3, %v7719_v45, -inf }
 0xe0e   :  { %v7560_v12 = vpop.f32.mrb[136].mxu1  ;;  %v7741_v60 = vsel %vm1013_vm2, %v7727_v32, -inf  ;;  %v7726_v35 = vsel %vm12936_vm3, %v7718_v0, -inf }
 0xe0f   :  { %v7721_v10 = vmul.f32 0.35355338, %v7560_v12  ;;  %7742 = vmax.xlane.f32.xlu1 %v7741_v60  ;;  %v7484_v31 = vpop.f32.mrb[136].mxu0  ;;  %v11838_v46 = vpop.f32.mrb[137].mxu1  ;;  %v7738_v56 = vsel %vm1013_vm2, %v7726_v35, -inf }
 0xe10   :  { %v7720_v19 = vmul.f32 0.35355338, %v7484_v31  ;;  %7739 = vmax.xlane.f32.xlu0 %v7738_v56  ;;  %v11833_v47 = vpop.f32.mrb[137].mxu0 }
 0xe11   :  { %v7729_v36 = vsel %vm12936_vm3, %v7721_v10, -inf }
 0xe12   :  { %v7712_v55 = vpop.f32.mrb[138].mxu1  ;;  %v7747_v39 = vsel %vm1013_vm2, %v7729_v36, -inf  ;;  %v7728_v49 = vsel %vm12936_vm3, %v7720_v19, -inf }
 0xe13   :  { %v7723_v61 = vmul.f32 0.35355338, %v7712_v55  ;;  %7748 = vmax.xlane.f32.xlu1 %v7747_v39  ;;  %v7636_v5 = vpop.f32.mrb[138].mxu0  ;;  %v11848_v9 = vpop.f32.mrb[139].mxu1  ;;  %v7744_v28 = vsel %vm1013_vm2, %v7728_v49, -inf }
 0xe14   :  { %v7722_v4 = vmul.f32 0.35355338, %v7636_v5  ;;  %7745 = vmax.xlane.f32.xlu0 %v7744_v28  ;;  %v11843_v18 = vpop.f32.mrb[139].mxu0 }
 0xe15   :  { %v7731_v59 = vsel %vm12936_vm3, %v7723_v61, -inf }
 0xe16   :  { %v7753_v7 = vsel %vm1013_vm2, %v7731_v59, -inf  ;;  %v7730_v50 = vsel %vm12936_vm3, %v7722_v4, -inf }
 0xe17   :  { %7754 = vmax.xlane.f32.xlu1 %v7753_v7  ;;  %v7750_v41 = vsel %vm1013_vm2, %v7730_v50, -inf }
 0xe18   :  { %7751 = vmax.xlane.f32.xlu0 %v7750_v41 }
 0xe98   :  { %v7737_v11 = vpop.xlane.xlu1 %7736 }
 0xe99   :  { %v7757_v13 = vsub.f32 %v7725_v34, %v7737_v11  ;;  %v7734_v38 = vpop.xlane.xlu0 %7733 }
 0xe9a   :  { %v7756_v58 = vsub.f32 %v7724_v54, %v7734_v38 }
 0xe9b   :  { %v7766_v62 = vmul.f32 1.442695, %v7757_v13 }
 0xe9c   :  { %v7764_v14 = vmul.f32 1.442695, %v7756_v58  ;;  %v7743_v30 = vpop.xlane.xlu1 %7742 }
 0xe9d   :  { %12373 = vpow2.f32 %v7766_v62  ;;  %v7759_v3 = vsub.f32 %v7727_v32, %v7743_v30  ;;  %v7740_v1 = vpop.xlane.xlu0 %7739  ;;  %v379_v62 = vld [vmem:[%s13395_s16 + $0x18] sm:$0xff]  ;;  %s10342_s16 = sld [smem:[%s14697_s0 + %s12515_s11]]  }
 0xe9e   :  { %12375 = vpow2.f32 %v7764_v14  ;;  %v7758_v37 = vsub.f32 %v7726_v35, %v7740_v1 }
 0xe9f   :  { %v7770_v40 = vmul.f32 1.442695, %v7759_v3 }
 0xea0   :  { %v7768_v43 = vmul.f32 1.442695, %v7758_v37  ;;  %v7749_v63 = vpop.xlane.xlu1 %7748 }
 0xea1   :  { %12377 = vpow2.f32 %v7770_v40  ;;  %v7761_v52 = vsub.f32 %v7729_v36, %v7749_v63  ;;  %v7746_v26 = vpop.xlane.xlu0 %7745 }
 0xea2   :  { %12379 = vpow2.f32 %v7768_v43  ;;  %v7760_v17 = vsub.f32 %v7728_v49, %v7746_v26 }
 0xea3   :  { %v7774_v51 = vmul.f32 1.442695, %v7761_v52 }
 0xea4   :  { %v7772_v48 = vmul.f32 1.442695, %v7760_v17  ;;  %v7755_v8 = vpop.xlane.xlu1 %7754 }
 0xea5   :  { %12381 = vpow2.f32 %v7774_v51  ;;  %v7763_v25 = vsub.f32 %v7731_v59, %v7755_v8  ;;  %v7752_v42 = vpop.xlane.xlu0 %7751  ;;  %v10654_v8 = vld [vmem:[%s10328_s21] ss:$0 sm:$0xff]  ;;  %s14671_s21 = sld [smem:[%s14697_s0 + %s12516_s9]]  }
 0xea6   :  { %12383 = vpow2.f32 %v7772_v48  ;;  %v7762_v33 = vsub.f32 %v7730_v50, %v7752_v42 }
 0xea7   :  { %v12374_v34 = vpop.eup %12373  ;;  %v7778_v27 = vmul.f32 1.442695, %v7763_v25 }
 0xea8   :  { %v12376_v23 = vpop.eup %12375  ;;  %v7776_v54 = vmul.f32 1.442695, %v7762_v33  ;;  %v7783_v45 = vsel %vm1013_vm2, %v12374_v34, 0.0 }
 0xea9   :  { %12385 = vpow2.f32 %v7778_v27  ;;  %7784 = vadd.xlane.f32.xlu1 %v7783_v45  ;;  %v7780_v15 = vsel %vm1013_vm2, %v12376_v23, 0.0  ;;  %v12473_v27 = vld [vmem:[%s12525_s5 + $0x8] sm:$0xff]  ;;  %v12474_v45 = vld [vmem:[%s12525_s5] sm:$0xff] }
 0xeaa   :  { %12387 = vpow2.f32 %v7776_v54  ;;  %7781 = vadd.xlane.f32.xlu0 %v7780_v15 }
 0xeab   :  { %v12378_v57 = vpop.eup %12377 }
 0xeac   :  { %v12380_v20 = vpop.eup %12379  ;;  %v7789_v0 = vsel %vm1013_vm2, %v12378_v57, 0.0 }
 0xead   :  { %7790 = vadd.xlane.f32.xlu1 %v7789_v0  ;;  %v7786_v21 = vsel %vm1013_vm2, %v12380_v20, 0.0 }
 0xeae   :  { %7787 = vadd.xlane.f32.xlu0 %v7786_v21 }
 0xeaf   :  { %v12382_v32 = vpop.eup %12381 }
 0xeb0   :  { %v12384_v12 = vpop.eup %12383  ;;  %v7795_v60 = vsel %vm1013_vm2, %v12382_v32, 0.0 }
 0xeb1   :  { %7796 = vadd.xlane.f32.xlu1 %v7795_v60  ;;  %v7792_v35 = vsel %vm1013_vm2, %v12384_v12, 0.0 }
 0xeb2   :  { %7793 = vadd.xlane.f32.xlu0 %v7792_v35 }
 0xeb3   :  { %v12386_v10 = vpop.eup %12385 }
 0xeb4   :  { %v12388_v31 = vpop.eup %12387  ;;  %v7801_v46 = vsel %vm1013_vm2, %v12386_v10, 0.0 }
 0xeb5   :  { %7802 = vadd.xlane.f32.xlu1 %v7801_v46  ;;  %v7798_v56 = vsel %vm1013_vm2, %v12388_v31, 0.0 }
 0xeb6   :  { %7799 = vadd.xlane.f32.xlu0 %v7798_v56  ;;  %v12476_v56 = vld [vmem:[%s12525_s5 + $0x28] sm:$0xff] }
 0xf36   :  { %v7785_v19 = vpop.xlane.xlu1 %7784 }
 0xf37   :  { %12389 = vrcp.f32 %v7785_v19  ;;  %v7782_v47 = vpop.xlane.xlu0 %7781 }
 0xf38   :  { %12391 = vrcp.f32 %v7782_v47 }
 0xf3a   :  { %v7791_v36 = vpop.xlane.xlu1 %7790 }
 0xf3b   :  { %12393 = vrcp.f32 %v7791_v36  ;;  %v7788_v55 = vpop.xlane.xlu0 %7787  ;;  %v12477_v36 = vld [vmem:[%s12525_s5 + $0x18] sm:$0xff] }
 0xf3c   :  { %12395 = vrcp.f32 %v7788_v55 }
 0xf3e   :  { %v7797_v39 = vpop.xlane.xlu1 %7796 }
 0xf3f   :  { %12397 = vrcp.f32 %v7797_v39  ;;  %v7794_v49 = vpop.xlane.xlu0 %7793  ;;  %v12478_v39 = vld [vmem:[%s12525_s5 + $0x20] sm:$0xff] }
 0xf40   :  { %12399 = vrcp.f32 %v7794_v49 }
 0xf41   :  { %v12390_v61 = vpop.eup %12389 }
 0xf42   :  { %v12392_v5 = vpop.eup %12391  ;;  %v7807_v9 = vmul.f32 %v12390_v61, %v12374_v34  ;;  %v7803_v28 = vpop.xlane.xlu1 %7802 }
 0xf43   :  { %v7805_v4 = vmul.f32 %v12392_v5, %v12376_v23  ;;  %12401 = vrcp.f32 %v7803_v28  ;;  %v7800_v18 = vpop.xlane.xlu0 %7799 }
 0xf44   :  { %12403 = vrcp.f32 %v7800_v18  ;;  %11857 = vmatmul.mubr.msk.f32.vlgmr.msra.gmra.mrb[140].mxu1 %vm1013_vm2, %v7807_v9  ;;  %v12479_v18 = vld [vmem:[%s12525_s5 + $0x30] sm:$0xff] }
 0xf45   :  { %v12394_v59 = vpop.eup %12393  ;;  %11865 = vmatpush3.msra.mxu1 %v13792_v2  ;;  %11852 = vmatmul.mubr.msk.f32.vlgmr.msra.gmra.mrb[140].mxu0 %vm1013_vm2, %v7805_v4 }
 0xf46   :  { %v12396_v7 = vpop.eup %12395  ;;  %v7811_v50 = vmul.f32 %v12394_v59, %v12378_v57  ;;  %11860 = vmatpush3.msra.mxu0 %v13795_v53  ;;  %11866 = vmatprep.mubr.msk.f32.mxu1 %vm12489_vm1, %v12488_v16 }
 0xf47   :  { %v7809_v41 = vmul.f32 %v12396_v7, %v12380_v20  ;;  %11874 = vmatprep.subr.mxu1 %v12488_v16  ;;  %11861 = vmatprep.mubr.msk.f32.mxu0 %vm12489_vm1, %v12488_v16 }
 0xf48   :  { %11867 = vmatmul.mubr.msk.f32.vlgmr.msra.gmra.mrb[142].mxu1 %vm1013_vm2, %v7811_v50  ;;  %11869 = vmatprep.subr.mxu0 %v12488_v16 }
 0xf49   :  { %v12398_v2 = vpop.eup %12397  ;;  %11875 = vmatpush3.msra.mxu1 %v13798_v24  ;;  %11862 = vmatmul.mubr.msk.f32.vlgmr.msra.gmra.mrb[142].mxu0 %vm1013_vm2, %v7809_v41  ;;  %v12480_v41 = vld [vmem:[%s12525_s5 + $0x38] sm:$0xff] }
 0xf4a   :  { %v12400_v11 = vpop.eup %12399  ;;  %v7815_v53 = vmul.f32 %v12398_v2, %v12382_v32  ;;  %11870 = vmatpush3.msra.mxu0 %v13801_v29  ;;  %11876 = vmatprep.mubr.msk.f32.mxu1 %vm12489_vm1, %v12488_v16 }
 0xf4b   :  { %v7813_v13 = vmul.f32 %v12400_v11, %v12384_v12  ;;  %11884 = vmatprep.subr.mxu1 %v12488_v16  ;;  %11871 = vmatprep.mubr.msk.f32.mxu0 %vm12489_vm1, %v12488_v16  ;;  %v12475_v12 = vld [vmem:[%s12525_s5 + $0x10] sm:$0xff]  ;;  %s12499_s5 = smov 19  }
 0xf4c   :  { %11877 = vmatmul.mubr.msk.f32.vlgmr.msra.gmra.mrb[144].mxu1 %vm1013_vm2, %v7815_v53  ;;  %11879 = vmatprep.subr.mxu0 %v12488_v16  ;;  %s10331_s14 = sld [smem:[%s14697_s0 + %s12499_s5]]  }
 0xf4d   :  { %v12402_v24 = vpop.eup %12401  ;;  %11885 = vmatpush3.msra.mxu1 %v13804_v22  ;;  %11872 = vmatmul.mubr.msk.f32.vlgmr.msra.gmra.mrb[144].mxu0 %vm1013_vm2, %v7813_v13 }
 0xf4e   :  { %v12404_v29 = vpop.eup %12403  ;;  %v7819_v38 = vmul.f32 %v12402_v24, %v12386_v10  ;;  %11880 = vmatpush3.msra.mxu0 %v13807_v44  ;;  %11886 = vmatprep.mubr.msk.f32.mxu1 %vm12489_vm1, %v12488_v16 }
 0xf4f   :  { %v7817_v58 = vmul.f32 %v12404_v29, %v12388_v31  ;;  %11881 = vmatprep.mubr.msk.f32.mxu0 %vm12489_vm1, %v12488_v16  ;;  %11889 = vmatprep.subr.mxu0 %v379_v62 }
 0xf50   :  { %11887 = vmatmul.mubr.msk.f32.vlgmr.msra.gmra.mrb[146].mxu1 %vm1013_vm2, %v7819_v38 }
 0xf51   :  { %11882 = vmatmul.mubr.msk.f32.vlgmr.msra.gmra.mrb[146].mxu0 %vm1013_vm2, %v7817_v58 }
 0xf52   :  { %11890 = vmatpush3.msra.mxu0 %v379_v62 }
0x1017   :  { %v7962_v22 = vpop.f32.mrb[140].mxu1 }
0x1018   :  { %v7889_v14 = vpop.f32.mrb[140].mxu0  ;;  %v11858_v30 = vpop.f32.mrb[141].mxu1 }
0x1019   :  { %v11853_v3 = vpop.f32.mrb[141].mxu0  ;;  %11891 = vmatprep.mubr.msk.f32.mxu0 %vm1013_vm2, %v7889_v14 }
0x101a   :  { %11892 = vmatmul.mubr.msk.f32.vlgmr.msra.gmra.mrb[78].mxu0 %vm1013_vm2, %v7962_v22 }
0x101b   :  { %v8108_v44 = vpop.f32.mrb[142].mxu1 }
0x101c   :  { %v8035_v1 = vpop.f32.mrb[142].mxu0  ;;  %v11868_v37 = vpop.f32.mrb[143].mxu1 }
0x101d   :  { %v11863_v40 = vpop.f32.mrb[143].mxu0  ;;  %11894 = vmatprep.mubr.msk.f32.mxu0 %vm1013_vm2, %v8035_v1 }
0x101e   :  { %11895 = vmatmul.mubr.msk.f32.gmra.mrb[80].mxu0 %vm1013_vm2, %v8108_v44 }
0x101f   :  { %v8254_v16 = vpop.f32.mrb[144].mxu1 }
0x1020   :  { %v8181_v43 = vpop.f32.mrb[144].mxu0  ;;  %v11878_v63 = vpop.f32.mrb[145].mxu1 }
0x1021   :  { %v11873_v52 = vpop.f32.mrb[145].mxu0  ;;  %11897 = vmatprep.mubr.msk.f32.mxu0 %vm1013_vm2, %v8181_v43 }
0x1022   :  { %11898 = vmatmul.mubr.msk.f32.gmra.mrb[82].mxu0 %vm1013_vm2, %v8254_v16 }
0x1023   :  { %v8400_v26 = vpop.f32.mrb[146].mxu1 }
0x1024   :  { %v8327_v17 = vpop.f32.mrb[146].mxu0  ;;  %v11888_v51 = vpop.f32.mrb[147].mxu1 }
0x1025   :  { %v11883_v48 = vpop.f32.mrb[147].mxu0  ;;  %11900 = vmatprep.mubr.msk.f32.mxu0 %vm1013_vm2, %v8327_v17 }
0x1026   :  { %11901 = vmatmul.mubr.msk.f32.gmra.mrb[84].mxu0 %vm1013_vm2, %v8400_v26 }
0x10ed   :  { %v11893_v25 = vpop.f32.mrb[78].mxu0 }
0x10ee   :  { %v8548_v42 = vadd.f32 %v11893_v25, %v10654_v8  ;;  %v8494_v33 = vpop.f32.mrb[79].mxu0 }
0x10ef   :  { %v8547_v34 = vadd.f32 %v10654_v8, %v8494_v33 }
0x10f0   :  { %v14000_v23 = vadd.f32 %v12473_v27, %v8548_v42 }
0x10f1   :  { %v11896_v54 = vpop.f32.mrb[80].mxu0  ;;  %v14003_v15 = vadd.f32 %v12474_v45, %v8547_v34 }
0x10f2   :  { %v8504_v57 = vpop.f32.mrb[81].mxu0  ;;  %v8568_v20 = vsel %vm140_vm0, %v14000_v23, 0.0  ;;  %v8550_v32 = vadd.f32 %v11896_v54, %v10654_v8 }
0x10f3   :  { %v8549_v0 = vadd.f32 %v10654_v8, %v8504_v57  ;;  %8569 = vadd.xlane.f32.xlu0 %v8568_v20  ;;  %v8565_v31 = vsel %vm140_vm0, %v14003_v15, 0.0 }
0x10f4   :  { %v14016_v55 = vadd.f32 %v12477_v36, %v8550_v32 }
0x10f5   :  { %v11899_v21 = vpop.f32.mrb[82].mxu0  ;;  %v14008_v60 = vadd.f32 %v12475_v12, %v8549_v0 }
0x10f6   :  { %v8552_v35 = vadd.f32 %v11899_v21, %v10654_v8  ;;  %v8514_v10 = vpop.f32.mrb[83].mxu0  ;;  %v8574_v7 = vsel %vm140_vm0, %v14016_v55, 0.0 }
0x10f7   :  { %v8551_v46 = vadd.f32 %v10654_v8, %v8514_v10  ;;  %8566 = vadd.xlane.f32.xlu0 %v8565_v31  ;;  %v8571_v5 = vsel %vm140_vm0, %v14008_v60, 0.0 }
0x10f8   :  { %v14013_v19 = vadd.f32 %v12476_v56, %v8552_v35  ;;  %v8851_v56 = vld [vmem:[%s10331_s14] sm:$0xff] }
0x10f9   :  { %v11902_v47 = vpop.f32.mrb[84].mxu0  ;;  %v14019_v49 = vadd.f32 %v12478_v39, %v8551_v46  ;;  %v8853_v39 = vld [vmem:[%s10331_s14 + $0x10] sm:$0xff] }
0x10fa   :  { %v8524_v61 = vpop.f32.mrb[85].mxu0  ;;  %v8580_v9 = vsel %vm140_vm0, %v14013_v19, 0.0  ;;  %v8554_v4 = vadd.f32 %v11902_v47, %v10654_v8  ;;  %v8852_v47 = vld [vmem:[%s10331_s14 + $0x8] sm:$0xff] }
0x10fb   :  { %v8553_v28 = vadd.f32 %v10654_v8, %v8524_v61  ;;  %8572 = vadd.xlane.f32.xlu0 %v8571_v5  ;;  %8581 = vadd.xlane.f32.xlu1 %v8580_v9  ;;  %v8577_v50 = vsel %vm140_vm0, %v14019_v49, 0.0  ;;  %v12145_v36 = vpack.c.bf16 %v8852_v47, %v8851_v56  ;;  %v8854_v61 = vld [vmem:[%s10331_s14 + $0x18] sm:$0xff] }
0x10fc   :  { %v14033_v2 = vadd.f32 %v12480_v41, %v8554_v4  ;;  %v12149_v5 = vpack.c.bf16 %v8854_v61, %v8853_v39 }
0x10fd   :  { %v14026_v59 = vadd.f32 %v12479_v18, %v8553_v28  ;;  %12146 = vmatprep.subr.bf16.mxu1 %v12145_v36 }
0x10fe   :  { %v8586_v53 = vsel %vm140_vm0, %v14033_v2, 0.0  ;;  %12148 = vmatpush3.bf16.msra.mxu1 %v12145_v36 }
0x10ff   :  { %8575 = vadd.xlane.f32.xlu0 %v8574_v7  ;;  %8578 = vadd.xlane.f32.xlu1 %v8577_v50  ;;  %v8583_v11 = vsel %vm140_vm0, %v14026_v59, 0.0 }
0x1100   :  { %12150 = vmatprep.subr.bf16.mxu1 %v12149_v5 }
0x1102   :  { %12152 = vmatpush3.bf16.msra.mxu1 %v12149_v5 }
0x1103   :  { %8584 = vadd.xlane.f32.xlu1 %v8583_v11 }
0x1107   :  { %8587 = vadd.xlane.f32.xlu1 %v8586_v53 }
0x1180   :  { %v8570_v13 = vpop.xlane.xlu0 %8569 }
0x1181   :  { %v8590_v24 = vmul.f32 0.03125, %v8570_v13 }
0x1183   :  { %v14040_v29 = vsub.f32 %v14000_v23, %v8590_v24 }
0x1184   :  { %v8567_v38 = vpop.xlane.xlu0 %8566 }
0x1185   :  { %v8589_v58 = vmul.f32 0.03125, %v8567_v38  ;;  %v8606_v62 = vmul.f32 %v14040_v29, %v14040_v29 }
0x1187   :  { %v14045_v22 = vsub.f32 %v14003_v15, %v8589_v58  ;;  %v8616_v14 = vsel %vm140_vm0, %v8606_v62, 0.0 }
0x1188   :  { %8617 = vadd.xlane.f32.xlu0 %v8616_v14  ;;  %v8573_v30 = vpop.xlane.xlu0 %8572  ;;  %v8582_v3 = vpop.xlane.xlu1 %8581 }
0x1189   :  { %v8591_v44 = vmul.f32 0.03125, %v8573_v30  ;;  %v8594_v1 = vmul.f32 0.03125, %v8582_v3  ;;  %v8605_v37 = vmul.f32 %v14045_v22, %v14045_v22 }
0x118b   :  { %v14051_v40 = vsub.f32 %v14008_v60, %v8591_v44  ;;  %v14054_v16 = vsub.f32 %v14013_v19, %v8594_v1  ;;  %v8613_v43 = vsel %vm140_vm0, %v8605_v37, 0.0  ;;  %v14096_v44 = vld [vmem:[%s10329_s22] ss:$0 sm:$0xff] }
0x118c   :  { %8614 = vadd.xlane.f32.xlu0 %v8613_v43  ;;  %v8576_v63 = vpop.xlane.xlu0 %8575  ;;  %v8579_v52 = vpop.xlane.xlu1 %8578 }
0x118d   :  { %v8592_v26 = vmul.f32 0.03125, %v8576_v63  ;;  %v8593_v17 = vmul.f32 0.03125, %v8579_v52  ;;  %v8607_v51 = vmul.f32 %v14051_v40, %v14051_v40  ;;  %v8610_v48 = vmul.f32 %v14054_v16, %v14054_v16  ;;  %v14099_v52 = vld [vmem:[%s10330_s26] ss:$0 sm:$0xff] }
0x118f   :  { %v14062_v8 = vsub.f32 %v14016_v55, %v8592_v26  ;;  %v14065_v25 = vsub.f32 %v14019_v49, %v8593_v17  ;;  %v8619_v42 = vsel %vm140_vm0, %v8607_v51, 0.0  ;;  %v8628_v33 = vsel %vm140_vm0, %v8610_v48, 0.0 }
0x1190   :  { %8620 = vadd.xlane.f32.xlu0 %v8619_v42  ;;  %8629 = vadd.xlane.f32.xlu1 %v8628_v33  ;;  %v8585_v34 = vpop.xlane.xlu1 %8584 }
0x1191   :  { %v8595_v27 = vmul.f32 0.03125, %v8585_v34  ;;  %v8608_v54 = vmul.f32 %v14062_v8, %v14062_v8  ;;  %v8609_v45 = vmul.f32 %v14065_v25, %v14065_v25 }
0x1193   :  { %v14074_v57 = vsub.f32 %v14026_v59, %v8595_v27  ;;  %v8622_v20 = vsel %vm140_vm0, %v8608_v54, 0.0  ;;  %v8625_v0 = vsel %vm140_vm0, %v8609_v45, 0.0 }
0x1194   :  { %8623 = vadd.xlane.f32.xlu0 %v8622_v20  ;;  %8626 = vadd.xlane.f32.xlu1 %v8625_v0  ;;  %v8588_v21 = vpop.xlane.xlu1 %8587 }
0x1195   :  { %v8596_v32 = vmul.f32 0.03125, %v8588_v21  ;;  %v8611_v12 = vmul.f32 %v14074_v57, %v14074_v57 }
0x1197   :  { %v14081_v35 = vsub.f32 %v14033_v2, %v8596_v32  ;;  %v8631_v10 = vsel %vm140_vm0, %v8611_v12, 0.0 }
0x1198   :  { %8632 = vadd.xlane.f32.xlu1 %v8631_v10 }
0x1199   :  { %v8612_v31 = vmul.f32 %v14081_v35, %v14081_v35 }
0x119b   :  { %v8634_v46 = vsel %vm140_vm0, %v8612_v31, 0.0 }
0x119c   :  { %8635 = vadd.xlane.f32.xlu1 %v8634_v46 }
0x1215   :  { %v8618_v9 = vpop.xlane.xlu0 %8617 }
0x1216   :  { %v8638_v28 = vmul.f32 0.03125, %v8618_v9 }
0x1218   :  { %v8646_v4 = vadd.f32 1e-05, %v8638_v28 }
0x1219   :  { %v8615_v18 = vpop.xlane.xlu0 %8614 }
0x121a   :  { %12405 = vrsqrt.f32 %v8646_v4  ;;  %v8637_v7 = vmul.f32 0.03125, %v8615_v18 }
0x121c   :  { %v8645_v50 = vadd.f32 1e-05, %v8637_v7 }
0x121d   :  { %v8621_v41 = vpop.xlane.xlu0 %8620  ;;  %v8630_v11 = vpop.xlane.xlu1 %8629 }
0x121e   :  { %12407 = vrsqrt.f32 %v8645_v50  ;;  %v8639_v53 = vmul.f32 0.03125, %v8621_v41  ;;  %v8642_v13 = vmul.f32 0.03125, %v8630_v11 }
0x1220   :  { %v8647_v24 = vadd.f32 1e-05, %v8639_v53  ;;  %v8650_v38 = vadd.f32 1e-05, %v8642_v13 }
0x1221   :  { %v8624_v58 = vpop.xlane.xlu0 %8623  ;;  %v8627_v62 = vpop.xlane.xlu1 %8626 }
0x1222   :  { %12409 = vrsqrt.f32 %v8647_v24  ;;  %v8640_v14 = vmul.f32 0.03125, %v8624_v58  ;;  %v8641_v30 = vmul.f32 0.03125, %v8627_v62 }
0x1223   :  { %12411 = vrsqrt.f32 %v8650_v38 }
0x1224   :  { %v12406_v3 = vpop.eup %12405  ;;  %v8648_v1 = vadd.f32 1e-05, %v8640_v14  ;;  %v8649_v37 = vadd.f32 1e-05, %v8641_v30 }
0x1225   :  { %v8662_v43 = vmul.f32 %v12406_v3, %v14040_v29  ;;  %v8633_v63 = vpop.xlane.xlu1 %8632 }
0x1226   :  { %12413 = vrsqrt.f32 %v8648_v1  ;;  %v8643_v26 = vmul.f32 0.03125, %v8633_v63 }
0x1227   :  { %v8676_v17 = vmul.f32 %v14096_v44, %v8662_v43  ;;  %12415 = vrsqrt.f32 %v8649_v37 }
0x1228   :  { %v12408_v51 = vpop.eup %12407  ;;  %v8651_v48 = vadd.f32 1e-05, %v8643_v26 }
0x1229   :  { %v14103_v42 = vadd.f32 %v14099_v52, %v8676_v17  ;;  %v8661_v33 = vmul.f32 %v12408_v51, %v14045_v22  ;;  %v8636_v34 = vpop.xlane.xlu1 %8635 }
0x122a   :  { %12417 = vrsqrt.f32 %v8651_v48  ;;  %v8644_v27 = vmul.f32 0.03125, %v8636_v34 }
0x122b   :  { %v14108_v29 = vcombine.high %v14103_v42, %v14103_v42  ;;  %v8736_v54 = vsel %vm8721_vm4, %v14103_v42, 0.0  ;;  %v8675_v45 = vmul.f32 %v14096_v44, %v8661_v33 }
0x122c   :  { %v12410_v20 = vpop.eup %12409  ;;  %v8737_v0 = vrot.slane %v8736_v54, 4  ;;  %v8652_v21 = vadd.f32 1e-05, %v8644_v27 }
0x122d   :  { %v12412_v32 = vpop.eup %12411  ;;  %v14114_v12 = vadd.f32 %v14099_v52, %v8675_v45  ;;  %v8663_v22 = vmul.f32 %v12410_v20, %v14051_v40  ;;  %v8743_v10 = vsel %vm8721_vm4, %v14108_v29, 0.0 }
0x122e   :  { %v8738_v31 = vadd.f32 %v8737_v0, %v8736_v54  ;;  %v8666_v46 = vmul.f32 %v12412_v32, %v14054_v16  ;;  %12419 = vrsqrt.f32 %v8652_v21  ;;  %v8744_v56 = vrot.slane %v8743_v10, 4 }
0x122f   :  { %v14122_v47 = vcombine.high %v14114_v12, %v14114_v12  ;;  %v8722_v36 = vsel %vm8721_vm4, %v14114_v12, 0.0  ;;  %v8677_v39 = vmul.f32 %v14096_v44, %v8663_v22 }
0x1230   :  { %v12414_v61 = vpop.eup %12413  ;;  %v8723_v5 = vrot.slane %v8722_v36, 4  ;;  %v8680_v40 = vmul.f32 %v14096_v44, %v8666_v46  ;;  %v8739_v9 = vrot.slane %v8738_v31, 2  ;;  %v8745_v28 = vadd.f32 %v8744_v56, %v8743_v10 }
0x1231   :  { %v12416_v4 = vpop.eup %12415  ;;  %v8729_v16 = vsel %vm8721_vm4, %v14122_v47, 0.0  ;;  %v14131_v18 = vadd.f32 %v14099_v52, %v8677_v39  ;;  %v8664_v7 = vmul.f32 %v12414_v61, %v14062_v8 }
0x1232   :  { %v8724_v50 = vadd.f32 %v8723_v5, %v8722_v36  ;;  %v8730_v41 = vrot.slane %v8729_v16, 4  ;;  %v14135_v11 = vadd.f32 %v14099_v52, %v8680_v40  ;;  %v8665_v53 = vmul.f32 %v12416_v4, %v14065_v25 }
0x1233   :  { %v8678_v13 = vmul.f32 %v14096_v44, %v8664_v7  ;;  %v14141_v24 = vcombine.high %v14131_v18, %v14131_v18  ;;  %v8740_v38 = vadd.f32 %v8739_v9, %v8738_v31  ;;  %v8746_v58 = vrot.slane %v8745_v28, 2 }
0x1234   :  { %v12418_v62 = vpop.eup %12417  ;;  %v8725_v14 = vrot.slane %v8724_v50, 2  ;;  %v8731_v30 = vadd.f32 %v8730_v41, %v8729_v16  ;;  %v14145_v8 = vcombine.high %v14135_v11, %v14135_v11  ;;  %v8792_v3 = vsel %vm8721_vm4, %v14135_v11, 0.0 }
0x1235   :  { %v8793_v1 = vrot.slane %v8792_v3, 4  ;;  %v14150_v25 = vadd.f32 %v14099_v52, %v8678_v13  ;;  %v8679_v37 = vmul.f32 %v14096_v44, %v8665_v53  ;;  %v8667_v43 = vmul.f32 %v12418_v62, %v14074_v57 }
0x1236   :  { %v14156_v63 = vsel %vm8721_vm4, %v14145_v8, 0.0  ;;  %v8726_v26 = vadd.f32 %v8725_v14, %v8724_v50  ;;  %v8732_v17 = vrot.slane %v8731_v30, 2  ;;  %v8741_v51 = vrot.slane %v8740_v38, 1 }
0x1237   :  { %v14158_v48 = vadd.f32 %v8793_v1, %v8792_v3  ;;  %v8800_v33 = vrot.slane %v14156_v63, 4  ;;  %v14162_v34 = vadd.f32 %v14099_v52, %v8679_v37  ;;  %v8681_v27 = vmul.f32 %v14096_v44, %v8667_v43 }
0x1238   :  { %v12420_v54 = vpop.eup %12419  ;;  %v14167_v57 = vcombine.high %v14150_v25, %v14150_v25  ;;  %v8727_v45 = vrot.slane %v8726_v26, 1  ;;  %v8733_v20 = vadd.f32 %v8732_v17, %v8731_v30  ;;  %v8742_v0 = vadd.f32 %v8741_v51, %v8740_v38 }
0x1239   :  { %v8795_v21 = vrot.slane %v14158_v48, 2  ;;  %v14172_v32 = vcombine.high %v14162_v34, %v14162_v34  ;;  %v8778_v22 = vsel %vm8721_vm4, %v14162_v34, 0.0  ;;  %v14177_v10 = vadd.f32 %v14099_v52, %v8681_v27 }
0x123a   :  { %v8779_v31 = vrot.slane %v8778_v22, 4  ;;  %v8668_v46 = vmul.f32 %v12420_v54, %v14081_v35  ;;  %v8728_v56 = vadd.f32 %v8727_v45, %v8726_v26  ;;  %v8734_v36 = vrot.slane %v8733_v20, 1 }
0x123b   :  { %v8785_v39 = vsel %vm8721_vm4, %v14172_v32, 0.0  ;;  %v14184_v61 = vcombine.high %v14177_v10, %v14177_v10  ;;  %v8806_v5 = vsel %vm8721_vm4, %v14177_v10, 0.0  ;;  %v8747_v40 = vadd.f32 %v8746_v58, %v8745_v28 }
0x123c   :  { %v8780_v9 = vadd.f32 %v8779_v31, %v8778_v22  ;;  %v8786_v4 = vrot.slane %v8785_v39, 4  ;;  %v8807_v16 = vrot.slane %v8806_v5, 4  ;;  %v8682_v35 = vmul.f32 %v14096_v44, %v8668_v46 }
0x123d   :  { %v8735_v7 = vadd.f32 %v8734_v36, %v8733_v20  ;;  %v8748_v50 = vrot.slane %v8747_v40, 1  ;;  %v8750_v41 = vsel %vm8721_vm4, %v14131_v18, 0.0  ;;  %v8757_v53 = vsel %vm8721_vm4, %v14141_v24, 0.0 }
0x123e   :  { %v8781_v13 = vrot.slane %v8780_v9, 2  ;;  %v8787_v38 = vadd.f32 %v8786_v4, %v8785_v39  ;;  %v14194_v62 = vadd.f32 %v14099_v52, %v8682_v35  ;;  %v8751_v28 = vrot.slane %v8750_v41, 4 }
0x123f   :  { %v8749_v58 = vadd.f32 %v8748_v50, %v8747_v40  ;;  %v8758_v14 = vrot.slane %v8757_v53, 4  ;;  %v8764_v30 = vsel %vm8721_vm4, %v14150_v25, 0.0  ;;  %v8771_v44 = vsel %vm8721_vm4, %v14167_v57, 0.0 }
0x1240   :  { %v8782_v3 = vadd.f32 %v8781_v13, %v8780_v9  ;;  %v8788_v1 = vrot.slane %v8787_v38, 2  ;;  %v8752_v37 = vadd.f32 %v8751_v28, %v8750_v41  ;;  %v8765_v43 = vrot.slane %v8764_v30, 4 }
0x1241   :  { %v8759_v26 = vadd.f32 %v8758_v14, %v8757_v53  ;;  %v8772_v17 = vrot.slane %v8771_v44, 4  ;;  %v8835_v51 = vmul.f32 0.25, %v8728_v56  ;;  %v8836_v27 = vmul.f32 0.25, %v8735_v7 }
0x1242   :  { %v8783_v52 = vrot.slane %v8782_v3, 1  ;;  %v8789_v54 = vadd.f32 %v8788_v1, %v8787_v38  ;;  %v8753_v45 = vrot.slane %v8752_v37, 2  ;;  %v8766_v20 = vadd.f32 %v8765_v43, %v8764_v30 }
0x1243   :  { %v8760_v22 = vrot.slane %v8759_v26, 2  ;;  %v8773_v31 = vadd.f32 %v8772_v17, %v8771_v44  ;;  %v8837_v46 = vmul.f32 0.25, %v8742_v0  ;;  %v8838_v36 = vmul.f32 0.25, %v8749_v58 }
0x1244   :  { %v8754_v39 = vadd.f32 %v8753_v45, %v8752_v37  ;;  %v8767_v40 = vrot.slane %v8766_v20, 2  ;;  %v8879_v9 = vsel %vm8878_vm5, %v8836_v27, %v8835_v51  ;;  %v14203_v56 = vcombine.high %v14194_v62, %v14194_v62 }
0x1245   :  { %v8761_v4 = vadd.f32 %v8760_v22, %v8759_v26  ;;  %v8774_v35 = vrot.slane %v8773_v31, 2  ;;  %v8881_v7 = vsel %vm8880_vm6, %v8837_v46, %v8879_v9  ;;  %v8784_v50 = vadd.f32 %v8783_v52, %v8782_v3 }
0x1246   :  { %v8755_v41 = vrot.slane %v8754_v39, 1  ;;  %v8768_v53 = vadd.f32 %v8767_v40, %v8766_v20  ;;  %v8883_v0 = vsel %vm8882_vm7, %v8838_v36, %v8881_v7  ;;  %v8790_v13 = vrot.slane %v8789_v54, 1 }
0x1247   :  { %v8762_v38 = vrot.slane %v8761_v4, 1  ;;  %v8775_v28 = vadd.f32 %v8774_v35, %v8773_v31  ;;  %v8796_v58 = vadd.f32 %v8795_v21, %v14158_v48  ;;  %v8801_v14 = vadd.f32 %v8800_v33, %v14156_v63 }
0x1248   :  { %v8756_v30 = vadd.f32 %v8755_v41, %v8754_v39  ;;  %v8769_v44 = vrot.slane %v8768_v53, 1  ;;  %v8791_v1 = vadd.f32 %v8790_v13, %v8789_v54  ;;  %v8808_v37 = vadd.f32 %v8807_v16, %v8806_v5 }
0x1249   :  { %v8763_v3 = vadd.f32 %v8762_v38, %v8761_v4  ;;  %v8776_v43 = vrot.slane %v8775_v28, 1  ;;  %v8797_v26 = vrot.slane %v8796_v58, 1  ;;  %v8802_v17 = vrot.slane %v8801_v14, 2 }
0x124a   :  { %v8770_v51 = vadd.f32 %v8769_v44, %v8768_v53  ;;  %v8839_v27 = vmul.f32 0.25, %v8756_v30  ;;  %v8809_v52 = vrot.slane %v8808_v37, 2  ;;  %v8813_v45 = vsel %vm8721_vm4, %v14184_v61, 0.0 }
0x124b   :  { %v8777_v20 = vadd.f32 %v8776_v43, %v8775_v28  ;;  %v8840_v48 = vmul.f32 0.25, %v8763_v3  ;;  %v8798_v21 = vadd.f32 %v8797_v26, %v8796_v58  ;;  %v8803_v22 = vadd.f32 %v8802_v17, %v8801_v14 }
0x124c   :  { %v8841_v31 = vmul.f32 0.25, %v8770_v51  ;;  %v8885_v63 = vsel %vm8884_vm8, %v8839_v27, %v8883_v0  ;;  %v8810_v33 = vadd.f32 %v8809_v52, %v8808_v37  ;;  %v8814_v54 = vrot.slane %v8813_v45, 4 }
0x124d   :  { %v8842_v5 = vmul.f32 0.25, %v8777_v20  ;;  %v8887_v16 = vsel %vm8886_vm9, %v8840_v48, %v8885_v63  ;;  %v8804_v46 = vrot.slane %v8803_v22, 1  ;;  %v8820_v36 = vsel %vm8721_vm4, %v14194_v62, 0.0 }
0x124e   :  { %v8889_v39 = vsel %vm8888_vm10, %v8841_v31, %v8887_v16  ;;  %v8811_v40 = vrot.slane %v8810_v33, 1  ;;  %v8815_v9 = vadd.f32 %v8814_v54, %v8813_v45  ;;  %v8821_v4 = vrot.slane %v8820_v36, 4 }
0x124f   :  { %v8891_v35 = vsel %vm8890_vm11, %v8842_v5, %v8889_v39  ;;  %v8805_v7 = vadd.f32 %v8804_v46, %v8803_v22  ;;  %v8827_v41 = vsel %vm8721_vm4, %v14203_v56, 0.0  ;;  %v8843_v28 = vmul.f32 0.25, %v8784_v50  ;;  %v8979_v39 = vld [vmem:[%s10333_s30 + $0x8] sm:$0xff] }
0x1250   :  { %11911 = vmatprep.mubr.msk.f32.mxu1 %vm140_vm0, %v8891_v35  ;;  %v8812_v53 = vadd.f32 %v8811_v40, %v8810_v33  ;;  %v8816_v0 = vrot.slane %v8815_v9, 2  ;;  %v8822_v13 = vadd.f32 %v8821_v4, %v8820_v36  ;;  %v8828_v38 = vrot.slane %v8827_v41, 4  ;;  %v8978_v36 = vld [vmem:[%s10333_s30] sm:$0xff] }
0x1251   :  { %v8844_v58 = vmul.f32 0.25, %v8791_v1  ;;  %v8845_v37 = vmul.f32 0.25, %v8798_v21  ;;  %v8846_v3 = vmul.f32 0.25, %v8805_v7  ;;  %v12153_v40 = vpack.c.bf16 %v8979_v39, %v8978_v36 }
0x1252   :  { %v8817_v14 = vadd.f32 %v8816_v0, %v8815_v9  ;;  %v8823_v30 = vrot.slane %v8822_v13, 2  ;;  %v8829_v44 = vadd.f32 %v8828_v38, %v8827_v41  ;;  %v8847_v43 = vmul.f32 0.25, %v8812_v53  ;;  %v10657_v9 = vld [vmem:[%s10332_s6] ss:$0 sm:$0xff] }
0x1253   :  { %v8892_v26 = vsel %vm8878_vm5, %v8844_v58, %v8843_v28  ;;  %12154 = vmatprep.subr.bf16.mxu1 %v12153_v40  ;;  %v12505_v53 = vmov 1966171168   ;;  %v10660_v38 = vld [vmem:[%s10334_s12] ss:$0 sm:$0xff] }
0x1254   :  { %v8818_v17 = vrot.slane %v8817_v14, 1  ;;  %v8824_v51 = vadd.f32 %v8823_v30, %v8822_v13  ;;  %v8830_v27 = vrot.slane %v8829_v44, 2  ;;  %v8893_v52 = vsel %vm8880_vm6, %v8845_v37, %v8892_v26 }
0x1255   :  { %v8894_v45 = vsel %vm8882_vm7, %v8846_v3, %v8893_v52  ;;  %v9073_v0 = vunpack.c.l.s4 %v12505_v53  ;;  %v9171_v52 = vsub.s32 0, %v12933_v6 }
0x1256   :  { %v8819_v20 = vadd.f32 %v8818_v17, %v8817_v14  ;;  %v8825_v48 = vrot.slane %v8824_v51, 1  ;;  %v8831_v22 = vadd.f32 %v8830_v27, %v8829_v44  ;;  %v8895_v50 = vsel %vm8884_vm8, %v8847_v43, %v8894_v45 }
0x1257   :  { %v9074_v13 = vunpack.c.0.s8 %v9073_v0 }
0x1258   :  { %v8826_v1 = vadd.f32 %v8825_v48, %v8824_v51  ;;  %v8832_v31 = vrot.slane %v8831_v22, 1  ;;  %v8848_v63 = vmul.f32 0.25, %v8819_v20 }
0x1259   :  { %v9077_v28 = vsub.s32 %v9074_v13, %v12933_v6 }
0x125a   :  { %v8833_v21 = vadd.f32 %v8832_v31, %v8831_v22  ;;  %v8849_v33 = vmul.f32 0.25, %v8826_v1  ;;  %v8896_v54 = vsel %vm8886_vm9, %v8848_v63, %v8895_v50 }
0x125c   :  { %v8850_v5 = vmul.f32 0.25, %v8833_v21  ;;  %v8897_v16 = vsel %vm8888_vm10, %v8849_v33, %v8896_v54 }
0x125e   :  { %v8898_v46 = vsel %vm8890_vm11, %v8850_v5, %v8897_v16 }
0x125f   :  { %11912 = vmatmul.mubr.msk.f32.vlgmr.msra.gmra.mrb[148].mxu1 %vm140_vm0, %v8898_v46 }
0x1260   :  { %12156 = vmatpush3.bf16.msra.mxu1 %v12153_v40 }
0x1332   :  { %v11913_v4 = vpop.f32.mrb[148].mxu1 }
0x1333   :  { %v8969_v35 = vpop.f32.mrb[149].mxu1  ;;  %v8975_v41 = vadd.f32 %v11913_v4, %v10657_v9 }
0x1334   :  { %v8970_v7 = vadd.f32 %v10657_v9, %v8969_v35 }
0x1336   :  { %11918 = vmatprep.mubr.msk.f32.mxu1 %vm8987_vm12, %v8970_v7 }
0x1337   :  { %11919 = vmatmul.mubr.msk.f32.vlgmr.msra.gmra.mrb[150].mxu1 %vm8987_vm12, %v8975_v41 }
0x140a   :  { %v11920_v58 = vpop.f32.mrb[150].mxu1 }
0x140b   :  { %v9066_v14 = vadd.f32 %v11920_v58, %v10660_v38  ;;  %v9060_v30 = vpop.f32.mrb[151].mxu1 }
0x140c   :  { %v9061_v44 = vadd.f32 %v10660_v38, %v9060_v30 }
0x140d   :  { %v9120_v37 = vcombine.high %v9066_v14, %v9066_v14  ;;  %v9127_v3 = vrot.slane %v9066_v14, %v9077_v28 }
0x140e   :  { %v9071_v43 = vcombine.high %v9061_v44, %v9061_v44  ;;  %v9078_v26 = vrot.slane %v9061_v44, %v9077_v28 }
0x140f   :  { %v9134_v17 = vrot.slane %v9120_v37, %v9077_v28  ;;  %v9135_v51 = vcombine.high %v9127_v3, %v9127_v3  ;;  %v9143_v27 = vrot.slane %v9127_v3, %v9077_v28 }
0x1410   :  { %v9085_v45 = vrot.slane %v9071_v43, %v9077_v28  ;;  %v9086_v20 = vcombine.high %v9078_v26, %v9078_v26  ;;  %v9094_v48 = vrot.slane %v9078_v26, %v9077_v28 }
0x1411   :  { %v9157_v22 = vrot.slane %v9135_v51, %v9077_v28  ;;  %v9136_v50 = vcombine.high %v9134_v17, %v9134_v17  ;;  %v9150_v21 = vrot.slane %v9134_v17, %v9077_v28  ;;  %v9165_v33 = vcombine.high %v9143_v27, %v9143_v27 }
0x1412   :  { %v9087_v1 = vcombine.high %v9085_v45, %v9085_v45  ;;  %v9101_v31 = vrot.slane %v9085_v45, %v9077_v28  ;;  %v9108_v63 = vrot.slane %v9086_v20, %v9077_v28  ;;  %v9116_v5 = vcombine.high %v9094_v48, %v9094_v48 }
0x1413   :  { %v9167_v54 = vcombine.high %v9157_v22, %v9157_v22  ;;  %v9172_v36 = vrot.slane %v9094_v48, %v9171_v52  ;;  %v9208_v35 = vrot.slane %v9157_v22, %v9171_v52  ;;  %v9164_v13 = vrot.slane %v9136_v50, %v9077_v28 }
0x1414   :  { %v9115_v16 = vrot.slane %v9087_v1, %v9077_v28  ;;  %v9117_v46 = vcombine.high %v9101_v31, %v9101_v31  ;;  %v9176_v39 = vrot.slane %v9108_v63, %v9171_v52  ;;  %v9118_v40 = vcombine.high %v9108_v63, %v9108_v63 }
0x1415   :  { %v9180_v9 = vrot.slane %v9116_v5, %v9171_v52  ;;  %v9188_v4 = vrot.slane %v9101_v31, %v9171_v52  ;;  %v14244_v7 = vadd.f32 %v9172_v36, %v14114_v12  ;;  %v9204_v38 = vrot.slane %v9143_v27, %v9171_v52 }
0x1416   :  { %v14247_v41 = vadd.f32 %v9176_v39, %v14122_v47  ;;  %v9192_v53 = vrot.slane %v9115_v16, %v9171_v52  ;;  %v9119_v0 = vcombine.high %v9115_v16, %v9115_v16  ;;  %v9184_v58 = vrot.slane %v9118_v40, %v9171_v52 }
0x1417   :  { %v9196_v14 = vrot.slane %v9117_v46, %v9171_v52  ;;  %v14252_v44 = vadd.f32 %v9188_v4, %v14131_v18  ;;  %v14258_v3 = vadd.f32 %v9180_v9, %v14103_v42  ;;  %v14264_v28 = vadd.f32 %v9208_v35, %v14172_v32 }
0x1418   :  { %v9283_v30 = vcombine.low %v14244_v7, %v14247_v41  ;;  %v14255_v37 = vadd.f32 %v9192_v53, %v14141_v24  ;;  %v9200_v12 = vrot.slane %v9119_v0, %v9171_v52  ;;  %v14261_v47 = vadd.f32 %v9184_v58, %v14108_v29 }
0x1419   :  { %v9216_v24 = vrot.slane %v9167_v54, %v9171_v52  ;;  %v9166_v17 = vcombine.high %v9150_v21, %v9150_v21  ;;  %v14275_v29 = vadd.f32 %v9196_v14, %v14150_v25  ;;  %v9212_v51 = vrot.slane %v9165_v33, %v9171_v52 }
0x141a   :  { %v9299_v43 = vsel %vm140_vm0, %v9283_v30, 0.0  ;;  %v9285_v26 = vcombine.low %v14252_v44, %v14255_v37  ;;  %v14270_v18 = vadd.f32 %v9200_v12, %v14167_v57  ;;  %v9284_v42 = vcombine.low %v14258_v3, %v14261_v47 }
0x141b   :  { %9300 = vadd.xlane.f32.xlu0 %v9299_v43  ;;  %v14278_v32 = vadd.f32 %v9204_v38, %v14162_v34  ;;  %v9220_v27 = vrot.slane %v9150_v21, %v9171_v52  ;;  %v9224_v45 = vrot.slane %v9164_v13, %v9171_v52  ;;  %v14284_v48 = vadd.f32 %v9216_v24, %v14145_v8 }
0x141c   :  { %v9302_v20 = vsel %vm140_vm0, %v9284_v42, 0.0  ;;  %v9286_v57 = vcombine.low %v14275_v29, %v14270_v18  ;;  %v9168_v22 = vcombine.high %v9164_v13, %v9164_v13  ;;  %v9305_v50 = vsel %vm140_vm0, %v9285_v26, 0.0 }
0x141d   :  { %9303 = vadd.xlane.f32.xlu1 %v9302_v20  ;;  %v9287_v25 = vcombine.low %v14278_v32, %v14264_v28  ;;  %v14290_v34 = vadd.f32 %v9224_v45, %v14184_v61  ;;  %v14293_v1 = vadd.f32 %v9212_v51, %v14135_v11  ;;  %v9228_v31 = vrot.slane %v9166_v17, %v9171_v52 }
0x141e   :  { %v9232_v63 = vrot.slane %v9168_v22, %v9171_v52  ;;  %v14296_v21 = vadd.f32 %v9220_v27, %v14177_v10  ;;  %v9308_v8 = vsel %vm140_vm0, %v9286_v57, 0.0  ;;  %v12506_v46 = vmov 839922192  }
0x141f   :  { %9306 = vadd.xlane.f32.xlu0 %v9305_v50  ;;  %v9288_v33 = vcombine.low %v14293_v1, %v14284_v48  ;;  %v9311_v61 = vsel %vm140_vm0, %v9287_v25, 0.0  ;;  %v14308_v52 = vadd.f32 %v9228_v31, %v14194_v62  ;;  %v9340_v36 = vunpack.c.l.s4 %v12506_v46 }
0x1420   :  { %v14302_v54 = vadd.f32 %v9232_v63, %v14203_v56  ;;  %v9289_v11 = vcombine.low %v14296_v21, %v14290_v34  ;;  %v12507_v39 = vmov 1985246804  }
0x1421   :  { %9309 = vadd.xlane.f32.xlu1 %v9308_v8  ;;  %v9314_v10 = vsel %vm140_vm0, %v9288_v33, 0.0  ;;  %v9347_v40 = vunpack.c.l.s4 %v12507_v39  ;;  %v9341_v9 = vunpack.c.0.s8 %v9340_v36 }
0x1422   :  { %v9290_v5 = vcombine.low %v14308_v52, %v14302_v54  ;;  %v9317_v16 = vsel %vm140_vm0, %v9289_v11, 0.0 }
0x1423   :  { %9312 = vadd.xlane.f32.xlu0 %v9311_v61  ;;  %v9348_v4 = vunpack.c.0.s8 %v9347_v40  ;;  %v14316_v62 = vsub.s32 %v9341_v9, %v12933_v6 }
0x1424   :  { %v9320_v56 = vsel %vm140_vm0, %v9290_v5, 0.0 }
0x1425   :  { %9315 = vadd.xlane.f32.xlu1 %v9314_v10  ;;  %v14319_v35 = vsub.s32 %v9348_v4, %v12933_v6 }
0x1427   :  { %9318 = vadd.xlane.f32.xlu0 %v9317_v16 }
0x1429   :  { %9321 = vadd.xlane.f32.xlu1 %v9320_v56 }
0x14a8   :  { %v9301_v53 = vpop.xlane.xlu0 %9300 }
0x14a9   :  { %v9323_v0 = vmul.f32 0.03125, %v9301_v53 }
0x14aa   :  { %v9304_v58 = vpop.xlane.xlu1 %9303 }
0x14ab   :  { %v9345_v13 = vrot.slane %v9323_v0, %v14316_v62  ;;  %v9352_v38 = vrot.slane %v9323_v0, %v14319_v35  ;;  %v9324_v14 = vmul.f32 0.03125, %v9304_v58 }
0x14ac   :  { %v9307_v30 = vpop.xlane.xlu0 %9306 }
0x14ad   :  { %v14324_v12 = vsub.f32 %v14244_v7, %v9345_v13  ;;  %v14327_v43 = vsub.f32 %v14247_v41, %v9352_v38  ;;  %v9325_v26 = vmul.f32 0.03125, %v9307_v30  ;;  %v9359_v24 = vrot.slane %v9324_v14, %v14316_v62 }
0x14ae   :  { %v9366_v6 = vrot.slane %v9324_v14, %v14319_v35  ;;  %v9310_v51 = vpop.xlane.xlu1 %9309 }
0x14af   :  { %v9373_v17 = vrot.slane %v9325_v26, %v14316_v62  ;;  %v9380_v42 = vrot.slane %v9325_v26, %v14319_v35  ;;  %v9483_v27 = vmul.f32 %v14324_v12, %v14324_v12  ;;  %v9484_v7 = vmul.f32 %v14327_v43, %v14327_v43 }
0x14b0   :  { %v14338_v45 = vsub.f32 %v14258_v3, %v9359_v24  ;;  %v14341_v41 = vsub.f32 %v14261_v47, %v9366_v6  ;;  %v9326_v20 = vmul.f32 0.03125, %v9310_v51  ;;  %v9313_v57 = vpop.xlane.xlu0 %9312 }
0x14b1   :  { %v14344_v22 = vsub.f32 %v14252_v44, %v9373_v17  ;;  %v14347_v50 = vsub.f32 %v14255_v37, %v9380_v42  ;;  %v9327_v25 = vmul.f32 0.03125, %v9313_v57  ;;  %v9515_v31 = vcombine.low %v9483_v27, %v9484_v7 }
0x14b2   :  { %v9387_v63 = vrot.slane %v9326_v20, %v14316_v62  ;;  %v9394_v8 = vrot.slane %v9326_v20, %v14319_v35  ;;  %v9485_v3 = vmul.f32 %v14338_v45, %v14338_v45  ;;  %v9486_v47 = vmul.f32 %v14341_v41, %v14341_v41  ;;  %v9316_v61 = vpop.xlane.xlu1 %9315 }
0x14b3   :  { %v9401_v33 = vrot.slane %v9327_v25, %v14316_v62  ;;  %v9408_v44 = vrot.slane %v9327_v25, %v14319_v35  ;;  %v9531_v37 = vsel %vm140_vm0, %v9515_v31, 0.0  ;;  %v9487_v11 = vmul.f32 %v14344_v22, %v14344_v22 }
0x14b4   :  { %v14361_v10 = vsub.f32 %v14275_v29, %v9387_v63  ;;  %v14364_v5 = vsub.f32 %v14270_v18, %v9394_v8  ;;  %v9328_v16 = vmul.f32 0.03125, %v9316_v61  ;;  %9532 = vadd.xlane.f32.xlu0 %v9531_v37  ;;  %v9319_v56 = vpop.xlane.xlu0 %9318  ;;  %v9516_v46 = vcombine.low %v9485_v3, %v9486_v47 }
0x14b5   :  { %v14367_v36 = vsub.f32 %v14278_v32, %v9401_v33  ;;  %v14370_v39 = vsub.f32 %v14264_v28, %v9408_v44  ;;  %v9329_v40 = vmul.f32 0.03125, %v9319_v56  ;;  %v9488_v9 = vmul.f32 %v14347_v50, %v14347_v50 }
0x14b6   :  { %v9415_v29 = vrot.slane %v9328_v16, %v14316_v62  ;;  %v9422_v4 = vrot.slane %v9328_v16, %v14319_v35  ;;  %v9534_v18 = vsel %vm140_vm0, %v9516_v46, 0.0  ;;  %v9489_v53 = vmul.f32 %v14361_v10, %v14361_v10  ;;  %v9322_v28 = vpop.xlane.xlu1 %9321 }
0x14b7   :  { %v9429_v0 = vrot.slane %v9329_v40, %v14316_v62  ;;  %v9436_v32 = vrot.slane %v9329_v40, %v14319_v35  ;;  %9535 = vadd.xlane.f32.xlu1 %v9534_v18  ;;  %v9517_v13 = vcombine.low %v9487_v11, %v9488_v9  ;;  %v9490_v38 = vmul.f32 %v14364_v5, %v14364_v5 }
0x14b8   :  { %v14384_v58 = vsub.f32 %v14293_v1, %v9415_v29  ;;  %v14387_v14 = vsub.f32 %v14284_v48, %v9422_v4  ;;  %v9330_v30 = vmul.f32 0.03125, %v9322_v28  ;;  %v9491_v26 = vmul.f32 %v14367_v36, %v14367_v36 }
0x14b9   :  { %v14392_v24 = vsub.f32 %v14296_v21, %v9429_v0  ;;  %v14395_v6 = vsub.f32 %v14290_v34, %v9436_v32  ;;  %v9537_v17 = vsel %vm140_vm0, %v9517_v13, 0.0  ;;  %v9518_v42 = vcombine.low %v9489_v53, %v9490_v38  ;;  %v14431_v38 = vld [vmem:[%s10335_s13] ss:$0 sm:$0xff] }
0x14ba   :  { %v9443_v51 = vrot.slane %v9330_v30, %v14316_v62  ;;  %v9450_v1 = vrot.slane %v9330_v30, %v14319_v35  ;;  %9538 = vadd.xlane.f32.xlu0 %v9537_v17  ;;  %v9492_v48 = vmul.f32 %v14370_v39, %v14370_v39  ;;  %v9493_v27 = vmul.f32 %v14384_v58, %v14384_v58 }
0x14bb   :  { %v9540_v21 = vsel %vm140_vm0, %v9518_v42, 0.0  ;;  %v9494_v34 = vmul.f32 %v14387_v14, %v14387_v14  ;;  %v9495_v7 = vmul.f32 %v14392_v24, %v14392_v24  ;;  %v9496_v20 = vmul.f32 %v14395_v6, %v14395_v6 }
0x14bc   :  { %v14412_v57 = vsub.f32 %v14308_v52, %v9443_v51  ;;  %v14415_v25 = vsub.f32 %v14302_v54, %v9450_v1  ;;  %9541 = vadd.xlane.f32.xlu1 %v9540_v21  ;;  %v9519_v31 = vcombine.low %v9491_v26, %v9492_v48  ;;  %v14433_v1 = vld [vmem:[%s10336_s3] ss:$0 sm:$0xff]  ;;  %v14437_v48 = vcombine.high %v14431_v38, %v14431_v38 }
0x14bd   :  { %v9520_v63 = vcombine.low %v9493_v27, %v9494_v34  ;;  %v9521_v8 = vcombine.low %v9495_v7, %v9496_v20 }
0x14be   :  { %v9543_v3 = vsel %vm140_vm0, %v9519_v31, 0.0  ;;  %v9497_v47 = vmul.f32 %v14412_v57, %v14412_v57  ;;  %v9498_v33 = vmul.f32 %v14415_v25, %v14415_v25 }
0x14bf   :  { %9544 = vadd.xlane.f32.xlu0 %v9543_v3  ;;  %v9546_v44 = vsel %vm140_vm0, %v9520_v63, 0.0  ;;  %v9549_v52 = vsel %vm140_vm0, %v9521_v8, 0.0 }
0x14c0   :  { %9547 = vadd.xlane.f32.xlu1 %v9546_v44  ;;  %v9522_v54 = vcombine.low %v9497_v47, %v9498_v33  ;;  %v14445_v47 = vcombine.high %v14433_v1, %v14433_v1 }
0x14c2   :  { %v9552_v61 = vsel %vm140_vm0, %v9522_v54, 0.0 }
0x14c3   :  { %9550 = vadd.xlane.f32.xlu0 %v9549_v52 }
0x14c4   :  { %9553 = vadd.xlane.f32.xlu1 %v9552_v61 }
0x1541   :  { %v9533_v37 = vpop.xlane.xlu0 %9532 }
0x1542   :  { %v9555_v11 = vmul.f32 0.03125, %v9533_v37 }
0x1544   :  { %v9563_v16 = vadd.f32 1e-05, %v9555_v11  ;;  %v9536_v56 = vpop.xlane.xlu1 %9535 }
0x1545   :  { %v9556_v46 = vmul.f32 0.03125, %v9536_v56 }
0x1546   :  { %12421 = vrsqrt.f32 %v9563_v16 }
0x1547   :  { %v9564_v40 = vadd.f32 1e-05, %v9556_v46  ;;  %v9539_v9 = vpop.xlane.xlu0 %9538 }
0x1548   :  { %v9557_v29 = vmul.f32 0.03125, %v9539_v9 }
0x1549   :  { %12423 = vrsqrt.f32 %v9564_v40  ;;  %v9542_v4 = vpop.xlane.xlu1 %9541 }
0x154a   :  { %v9565_v18 = vadd.f32 1e-05, %v9557_v29  ;;  %v9558_v53 = vmul.f32 0.03125, %v9542_v4 }
0x154c   :  { %12425 = vrsqrt.f32 %v9565_v18  ;;  %v9566_v0 = vadd.f32 1e-05, %v9558_v53  ;;  %v9545_v32 = vpop.xlane.xlu0 %9544 }
0x154d   :  { %v9559_v28 = vmul.f32 0.03125, %v9545_v32  ;;  %v9548_v13 = vpop.xlane.xlu1 %9547 }
0x154e   :  { %12427 = vrsqrt.f32 %v9566_v0  ;;  %v9560_v30 = vmul.f32 0.03125, %v9548_v13 }
0x154f   :  { %v9567_v26 = vadd.f32 1e-05, %v9559_v28 }
0x1550   :  { %v12422_v17 = vpop.eup %12421  ;;  %v9568_v42 = vadd.f32 1e-05, %v9560_v30  ;;  %v9551_v51 = vpop.xlane.xlu0 %9550 }
0x1551   :  { %v9593_v27 = vrot.slane %v12422_v17, %v14316_v62  ;;  %v9600_v21 = vrot.slane %v12422_v17, %v14319_v35  ;;  %12429 = vrsqrt.f32 %v9567_v26  ;;  %v9561_v34 = vmul.f32 0.03125, %v9551_v51  ;;  %v9554_v7 = vpop.xlane.xlu1 %9553 }
0x1552   :  { %12431 = vrsqrt.f32 %v9568_v42  ;;  %v9562_v20 = vmul.f32 0.03125, %v9554_v7 }
0x1553   :  { %v12424_v31 = vpop.eup %12423  ;;  %v9569_v63 = vadd.f32 1e-05, %v9561_v34  ;;  %v9715_v8 = vmul.f32 %v9593_v27, %v14324_v12  ;;  %v9716_v3 = vmul.f32 %v9600_v21, %v14327_v43 }
0x1554   :  { %v9607_v33 = vrot.slane %v12424_v31, %v14316_v62  ;;  %v9614_v44 = vrot.slane %v12424_v31, %v14319_v35  ;;  %v9570_v52 = vadd.f32 1e-05, %v9562_v20 }
0x1555   :  { %12433 = vrsqrt.f32 %v9569_v63  ;;  %v9739_v54 = vmul.f32 %v14431_v38, %v9715_v8  ;;  %v9740_v61 = vmul.f32 %v14437_v48, %v9716_v3 }
0x1556   :  { %v12426_v37 = vpop.eup %12425  ;;  %12435 = vrsqrt.f32 %v9570_v52  ;;  %v9717_v12 = vmul.f32 %v9607_v33, %v14338_v45  ;;  %v9718_v43 = vmul.f32 %v9614_v44, %v14341_v41 }
0x1557   :  { %v9621_v11 = vrot.slane %v12426_v37, %v14316_v62  ;;  %v9628_v16 = vrot.slane %v12426_v37, %v14319_v35  ;;  %v9763_v56 = vadd.f32 %v14433_v1, %v9739_v54  ;;  %v9764_v46 = vadd.f32 %v14445_v47, %v9740_v61 }
0x1558   :  { %v12428_v40 = vpop.eup %12427  ;;  %v9741_v9 = vmul.f32 %v14431_v38, %v9717_v12  ;;  %v9742_v29 = vmul.f32 %v14437_v48, %v9718_v43 }
0x1559   :  { %v9635_v4 = vrot.slane %v12428_v40, %v14316_v62  ;;  %v9642_v18 = vrot.slane %v12428_v40, %v14319_v35  ;;  %v9795_v45 = vcombine.low %v9763_v56, %v9764_v46  ;;  %v9719_v41 = vmul.f32 %v9621_v11, %v14344_v22 }
0x155a   :  { %v9765_v53 = vadd.f32 %v14433_v1, %v9741_v9  ;;  %v9766_v0 = vadd.f32 %v14445_v47, %v9742_v29  ;;  %v9720_v32 = vmul.f32 %v9628_v16, %v14347_v50 }
0x155b   :  { %v12430_v28 = vpop.eup %12429  ;;  %v14466_v13 = vadd.f32 %v9795_v45, %v14003_v15  ;;  %v9743_v30 = vmul.f32 %v14431_v38, %v9719_v41  ;;  %v9721_v26 = vmul.f32 %v9635_v4, %v14361_v10  ;;  %v9722_v17 = vmul.f32 %v9642_v18, %v14364_v5 }
0x155c   :  { %v12432_v42 = vpop.eup %12431  ;;  %v9649_v51 = vrot.slane %v12430_v28, %v14316_v62  ;;  %v9656_v22 = vrot.slane %v12430_v28, %v14319_v35  ;;  %v9796_v27 = vcombine.low %v9765_v53, %v9766_v0  ;;  %v9744_v21 = vmul.f32 %v14437_v48, %v9720_v32 }
0x155d   :  { %v9663_v50 = vrot.slane %v12432_v42, %v14316_v62  ;;  %v9670_v34 = vrot.slane %v12432_v42, %v14319_v35  ;;  %v9821_v15 = vsel %vm140_vm0, %v14466_v13, 0.0  ;;  %v9767_v7 = vadd.f32 %v14433_v1, %v9743_v30 }
0x155e   :  { %9822 = vadd.xlane.f32.xlu0 %v9821_v15  ;;  %v14480_v10 = vadd.f32 %v9796_v27, %v14000_v23  ;;  %v9768_v5 = vadd.f32 %v14445_v47, %v9744_v21  ;;  %v9745_v20 = vmul.f32 %v14431_v38, %v9721_v26  ;;  %v9746_v31 = vmul.f32 %v14437_v48, %v9722_v17 }
0x155f   :  { %v12434_v63 = vpop.eup %12433  ;;  %v9723_v8 = vmul.f32 %v9649_v51, %v14367_v36  ;;  %v9724_v3 = vmul.f32 %v9656_v22, %v14370_v39  ;;  %v9725_v33 = vmul.f32 %v9663_v50, %v14384_v58  ;;  %v9726_v44 = vmul.f32 %v9670_v34, %v14387_v14 }
0x1560   :  { %v12436_v52 = vpop.eup %12435  ;;  %v9677_v54 = vrot.slane %v12434_v63, %v14316_v62  ;;  %v9684_v23 = vrot.slane %v12434_v63, %v14319_v35  ;;  %v9824_v61 = vsel %vm140_vm0, %v14480_v10, 0.0  ;;  %v9797_v37 = vcombine.low %v9767_v7, %v9768_v5 }
0x1561   :  { %v9691_v12 = vrot.slane %v12436_v52, %v14316_v62  ;;  %v9698_v43 = vrot.slane %v12436_v52, %v14319_v35  ;;  %9825 = vadd.xlane.f32.xlu1 %v9824_v61  ;;  %v9769_v36 = vadd.f32 %v14433_v1, %v9745_v20  ;;  %v9770_v39 = vadd.f32 %v14445_v47, %v9746_v31 }
0x1562   :  { %v14498_v58 = vadd.f32 %v9797_v37, %v14008_v60  ;;  %v9747_v14 = vmul.f32 %v14431_v38, %v9723_v8  ;;  %v9748_v11 = vmul.f32 %v14437_v48, %v9724_v3  ;;  %v9749_v16 = vmul.f32 %v14431_v38, %v9725_v33 }
0x1563   :  { %v9798_v56 = vcombine.low %v9769_v36, %v9770_v39  ;;  %v9750_v46 = vmul.f32 %v14437_v48, %v9726_v44  ;;  %v9727_v62 = vmul.f32 %v9677_v54, %v14392_v24  ;;  %v9728_v35 = vmul.f32 %v9684_v23, %v14395_v6 }
0x1564   :  { %v9827_v40 = vsel %vm140_vm0, %v14498_v58, 0.0  ;;  %v9771_v9 = vadd.f32 %v14433_v1, %v9747_v14  ;;  %v9772_v60 = vadd.f32 %v14445_v47, %v9748_v11  ;;  %v9773_v29 = vadd.f32 %v14433_v1, %v9749_v16 }
0x1565   :  { %9828 = vadd.xlane.f32.xlu0 %v9827_v40  ;;  %v14512_v4 = vadd.f32 %v9798_v56, %v14016_v55  ;;  %v9774_v18 = vadd.f32 %v14445_v47, %v9750_v46  ;;  %v9751_v45 = vmul.f32 %v14431_v38, %v9727_v62  ;;  %v9752_v24 = vmul.f32 %v14437_v48, %v9728_v35 }
0x1566   :  { %v9799_v6 = vcombine.low %v9771_v9, %v9772_v60  ;;  %v9729_v41 = vmul.f32 %v9691_v12, %v14412_v57  ;;  %v9730_v53 = vmul.f32 %v9698_v43, %v14415_v25 }
0x1567   :  { %v9830_v0 = vsel %vm140_vm0, %v14512_v4, 0.0  ;;  %v9800_v32 = vcombine.low %v9773_v29, %v9774_v18  ;;  %v9775_v28 = vadd.f32 %v14433_v1, %v9751_v45  ;;  %v9776_v55 = vadd.f32 %v14445_v47, %v9752_v24 }
0x1568   :  { %9831 = vadd.xlane.f32.xlu1 %v9830_v0  ;;  %v14524_v30 = vadd.f32 %v9799_v6, %v14019_v49  ;;  %v9753_v26 = vmul.f32 %v14431_v38, %v9729_v41  ;;  %v9754_v17 = vmul.f32 %v14437_v48, %v9730_v53  ;;  %v9953_v41 = vld [vmem:[%s10339_s19] sm:$0xff]  ;;  %v9954_v53 = vld [vmem:[%s10339_s19 + $0x8] sm:$0xff] }
0x1569   :  { %v14529_v57 = vadd.f32 %v9800_v32, %v14013_v19  ;;  %v9801_v25 = vcombine.low %v9775_v28, %v9776_v55  ;;  %v12157_v0 = vpack.c.bf16 %v9954_v53, %v9953_v41  ;;  %v9955_v32 = vld [vmem:[%s10339_s19 + $0x10] sm:$0xff]  ;;  %v9956_v28 = vld [vmem:[%s10339_s19 + $0x18] sm:$0xff] }
0x156a   :  { %v9833_v42 = vsel %vm140_vm0, %v14524_v30, 0.0  ;;  %v9777_v51 = vadd.f32 %v14433_v1, %v9753_v26  ;;  %v9778_v22 = vadd.f32 %v14445_v47, %v9754_v17  ;;  %v12161_v55 = vpack.c.bf16 %v9956_v28, %v9955_v32  ;;  %v9958_v26 = vld [vmem:[%s14601_s24] sm:$0xff]  ;;  %v9959_v17 = vld [vmem:[%s14601_s24 + $0x8] sm:$0xff] }
0x156b   :  { %9834 = vadd.xlane.f32.xlu0 %v9833_v42  ;;  %v9836_v49 = vsel %vm140_vm0, %v14529_v57, 0.0  ;;  %v14538_v27 = vadd.f32 %v9801_v25, %v14026_v59  ;;  %12158 = vmatprep.subr.bf16.mxu0 %v12157_v0  ;;  %v12165_v25 = vpack.c.bf16 %v9959_v17, %v9958_v26 }
0x156c   :  { %9837 = vadd.xlane.f32.xlu1 %v9836_v49  ;;  %v9802_v38 = vcombine.low %v9777_v51, %v9778_v22  ;;  %12160 = vmatpush3.bf16.msra.mxu0 %v12157_v0 }
0x156d   :  { %v9839_v19 = vsel %vm140_vm0, %v14538_v27, 0.0  ;;  %12162 = vmatprep.subr.bf16.mxu0 %v12161_v55  ;;  %12166 = vmatprep.subr.bf16.mxu1 %v12165_v25 }
0x156e   :  { %v14543_v48 = vadd.f32 %v9802_v38, %v14033_v2  ;;  %12168 = vmatpush3.bf16.msra.mxu1 %v12165_v25 }
0x156f   :  { %9840 = vadd.xlane.f32.xlu0 %v9839_v19 }
0x1570   :  { %v9842_v1 = vsel %vm140_vm0, %v14543_v48, 0.0  ;;  %12164 = vmatpush3.bf16.msra.mxu0 %v12161_v55 }
0x1571   :  { %9843 = vadd.xlane.f32.xlu1 %v9842_v1 }
0x15eb   :  { %v9823_v47 = vpop.xlane.xlu0 %9822 }
0x15ec   :  { %v9845_v21 = vmul.f32 0.03125, %v9823_v47 }
0x15ee   :  { %v14548_v50 = vsub.f32 %v14466_v13, %v9845_v21  ;;  %v9826_v59 = vpop.xlane.xlu1 %9825 }
0x15ef   :  { %v9846_v34 = vmul.f32 0.03125, %v9826_v59 }
0x15f0   :  { %v9861_v15 = vmul.f32 %v14548_v50, %v14548_v50 }
0x15f1   :  { %v14553_v7 = vsub.f32 %v14480_v10, %v9846_v34 }
0x15f2   :  { %v9829_v2 = vpop.xlane.xlu0 %9828  ;;  %v9869_v5 = vsel %vm140_vm0, %v9861_v15, 0.0 }
0x15f3   :  { %v9847_v20 = vmul.f32 0.03125, %v9829_v2  ;;  %9870 = vadd.xlane.f32.xlu0 %v9869_v5  ;;  %v9862_v31 = vmul.f32 %v14553_v7, %v14553_v7 }
0x15f5   :  { %v14559_v63 = vsub.f32 %v14498_v58, %v9847_v20  ;;  %v9832_v8 = vpop.xlane.xlu1 %9831  ;;  %v9872_v3 = vsel %vm140_vm0, %v9862_v31, 0.0 }
0x15f6   :  { %v9848_v33 = vmul.f32 0.03125, %v9832_v8  ;;  %9873 = vadd.xlane.f32.xlu1 %v9872_v3  ;;  %v10665_v8 = vld [vmem:[%s10337_s28] ss:$0 sm:$0xff] }
0x15f7   :  { %v9863_v44 = vmul.f32 %v14559_v63, %v14559_v63 }
0x15f8   :  { %v14565_v52 = vsub.f32 %v14512_v4, %v9848_v33  ;;  %v9835_v54 = vpop.xlane.xlu0 %9834 }
0x15f9   :  { %v9849_v23 = vmul.f32 0.03125, %v9835_v54  ;;  %v9838_v61 = vpop.xlane.xlu1 %9837  ;;  %v9875_v37 = vsel %vm140_vm0, %v9863_v44, 0.0  ;;  %v10666_v54 = vld [vmem:[%s10338_s2] ss:$0 sm:$0xff] }
0x15fa   :  { %v9850_v12 = vmul.f32 0.03125, %v9838_v61  ;;  %9876 = vadd.xlane.f32.xlu0 %v9875_v37  ;;  %v9864_v43 = vmul.f32 %v14565_v52, %v14565_v52 }
0x15fb   :  { %v14571_v36 = vsub.f32 %v14524_v30, %v9849_v23 }
0x15fc   :  { %v14574_v39 = vsub.f32 %v14529_v57, %v9850_v12  ;;  %v9841_v14 = vpop.xlane.xlu0 %9840  ;;  %v9878_v11 = vsel %vm140_vm0, %v9864_v43, 0.0 }
0x15fd   :  { %v9851_v16 = vmul.f32 0.03125, %v9841_v14  ;;  %9879 = vadd.xlane.f32.xlu1 %v9878_v11  ;;  %v9865_v56 = vmul.f32 %v14571_v36, %v14571_v36 }
0x15fe   :  { %v9844_v46 = vpop.xlane.xlu1 %9843  ;;  %v9866_v62 = vmul.f32 %v14574_v39, %v14574_v39 }
0x15ff   :  { %v14582_v35 = vsub.f32 %v14538_v27, %v9851_v16  ;;  %v9852_v40 = vmul.f32 0.03125, %v9844_v46  ;;  %v9881_v9 = vsel %vm140_vm0, %v9865_v56, 0.0 }
0x1600   :  { %9882 = vadd.xlane.f32.xlu0 %v9881_v9  ;;  %v9884_v60 = vsel %vm140_vm0, %v9866_v62, 0.0 }
0x1601   :  { %v14587_v29 = vsub.f32 %v14543_v48, %v9852_v40  ;;  %9885 = vadd.xlane.f32.xlu1 %v9884_v60  ;;  %v9867_v18 = vmul.f32 %v14582_v35, %v14582_v35 }
0x1603   :  { %v9887_v45 = vsel %vm140_vm0, %v9867_v18, 0.0  ;;  %v9868_v24 = vmul.f32 %v14587_v29, %v14587_v29 }
0x1604   :  { %9888 = vadd.xlane.f32.xlu0 %v9887_v45 }
0x1605   :  { %v9890_v6 = vsel %vm140_vm0, %v9868_v24, 0.0 }
0x1606   :  { %9891 = vadd.xlane.f32.xlu1 %v9890_v6 }
0x1680   :  { %v9871_v42 = vpop.xlane.xlu0 %9870 }
0x1681   :  { %v9893_v51 = vmul.f32 0.03125, %v9871_v42 }
0x1683   :  { %v9901_v22 = vadd.f32 1e-05, %v9893_v51  ;;  %v9874_v49 = vpop.xlane.xlu1 %9873 }
0x1684   :  { %v9894_v38 = vmul.f32 0.03125, %v9874_v49 }
0x1685   :  { %12437 = vrsqrt.f32 %v9901_v22 }
0x1686   :  { %v9902_v19 = vadd.f32 1e-05, %v9894_v38  ;;  %v9961_v38 = vld [vmem:[%s14601_s24 + $0x18] sm:$0xff] }
0x1687   :  { %v9877_v1 = vpop.xlane.xlu0 %9876 }
0x1688   :  { %12439 = vrsqrt.f32 %v9902_v19  ;;  %v9895_v47 = vmul.f32 0.03125, %v9877_v1  ;;  %v9963_v1 = vld [vmem:[%s14601_s24 + $0x28] sm:$0xff] }
0x168a   :  { %v9903_v21 = vadd.f32 1e-05, %v9895_v47  ;;  %v9880_v59 = vpop.xlane.xlu1 %9879 }
0x168b   :  { %v9896_v34 = vmul.f32 0.03125, %v9880_v59  ;;  %v9965_v59 = vld [vmem:[%s14601_s24 + $0x38] sm:$0xff] }
0x168c   :  { %12441 = vrsqrt.f32 %v9903_v21  ;;  %v9964_v21 = vld [vmem:[%s14601_s24 + $0x30] sm:$0xff] }
0x168d   :  { %v9904_v15 = vadd.f32 1e-05, %v9896_v34  ;;  %v9883_v2 = vpop.xlane.xlu0 %9882  ;;  %v12177_v34 = vpack.c.bf16 %v9965_v59, %v9964_v21 }
0x168e   :  { %v9897_v5 = vmul.f32 0.03125, %v9883_v2  ;;  %v9886_v20 = vpop.xlane.xlu1 %9885  ;;  %v9967_v2 = vld [vmem:[%s14601_s24 + $0x48] sm:$0xff] }
0x168f   :  { %v12438_v31 = vpop.eup %12437  ;;  %12443 = vrsqrt.f32 %v9904_v15  ;;  %v9898_v3 = vmul.f32 0.03125, %v9886_v20  ;;  %v9966_v15 = vld [vmem:[%s14601_s24 + $0x40] sm:$0xff]  ;;  %v9968_v20 = vld [vmem:[%s14601_s24 + $0x50] sm:$0xff] }
0x1690   :  { %v9905_v33 = vadd.f32 1e-05, %v9897_v5  ;;  %v9917_v44 = vmul.f32 %v12438_v31, %v14548_v50  ;;  %v12181_v5 = vpack.c.bf16 %v9967_v2, %v9966_v15  ;;  %v9969_v31 = vld [vmem:[%s14601_s24 + $0x58] sm:$0xff] }
0x1691   :  { %v9906_v23 = vadd.f32 1e-05, %v9898_v3  ;;  %v9889_v61 = vpop.xlane.xlu0 %9888  ;;  %v12185_v3 = vpack.c.bf16 %v9969_v31, %v9968_v20 }
0x1692   :  { %v12440_v37 = vpop.eup %12439  ;;  %12445 = vrsqrt.f32 %v9905_v33  ;;  %v9899_v12 = vmul.f32 0.03125, %v9889_v61  ;;  %v9931_v43 = vmul.f32 %v10665_v8, %v9917_v44  ;;  %v9971_v33 = vld [vmem:[%s14601_s24 + $0x68] sm:$0xff] }
0x1693   :  { %v9918_v14 = vmul.f32 %v12440_v37, %v14553_v7  ;;  %12447 = vrsqrt.f32 %v9906_v23  ;;  %v9892_v11 = vpop.xlane.xlu1 %9891  ;;  %v9973_v23 = vld [vmem:[%s14601_s24 + $0x78] sm:$0xff]  ;;  %v10667_v37 = vld [vmem:[%s10340_s10] ss:$0 sm:$0xff] }
0x1694   :  { %v9907_v16 = vadd.f32 1e-05, %v9899_v12  ;;  %v9900_v56 = vmul.f32 0.03125, %v9892_v11  ;;  %v9945_v46 = vadd.f32 %v10666_v54, %v9931_v43 }
0x1695   :  { %v9932_v62 = vmul.f32 %v10665_v8, %v9918_v14 }
0x1696   :  { %v12442_v40 = vpop.eup %12441  ;;  %12449 = vrsqrt.f32 %v9907_v16  ;;  %v9908_v9 = vadd.f32 1e-05, %v9900_v56  ;;  %11929 = vmatprep.mubr.msk.f32.mxu0 %vm140_vm0, %v9945_v46 }
0x1697   :  { %v9946_v50 = vadd.f32 %v10666_v54, %v9932_v62  ;;  %v9919_v60 = vmul.f32 %v12442_v40, %v14559_v63 }
0x1698   :  { %12451 = vrsqrt.f32 %v9908_v9 }
0x1699   :  { %v12444_v18 = vpop.eup %12443  ;;  %11930 = vmatmul.mubr.msk.f32.vlgmr.msra.gmra.mrb[148].mxu0 %vm140_vm0, %v9946_v50  ;;  %v9933_v45 = vmul.f32 %v10665_v8, %v9919_v60 }
0x169a   :  { %v9920_v7 = vmul.f32 %v12444_v18, %v14565_v52 }
0x169b   :  { %v9947_v24 = vadd.f32 %v10666_v54, %v9933_v45 }
0x169c   :  { %v12446_v6 = vpop.eup %12445  ;;  %v9934_v41 = vmul.f32 %v10665_v8, %v9920_v7 }
0x169d   :  { %v12448_v53 = vpop.eup %12447  ;;  %11932 = vmatprep.mubr.msk.f32.mxu0 %vm140_vm0, %v9947_v24  ;;  %v9921_v0 = vmul.f32 %v12446_v6, %v14571_v36 }
0x169e   :  { %v9948_v32 = vadd.f32 %v10666_v54, %v9934_v41  ;;  %v9922_v28 = vmul.f32 %v12448_v53, %v14574_v39 }
0x169f   :  { %v9935_v55 = vmul.f32 %v10665_v8, %v9921_v0 }
0x16a0   :  { %v12450_v63 = vpop.eup %12449  ;;  %11933 = vmatmul.mubr.msk.f32.gmra.mrb[150].mxu0 %vm140_vm0, %v9948_v32  ;;  %v9936_v26 = vmul.f32 %v10665_v8, %v9922_v28 }
0x16a1   :  { %v9949_v17 = vadd.f32 %v10666_v54, %v9935_v55  ;;  %v9923_v52 = vmul.f32 %v12450_v63, %v14582_v35  ;;  %v9960_v35 = vld [vmem:[%s14601_s24 + $0x10] sm:$0xff] }
0x16a2   :  { %v12452_v25 = vpop.eup %12451  ;;  %v9950_v42 = vadd.f32 %v10666_v54, %v9936_v26  ;;  %v12169_v19 = vpack.c.bf16 %v9961_v38, %v9960_v35 }
0x16a3   :  { %11935 = vmatprep.mubr.msk.f32.mxu0 %vm140_vm0, %v9949_v17  ;;  %v9937_v36 = vmul.f32 %v10665_v8, %v9923_v52  ;;  %v9924_v51 = vmul.f32 %v12452_v25, %v14587_v29  ;;  %v9962_v29 = vld [vmem:[%s14601_s24 + $0x20] sm:$0xff] }
0x16a4   :  { %11936 = vmatmul.mubr.msk.f32.gmra.mrb[152].mxu0 %vm140_vm0, %v9950_v42  ;;  %12170 = vmatprep.subr.bf16.mxu1 %v12169_v19  ;;  %v12173_v47 = vpack.c.bf16 %v9963_v1, %v9962_v29 }
0x16a5   :  { %v9951_v39 = vadd.f32 %v10666_v54, %v9937_v36  ;;  %v9938_v22 = vmul.f32 %v10665_v8, %v9924_v51  ;;  %12172 = vmatpush3.bf16.msra.mxu1 %v12169_v19  ;;  %v9970_v8 = vld [vmem:[%s14601_s24 + $0x60] sm:$0xff] }
0x16a6   :  { %12174 = vmatprep.subr.bf16.mxu1 %v12173_v47  ;;  %v12189_v44 = vpack.c.bf16 %v9971_v33, %v9970_v8 }
0x16a7   :  { %11938 = vmatprep.mubr.msk.f32.mxu0 %vm140_vm0, %v9951_v39  ;;  %v9952_v49 = vadd.f32 %v10666_v54, %v9938_v22  ;;  %v9972_v54 = vld [vmem:[%s14601_s24 + $0x70] sm:$0xff] }
0x16a8   :  { %v12193_v61 = vpack.c.bf16 %v9973_v23, %v9972_v54 }
0x16a9   :  { %11939 = vmatmul.mubr.msk.f32.gmra.mrb[154].mxu0 %vm140_vm0, %v9952_v49  ;;  %12176 = vmatpush3.bf16.msra.mxu1 %v12173_v47 }
0x16aa   :  { %12178 = vmatprep.subr.bf16.mxu1 %v12177_v34 }
0x16ad   :  { %12180 = vmatpush3.bf16.msra.mxu1 %v12177_v34 }
0x16ae   :  { %12182 = vmatprep.subr.bf16.mxu1 %v12181_v5 }
0x16b1   :  { %12184 = vmatpush3.bf16.msra.mxu1 %v12181_v5 }
0x16b2   :  { %12186 = vmatprep.subr.bf16.mxu1 %v12185_v3 }
0x16b5   :  { %12188 = vmatpush3.bf16.msra.mxu1 %v12185_v3 }
0x16b6   :  { %12190 = vmatprep.subr.bf16.mxu1 %v12189_v44 }
0x16b9   :  { %12192 = vmatpush3.bf16.msra.mxu1 %v12189_v44 }
0x16ba   :  { %12194 = vmatprep.subr.bf16.mxu1 %v12193_v61 }
0x16bd   :  { %12196 = vmatpush3.bf16.msra.mxu1 %v12193_v61 }
0x176c   :  { %v11931_v12 = vpop.f32.mrb[148].mxu0 }
0x176d   :  { %v14644_v43 = vadd.f32 %v11931_v12, %v10667_v37  ;;  %v10071_v14 = vpop.f32.mrb[149].mxu0 }
0x176e   :  { %v10072_v11 = vadd.f32 %v10667_v37, %v10071_v14 }
0x176f   :  { %v10119_v16 = vmul.f32 0.044715, %v14644_v43 }
0x1770   :  { %v10118_v56 = vmul.f32 0.044715, %v10072_v11 }
0x1771   :  { %v10127_v46 = vmul.f32 %v10119_v16, %v14644_v43  ;;  %v10111_v16 = vmul.f32 0.5, %v14644_v43 }
0x1772   :  { %v10126_v62 = vmul.f32 %v10118_v56, %v10072_v11 }
0x1773   :  { %v10135_v40 = vmul.f32 %v10127_v46, %v14644_v43  ;;  %v11934_v9 = vpop.f32.mrb[150].mxu0 }
0x1774   :  { %v14649_v50 = vadd.f32 %v11934_v9, %v10667_v37  ;;  %v10081_v60 = vpop.f32.mrb[151].mxu0  ;;  %v10134_v18 = vmul.f32 %v10126_v62, %v10072_v11 }
0x1775   :  { %v10143_v45 = vadd.f32 %v10135_v40, %v14644_v43  ;;  %v10082_v7 = vadd.f32 %v10667_v37, %v10081_v60 }
0x1776   :  { %v10121_v24 = vmul.f32 0.044715, %v14649_v50  ;;  %v10142_v6 = vadd.f32 %v10134_v18, %v10072_v11 }
0x1777   :  { %v10120_v41 = vmul.f32 0.044715, %v10082_v7  ;;  %v11937_v53 = vpop.f32.mrb[152].mxu0  ;;  %v10151_v0 = vmul.f32 0.7978846, %v10143_v45 }
0x1778   :  { %v10129_v32 = vmul.f32 %v10121_v24, %v14649_v50  ;;  %v14654_v28 = vadd.f32 %v11937_v53, %v10667_v37  ;;  %v10091_v55 = vpop.f32.mrb[153].mxu0  ;;  %v10150_v63 = vmul.f32 0.7978846, %v10142_v6  ;;  %v10112_v24 = vmul.f32 0.5, %v10082_v7 }
0x1779   :  { %v10128_v26 = vmul.f32 %v10120_v41, %v10082_v7  ;;  %v10092_v17 = vadd.f32 %v10667_v37, %v10091_v55  ;;  %12453 = vtanh.f32 %v10151_v0 }
0x177a   :  { %v10123_v52 = vmul.f32 0.044715, %v14654_v28  ;;  %12455 = vtanh.f32 %v10150_v63  ;;  %v10137_v25 = vmul.f32 %v10129_v32, %v14649_v50 }
0x177b   :  { %v10122_v42 = vmul.f32 0.044715, %v10092_v17  ;;  %v10136_v36 = vmul.f32 %v10128_v26, %v10082_v7  ;;  %v10114_v55 = vmul.f32 0.5, %v10092_v17  ;;  %v10115_v26 = vmul.f32 0.5, %v14654_v28 }
0x177c   :  { %v10131_v51 = vmul.f32 %v10123_v52, %v14654_v28  ;;  %v11940_v39 = vpop.f32.mrb[154].mxu0  ;;  %v10145_v22 = vadd.f32 %v10137_v25, %v14649_v50 }
0x177d   :  { %v10130_v49 = vmul.f32 %v10122_v42, %v10092_v17  ;;  %v10107_v35 = vadd.f32 %v11940_v39, %v10667_v37  ;;  %v10101_v38 = vpop.f32.mrb[155].mxu0  ;;  %v10144_v19 = vadd.f32 %v10136_v36, %v10082_v7 }
0x177e   :  { %v10102_v29 = vadd.f32 %v10667_v37, %v10101_v38  ;;  %v10153_v1 = vmul.f32 0.7978846, %v10145_v22  ;;  %v10139_v47 = vmul.f32 %v10131_v51, %v14654_v28  ;;  %v10110_v37 = vmul.f32 0.5, %v10072_v11 }
0x177f   :  { %v10125_v21 = vmul.f32 0.044715, %v10107_v35  ;;  %v10152_v59 = vmul.f32 0.7978846, %v10144_v19  ;;  %v10138_v34 = vmul.f32 %v10130_v49, %v10092_v17  ;;  %v10113_v11 = vmul.f32 0.5, %v14649_v50 }
0x1780   :  { %v10124_v15 = vmul.f32 0.044715, %v10102_v29  ;;  %12457 = vtanh.f32 %v10153_v1  ;;  %v10147_v2 = vadd.f32 %v10139_v47, %v14654_v28  ;;  %v10116_v51 = vmul.f32 0.5, %v10102_v29  ;;  %v10676_v28 = vld [vmem:[%s10342_s16] ss:$0 sm:$0xff] }
0x1781   :  { %v10133_v5 = vmul.f32 %v10125_v21, %v10107_v35  ;;  %12459 = vtanh.f32 %v10152_v59  ;;  %v10146_v20 = vadd.f32 %v10138_v34, %v10092_v17  ;;  %v10117_v39 = vmul.f32 0.5, %v10107_v35 }
0x1782   :  { %v10132_v31 = vmul.f32 %v10124_v15, %v10102_v29  ;;  %v10155_v8 = vmul.f32 0.7978846, %v10147_v2 }
0x1783   :  { %v12454_v3 = vpop.eup %12453  ;;  %v10154_v33 = vmul.f32 0.7978846, %v10146_v20  ;;  %v10141_v44 = vmul.f32 %v10133_v5, %v10107_v35 }
0x1784   :  { %v12456_v54 = vpop.eup %12455  ;;  %v10167_v23 = vadd.f32 1.0, %v12454_v3  ;;  %12461 = vtanh.f32 %v10155_v8  ;;  %v10140_v61 = vmul.f32 %v10132_v31, %v10102_v29 }
0x1785   :  { %v10166_v12 = vadd.f32 1.0, %v12456_v54  ;;  %12463 = vtanh.f32 %v10154_v33  ;;  %v10149_v14 = vadd.f32 %v10141_v44, %v10107_v35 }
0x1786   :  { %v10148_v56 = vadd.f32 %v10140_v61, %v10102_v29  ;;  %v10175_v40 = vmul.f32 %v10167_v23, %v10111_v16 }
0x1787   :  { %v10174_v46 = vmul.f32 %v10166_v12, %v10110_v37  ;;  %v10157_v62 = vmul.f32 0.7978846, %v10149_v14 }
0x1788   :  { %v10156_v9 = vmul.f32 0.7978846, %v10148_v56 }
0x1789   :  { %11973 = vmatprep.mubr.f32.mxu1 %v10174_v46  ;;  %12465 = vtanh.f32 %v10157_v62 }
0x178a   :  { %v12458_v60 = vpop.eup %12457  ;;  %11974 = vmatmul.mubr.f32.vlgmr.msra.gmra.mrb[152].mxu1 %v10175_v40  ;;  %12467 = vtanh.f32 %v10156_v9 }
0x178b   :  { %v12460_v18 = vpop.eup %12459  ;;  %v10169_v45 = vadd.f32 1.0, %v12458_v60 }
0x178c   :  { %v10168_v6 = vadd.f32 1.0, %v12460_v18 }
0x178d   :  { %v10177_v43 = vmul.f32 %v10169_v45, %v10113_v11 }
0x178e   :  { %v12462_v41 = vpop.eup %12461  ;;  %v10176_v53 = vmul.f32 %v10168_v6, %v10112_v24 }
0x178f   :  { %v12464_v0 = vpop.eup %12463  ;;  %v10171_v32 = vadd.f32 1.0, %v12462_v41 }
0x1790   :  { %11976 = vmatprep.mubr.f32.mxu1 %v10176_v53  ;;  %v10170_v63 = vadd.f32 1.0, %v12464_v0 }
0x1791   :  { %11977 = vmatmul.mubr.f32.gmra.mrb[154].mxu1 %v10177_v43  ;;  %v10179_v42 = vmul.f32 %v10171_v32, %v10115_v26 }
0x1792   :  { %v10178_v52 = vmul.f32 %v10170_v63, %v10114_v55 }
0x1793   :  { %v12466_v25 = vpop.eup %12465 }
0x1794   :  { %v12468_v36 = vpop.eup %12467  ;;  %11979 = vmatprep.mubr.f32.mxu1 %v10178_v52  ;;  %v10173_v7 = vadd.f32 1.0, %v12466_v25 }
0x1795   :  { %11980 = vmatmul.mubr.f32.gmra.mrb[156].mxu1 %v10179_v42  ;;  %v10172_v50 = vadd.f32 1.0, %v12468_v36 }
0x1796   :  { %v10181_v49 = vmul.f32 %v10173_v7, %v10117_v39 }
0x1797   :  { %v10180_v22 = vmul.f32 %v10172_v50, %v10116_v51 }
0x1799   :  { %11982 = vmatprep.mubr.f32.mxu1 %v10180_v22 }
0x179a   :  { %11983 = vmatmul.mubr.f32.gmra.mrb[158].mxu1 %v10181_v49 }
0x185d   :  { %v11975_v17 = vpop.f32.mrb[152].mxu1 }
0x185e   :  { %v10260_v35 = vadd.f32 %v11975_v17, %v10676_v28  ;;  %v10254_v38 = vpop.f32.mrb[153].mxu1 }
0x185f   :  { %v10255_v19 = vadd.f32 %v10676_v28, %v10254_v38 }
0x1860   :  { %v10294_v29 = vadd.f32 %v10260_v35, %v14480_v10 }
0x1861   :  { %v10293_v1 = vadd.f32 %v10255_v19, %v14466_v13 }
0x1862   :  { %10302 = vst.msk [vmem:[%s14671_s21 + $0x8] sm:$0xff] %vm140_vm0, %v10294_v29 }
0x1863   :  { %10301 = vst.msk [vmem:[%s14671_s21] sm:$0xff] %vm140_vm0, %v10293_v1 }
0x1864   :  { %v11978_v47 = vpop.f32.mrb[154].mxu1 }
0x1865   :  { %v10270_v21 = vadd.f32 %v11978_v47, %v10676_v28  ;;  %v10264_v59 = vpop.f32.mrb[155].mxu1 }
0x1866   :  { %v10265_v34 = vadd.f32 %v10676_v28, %v10264_v59 }
0x1867   :  { %v10296_v15 = vadd.f32 %v10270_v21, %v14512_v4 }
0x1868   :  { %v10295_v2 = vadd.f32 %v10265_v34, %v14498_v58  ;;  %v11981_v5 = vpop.f32.mrb[156].mxu1 }
0x1869   :  { %10304 = vst.msk [vmem:[%s14671_s21 + $0x18] sm:$0xff] %vm140_vm0, %v10296_v15  ;;  %v10280_v13 = vadd.f32 %v11981_v5, %v10676_v28  ;;  %v10274_v10 = vpop.f32.mrb[157].mxu1 }
0x186a   :  { %10303 = vst.msk [vmem:[%s14671_s21 + $0x10] sm:$0xff] %vm140_vm0, %v10295_v2  ;;  %v10275_v20 = vadd.f32 %v10676_v28, %v10274_v10 }
0x186b   :  { %v10298_v31 = vadd.f32 %v10280_v13, %v14529_v57 }
0x186c   :  { %v10297_v8 = vadd.f32 %v10275_v20, %v14524_v30 }
0x186d   :  { %10306 = vst.msk [vmem:[%s14671_s21 + $0x28] sm:$0xff] %vm140_vm0, %v10298_v31  ;;  %v11984_v3 = vpop.f32.mrb[158].mxu1 }
0x186e   :  { %10305 = vst.msk [vmem:[%s14671_s21 + $0x20] sm:$0xff] %vm140_vm0, %v10297_v8  ;;  %v10290_v58 = vadd.f32 %v11984_v3, %v10676_v28  ;;  %v10284_v4 = vpop.f32.mrb[159].mxu1 }
0x186f   :  { %v10285_v33 = vadd.f32 %v10676_v28, %v10284_v4 }
0x1870   :  { %v10300_v44 = vadd.f32 %v10290_v58, %v14543_v48 }
0x1871   :  { %v10299_v54 = vadd.f32 %v10285_v33, %v14538_v27 }
0x1872   :  { %10308 = vst.msk [vmem:[%s14671_s21 + $0x38] sm:$0xff] %vm140_vm0, %v10300_v44 }
0x1873   :  { %10307 = vst.msk [vmem:[%s14671_s21 + $0x30] sm:$0xff] %vm140_vm0, %v10299_v54 }

</bundles_post_ra>
